<compile_context>
chip_gen: v7x
topology: tpu7x:2x2x1
jax: 0.10.0
libtpu: 0.0.40
codegen_flags: <defaults>
</compile_context>

<pallas_src>
import functools
import numpy as np
import jax
import jax.numpy as jnp
from jax.experimental import pallas as pl
from jax.experimental.pallas import tpu as pltpu


# --------------------------------------------------------------------------- #
# Fused whole-model kernel (one grid step per batch element)
# --------------------------------------------------------------------------- #
def _model_kernel(*refs, plan, T, n):
    """refs = x, <packed weights in plan order...>, out, scratch.

    x   : (Tn, c0)  channel-last input slab for this batch element
    out : (Tn, 1)
    scr : (max_Tpn, max_c) VMEM pad/zero-fill slab, reused by every temporal conv
    """
    Tn = T * n
    x_ref = refs[0]
    o_ref = refs[-2]
    scr = refs[-1]

    h = x_ref[...].astype(jnp.float32)              # (Tn, c_cur)
    idx = 1
    for st in plan:
        if st["kind"] == "tconv":
            kt, c_out, act = st["kt"], st["c_out"], st["act"]
            G = 2 if act == "GLU" else 1
            pad_top = (kt - 1) // 2

            pw_ref = None
            if st["has_proj"]:
                pw_ref = refs[idx]; idx += 1
            w_ref = refs[idx]; b_ref = refs[idx + 1]; idx += 2
            s_ref = t_ref = None
            if st["has_bn"]:
                s_ref = refs[idx]; t_ref = refs[idx + 1]; idx += 2

            if pw_ref is not None:                  # 1x1 input projection (c_in > c_out)
                xin = jnp.dot(h, pw_ref[...], preferred_element_type=jnp.float32)
            else:
                xin = h
            c_x = xin.shape[1]                      # <= c_out (zero-fill handled below)

            def epilogue(acc, act=act, c_out=c_out):
                # GLU / ReLU residual is already folded into the centre-tap weight.
                if act == "GLU":
                    return acc[:, :c_out] * jax.nn.sigmoid(acc[:, c_out:])
                if act == "relu":
                    return jnp.maximum(acc, 0.0)
                if act == "sigmoid":
                    return jax.nn.sigmoid(acc)
                return acc

            if kt == 1:                             # no temporal pad needed
                acc = jnp.dot(xin, w_ref[0], preferred_element_type=jnp.float32)
                y = epilogue(acc + b_ref[...])
            else:
                Tpn = Tn + (kt - 1) * n
                # In-kernel 'same' temporal pad + channel zero-fill via scratch.
                scr[0:Tpn, 0:c_out] = jnp.zeros((Tpn, c_out), jnp.float32)
                scr[pad_top * n: pad_top * n + Tn, 0:c_x] = xin
                # Row-chunk the heavy GLU conv so the (rows, 2*c_out) accumulator
                # stays within vreg budget.
                rc = 64 if (G * c_out >= 256 and Tn % 64 == 0) else Tn
                outs = []
                for r0 in range(0, Tn, rc):
                    acc = jnp.zeros((rc, G * c_out), jnp.float32)
                    for dt in range(kt):            # kt accumulating MXU taps
                        lo = r0 + dt * n
                        win = scr[lo:lo + rc, 0:c_out]
                        acc = acc + jnp.dot(win, w_ref[dt],
                                            preferred_element_type=jnp.float32)
                    outs.append(epilogue(acc + b_ref[...]))
                y = outs[0] if len(outs) == 1 else jnp.concatenate(outs, axis=0)

            if s_ref is not None:                   # folded eval-mode BatchNorm
                y = y * s_ref[...] + t_ref[...]
            h = y

        elif st["kind"] == "spatio":
            # torch semantics: NCHW .reshape(-1, c) -> ks x (Linear + ReLU).
            # On the channel-last slab this is a block-diagonal LEFT matmul
            # (block-diag weights + row-tiled bias prepared at pack time).
            bd_ref = refs[idx]; bt_ref = refs[idx + 1]; idx += 2
            for i in range(st["ks"]):
                h = jnp.dot(bd_ref[i], h, preferred_element_type=jnp.float32) + bt_ref[i]
                h = jnp.maximum(h, 0.0)

        else:  # "fc": fully_con_layer, plain 1x1 conv (channel -> 1) with bias
            w_ref = refs[idx]; b_ref = refs[idx + 1]; idx += 2
            h = jnp.dot(h, w_ref[...], preferred_element_type=jnp.float32) + b_ref[...]

    assert idx == len(refs) - 2                     # all operands consumed (trace time)
    o_ref[...] = h.astype(o_ref.dtype)


def _full_spec(shape):
    nd = len(shape)

    def imap(b):
        return (0,) * nd

    return pl.BlockSpec(shape, imap)


def model_fwd(x, ops, *, plan, T, n, scr_shape):
    B, c0 = x.shape[0], x.shape[1]
    Tn = T * n
    # NCHW -> channel-last slab once at the model boundary (tiny, boundary only).
    h = jnp.transpose(x, (0, 2, 3, 1)).reshape(B, Tn, c0).astype(jnp.float32)

    in_specs = [pl.BlockSpec((None, Tn, c0), lambda b: (b, 0, 0))]
    in_specs += [_full_spec(a.shape) for a in ops]

    out = pl.pallas_call(
        functools.partial(_model_kernel, plan=plan, T=T, n=n),
        out_shape=jax.ShapeDtypeStruct((B, Tn, 1), jnp.float32),
        grid=(B,),
        in_specs=in_specs,
        out_specs=pl.BlockSpec((None, Tn, 1), lambda b: (b, 0, 0)),
        scratch_shapes=[pltpu.VMEM(scr_shape, jnp.float32)],
        compiler_params=pltpu.CompilerParams(dimension_semantics=("parallel",)),
    )(h, *ops)
    return jnp.transpose(out.reshape(B, T, n, 1), (0, 3, 1, 2))


# --------------------------------------------------------------------------- #
# Parameter init (torch-equivalent layout) and kernel-layout packing
# --------------------------------------------------------------------------- #
def _uniform(key, shape, fan_in):
    bound = 1.0 / np.sqrt(fan_in)
    return jax.random.uniform(key, shape, jnp.float32, -bound, bound)


def init_tconv(key, kt, c_in, c_out, act):
    # torch: conv_1 = Conv2d(c_out, G*c_out, [kt,1], bias=True), optional 1x1
    # projection Conv2d(c_in, c_out, bias=False) when c_in > c_out.
    G = 2 if act == "GLU" else 1
    k0, k1, k2 = jax.random.split(key, 3)
    p = {}
    if c_in > c_out:
        p["pw"] = _uniform(k0, (c_in, c_out), c_in)          # (ci, co) == torch W.T
    fan = c_out * kt
    p["w"] = _uniform(k1, (kt, c_out, G * c_out), fan)       # (kt, ci=c_out, co)
    p["b"] = _uniform(k2, (1, G * c_out), fan)
    return p


def init_spatio(key, ks, c):
    k1, k2 = jax.random.split(key)
    return {"w": _uniform(k1, (ks, c, c), c),                 # torch Linear (out, in)
            "b": _uniform(k2, (ks, c), c)}


def init_bn(c):
    return (jnp.ones((c,), jnp.float32), jnp.zeros((c,), jnp.float32),
            jnp.zeros((c,), jnp.float32), jnp.ones((c,), jnp.float32))


def init_fc(key, channel):
    kw, kb = jax.random.split(key)
    return {"w": _uniform(kw, (channel, 1), channel),
            "b": _uniform(kb, (1, 1), channel)}


def init_st_block(key, ks, kt, channels):
    c_si, c_t, c_oo = channels
    k1, k2, k3 = jax.random.split(key, 3)
    return {"tconv1": init_tconv(k1, kt, c_si, c_t, "GLU"),
            "sconv": init_spatio(k2, ks, c_t),
            "tconv2": init_tconv(k3, kt, c_t, c_oo, "relu"),
            "bn": init_bn(c_oo)}


def init_output(key, T_k, channel):
    k1, k2, k3 = jax.random.split(key, 3)
    return {"tconv1": init_tconv(k1, T_k, channel, channel, "GLU"),
            "bn": init_bn(channel),
            "tconv2": init_tconv(k2, 1, channel, channel, "sigmoid"),
            "fc": init_fc(k3, channel)}


def init_model(key, args):
    k1, k2, k3 = jax.random.split(key, 3)
    return {"st1": init_st_block(k1, args["Ks"], args["Kt"], args["blocks"][0]),
            "st2": init_st_block(k2, args["Ks"], args["Kt"], args["blocks"][1]),
            "output": init_output(k3, args["n_his"], 128)}


def build_plan_and_ops(params, args, T, n):
    """Packs torch-equivalent params into kernel-ready operands + static plan."""
    Tn = T * n
    ks, kt = args["Ks"], args["Kt"]
    plan, ops = [], []

    def add_tconv(p, kt_, c_in, c_out, act, bn=None):
        G = 2 if act == "GLU" else 1
        pad_top = (kt_ - 1) // 2
        has_proj = c_in > c_out
        if has_proj:
            ops.append(p["pw"].astype(jnp.float32))
        w = p["w"].astype(jnp.float32)                        # (kt, c_out, G*c_out)
        if act in ("GLU", "relu"):                            # fold residual (identity)
            w = w.at[pad_top, :, :c_out].add(jnp.eye(c_out, dtype=jnp.float32))
        ops.append(w)
        ops.append(p["b"].astype(jnp.float32))                # (1, G*c_out)
        has_bn = bn is not None
        if has_bn:                                            # eval-mode BN fold
            gamma, beta, mean, var = bn
            scale = gamma / jnp.sqrt(var + 1e-5)
            shift = beta - mean * scale
            ops.append(scale.reshape(1, c_out).astype(jnp.float32))
            ops.append(shift.reshape(1, c_out).astype(jnp.float32))
        plan.append(dict(kind="tconv", kt=kt_, c_out=c_out, act=act,
                         has_proj=has_proj, has_bn=has_bn))

    def add_spatio(p, c):
        assert Tn % c == 0, "spatio reshape(-1, c) groups must not cross channels"
        q = Tn // c
        eye_q = jnp.eye(q, dtype=jnp.float32)
        bd = jnp.stack([jnp.kron(eye_q, p["w"][i]) for i in range(ks)])   # (ks, Tn, Tn)
        bt = jnp.stack([jnp.tile(p["b"][i], q)[:, None] for i in range(ks)])  # (ks, Tn, 1)
        ops.append(bd.astype(jnp.float32))
        ops.append(bt.astype(jnp.float32))
        plan.append(dict(kind="spatio", ks=ks))

    for name, channels in (("st1", args["blocks"][0]), ("st2", args["blocks"][1])):
        c_si, c_t, c_oo = channels
        blk = params[name]
        add_tconv(blk["tconv1"], kt, c_si, c_t, "GLU")
        add_spatio(blk["sconv"], c_t)
        add_tconv(blk["tconv2"], kt, c_t, c_oo, "relu", bn=blk["bn"])
        # dropout(keep_prob=1.0) == identity

    op = params["output"]
    channel = 128
    add_tconv(op["tconv1"], args["n_his"], channel, channel, "GLU", bn=op["bn"])
    add_tconv(op["tconv2"], 1, channel, channel, "sigmoid")
    ops.append(op["fc"]["w"].astype(jnp.float32))
    ops.append(op["fc"]["b"].astype(jnp.float32))
    plan.append(dict(kind="fc"))

    scr_rows, scr_cols = Tn, 8
    for st in plan:
        if st["kind"] == "tconv" and st["kt"] > 1:
            scr_rows = max(scr_rows, Tn + (st["kt"] - 1) * n)
            scr_cols = max(scr_cols, st["c_out"])
    return tuple(plan), ops, (scr_rows, scr_cols)


# --------------------------------------------------------------------------- #
# Pure-JAX reference (no Pallas) used only as a correctness check
# --------------------------------------------------------------------------- #
def ref_model(x, params, args, T, n):
    P = jax.lax.Precision.HIGHEST
    B, c0 = x.shape[0], x.shape[1]
    Tn = T * n
    ks, kt = args["Ks"], args["Kt"]

    def tconv(h, p, kt_, c_in, c_out, act, bn=None):
        if c_in > c_out:
            xin = jnp.einsum('bri,io->bro', h, p["pw"], precision=P)
        elif c_in < c_out:
            xin = jnp.pad(h, ((0, 0), (0, 0), (0, c_out - c_in)))
        else:
            xin = h
        pad_top = (kt_ - 1) // 2
        pad_bot = (kt_ - 1) - pad_top
        x4 = jnp.pad(xin.reshape(B, T, n, c_out),
                     ((0, 0), (pad_top, pad_bot), (0, 0), (0, 0)))
        xp = x4.reshape(B, (T + kt_ - 1) * n, c_out)
        G = 2 if act == "GLU" else 1
        acc = jnp.zeros((B, Tn, G * c_out), jnp.float32)
        for dt in range(kt_):
            acc = acc + jnp.einsum('bri,io->bro', xp[:, dt * n: dt * n + Tn, :],
                                   p["w"][dt], precision=P)
        acc = acc + p["b"]
        if act == "GLU":
            y = (acc[..., :c_out] + xin) * jax.nn.sigmoid(acc[..., c_out:])
        elif act == "relu":
            y = jnp.maximum(acc + xin, 0.0)
        elif act == "sigmoid":
            y = jax.nn.sigmoid(acc)
        else:
            y = acc
        if bn is not None:
            gamma, beta, mean, var = bn
            y = (y - mean) / jnp.sqrt(var + 1e-5) * gamma + beta
        return y

    def spatio(h, p, c):
        v = jnp.transpose(h.reshape(B, T, n, c), (0, 3, 1, 2)).reshape(-1, c)
        for i in range(ks):
            v = jnp.maximum(jnp.einsum('rj,ij->ri', v, p["w"][i], precision=P)
                            + p["b"][i], 0.0)
        y = v.reshape(B, c, T, n)
        return jnp.transpose(y, (0, 2, 3, 1)).reshape(B, Tn, c)

    h = jnp.transpose(x, (0, 2, 3, 1)).reshape(B, Tn, c0).astype(jnp.float32)
    for name, channels in (("st1", args["blocks"][0]), ("st2", args["blocks"][1])):
        c_si, c_t, c_oo = channels
        blk = params[name]
        h = tconv(h, blk["tconv1"], kt, c_si, c_t, "GLU")
        h = spatio(h, blk["sconv"], c_t)
        h = tconv(h, blk["tconv2"], kt, c_t, c_oo, "relu", bn=blk["bn"])
    op = params["output"]
    channel = 128
    h = tconv(h, op["tconv1"], args["n_his"], channel, channel, "GLU", bn=op["bn"])
    h = tconv(h, op["tconv2"], 1, channel, channel, "sigmoid")
    h = jnp.einsum('brc,co->bro', h, op["fc"]["w"], precision=P) + op["fc"]["b"]
    return jnp.transpose(h.reshape(B, T, n, 1), (0, 3, 1, 2))


# --------------------------------------------------------------------------- #
if __name__ == "__main__":
    args = dict(Ks=3, Kt=3, blocks=[[1, 16, 32], [32, 16, 128]],
                keep_prob=1.0, n_his=8)
    B, n = 2, 16
    T = args["n_his"]
    c0 = args["blocks"][0][0]

    key = jax.random.PRNGKey(0)
    kx, kp = jax.random.split(key)
    x = jax.random.normal(kx, (B, c0, T, n), jnp.float32)
    params = init_model(kp, args)

    plan, ops, scr_shape = build_plan_and_ops(params, args, T, n)
    fwd = jax.jit(functools.partial(model_fwd, plan=plan, T=T, n=n,
                                    scr_shape=scr_shape))
    out = jax.block_until_ready(fwd(x, ops))
    assert out.shape == (B, 1, T, n), out.shape
    assert bool(jnp.all(jnp.isfinite(out)))

    # Correctness check against a pure-JAX reference of the PyTorch forward.
    ref = jax.block_until_ready(ref_model(x, params, args, T, n))
    err = float(jnp.max(jnp.abs(out - ref)))
    assert err < 5e-2, f"kernel/reference mismatch: max abs err {err}"

    print("KERNEL_OK")
</pallas_src>

<mosaic_0001>
module attributes {stable_mosaic.version = 11 : i64} {
  func.func @_model_kernel(%arg0: i32, %arg1: memref<1x128x1xf32, #tpu.memory_space<vmem>>, %arg2: memref<3x16x32xf32, #tpu.memory_space<vmem>>, %arg3: memref<1x32xf32, #tpu.memory_space<vmem>>, %arg4: memref<3x128x128xf32, #tpu.memory_space<vmem>>, %arg5: memref<3x128x1xf32, #tpu.memory_space<vmem>>, %arg6: memref<3x32x32xf32, #tpu.memory_space<vmem>>, %arg7: memref<1x32xf32, #tpu.memory_space<vmem>>, %arg8: memref<1x32xf32, #tpu.memory_space<vmem>>, %arg9: memref<1x32xf32, #tpu.memory_space<vmem>>, %arg10: memref<32x16xf32, #tpu.memory_space<vmem>>, %arg11: memref<3x16x32xf32, #tpu.memory_space<vmem>>, %arg12: memref<1x32xf32, #tpu.memory_space<vmem>>, %arg13: memref<3x128x128xf32, #tpu.memory_space<vmem>>, %arg14: memref<3x128x1xf32, #tpu.memory_space<vmem>>, %arg15: memref<3x128x128xf32, #tpu.memory_space<vmem>>, %arg16: memref<1x128xf32, #tpu.memory_space<vmem>>, %arg17: memref<1x128xf32, #tpu.memory_space<vmem>>, %arg18: memref<1x128xf32, #tpu.memory_space<vmem>>, %arg19: memref<8x128x256xf32, #tpu.memory_space<vmem>>, %arg20: memref<1x256xf32, #tpu.memory_space<vmem>>, %arg21: memref<1x128xf32, #tpu.memory_space<vmem>>, %arg22: memref<1x128xf32, #tpu.memory_space<vmem>>, %arg23: memref<1x128x128xf32, #tpu.memory_space<vmem>>, %arg24: memref<1x128xf32, #tpu.memory_space<vmem>>, %arg25: memref<128x1xf32, #tpu.memory_space<vmem>>, %arg26: memref<1x1xf32, #tpu.memory_space<vmem>>, %arg27: memref<1x128x1xf32, #tpu.memory_space<vmem>>, %arg28: memref<240x128xf32, #tpu.memory_space<vmem>>) attributes {dimension_semantics = [#tpu.dimension_semantics<parallel>], iteration_bounds = array<i64: 2>, scalar_prefetch = 0 : i64, scratch_operands = 1 : i64, tpu.core_type = #tpu.core_type<tc>, window_params = [{transform_indices = @transform_0, window_bounds = array<i64: 1, 128, 1>}, {pipeline_mode = #tpu.pipeline_mode<synchronous>, transform_indices = @transform_1, window_bounds = array<i64: 3, 16, 32>}, {pipeline_mode = #tpu.pipeline_mode<synchronous>, transform_indices = @transform_2, window_bounds = array<i64: 1, 32>}, {pipeline_mode = #tpu.pipeline_mode<synchronous>, transform_indices = @transform_3, window_bounds = array<i64: 3, 128, 128>}, {pipeline_mode = #tpu.pipeline_mode<synchronous>, transform_indices = @transform_4, window_bounds = array<i64: 3, 128, 1>}, {pipeline_mode = #tpu.pipeline_mode<synchronous>, transform_indices = @transform_5, window_bounds = array<i64: 3, 32, 32>}, {pipeline_mode = #tpu.pipeline_mode<synchronous>, transform_indices = @transform_6, window_bounds = array<i64: 1, 32>}, {pipeline_mode = #tpu.pipeline_mode<synchronous>, transform_indices = @transform_7, window_bounds = array<i64: 1, 32>}, {pipeline_mode = #tpu.pipeline_mode<synchronous>, transform_indices = @transform_8, window_bounds = array<i64: 1, 32>}, {pipeline_mode = #tpu.pipeline_mode<synchronous>, transform_indices = @transform_9, window_bounds = array<i64: 32, 16>}, {pipeline_mode = #tpu.pipeline_mode<synchronous>, transform_indices = @transform_10, window_bounds = array<i64: 3, 16, 32>}, {pipeline_mode = #tpu.pipeline_mode<synchronous>, transform_indices = @transform_11, window_bounds = array<i64: 1, 32>}, {pipeline_mode = #tpu.pipeline_mode<synchronous>, transform_indices = @transform_12, window_bounds = array<i64: 3, 128, 128>}, {pipeline_mode = #tpu.pipeline_mode<synchronous>, transform_indices = @transform_13, window_bounds = array<i64: 3, 128, 1>}, {pipeline_mode = #tpu.pipeline_mode<synchronous>, transform_indices = @transform_14, window_bounds = array<i64: 3, 128, 128>}, {pipeline_mode = #tpu.pipeline_mode<synchronous>, transform_indices = @transform_15, window_bounds = array<i64: 1, 128>}, {pipeline_mode = #tpu.pipeline_mode<synchronous>, transform_indices = @transform_16, window_bounds = array<i64: 1, 128>}, {pipeline_mode = #tpu.pipeline_mode<synchronous>, transform_indices = @transform_17, window_bounds = array<i64: 1, 128>}, {pipeline_mode = #tpu.pipeline_mode<synchronous>, transform_indices = @transform_18, window_bounds = array<i64: 8, 128, 256>}, {pipeline_mode = #tpu.pipeline_mode<synchronous>, transform_indices = @transform_19, window_bounds = array<i64: 1, 256>}, {pipeline_mode = #tpu.pipeline_mode<synchronous>, transform_indices = @transform_20, window_bounds = array<i64: 1, 128>}, {pipeline_mode = #tpu.pipeline_mode<synchronous>, transform_indices = @transform_21, window_bounds = array<i64: 1, 128>}, {pipeline_mode = #tpu.pipeline_mode<synchronous>, transform_indices = @transform_22, window_bounds = array<i64: 1, 128, 128>}, {pipeline_mode = #tpu.pipeline_mode<synchronous>, transform_indices = @transform_23, window_bounds = array<i64: 1, 128>}, {pipeline_mode = #tpu.pipeline_mode<synchronous>, transform_indices = @transform_24, window_bounds = array<i64: 128, 1>}, {pipeline_mode = #tpu.pipeline_mode<synchronous>, transform_indices = @transform_25, window_bounds = array<i64: 1, 1>}, {transform_indices = @transform_26, window_bounds = array<i64: 1, 128, 1>}]} {
    %c0 = arith.constant 0 : index
    %c0_0 = arith.constant 0 : index
    %c0_1 = arith.constant 0 : index
    %0 = vector.load %arg1[%c0, %c0_0, %c0_1] : memref<1x128x1xf32, #tpu.memory_space<vmem>>, vector<1x128x1xf32>
    %1 = vector.shape_cast %0 : vector<1x128x1xf32> to vector<128x1xf32>
    %cst = arith.constant 0.000000e+00 : f32
    %2 = vector.broadcast %cst : f32 to vector<160x16xf32>
    %c0_2 = arith.constant 0 : index
    %c0_3 = arith.constant 0 : index
    %3 = vector.load %arg28[%c0_2, %c0_3] : memref<240x128xf32, #tpu.memory_space<vmem>>, vector<160x16xf32>
    tpu.vector_store %arg28[%c0_2, %c0_3], %2 {strides = array<i32>} : memref<240x128xf32, #tpu.memory_space<vmem>>, vector<160x16xf32>,
    %c16 = arith.constant 16 : index
    %c0_4 = arith.constant 0 : index
    %4 = vector.load %arg28[%c16, %c0_4] : memref<240x128xf32, #tpu.memory_space<vmem>>, vector<128x1xf32>
    tpu.vector_store %arg28[%c16, %c0_4], %1 {strides = array<i32>} : memref<240x128xf32, #tpu.memory_space<vmem>>, vector<128x1xf32>,
    %cst_5 = arith.constant 0.000000e+00 : f32
    %5 = vector.broadcast %cst_5 : f32 to vector<128x32xf32>
    %c0_6 = arith.constant 0 : index
    %c0_7 = arith.constant 0 : index
    %6 = vector.load %arg28[%c0_6, %c0_7] : memref<240x128xf32, #tpu.memory_space<vmem>>, vector<128x16xf32>
    %c0_8 = arith.constant 0 : index
    %c0_9 = arith.constant 0 : index
    %c0_10 = arith.constant 0 : index
    %7 = vector.load %arg2[%c0_8, %c0_9, %c0_10] : memref<3x16x32xf32, #tpu.memory_space<vmem>>, vector<1x16x32xf32>
    %8 = vector.shape_cast %7 : vector<1x16x32xf32> to vector<16x32xf32>
    %cst_11 = arith.constant dense<0.000000e+00> : vector<128x32xf32>
    %9 = tpu.matmul %6, %8, %cst_11 {dimension_numbers = #tpu.dot_dimension_numbers<[1], [0], [0], [1], [0, 0, 1, 1], [], []>} : vector<128x16xf32>, vector<16x32xf32>, vector<128x32xf32> -> vector<128x32xf32>
    %10 = arith.addf %5, %9 : vector<128x32xf32>
    %c16_12 = arith.constant 16 : index
    %c0_13 = arith.constant 0 : index
    %11 = vector.load %arg28[%c16_12, %c0_13] : memref<240x128xf32, #tpu.memory_space<vmem>>, vector<128x16xf32>
    %c1 = arith.constant 1 : index
    %c0_14 = arith.constant 0 : index
    %c0_15 = arith.constant 0 : index
    %12 = vector.load %arg2[%c1, %c0_14, %c0_15] : memref<3x16x32xf32, #tpu.memory_space<vmem>>, vector<1x16x32xf32>
    %13 = vector.shape_cast %12 : vector<1x16x32xf32> to vector<16x32xf32>
    %cst_16 = arith.constant dense<0.000000e+00> : vector<128x32xf32>
    %14 = tpu.matmul %11, %13, %cst_16 {dimension_numbers = #tpu.dot_dimension_numbers<[1], [0], [0], [1], [0, 0, 1, 1], [], []>} : vector<128x16xf32>, vector<16x32xf32>, vector<128x32xf32> -> vector<128x32xf32>
    %15 = arith.addf %10, %14 : vector<128x32xf32>
    %c32 = arith.constant 32 : index
    %c0_17 = arith.constant 0 : index
    %16 = vector.load %arg28[%c32, %c0_17] : memref<240x128xf32, #tpu.memory_space<vmem>>, vector<128x16xf32>
    %c2 = arith.constant 2 : index
    %c0_18 = arith.constant 0 : index
    %c0_19 = arith.constant 0 : index
    %17 = vector.load %arg2[%c2, %c0_18, %c0_19] : memref<3x16x32xf32, #tpu.memory_space<vmem>>, vector<1x16x32xf32>
    %18 = vector.shape_cast %17 : vector<1x16x32xf32> to vector<16x32xf32>
    %cst_20 = arith.constant dense<0.000000e+00> : vector<128x32xf32>
    %19 = tpu.matmul %16, %18, %cst_20 {dimension_numbers = #tpu.dot_dimension_numbers<[1], [0], [0], [1], [0, 0, 1, 1], [], []>} : vector<128x16xf32>, vector<16x32xf32>, vector<128x32xf32> -> vector<128x32xf32>
    %20 = arith.addf %15, %19 : vector<128x32xf32>
    %c0_21 = arith.constant 0 : index
    %c0_22 = arith.constant 0 : index
    %21 = vector.load %arg3[%c0_21, %c0_22] : memref<1x32xf32, #tpu.memory_space<vmem>>, vector<1x32xf32>
    %22 = vector.broadcast %21 : vector<1x32xf32> to vector<128x32xf32>
    %23 = arith.addf %20, %22 : vector<128x32xf32>
    %24 = vector.extract_strided_slice %23 {offsets = [0, 0], sizes = [128, 16], strides = [1, 1]} : vector<128x32xf32> to vector<128x16xf32>
    %25 = vector.extract_strided_slice %23 {offsets = [0, 16], sizes = [128, 16], strides = [1, 1]} : vector<128x32xf32> to vector<128x16xf32>
    %26 = arith.negf %25 : vector<128x16xf32>
    %27 = math.exp %26 : vector<128x16xf32>
    %cst_23 = arith.constant 1.000000e+00 : f32
    %28 = vector.broadcast %cst_23 : f32 to vector<128x16xf32>
    %29 = arith.addf %28, %27 : vector<128x16xf32>
    %30 = arith.divf %28, %29 : vector<128x16xf32>
    %31 = arith.mulf %24, %30 : vector<128x16xf32>
    %c0_24 = arith.constant 0 : index
    %c0_25 = arith.constant 0 : index
    %c0_26 = arith.constant 0 : index
    %32 = vector.load %arg4[%c0_24, %c0_25, %c0_26] : memref<3x128x128xf32, #tpu.memory_space<vmem>>, vector<1x128x128xf32>
    %33 = vector.shape_cast %32 : vector<1x128x128xf32> to vector<128x128xf32>
    %cst_27 = arith.constant dense<0.000000e+00> : vector<128x16xf32>
    %34 = tpu.matmul %33, %31, %cst_27 {dimension_numbers = #tpu.dot_dimension_numbers<[1], [0], [0], [1], [0, 0, 1, 1], [], []>} : vector<128x128xf32>, vector<128x16xf32>, vector<128x16xf32> -> vector<128x16xf32>
    %c0_28 = arith.constant 0 : index
    %c0_29 = arith.constant 0 : index
    %c0_30 = arith.constant 0 : index
    %35 = vector.load %arg5[%c0_28, %c0_29, %c0_30] : memref<3x128x1xf32, #tpu.memory_space<vmem>>, vector<1x128x1xf32>
    %36 = vector.shape_cast %35 : vector<1x128x1xf32> to vector<128x1xf32>
    %37 = vector.broadcast %36 : vector<128x1xf32> to vector<128x16xf32>
    %38 = arith.addf %34, %37 : vector<128x16xf32>
    %cst_31 = arith.constant 0.000000e+00 : f32
    %39 = vector.broadcast %cst_31 : f32 to vector<128x16xf32>
    %40 = arith.maximumf %38, %39 : vector<128x16xf32>
    %c1_32 = arith.constant 1 : index
    %c0_33 = arith.constant 0 : index
    %c0_34 = arith.constant 0 : index
    %41 = vector.load %arg4[%c1_32, %c0_33, %c0_34] : memref<3x128x128xf32, #tpu.memory_space<vmem>>, vector<1x128x128xf32>
    %42 = vector.shape_cast %41 : vector<1x128x128xf32> to vector<128x128xf32>
    %cst_35 = arith.constant dense<0.000000e+00> : vector<128x16xf32>
    %43 = tpu.matmul %42, %40, %cst_35 {dimension_numbers = #tpu.dot_dimension_numbers<[1], [0], [0], [1], [0, 0, 1, 1], [], []>} : vector<128x128xf32>, vector<128x16xf32>, vector<128x16xf32> -> vector<128x16xf32>
    %c1_36 = arith.constant 1 : index
    %c0_37 = arith.constant 0 : index
    %c0_38 = arith.constant 0 : index
    %44 = vector.load %arg5[%c1_36, %c0_37, %c0_38] : memref<3x128x1xf32, #tpu.memory_space<vmem>>, vector<1x128x1xf32>
    %45 = vector.shape_cast %44 : vector<1x128x1xf32> to vector<128x1xf32>
    %46 = vector.broadcast %45 : vector<128x1xf32> to vector<128x16xf32>
    %47 = arith.addf %43, %46 : vector<128x16xf32>
    %cst_39 = arith.constant 0.000000e+00 : f32
    %48 = vector.broadcast %cst_39 : f32 to vector<128x16xf32>
    %49 = arith.maximumf %47, %48 : vector<128x16xf32>
    %c2_40 = arith.constant 2 : index
    %c0_41 = arith.constant 0 : index
    %c0_42 = arith.constant 0 : index
    %50 = vector.load %arg4[%c2_40, %c0_41, %c0_42] : memref<3x128x128xf32, #tpu.memory_space<vmem>>, vector<1x128x128xf32>
    %51 = vector.shape_cast %50 : vector<1x128x128xf32> to vector<128x128xf32>
    %cst_43 = arith.constant dense<0.000000e+00> : vector<128x16xf32>
    %52 = tpu.matmul %51, %49, %cst_43 {dimension_numbers = #tpu.dot_dimension_numbers<[1], [0], [0], [1], [0, 0, 1, 1], [], []>} : vector<128x128xf32>, vector<128x16xf32>, vector<128x16xf32> -> vector<128x16xf32>
    %c2_44 = arith.constant 2 : index
    %c0_45 = arith.constant 0 : index
    %c0_46 = arith.constant 0 : index
    %53 = vector.load %arg5[%c2_44, %c0_45, %c0_46] : memref<3x128x1xf32, #tpu.memory_space<vmem>>, vector<1x128x1xf32>
    %54 = vector.shape_cast %53 : vector<1x128x1xf32> to vector<128x1xf32>
    %55 = vector.broadcast %54 : vector<128x1xf32> to vector<128x16xf32>
    %56 = arith.addf %52, %55 : vector<128x16xf32>
    %cst_47 = arith.constant 0.000000e+00 : f32
    %57 = vector.broadcast %cst_47 : f32 to vector<128x16xf32>
    %58 = arith.maximumf %56, %57 : vector<128x16xf32>
    %cst_48 = arith.constant 0.000000e+00 : f32
    %59 = vector.broadcast %cst_48 : f32 to vector<160x32xf32>
    %c0_49 = arith.constant 0 : index
    %c0_50 = arith.constant 0 : index
    %60 = vector.load %arg28[%c0_49, %c0_50] : memref<240x128xf32, #tpu.memory_space<vmem>>, vector<160x32xf32>
    tpu.vector_store %arg28[%c0_49, %c0_50], %59 {strides = array<i32>} : memref<240x128xf32, #tpu.memory_space<vmem>>, vector<160x32xf32>,
    %c16_51 = arith.constant 16 : index
    %c0_52 = arith.constant 0 : index
    %61 = vector.load %arg28[%c16_51, %c0_52] : memref<240x128xf32, #tpu.memory_space<vmem>>, vector<128x16xf32>
    tpu.vector_store %arg28[%c16_51, %c0_52], %58 {strides = array<i32>} : memref<240x128xf32, #tpu.memory_space<vmem>>, vector<128x16xf32>,
    %cst_53 = arith.constant 0.000000e+00 : f32
    %62 = vector.broadcast %cst_53 : f32 to vector<128x32xf32>
    %c0_54 = arith.constant 0 : index
    %c0_55 = arith.constant 0 : index
    %63 = vector.load %arg28[%c0_54, %c0_55] : memref<240x128xf32, #tpu.memory_space<vmem>>, vector<128x32xf32>
    %c0_56 = arith.constant 0 : index
    %c0_57 = arith.constant 0 : index
    %c0_58 = arith.constant 0 : index
    %64 = vector.load %arg6[%c0_56, %c0_57, %c0_58] : memref<3x32x32xf32, #tpu.memory_space<vmem>>, vector<1x32x32xf32>
    %65 = vector.shape_cast %64 : vector<1x32x32xf32> to vector<32x32xf32>
    %cst_59 = arith.constant dense<0.000000e+00> : vector<128x32xf32>
    %66 = tpu.matmul %63, %65, %cst_59 {dimension_numbers = #tpu.dot_dimension_numbers<[1], [0], [0], [1], [0, 0, 1, 1], [], []>} : vector<128x32xf32>, vector<32x32xf32>, vector<128x32xf32> -> vector<128x32xf32>
    %67 = arith.addf %62, %66 : vector<128x32xf32>
    %c16_60 = arith.constant 16 : index
    %c0_61 = arith.constant 0 : index
    %68 = vector.load %arg28[%c16_60, %c0_61] : memref<240x128xf32, #tpu.memory_space<vmem>>, vector<128x32xf32>
    %c1_62 = arith.constant 1 : index
    %c0_63 = arith.constant 0 : index
    %c0_64 = arith.constant 0 : index
    %69 = vector.load %arg6[%c1_62, %c0_63, %c0_64] : memref<3x32x32xf32, #tpu.memory_space<vmem>>, vector<1x32x32xf32>
    %70 = vector.shape_cast %69 : vector<1x32x32xf32> to vector<32x32xf32>
    %cst_65 = arith.constant dense<0.000000e+00> : vector<128x32xf32>
    %71 = tpu.matmul %68, %70, %cst_65 {dimension_numbers = #tpu.dot_dimension_numbers<[1], [0], [0], [1], [0, 0, 1, 1], [], []>} : vector<128x32xf32>, vector<32x32xf32>, vector<128x32xf32> -> vector<128x32xf32>
    %72 = arith.addf %67, %71 : vector<128x32xf32>
    %c32_66 = arith.constant 32 : index
    %c0_67 = arith.constant 0 : index
    %73 = vector.load %arg28[%c32_66, %c0_67] : memref<240x128xf32, #tpu.memory_space<vmem>>, vector<128x32xf32>
    %c2_68 = arith.constant 2 : index
    %c0_69 = arith.constant 0 : index
    %c0_70 = arith.constant 0 : index
    %74 = vector.load %arg6[%c2_68, %c0_69, %c0_70] : memref<3x32x32xf32, #tpu.memory_space<vmem>>, vector<1x32x32xf32>
    %75 = vector.shape_cast %74 : vector<1x32x32xf32> to vector<32x32xf32>
    %cst_71 = arith.constant dense<0.000000e+00> : vector<128x32xf32>
    %76 = tpu.matmul %73, %75, %cst_71 {dimension_numbers = #tpu.dot_dimension_numbers<[1], [0], [0], [1], [0, 0, 1, 1], [], []>} : vector<128x32xf32>, vector<32x32xf32>, vector<128x32xf32> -> vector<128x32xf32>
    %77 = arith.addf %72, %76 : vector<128x32xf32>
    %c0_72 = arith.constant 0 : index
    %c0_73 = arith.constant 0 : index
    %78 = vector.load %arg7[%c0_72, %c0_73] : memref<1x32xf32, #tpu.memory_space<vmem>>, vector<1x32xf32>
    %79 = vector.broadcast %78 : vector<1x32xf32> to vector<128x32xf32>
    %80 = arith.addf %77, %79 : vector<128x32xf32>
    %cst_74 = arith.constant 0.000000e+00 : f32
    %81 = vector.broadcast %cst_74 : f32 to vector<128x32xf32>
    %82 = arith.maximumf %80, %81 : vector<128x32xf32>
    %c0_75 = arith.constant 0 : index
    %c0_76 = arith.constant 0 : index
    %83 = vector.load %arg8[%c0_75, %c0_76] : memref<1x32xf32, #tpu.memory_space<vmem>>, vector<1x32xf32>
    %84 = vector.broadcast %83 : vector<1x32xf32> to vector<128x32xf32>
    %85 = arith.mulf %82, %84 : vector<128x32xf32>
    %c0_77 = arith.constant 0 : index
    %c0_78 = arith.constant 0 : index
    %86 = vector.load %arg9[%c0_77, %c0_78] : memref<1x32xf32, #tpu.memory_space<vmem>>, vector<1x32xf32>
    %87 = vector.broadcast %86 : vector<1x32xf32> to vector<128x32xf32>
    %88 = arith.addf %85, %87 : vector<128x32xf32>
    %c0_79 = arith.constant 0 : index
    %c0_80 = arith.constant 0 : index
    %89 = vector.load %arg10[%c0_79, %c0_80] : memref<32x16xf32, #tpu.memory_space<vmem>>, vector<32x16xf32>
    %cst_81 = arith.constant dense<0.000000e+00> : vector<128x16xf32>
    %90 = tpu.matmul %88, %89, %cst_81 {dimension_numbers = #tpu.dot_dimension_numbers<[1], [0], [0], [1], [0, 0, 1, 1], [], []>} : vector<128x32xf32>, vector<32x16xf32>, vector<128x16xf32> -> vector<128x16xf32>
    %cst_82 = arith.constant 0.000000e+00 : f32
    %91 = vector.broadcast %cst_82 : f32 to vector<160x16xf32>
    %c0_83 = arith.constant 0 : index
    %c0_84 = arith.constant 0 : index
    %92 = vector.load %arg28[%c0_83, %c0_84] : memref<240x128xf32, #tpu.memory_space<vmem>>, vector<160x16xf32>
    tpu.vector_store %arg28[%c0_83, %c0_84], %91 {strides = array<i32>} : memref<240x128xf32, #tpu.memory_space<vmem>>, vector<160x16xf32>,
    %c16_85 = arith.constant 16 : index
    %c0_86 = arith.constant 0 : index
    %93 = vector.load %arg28[%c16_85, %c0_86] : memref<240x128xf32, #tpu.memory_space<vmem>>, vector<128x16xf32>
    tpu.vector_store %arg28[%c16_85, %c0_86], %90 {strides = array<i32>} : memref<240x128xf32, #tpu.memory_space<vmem>>, vector<128x16xf32>,
    %cst_87 = arith.constant 0.000000e+00 : f32
    %94 = vector.broadcast %cst_87 : f32 to vector<128x32xf32>
    %c0_88 = arith.constant 0 : index
    %c0_89 = arith.constant 0 : index
    %95 = vector.load %arg28[%c0_88, %c0_89] : memref<240x128xf32, #tpu.memory_space<vmem>>, vector<128x16xf32>
    %c0_90 = arith.constant 0 : index
    %c0_91 = arith.constant 0 : index
    %c0_92 = arith.constant 0 : index
    %96 = vector.load %arg11[%c0_90, %c0_91, %c0_92] : memref<3x16x32xf32, #tpu.memory_space<vmem>>, vector<1x16x32xf32>
    %97 = vector.shape_cast %96 : vector<1x16x32xf32> to vector<16x32xf32>
    %cst_93 = arith.constant dense<0.000000e+00> : vector<128x32xf32>
    %98 = tpu.matmul %95, %97, %cst_93 {dimension_numbers = #tpu.dot_dimension_numbers<[1], [0], [0], [1], [0, 0, 1, 1], [], []>} : vector<128x16xf32>, vector<16x32xf32>, vector<128x32xf32> -> vector<128x32xf32>
    %99 = arith.addf %94, %98 : vector<128x32xf32>
    %c16_94 = arith.constant 16 : index
    %c0_95 = arith.constant 0 : index
    %100 = vector.load %arg28[%c16_94, %c0_95] : memref<240x128xf32, #tpu.memory_space<vmem>>, vector<128x16xf32>
    %c1_96 = arith.constant 1 : index
    %c0_97 = arith.constant 0 : index
    %c0_98 = arith.constant 0 : index
    %101 = vector.load %arg11[%c1_96, %c0_97, %c0_98] : memref<3x16x32xf32, #tpu.memory_space<vmem>>, vector<1x16x32xf32>
    %102 = vector.shape_cast %101 : vector<1x16x32xf32> to vector<16x32xf32>
    %cst_99 = arith.constant dense<0.000000e+00> : vector<128x32xf32>
    %103 = tpu.matmul %100, %102, %cst_99 {dimension_numbers = #tpu.dot_dimension_numbers<[1], [0], [0], [1], [0, 0, 1, 1], [], []>} : vector<128x16xf32>, vector<16x32xf32>, vector<128x32xf32> -> vector<128x32xf32>
    %104 = arith.addf %99, %103 : vector<128x32xf32>
    %c32_100 = arith.constant 32 : index
    %c0_101 = arith.constant 0 : index
    %105 = vector.load %arg28[%c32_100, %c0_101] : memref<240x128xf32, #tpu.memory_space<vmem>>, vector<128x16xf32>
    %c2_102 = arith.constant 2 : index
    %c0_103 = arith.constant 0 : index
    %c0_104 = arith.constant 0 : index
    %106 = vector.load %arg11[%c2_102, %c0_103, %c0_104] : memref<3x16x32xf32, #tpu.memory_space<vmem>>, vector<1x16x32xf32>
    %107 = vector.shape_cast %106 : vector<1x16x32xf32> to vector<16x32xf32>
    %cst_105 = arith.constant dense<0.000000e+00> : vector<128x32xf32>
    %108 = tpu.matmul %105, %107, %cst_105 {dimension_numbers = #tpu.dot_dimension_numbers<[1], [0], [0], [1], [0, 0, 1, 1], [], []>} : vector<128x16xf32>, vector<16x32xf32>, vector<128x32xf32> -> vector<128x32xf32>
    %109 = arith.addf %104, %108 : vector<128x32xf32>
    %c0_106 = arith.constant 0 : index
    %c0_107 = arith.constant 0 : index
    %110 = vector.load %arg12[%c0_106, %c0_107] : memref<1x32xf32, #tpu.memory_space<vmem>>, vector<1x32xf32>
    %111 = vector.broadcast %110 : vector<1x32xf32> to vector<128x32xf32>
    %112 = arith.addf %109, %111 : vector<128x32xf32>
    %113 = vector.extract_strided_slice %112 {offsets = [0, 0], sizes = [128, 16], strides = [1, 1]} : vector<128x32xf32> to vector<128x16xf32>
    %114 = vector.extract_strided_slice %112 {offsets = [0, 16], sizes = [128, 16], strides = [1, 1]} : vector<128x32xf32> to vector<128x16xf32>
    %115 = arith.negf %114 : vector<128x16xf32>
    %116 = math.exp %115 : vector<128x16xf32>
    %cst_108 = arith.constant 1.000000e+00 : f32
    %117 = vector.broadcast %cst_108 : f32 to vector<128x16xf32>
    %118 = arith.addf %117, %116 : vector<128x16xf32>
    %119 = arith.divf %117, %118 : vector<128x16xf32>
    %120 = arith.mulf %113, %119 : vector<128x16xf32>
    %c0_109 = arith.constant 0 : index
    %c0_110 = arith.constant 0 : index
    %c0_111 = arith.constant 0 : index
    %121 = vector.load %arg13[%c0_109, %c0_110, %c0_111] : memref<3x128x128xf32, #tpu.memory_space<vmem>>, vector<1x128x128xf32>
    %122 = vector.shape_cast %121 : vector<1x128x128xf32> to vector<128x128xf32>
    %cst_112 = arith.constant dense<0.000000e+00> : vector<128x16xf32>
    %123 = tpu.matmul %122, %120, %cst_112 {dimension_numbers = #tpu.dot_dimension_numbers<[1], [0], [0], [1], [0, 0, 1, 1], [], []>} : vector<128x128xf32>, vector<128x16xf32>, vector<128x16xf32> -> vector<128x16xf32>
    %c0_113 = arith.constant 0 : index
    %c0_114 = arith.constant 0 : index
    %c0_115 = arith.constant 0 : index
    %124 = vector.load %arg14[%c0_113, %c0_114, %c0_115] : memref<3x128x1xf32, #tpu.memory_space<vmem>>, vector<1x128x1xf32>
    %125 = vector.shape_cast %124 : vector<1x128x1xf32> to vector<128x1xf32>
    %126 = vector.broadcast %125 : vector<128x1xf32> to vector<128x16xf32>
    %127 = arith.addf %123, %126 : vector<128x16xf32>
    %cst_116 = arith.constant 0.000000e+00 : f32
    %128 = vector.broadcast %cst_116 : f32 to vector<128x16xf32>
    %129 = arith.maximumf %127, %128 : vector<128x16xf32>
    %c1_117 = arith.constant 1 : index
    %c0_118 = arith.constant 0 : index
    %c0_119 = arith.constant 0 : index
    %130 = vector.load %arg13[%c1_117, %c0_118, %c0_119] : memref<3x128x128xf32, #tpu.memory_space<vmem>>, vector<1x128x128xf32>
    %131 = vector.shape_cast %130 : vector<1x128x128xf32> to vector<128x128xf32>
    %cst_120 = arith.constant dense<0.000000e+00> : vector<128x16xf32>
    %132 = tpu.matmul %131, %129, %cst_120 {dimension_numbers = #tpu.dot_dimension_numbers<[1], [0], [0], [1], [0, 0, 1, 1], [], []>} : vector<128x128xf32>, vector<128x16xf32>, vector<128x16xf32> -> vector<128x16xf32>
    %c1_121 = arith.constant 1 : index
    %c0_122 = arith.constant 0 : index
    %c0_123 = arith.constant 0 : index
    %133 = vector.load %arg14[%c1_121, %c0_122, %c0_123] : memref<3x128x1xf32, #tpu.memory_space<vmem>>, vector<1x128x1xf32>
    %134 = vector.shape_cast %133 : vector<1x128x1xf32> to vector<128x1xf32>
    %135 = vector.broadcast %134 : vector<128x1xf32> to vector<128x16xf32>
    %136 = arith.addf %132, %135 : vector<128x16xf32>
    %cst_124 = arith.constant 0.000000e+00 : f32
    %137 = vector.broadcast %cst_124 : f32 to vector<128x16xf32>
    %138 = arith.maximumf %136, %137 : vector<128x16xf32>
    %c2_125 = arith.constant 2 : index
    %c0_126 = arith.constant 0 : index
    %c0_127 = arith.constant 0 : index
    %139 = vector.load %arg13[%c2_125, %c0_126, %c0_127] : memref<3x128x128xf32, #tpu.memory_space<vmem>>, vector<1x128x128xf32>
    %140 = vector.shape_cast %139 : vector<1x128x128xf32> to vector<128x128xf32>
    %cst_128 = arith.constant dense<0.000000e+00> : vector<128x16xf32>
    %141 = tpu.matmul %140, %138, %cst_128 {dimension_numbers = #tpu.dot_dimension_numbers<[1], [0], [0], [1], [0, 0, 1, 1], [], []>} : vector<128x128xf32>, vector<128x16xf32>, vector<128x16xf32> -> vector<128x16xf32>
    %c2_129 = arith.constant 2 : index
    %c0_130 = arith.constant 0 : index
    %c0_131 = arith.constant 0 : index
    %142 = vector.load %arg14[%c2_129, %c0_130, %c0_131] : memref<3x128x1xf32, #tpu.memory_space<vmem>>, vector<1x128x1xf32>
    %143 = vector.shape_cast %142 : vector<1x128x1xf32> to vector<128x1xf32>
    %144 = vector.broadcast %143 : vector<128x1xf32> to vector<128x16xf32>
    %145 = arith.addf %141, %144 : vector<128x16xf32>
    %cst_132 = arith.constant 0.000000e+00 : f32
    %146 = vector.broadcast %cst_132 : f32 to vector<128x16xf32>
    %147 = arith.maximumf %145, %146 : vector<128x16xf32>
    %cst_133 = arith.constant 0.000000e+00 : f32
    %148 = vector.broadcast %cst_133 : f32 to vector<160x128xf32>
    %c0_134 = arith.constant 0 : index
    %c0_135 = arith.constant 0 : index
    %149 = vector.load %arg28[%c0_134, %c0_135] : memref<240x128xf32, #tpu.memory_space<vmem>>, vector<160x128xf32>
    tpu.vector_store %arg28[%c0_134, %c0_135], %148 {strides = array<i32>} : memref<240x128xf32, #tpu.memory_space<vmem>>, vector<160x128xf32>,
    %c16_136 = arith.constant 16 : index
    %c0_137 = arith.constant 0 : index
    %150 = vector.load %arg28[%c16_136, %c0_137] : memref<240x128xf32, #tpu.memory_space<vmem>>, vector<128x16xf32>
    tpu.vector_store %arg28[%c16_136, %c0_137], %147 {strides = array<i32>} : memref<240x128xf32, #tpu.memory_space<vmem>>, vector<128x16xf32>,
    %cst_138 = arith.constant 0.000000e+00 : f32
    %151 = vector.broadcast %cst_138 : f32 to vector<128x128xf32>
    %c0_139 = arith.constant 0 : index
    %c0_140 = arith.constant 0 : index
    %152 = vector.load %arg28[%c0_139, %c0_140] : memref<240x128xf32, #tpu.memory_space<vmem>>, vector<128x128xf32>
    %c0_141 = arith.constant 0 : index
    %c0_142 = arith.constant 0 : index
    %c0_143 = arith.constant 0 : index
    %153 = vector.load %arg15[%c0_141, %c0_142, %c0_143] : memref<3x128x128xf32, #tpu.memory_space<vmem>>, vector<1x128x128xf32>
    %154 = vector.shape_cast %153 : vector<1x128x128xf32> to vector<128x128xf32>
    %cst_144 = arith.constant dense<0.000000e+00> : vector<128x128xf32>
    %155 = tpu.matmul %152, %154, %cst_144 {dimension_numbers = #tpu.dot_dimension_numbers<[1], [0], [0], [1], [0, 0, 1, 1], [], []>} : vector<128x128xf32>, vector<128x128xf32>, vector<128x128xf32> -> vector<128x128xf32>
    %156 = arith.addf %151, %155 : vector<128x128xf32>
    %c16_145 = arith.constant 16 : index
    %c0_146 = arith.constant 0 : index
    %157 = vector.load %arg28[%c16_145, %c0_146] : memref<240x128xf32, #tpu.memory_space<vmem>>, vector<128x128xf32>
    %c1_147 = arith.constant 1 : index
    %c0_148 = arith.constant 0 : index
    %c0_149 = arith.constant 0 : index
    %158 = vector.load %arg15[%c1_147, %c0_148, %c0_149] : memref<3x128x128xf32, #tpu.memory_space<vmem>>, vector<1x128x128xf32>
    %159 = vector.shape_cast %158 : vector<1x128x128xf32> to vector<128x128xf32>
    %cst_150 = arith.constant dense<0.000000e+00> : vector<128x128xf32>
    %160 = tpu.matmul %157, %159, %cst_150 {dimension_numbers = #tpu.dot_dimension_numbers<[1], [0], [0], [1], [0, 0, 1, 1], [], []>} : vector<128x128xf32>, vector<128x128xf32>, vector<128x128xf32> -> vector<128x128xf32>
    %161 = arith.addf %156, %160 : vector<128x128xf32>
    %c32_151 = arith.constant 32 : index
    %c0_152 = arith.constant 0 : index
    %162 = vector.load %arg28[%c32_151, %c0_152] : memref<240x128xf32, #tpu.memory_space<vmem>>, vector<128x128xf32>
    %c2_153 = arith.constant 2 : index
    %c0_154 = arith.constant 0 : index
    %c0_155 = arith.constant 0 : index
    %163 = vector.load %arg15[%c2_153, %c0_154, %c0_155] : memref<3x128x128xf32, #tpu.memory_space<vmem>>, vector<1x128x128xf32>
    %164 = vector.shape_cast %163 : vector<1x128x128xf32> to vector<128x128xf32>
    %cst_156 = arith.constant dense<0.000000e+00> : vector<128x128xf32>
    %165 = tpu.matmul %162, %164, %cst_156 {dimension_numbers = #tpu.dot_dimension_numbers<[1], [0], [0], [1], [0, 0, 1, 1], [], []>} : vector<128x128xf32>, vector<128x128xf32>, vector<128x128xf32> -> vector<128x128xf32>
    %166 = arith.addf %161, %165 : vector<128x128xf32>
    %c0_157 = arith.constant 0 : index
    %c0_158 = arith.constant 0 : index
    %167 = vector.load %arg16[%c0_157, %c0_158] : memref<1x128xf32, #tpu.memory_space<vmem>>, vector<1x128xf32>
    %168 = vector.broadcast %167 : vector<1x128xf32> to vector<128x128xf32>
    %169 = arith.addf %166, %168 : vector<128x128xf32>
    %cst_159 = arith.constant 0.000000e+00 : f32
    %170 = vector.broadcast %cst_159 : f32 to vector<128x128xf32>
    %171 = arith.maximumf %169, %170 : vector<128x128xf32>
    %c0_160 = arith.constant 0 : index
    %c0_161 = arith.constant 0 : index
    %172 = vector.load %arg17[%c0_160, %c0_161] : memref<1x128xf32, #tpu.memory_space<vmem>>, vector<1x128xf32>
    %173 = vector.broadcast %172 : vector<1x128xf32> to vector<128x128xf32>
    %174 = arith.mulf %171, %173 : vector<128x128xf32>
    %c0_162 = arith.constant 0 : index
    %c0_163 = arith.constant 0 : index
    %175 = vector.load %arg18[%c0_162, %c0_163] : memref<1x128xf32, #tpu.memory_space<vmem>>, vector<1x128xf32>
    %176 = vector.broadcast %175 : vector<1x128xf32> to vector<128x128xf32>
    %177 = arith.addf %174, %176 : vector<128x128xf32>
    %cst_164 = arith.constant 0.000000e+00 : f32
    %178 = vector.broadcast %cst_164 : f32 to vector<240x128xf32>
    %c0_165 = arith.constant 0 : index
    %c0_166 = arith.constant 0 : index
    %179 = vector.load %arg28[%c0_165, %c0_166] : memref<240x128xf32, #tpu.memory_space<vmem>>, vector<240x128xf32>
    tpu.vector_store %arg28[%c0_165, %c0_166], %178 {strides = array<i32>} : memref<240x128xf32, #tpu.memory_space<vmem>>, vector<240x128xf32>,
    %c48 = arith.constant 48 : index
    %c0_167 = arith.constant 0 : index
    %180 = vector.load %arg28[%c48, %c0_167] : memref<240x128xf32, #tpu.memory_space<vmem>>, vector<128x128xf32>
    tpu.vector_store %arg28[%c48, %c0_167], %177 {strides = array<i32>} : memref<240x128xf32, #tpu.memory_space<vmem>>, vector<128x128xf32>,
    %cst_168 = arith.constant 0.000000e+00 : f32
    %181 = vector.broadcast %cst_168 : f32 to vector<64x256xf32>
    %c0_169 = arith.constant 0 : index
    %c0_170 = arith.constant 0 : index
    %182 = vector.load %arg28[%c0_169, %c0_170] : memref<240x128xf32, #tpu.memory_space<vmem>>, vector<64x128xf32>
    %c0_171 = arith.constant 0 : index
    %c0_172 = arith.constant 0 : index
    %c0_173 = arith.constant 0 : index
    %183 = vector.load %arg19[%c0_171, %c0_172, %c0_173] : memref<8x128x256xf32, #tpu.memory_space<vmem>>, vector<1x128x256xf32>
    %184 = vector.shape_cast %183 : vector<1x128x256xf32> to vector<128x256xf32>
    %cst_174 = arith.constant dense<0.000000e+00> : vector<64x256xf32>
    %185 = tpu.matmul %182, %184, %cst_174 {dimension_numbers = #tpu.dot_dimension_numbers<[1], [0], [0], [1], [0, 0, 1, 1], [], []>} : vector<64x128xf32>, vector<128x256xf32>, vector<64x256xf32> -> vector<64x256xf32>
    %186 = arith.addf %181, %185 : vector<64x256xf32>
    %c16_175 = arith.constant 16 : index
    %c0_176 = arith.constant 0 : index
    %187 = vector.load %arg28[%c16_175, %c0_176] : memref<240x128xf32, #tpu.memory_space<vmem>>, vector<64x128xf32>
    %c1_177 = arith.constant 1 : index
    %c0_178 = arith.constant 0 : index
    %c0_179 = arith.constant 0 : index
    %188 = vector.load %arg19[%c1_177, %c0_178, %c0_179] : memref<8x128x256xf32, #tpu.memory_space<vmem>>, vector<1x128x256xf32>
    %189 = vector.shape_cast %188 : vector<1x128x256xf32> to vector<128x256xf32>
    %cst_180 = arith.constant dense<0.000000e+00> : vector<64x256xf32>
    %190 = tpu.matmul %187, %189, %cst_180 {dimension_numbers = #tpu.dot_dimension_numbers<[1], [0], [0], [1], [0, 0, 1, 1], [], []>} : vector<64x128xf32>, vector<128x256xf32>, vector<64x256xf32> -> vector<64x256xf32>
    %191 = arith.addf %186, %190 : vector<64x256xf32>
    %c32_181 = arith.constant 32 : index
    %c0_182 = arith.constant 0 : index
    %192 = vector.load %arg28[%c32_181, %c0_182] : memref<240x128xf32, #tpu.memory_space<vmem>>, vector<64x128xf32>
    %c2_183 = arith.constant 2 : index
    %c0_184 = arith.constant 0 : index
    %c0_185 = arith.constant 0 : index
    %193 = vector.load %arg19[%c2_183, %c0_184, %c0_185] : memref<8x128x256xf32, #tpu.memory_space<vmem>>, vector<1x128x256xf32>
    %194 = vector.shape_cast %193 : vector<1x128x256xf32> to vector<128x256xf32>
    %cst_186 = arith.constant dense<0.000000e+00> : vector<64x256xf32>
    %195 = tpu.matmul %192, %194, %cst_186 {dimension_numbers = #tpu.dot_dimension_numbers<[1], [0], [0], [1], [0, 0, 1, 1], [], []>} : vector<64x128xf32>, vector<128x256xf32>, vector<64x256xf32> -> vector<64x256xf32>
    %196 = arith.addf %191, %195 : vector<64x256xf32>
    %c48_187 = arith.constant 48 : index
    %c0_188 = arith.constant 0 : index
    %197 = vector.load %arg28[%c48_187, %c0_188] : memref<240x128xf32, #tpu.memory_space<vmem>>, vector<64x128xf32>
    %c3 = arith.constant 3 : index
    %c0_189 = arith.constant 0 : index
    %c0_190 = arith.constant 0 : index
    %198 = vector.load %arg19[%c3, %c0_189, %c0_190] : memref<8x128x256xf32, #tpu.memory_space<vmem>>, vector<1x128x256xf32>
    %199 = vector.shape_cast %198 : vector<1x128x256xf32> to vector<128x256xf32>
    %cst_191 = arith.constant dense<0.000000e+00> : vector<64x256xf32>
    %200 = tpu.matmul %197, %199, %cst_191 {dimension_numbers = #tpu.dot_dimension_numbers<[1], [0], [0], [1], [0, 0, 1, 1], [], []>} : vector<64x128xf32>, vector<128x256xf32>, vector<64x256xf32> -> vector<64x256xf32>
    %201 = arith.addf %196, %200 : vector<64x256xf32>
    %c64 = arith.constant 64 : index
    %c0_192 = arith.constant 0 : index
    %202 = vector.load %arg28[%c64, %c0_192] : memref<240x128xf32, #tpu.memory_space<vmem>>, vector<64x128xf32>
    %c4 = arith.constant 4 : index
    %c0_193 = arith.constant 0 : index
    %c0_194 = arith.constant 0 : index
    %203 = vector.load %arg19[%c4, %c0_193, %c0_194] : memref<8x128x256xf32, #tpu.memory_space<vmem>>, vector<1x128x256xf32>
    %204 = vector.shape_cast %203 : vector<1x128x256xf32> to vector<128x256xf32>
    %cst_195 = arith.constant dense<0.000000e+00> : vector<64x256xf32>
    %205 = tpu.matmul %202, %204, %cst_195 {dimension_numbers = #tpu.dot_dimension_numbers<[1], [0], [0], [1], [0, 0, 1, 1], [], []>} : vector<64x128xf32>, vector<128x256xf32>, vector<64x256xf32> -> vector<64x256xf32>
    %206 = arith.addf %201, %205 : vector<64x256xf32>
    %c80 = arith.constant 80 : index
    %c0_196 = arith.constant 0 : index
    %207 = vector.load %arg28[%c80, %c0_196] : memref<240x128xf32, #tpu.memory_space<vmem>>, vector<64x128xf32>
    %c5 = arith.constant 5 : index
    %c0_197 = arith.constant 0 : index
    %c0_198 = arith.constant 0 : index
    %208 = vector.load %arg19[%c5, %c0_197, %c0_198] : memref<8x128x256xf32, #tpu.memory_space<vmem>>, vector<1x128x256xf32>
    %209 = vector.shape_cast %208 : vector<1x128x256xf32> to vector<128x256xf32>
    %cst_199 = arith.constant dense<0.000000e+00> : vector<64x256xf32>
    %210 = tpu.matmul %207, %209, %cst_199 {dimension_numbers = #tpu.dot_dimension_numbers<[1], [0], [0], [1], [0, 0, 1, 1], [], []>} : vector<64x128xf32>, vector<128x256xf32>, vector<64x256xf32> -> vector<64x256xf32>
    %211 = arith.addf %206, %210 : vector<64x256xf32>
    %c96 = arith.constant 96 : index
    %c0_200 = arith.constant 0 : index
    %212 = vector.load %arg28[%c96, %c0_200] : memref<240x128xf32, #tpu.memory_space<vmem>>, vector<64x128xf32>
    %c6 = arith.constant 6 : index
    %c0_201 = arith.constant 0 : index
    %c0_202 = arith.constant 0 : index
    %213 = vector.load %arg19[%c6, %c0_201, %c0_202] : memref<8x128x256xf32, #tpu.memory_space<vmem>>, vector<1x128x256xf32>
    %214 = vector.shape_cast %213 : vector<1x128x256xf32> to vector<128x256xf32>
    %cst_203 = arith.constant dense<0.000000e+00> : vector<64x256xf32>
    %215 = tpu.matmul %212, %214, %cst_203 {dimension_numbers = #tpu.dot_dimension_numbers<[1], [0], [0], [1], [0, 0, 1, 1], [], []>} : vector<64x128xf32>, vector<128x256xf32>, vector<64x256xf32> -> vector<64x256xf32>
    %216 = arith.addf %211, %215 : vector<64x256xf32>
    %c112 = arith.constant 112 : index
    %c0_204 = arith.constant 0 : index
    %217 = vector.load %arg28[%c112, %c0_204] : memref<240x128xf32, #tpu.memory_space<vmem>>, vector<64x128xf32>
    %c7 = arith.constant 7 : index
    %c0_205 = arith.constant 0 : index
    %c0_206 = arith.constant 0 : index
    %218 = vector.load %arg19[%c7, %c0_205, %c0_206] : memref<8x128x256xf32, #tpu.memory_space<vmem>>, vector<1x128x256xf32>
    %219 = vector.shape_cast %218 : vector<1x128x256xf32> to vector<128x256xf32>
    %cst_207 = arith.constant dense<0.000000e+00> : vector<64x256xf32>
    %220 = tpu.matmul %217, %219, %cst_207 {dimension_numbers = #tpu.dot_dimension_numbers<[1], [0], [0], [1], [0, 0, 1, 1], [], []>} : vector<64x128xf32>, vector<128x256xf32>, vector<64x256xf32> -> vector<64x256xf32>
    %221 = arith.addf %216, %220 : vector<64x256xf32>
    %c0_208 = arith.constant 0 : index
    %c0_209 = arith.constant 0 : index
    %222 = vector.load %arg20[%c0_208, %c0_209] : memref<1x256xf32, #tpu.memory_space<vmem>>, vector<1x256xf32>
    %223 = vector.broadcast %222 : vector<1x256xf32> to vector<64x256xf32>
    %224 = arith.addf %221, %223 : vector<64x256xf32>
    %225 = vector.extract_strided_slice %224 {offsets = [0, 0], sizes = [64, 128], strides = [1, 1]} : vector<64x256xf32> to vector<64x128xf32>
    %226 = vector.extract_strided_slice %224 {offsets = [0, 128], sizes = [64, 128], strides = [1, 1]} : vector<64x256xf32> to vector<64x128xf32>
    %227 = arith.negf %226 : vector<64x128xf32>
    %228 = math.exp %227 : vector<64x128xf32>
    %cst_210 = arith.constant 1.000000e+00 : f32
    %229 = vector.broadcast %cst_210 : f32 to vector<64x128xf32>
    %230 = arith.addf %229, %228 : vector<64x128xf32>
    %231 = arith.divf %229, %230 : vector<64x128xf32>
    %232 = arith.mulf %225, %231 : vector<64x128xf32>
    %cst_211 = arith.constant 0.000000e+00 : f32
    %233 = vector.broadcast %cst_211 : f32 to vector<64x256xf32>
    %c64_212 = arith.constant 64 : index
    %c0_213 = arith.constant 0 : index
    %234 = vector.load %arg28[%c64_212, %c0_213] : memref<240x128xf32, #tpu.memory_space<vmem>>, vector<64x128xf32>
    %c0_214 = arith.constant 0 : index
    %c0_215 = arith.constant 0 : index
    %c0_216 = arith.constant 0 : index
    %235 = vector.load %arg19[%c0_214, %c0_215, %c0_216] : memref<8x128x256xf32, #tpu.memory_space<vmem>>, vector<1x128x256xf32>
    %236 = vector.shape_cast %235 : vector<1x128x256xf32> to vector<128x256xf32>
    %cst_217 = arith.constant dense<0.000000e+00> : vector<64x256xf32>
    %237 = tpu.matmul %234, %236, %cst_217 {dimension_numbers = #tpu.dot_dimension_numbers<[1], [0], [0], [1], [0, 0, 1, 1], [], []>} : vector<64x128xf32>, vector<128x256xf32>, vector<64x256xf32> -> vector<64x256xf32>
    %238 = arith.addf %233, %237 : vector<64x256xf32>
    %c80_218 = arith.constant 80 : index
    %c0_219 = arith.constant 0 : index
    %239 = vector.load %arg28[%c80_218, %c0_219] : memref<240x128xf32, #tpu.memory_space<vmem>>, vector<64x128xf32>
    %c1_220 = arith.constant 1 : index
    %c0_221 = arith.constant 0 : index
    %c0_222 = arith.constant 0 : index
    %240 = vector.load %arg19[%c1_220, %c0_221, %c0_222] : memref<8x128x256xf32, #tpu.memory_space<vmem>>, vector<1x128x256xf32>
    %241 = vector.shape_cast %240 : vector<1x128x256xf32> to vector<128x256xf32>
    %cst_223 = arith.constant dense<0.000000e+00> : vector<64x256xf32>
    %242 = tpu.matmul %239, %241, %cst_223 {dimension_numbers = #tpu.dot_dimension_numbers<[1], [0], [0], [1], [0, 0, 1, 1], [], []>} : vector<64x128xf32>, vector<128x256xf32>, vector<64x256xf32> -> vector<64x256xf32>
    %243 = arith.addf %238, %242 : vector<64x256xf32>
    %c96_224 = arith.constant 96 : index
    %c0_225 = arith.constant 0 : index
    %244 = vector.load %arg28[%c96_224, %c0_225] : memref<240x128xf32, #tpu.memory_space<vmem>>, vector<64x128xf32>
    %c2_226 = arith.constant 2 : index
    %c0_227 = arith.constant 0 : index
    %c0_228 = arith.constant 0 : index
    %245 = vector.load %arg19[%c2_226, %c0_227, %c0_228] : memref<8x128x256xf32, #tpu.memory_space<vmem>>, vector<1x128x256xf32>
    %246 = vector.shape_cast %245 : vector<1x128x256xf32> to vector<128x256xf32>
    %cst_229 = arith.constant dense<0.000000e+00> : vector<64x256xf32>
    %247 = tpu.matmul %244, %246, %cst_229 {dimension_numbers = #tpu.dot_dimension_numbers<[1], [0], [0], [1], [0, 0, 1, 1], [], []>} : vector<64x128xf32>, vector<128x256xf32>, vector<64x256xf32> -> vector<64x256xf32>
    %248 = arith.addf %243, %247 : vector<64x256xf32>
    %c112_230 = arith.constant 112 : index
    %c0_231 = arith.constant 0 : index
    %249 = vector.load %arg28[%c112_230, %c0_231] : memref<240x128xf32, #tpu.memory_space<vmem>>, vector<64x128xf32>
    %c3_232 = arith.constant 3 : index
    %c0_233 = arith.constant 0 : index
    %c0_234 = arith.constant 0 : index
    %250 = vector.load %arg19[%c3_232, %c0_233, %c0_234] : memref<8x128x256xf32, #tpu.memory_space<vmem>>, vector<1x128x256xf32>
    %251 = vector.shape_cast %250 : vector<1x128x256xf32> to vector<128x256xf32>
    %cst_235 = arith.constant dense<0.000000e+00> : vector<64x256xf32>
    %252 = tpu.matmul %249, %251, %cst_235 {dimension_numbers = #tpu.dot_dimension_numbers<[1], [0], [0], [1], [0, 0, 1, 1], [], []>} : vector<64x128xf32>, vector<128x256xf32>, vector<64x256xf32> -> vector<64x256xf32>
    %253 = arith.addf %248, %252 : vector<64x256xf32>
    %c128 = arith.constant 128 : index
    %c0_236 = arith.constant 0 : index
    %254 = vector.load %arg28[%c128, %c0_236] : memref<240x128xf32, #tpu.memory_space<vmem>>, vector<64x128xf32>
    %c4_237 = arith.constant 4 : index
    %c0_238 = arith.constant 0 : index
    %c0_239 = arith.constant 0 : index
    %255 = vector.load %arg19[%c4_237, %c0_238, %c0_239] : memref<8x128x256xf32, #tpu.memory_space<vmem>>, vector<1x128x256xf32>
    %256 = vector.shape_cast %255 : vector<1x128x256xf32> to vector<128x256xf32>
    %cst_240 = arith.constant dense<0.000000e+00> : vector<64x256xf32>
    %257 = tpu.matmul %254, %256, %cst_240 {dimension_numbers = #tpu.dot_dimension_numbers<[1], [0], [0], [1], [0, 0, 1, 1], [], []>} : vector<64x128xf32>, vector<128x256xf32>, vector<64x256xf32> -> vector<64x256xf32>
    %258 = arith.addf %253, %257 : vector<64x256xf32>
    %c144 = arith.constant 144 : index
    %c0_241 = arith.constant 0 : index
    %259 = vector.load %arg28[%c144, %c0_241] : memref<240x128xf32, #tpu.memory_space<vmem>>, vector<64x128xf32>
    %c5_242 = arith.constant 5 : index
    %c0_243 = arith.constant 0 : index
    %c0_244 = arith.constant 0 : index
    %260 = vector.load %arg19[%c5_242, %c0_243, %c0_244] : memref<8x128x256xf32, #tpu.memory_space<vmem>>, vector<1x128x256xf32>
    %261 = vector.shape_cast %260 : vector<1x128x256xf32> to vector<128x256xf32>
    %cst_245 = arith.constant dense<0.000000e+00> : vector<64x256xf32>
    %262 = tpu.matmul %259, %261, %cst_245 {dimension_numbers = #tpu.dot_dimension_numbers<[1], [0], [0], [1], [0, 0, 1, 1], [], []>} : vector<64x128xf32>, vector<128x256xf32>, vector<64x256xf32> -> vector<64x256xf32>
    %263 = arith.addf %258, %262 : vector<64x256xf32>
    %c160 = arith.constant 160 : index
    %c0_246 = arith.constant 0 : index
    %264 = vector.load %arg28[%c160, %c0_246] : memref<240x128xf32, #tpu.memory_space<vmem>>, vector<64x128xf32>
    %c6_247 = arith.constant 6 : index
    %c0_248 = arith.constant 0 : index
    %c0_249 = arith.constant 0 : index
    %265 = vector.load %arg19[%c6_247, %c0_248, %c0_249] : memref<8x128x256xf32, #tpu.memory_space<vmem>>, vector<1x128x256xf32>
    %266 = vector.shape_cast %265 : vector<1x128x256xf32> to vector<128x256xf32>
    %cst_250 = arith.constant dense<0.000000e+00> : vector<64x256xf32>
    %267 = tpu.matmul %264, %266, %cst_250 {dimension_numbers = #tpu.dot_dimension_numbers<[1], [0], [0], [1], [0, 0, 1, 1], [], []>} : vector<64x128xf32>, vector<128x256xf32>, vector<64x256xf32> -> vector<64x256xf32>
    %268 = arith.addf %263, %267 : vector<64x256xf32>
    %c176 = arith.constant 176 : index
    %c0_251 = arith.constant 0 : index
    %269 = vector.load %arg28[%c176, %c0_251] : memref<240x128xf32, #tpu.memory_space<vmem>>, vector<64x128xf32>
    %c7_252 = arith.constant 7 : index
    %c0_253 = arith.constant 0 : index
    %c0_254 = arith.constant 0 : index
    %270 = vector.load %arg19[%c7_252, %c0_253, %c0_254] : memref<8x128x256xf32, #tpu.memory_space<vmem>>, vector<1x128x256xf32>
    %271 = vector.shape_cast %270 : vector<1x128x256xf32> to vector<128x256xf32>
    %cst_255 = arith.constant dense<0.000000e+00> : vector<64x256xf32>
    %272 = tpu.matmul %269, %271, %cst_255 {dimension_numbers = #tpu.dot_dimension_numbers<[1], [0], [0], [1], [0, 0, 1, 1], [], []>} : vector<64x128xf32>, vector<128x256xf32>, vector<64x256xf32> -> vector<64x256xf32>
    %273 = arith.addf %268, %272 : vector<64x256xf32>
    %c0_256 = arith.constant 0 : index
    %c0_257 = arith.constant 0 : index
    %274 = vector.load %arg20[%c0_256, %c0_257] : memref<1x256xf32, #tpu.memory_space<vmem>>, vector<1x256xf32>
    %275 = vector.broadcast %274 : vector<1x256xf32> to vector<64x256xf32>
    %276 = arith.addf %273, %275 : vector<64x256xf32>
    %277 = vector.extract_strided_slice %276 {offsets = [0, 0], sizes = [64, 128], strides = [1, 1]} : vector<64x256xf32> to vector<64x128xf32>
    %278 = vector.extract_strided_slice %276 {offsets = [0, 128], sizes = [64, 128], strides = [1, 1]} : vector<64x256xf32> to vector<64x128xf32>
    %279 = arith.negf %278 : vector<64x128xf32>
    %280 = math.exp %279 : vector<64x128xf32>
    %cst_258 = arith.constant 1.000000e+00 : f32
    %281 = vector.broadcast %cst_258 : f32 to vector<64x128xf32>
    %282 = arith.addf %281, %280 : vector<64x128xf32>
    %283 = arith.divf %281, %282 : vector<64x128xf32>
    %284 = arith.mulf %277, %283 : vector<64x128xf32>
    %285 = tpu.concatenate %232, %284 in 0 : vector<64x128xf32>, vector<64x128xf32> -> vector<128x128xf32>
    %c0_259 = arith.constant 0 : index
    %c0_260 = arith.constant 0 : index
    %286 = vector.load %arg21[%c0_259, %c0_260] : memref<1x128xf32, #tpu.memory_space<vmem>>, vector<1x128xf32>
    %287 = vector.broadcast %286 : vector<1x128xf32> to vector<128x128xf32>
    %288 = arith.mulf %285, %287 : vector<128x128xf32>
    %c0_261 = arith.constant 0 : index
    %c0_262 = arith.constant 0 : index
    %289 = vector.load %arg22[%c0_261, %c0_262] : memref<1x128xf32, #tpu.memory_space<vmem>>, vector<1x128xf32>
    %290 = vector.broadcast %289 : vector<1x128xf32> to vector<128x128xf32>
    %291 = arith.addf %288, %290 : vector<128x128xf32>
    %c0_263 = arith.constant 0 : index
    %c0_264 = arith.constant 0 : index
    %c0_265 = arith.constant 0 : index
    %292 = vector.load %arg23[%c0_263, %c0_264, %c0_265] : memref<1x128x128xf32, #tpu.memory_space<vmem>>, vector<1x128x128xf32>
    %293 = vector.shape_cast %292 : vector<1x128x128xf32> to vector<128x128xf32>
    %cst_266 = arith.constant dense<0.000000e+00> : vector<128x128xf32>
    %294 = tpu.matmul %291, %293, %cst_266 {dimension_numbers = #tpu.dot_dimension_numbers<[1], [0], [0], [1], [0, 0, 1, 1], [], []>} : vector<128x128xf32>, vector<128x128xf32>, vector<128x128xf32> -> vector<128x128xf32>
    %c0_267 = arith.constant 0 : index
    %c0_268 = arith.constant 0 : index
    %295 = vector.load %arg24[%c0_267, %c0_268] : memref<1x128xf32, #tpu.memory_space<vmem>>, vector<1x128xf32>
    %296 = vector.broadcast %295 : vector<1x128xf32> to vector<128x128xf32>
    %297 = arith.addf %294, %296 : vector<128x128xf32>
    %298 = arith.negf %297 : vector<128x128xf32>
    %299 = math.exp %298 : vector<128x128xf32>
    %cst_269 = arith.constant 1.000000e+00 : f32
    %300 = vector.broadcast %cst_269 : f32 to vector<128x128xf32>
    %301 = arith.addf %300, %299 : vector<128x128xf32>
    %302 = arith.divf %300, %301 : vector<128x128xf32>
    %c0_270 = arith.constant 0 : index
    %c0_271 = arith.constant 0 : index
    %303 = vector.load %arg25[%c0_270, %c0_271] : memref<128x1xf32, #tpu.memory_space<vmem>>, vector<128x1xf32>
    %cst_272 = arith.constant dense<0.000000e+00> : vector<128x1xf32>
    %304 = tpu.matmul %302, %303, %cst_272 {dimension_numbers = #tpu.dot_dimension_numbers<[1], [0], [0], [1], [0, 0, 1, 1], [], []>} : vector<128x128xf32>, vector<128x1xf32>, vector<128x1xf32> -> vector<128x1xf32>
    %c0_273 = arith.constant 0 : index
    %c0_274 = arith.constant 0 : index
    %305 = vector.load %arg26[%c0_273, %c0_274] : memref<1x1xf32, #tpu.memory_space<vmem>>, vector<1x1xf32>
    %306 = vector.broadcast %305 : vector<1x1xf32> to vector<128x1xf32>
    %307 = arith.addf %304, %306 : vector<128x1xf32>
    %c0_275 = arith.constant 0 : index
    %c0_276 = arith.constant 0 : index
    %c0_277 = arith.constant 0 : index
    %308 = vector.load %arg27[%c0_275, %c0_276, %c0_277] : memref<1x128x1xf32, #tpu.memory_space<vmem>>, vector<1x128x1xf32>
    %309 = vector.shape_cast %308 : vector<1x128x1xf32> to vector<128x1xf32>
    %310 = vector.shape_cast %307 : vector<128x1xf32> to vector<1x128x1xf32>
    tpu.vector_store %arg27[%c0_275, %c0_276, %c0_277], %310 {strides = array<i32>} : memref<1x128x1xf32, #tpu.memory_space<vmem>>, vector<1x128x1xf32>,
    return
  }
  func.func @transform_0(%arg0: i32) -> (i32, i32, i32) {
    %c0_i32 = arith.constant 0 : i32
    %c0_i32_0 = arith.constant 0 : i32
    %c0_i32_1 = arith.constant 0 : i32
    return %arg0, %c0_i32, %c0_i32_0 : i32, i32, i32
  }
  func.func @transform_1(%arg0: i32) -> (i32, i32, i32) {
    %c0_i32 = arith.constant 0 : i32
    %c0_i32_0 = arith.constant 0 : i32
    %c0_i32_1 = arith.constant 0 : i32
    %c0_i32_2 = arith.constant 0 : i32
    return %c0_i32, %c0_i32_0, %c0_i32_1 : i32, i32, i32
  }
  func.func @transform_2(%arg0: i32) -> (i32, i32) {
    %c0_i32 = arith.constant 0 : i32
    %c0_i32_0 = arith.constant 0 : i32
    %c0_i32_1 = arith.constant 0 : i32
    return %c0_i32, %c0_i32_0 : i32, i32
  }
  func.func @transform_3(%arg0: i32) -> (i32, i32, i32) {
    %c0_i32 = arith.constant 0 : i32
    %c0_i32_0 = arith.constant 0 : i32
    %c0_i32_1 = arith.constant 0 : i32
    %c0_i32_2 = arith.constant 0 : i32
    return %c0_i32, %c0_i32_0, %c0_i32_1 : i32, i32, i32
  }
  func.func @transform_4(%arg0: i32) -> (i32, i32, i32) {
    %c0_i32 = arith.constant 0 : i32
    %c0_i32_0 = arith.constant 0 : i32
    %c0_i32_1 = arith.constant 0 : i32
    %c0_i32_2 = arith.constant 0 : i32
    return %c0_i32, %c0_i32_0, %c0_i32_1 : i32, i32, i32
  }
  func.func @transform_5(%arg0: i32) -> (i32, i32, i32) {
    %c0_i32 = arith.constant 0 : i32
    %c0_i32_0 = arith.constant 0 : i32
    %c0_i32_1 = arith.constant 0 : i32
    %c0_i32_2 = arith.constant 0 : i32
    return %c0_i32, %c0_i32_0, %c0_i32_1 : i32, i32, i32
  }
  func.func @transform_6(%arg0: i32) -> (i32, i32) {
    %c0_i32 = arith.constant 0 : i32
    %c0_i32_0 = arith.constant 0 : i32
    %c0_i32_1 = arith.constant 0 : i32
    return %c0_i32, %c0_i32_0 : i32, i32
  }
  func.func @transform_7(%arg0: i32) -> (i32, i32) {
    %c0_i32 = arith.constant 0 : i32
    %c0_i32_0 = arith.constant 0 : i32
    %c0_i32_1 = arith.constant 0 : i32
    return %c0_i32, %c0_i32_0 : i32, i32
  }
  func.func @transform_8(%arg0: i32) -> (i32, i32) {
    %c0_i32 = arith.constant 0 : i32
    %c0_i32_0 = arith.constant 0 : i32
    %c0_i32_1 = arith.constant 0 : i32
    return %c0_i32, %c0_i32_0 : i32, i32
  }
  func.func @transform_9(%arg0: i32) -> (i32, i32) {
    %c0_i32 = arith.constant 0 : i32
    %c0_i32_0 = arith.constant 0 : i32
    %c0_i32_1 = arith.constant 0 : i32
    return %c0_i32, %c0_i32_0 : i32, i32
  }
  func.func @transform_10(%arg0: i32) -> (i32, i32, i32) {
    %c0_i32 = arith.constant 0 : i32
    %c0_i32_0 = arith.constant 0 : i32
    %c0_i32_1 = arith.constant 0 : i32
    %c0_i32_2 = arith.constant 0 : i32
    return %c0_i32, %c0_i32_0, %c0_i32_1 : i32, i32, i32
  }
  func.func @transform_11(%arg0: i32) -> (i32, i32) {
    %c0_i32 = arith.constant 0 : i32
    %c0_i32_0 = arith.constant 0 : i32
    %c0_i32_1 = arith.constant 0 : i32
    return %c0_i32, %c0_i32_0 : i32, i32
  }
  func.func @transform_12(%arg0: i32) -> (i32, i32, i32) {
    %c0_i32 = arith.constant 0 : i32
    %c0_i32_0 = arith.constant 0 : i32
    %c0_i32_1 = arith.constant 0 : i32
    %c0_i32_2 = arith.constant 0 : i32
    return %c0_i32, %c0_i32_0, %c0_i32_1 : i32, i32, i32
  }
  func.func @transform_13(%arg0: i32) -> (i32, i32, i32) {
    %c0_i32 = arith.constant 0 : i32
    %c0_i32_0 = arith.constant 0 : i32
    %c0_i32_1 = arith.constant 0 : i32
    %c0_i32_2 = arith.constant 0 : i32
    return %c0_i32, %c0_i32_0, %c0_i32_1 : i32, i32, i32
  }
  func.func @transform_14(%arg0: i32) -> (i32, i32, i32) {
    %c0_i32 = arith.constant 0 : i32
    %c0_i32_0 = arith.constant 0 : i32
    %c0_i32_1 = arith.constant 0 : i32
    %c0_i32_2 = arith.constant 0 : i32
    return %c0_i32, %c0_i32_0, %c0_i32_1 : i32, i32, i32
  }
  func.func @transform_15(%arg0: i32) -> (i32, i32) {
    %c0_i32 = arith.constant 0 : i32
    %c0_i32_0 = arith.constant 0 : i32
    %c0_i32_1 = arith.constant 0 : i32
    return %c0_i32, %c0_i32_0 : i32, i32
  }
  func.func @transform_16(%arg0: i32) -> (i32, i32) {
    %c0_i32 = arith.constant 0 : i32
    %c0_i32_0 = arith.constant 0 : i32
    %c0_i32_1 = arith.constant 0 : i32
    return %c0_i32, %c0_i32_0 : i32, i32
  }
  func.func @transform_17(%arg0: i32) -> (i32, i32) {
    %c0_i32 = arith.constant 0 : i32
    %c0_i32_0 = arith.constant 0 : i32
    %c0_i32_1 = arith.constant 0 : i32
    return %c0_i32, %c0_i32_0 : i32, i32
  }
  func.func @transform_18(%arg0: i32) -> (i32, i32, i32) {
    %c0_i32 = arith.constant 0 : i32
    %c0_i32_0 = arith.constant 0 : i32
    %c0_i32_1 = arith.constant 0 : i32
    %c0_i32_2 = arith.constant 0 : i32
    return %c0_i32, %c0_i32_0, %c0_i32_1 : i32, i32, i32
  }
  func.func @transform_19(%arg0: i32) -> (i32, i32) {
    %c0_i32 = arith.constant 0 : i32
    %c0_i32_0 = arith.constant 0 : i32
    %c0_i32_1 = arith.constant 0 : i32
    return %c0_i32, %c0_i32_0 : i32, i32
  }
  func.func @transform_20(%arg0: i32) -> (i32, i32) {
    %c0_i32 = arith.constant 0 : i32
    %c0_i32_0 = arith.constant 0 : i32
    %c0_i32_1 = arith.constant 0 : i32
    return %c0_i32, %c0_i32_0 : i32, i32
  }
  func.func @transform_21(%arg0: i32) -> (i32, i32) {
    %c0_i32 = arith.constant 0 : i32
    %c0_i32_0 = arith.constant 0 : i32
    %c0_i32_1 = arith.constant 0 : i32
    return %c0_i32, %c0_i32_0 : i32, i32
  }
  func.func @transform_22(%arg0: i32) -> (i32, i32, i32) {
    %c0_i32 = arith.constant 0 : i32
    %c0_i32_0 = arith.constant 0 : i32
    %c0_i32_1 = arith.constant 0 : i32
    %c0_i32_2 = arith.constant 0 : i32
    return %c0_i32, %c0_i32_0, %c0_i32_1 : i32, i32, i32
  }
  func.func @transform_23(%arg0: i32) -> (i32, i32) {
    %c0_i32 = arith.constant 0 : i32
    %c0_i32_0 = arith.constant 0 : i32
    %c0_i32_1 = arith.constant 0 : i32
    return %c0_i32, %c0_i32_0 : i32, i32
  }
  func.func @transform_24(%arg0: i32) -> (i32, i32) {
    %c0_i32 = arith.constant 0 : i32
    %c0_i32_0 = arith.constant 0 : i32
    %c0_i32_1 = arith.constant 0 : i32
    return %c0_i32, %c0_i32_0 : i32, i32
  }
  func.func @transform_25(%arg0: i32) -> (i32, i32) {
    %c0_i32 = arith.constant 0 : i32
    %c0_i32_0 = arith.constant 0 : i32
    %c0_i32_1 = arith.constant 0 : i32
    return %c0_i32, %c0_i32_0 : i32, i32
  }
  func.func @transform_26(%arg0: i32) -> (i32, i32, i32) {
    %c0_i32 = arith.constant 0 : i32
    %c0_i32_0 = arith.constant 0 : i32
    %c0_i32_1 = arith.constant 0 : i32
    return %arg0, %c0_i32, %c0_i32_0 : i32, i32, i32
  }
}

</mosaic_0001>

<bundles_post_ra>
// kernel: model_fwd.1
= control target key start
LH: loop header
LB: loop body
LE: loop exit
PB: predicated region body
PF: predicated region fallthrough
CT: control target
= control target key end

     0   :  { %s16214_s0 = inlined_call_operand.vmem [shape: f32[2,128,1], index: 0, kind: input, shape index: {}]   ;;  %s16215_s1 = inlined_call_operand.hbm [shape: f32[3,16,32], index: 1, kind: input, shape index: {}]   ;;  %s16216_s2 = inlined_call_operand.hbm [shape: f32[1,32], index: 2, kind: input, shape index: {}]   ;;  %s16217_s3 = inlined_call_operand.vmem [shape: f32[3,128,128], index: 3, kind: input, shape index: {}]   ;;  %s16218_s4 = inlined_call_operand.vmem [shape: f32[3,128,1], index: 4, kind: input, shape index: {}]   ;;  %s16219_s5 = inlined_call_operand.hbm [shape: f32[3,32,32], index: 5, kind: input, shape index: {}]   ;;  %s16220_s6 = inlined_call_operand.hbm [shape: f32[1,32], index: 6, kind: input, shape index: {}]   ;;  %s16221_s7 = inlined_call_operand.hbm [shape: f32[1,32], index: 7, kind: input, shape index: {}]   ;;  %s16222_s8 = inlined_call_operand.hbm [shape: f32[1,32], index: 8, kind: input, shape index: {}]   ;;  %s16223_s9 = inlined_call_operand.vmem [shape: f32[32,16], index: 9, kind: input, shape index: {}]   ;;  %s16224_s10 = inlined_call_operand.hbm [shape: f32[3,16,32], index: 10, kind: input, shape index: {}]   ;;  %s16225_s11 = inlined_call_operand.hbm [shape: f32[1,32], index: 11, kind: input, shape index: {}]   ;;  %s16226_s12 = inlined_call_operand.vmem [shape: f32[3,128,128], index: 12, kind: input, shape index: {}]   ;;  %s16227_s13 = inlined_call_operand.vmem [shape: f32[3,128,1], index: 13, kind: input, shape index: {}]   ;;  %s16228_s14 = inlined_call_operand.vmem [shape: f32[3,128,128], index: 14, kind: input, shape index: {}]   ;;  %s16229_s15 = inlined_call_operand.hbm [shape: f32[1,128], index: 15, kind: input, shape index: {}]   ;;  %s16230_s16 = inlined_call_operand.hbm [shape: f32[1,128], index: 16, kind: input, shape index: {}]   ;;  %s16231_s17 = inlined_call_operand.hbm [shape: f32[1,128], index: 17, kind: input, shape index: {}]   ;;  %s16232_s18 = inlined_call_operand.hbm [shape: f32[8,128,256], index: 18, kind: input, shape index: {}]   ;;  %s16233_s19 = inlined_call_operand.vmem [shape: f32[1,256], index: 19, kind: input, shape index: {}]   ;;  %s16234_s20 = inlined_call_operand.vmem [shape: f32[1,128], index: 20, kind: input, shape index: {}]   ;;  %s16235_s21 = inlined_call_operand.vmem [shape: f32[1,128], index: 21, kind: input, shape index: {}]   ;;  %s16236_s22 = inlined_call_operand.vmem [shape: f32[1,128,128], index: 22, kind: input, shape index: {}]   ;;  %s16237_s23 = inlined_call_operand.vmem [shape: f32[1,128], index: 23, kind: input, shape index: {}]   ;;  %s16238_s24 = inlined_call_operand.vmem [shape: f32[128,1], index: 24, kind: input, shape index: {}]   ;;  %s16239_s25 = inlined_call_operand.<no memory space> [shape: f32[1,1], index: 25, kind: input, shape index: {}]   ;;  %s16240_s26 = inlined_call_operand.vmem [shape: f32[2,128,1], index: 26, kind: output, shape index: {}]  }
   0x1   :  { %16257 = sst [smem:[#allocation31_spill]] %s16214_s0  ;;  %v31_v0 = vstv %s16239_s25 }
   0x2   :  { %16258 = sst [smem:[#allocation32_spill]] %s16215_s1  ;;  %32 = vst [vmem:[#allocation3] sm:$0x1] %v31_v0 }
   0x3   :  { %16259 = sst [smem:[#allocation33_spill]] %s16216_s2 }
   0x4   :  { %16260 = sst [smem:[#allocation34_spill]] %s16217_s3 }
   0x5   :  { %16261 = sst [smem:[#allocation35_spill]] %s16218_s4 }
   0x6   :  { %16262 = sst [smem:[#allocation36_spill]] %s16219_s5 }
   0x7   :  { %16263 = sst [smem:[#allocation37_spill]] %s16220_s6 }
   0x8   :  { %16264 = sst [smem:[#allocation38_spill]] %s16221_s7 }
   0x9   :  { %16265 = sst [smem:[#allocation39_spill]] %s16222_s8 }
   0xa   :  { %16266 = sst [smem:[#allocation40_spill]] %s16223_s9 }
   0xb   :  { %16267 = sst [smem:[#allocation41_spill]] %s16224_s10 }
   0xc   :  { %16268 = sst [smem:[#allocation42_spill]] %s16225_s11 }
   0xd   :  { %16269 = sst [smem:[#allocation43_spill]] %s16230_s16 }
   0xe   :  { %16270 = sst [smem:[#allocation44_spill]] %s16233_s19 }
   0xf   :  { %16271 = sst [smem:[#allocation45_spill]] %s16234_s20 }
  0x10   :  { %16272 = sst [smem:[#allocation46_spill]] %s16235_s21 }
  0x11   :  { %16273 = sst [smem:[#allocation47_spill]] %s16237_s23 }
  0x12   :  { %16274 = sst [smem:[#allocation48_spill]] %s16240_s26 }
  0x13   :  { %33 = vsyncpa [#allocation5], 0 }
  0x14   :  { %34 = vsyncpa [#allocation7], 0 }
  0x15   :  { %35 = vsyncpa [#allocation10], 0 }
  0x16   :  { %36 = vsyncpa [#allocation13], 0 }
  0x17   :  { %37 = vsyncpa [#allocation16], 0 }
  0x18   :  { %38 = vsyncpa [#allocation19], 0 }
  0x19   :  { %39 = vsyncpa [#allocation22], 0  ;;  %s13170_s7 = smov 0  }
  0x1a LB: > { %16275 = sst [smem:[#allocation30_spill]] %s13011_s7  ;;  %s13013_s28 = smov [#allocation6]   ;;  %s13011_s7 = sphi %s13170_s7, %s45_s7  }
  0x1b   : > { %s653_s25 = sshll.u32 %s13013_s28, 4  ;;  %s13176_s8 = sadd.s32 4294967295, %s13011_s7   ;;  %s13181_s25 = int_to_ptr.vmem [resolvable:$true] %s653_s25 }
  0x1c   : > { %p9076_p0 = scmp.ge.s32.totalorder %s13011_s7, 1  ;;  %p627_p1 = scmp.lt.s32.totalorder %s13011_s7, 3 }
  0x1d   : > { %p16253_p2 = scmp.eq.s32.totalorder %s13176_s8, 0  ;;  %s13014_s29 = smov [#allocation9]  }
  0x1e   : > { %p13183_p3 = pnand %p9076_p0, %p627_p1  ;;  %s683_s0 = sshll.u32 %s13014_s29, 4  ;;  %s13189_s0 = int_to_ptr.vmem [resolvable:$true] %s683_s0 }
  0x1f   : > { %s13015_s9 = smov [#allocation12]   ;;  %s13016_s5 = smov [#allocation15]  }
  0x20   : > { %s16276_s4 = scalar_select %p13183_p3, 1, 0 }
  0x21   : > { %p12279_p4 = pneg %p13183_p3  ;;  %s705_s30 = sshll.u32 %s13015_s9, 4  ;;  %s13197_s30 = int_to_ptr.vmem [resolvable:$true] %s705_s30 }
  0x22   : > { %s732_s10 = sshll.u32 %s13016_s5, 4  ;;  %s16278_s27 = sld [smem:[#allocation33_spill]]  ;;  %s13199_s10 = int_to_ptr.vmem [resolvable:$true] %s732_s10 }
  0x23   : > { %p13193_p5 = pnand %p16253_p2, %p12279_p4 }
  0x25   : > { %p13209_p7 = pneg %p13193_p5 }
  0x28   : > { %s12641_s3 = scalar_lea.hbm %s16278_s27, 16 }
  0x29   : > { %p12642_p6 = scmp.ne.s32.totalorder %s16278_s27, %s12641_s3  ;;  %p12648_p10 = scmp.lt.u32.totalorder %s12641_s3, %s16278_s27 }
  0x2b   : > { %p12644_p8 = pnand %p13209_p7, %p12642_p6 }
  0x2d   : > { %p12645_p9 = pneg %p12644_p8 }
  0x2f   : > { %p12650_p11 = pnand %p12648_p10, %p12645_p9 }
  0x31   : > { %12653 = shalt.err (!%p12650_p11)
}
  0x32   : > { %s12654_s6 = scalar_lea.vmem %s13181_s25, 16  ;;  %s12661_s1 = scalar_lea.vmem %s13181_s25, 32 }
  0x33   : > { %p12655_p12 = scmp.ne.s32.totalorder %s13181_s25, %s12654_s6  ;;  %p12662_p1 = scmp.lt.s32.totalorder %s13181_s25, %s13181_s25 }
  0x34   : > { %p12663_p4 = scmp.lt.s32.totalorder %s12661_s1, %s12654_s6 }
  0x35   : > { %p12657_p13 = pnand %p12655_p12, %p13209_p7 }
  0x36   : > { %p12664_p6 = por %p12663_p4, %p12662_p1 }
  0x37   : > { %p12658_p0 = pneg %p12657_p13 }
  0x39   : > { %p12665_p8 = pnand %p12664_p6, %p12658_p0 }
  0x3b   : > { %12668 = shalt.err (!%p12665_p8)
}
  0x3c   : > { %12285 = dma.hbm_to_vmem [thread:$0]  (!%p13193_p5), %s16278_s27, 16, %s13181_s25, [#allocation7]  }
  0x3d   : > { %s16280_s5 = sld [smem:[#allocation37_spill]] }
  0x43   : > { %s12669_s26 = scalar_lea.hbm %s16280_s5, 16 }
  0x44   : > { %p12670_p9 = scmp.ne.s32.totalorder %s16280_s5, %s12669_s26  ;;  %p12676_p12 = scmp.lt.u32.totalorder %s12669_s26, %s16280_s5 }
  0x46   : > { %p12672_p10 = pnand %p12670_p9, %p13209_p7 }
  0x48   : > { %p12673_p11 = pneg %p12672_p10 }
  0x4a   : > { %p12678_p13 = pnand %p12676_p12, %p12673_p11 }
  0x4c   : > { %12681 = shalt.err (!%p12678_p13)
}
  0x4d   : > { %s12682_s25 = scalar_lea.vmem %s13189_s0, 16  ;;  %s12689_s21 = scalar_lea.vmem %s13189_s0, 32 }
  0x4e   : > { %p12683_p0 = scmp.ne.s32.totalorder %s13189_s0, %s12682_s25  ;;  %p12690_p6 = scmp.lt.s32.totalorder %s13189_s0, %s13189_s0 }
  0x4f   : > { %p12691_p8 = scmp.lt.s32.totalorder %s12689_s21, %s12682_s25 }
  0x50   : > { %p12685_p1 = pnand %p12683_p0, %p13209_p7 }
  0x51   : > { %p12692_p9 = por %p12691_p8, %p12690_p6 }
  0x52   : > { %p12686_p4 = pneg %p12685_p1 }
  0x54   : > { %p12693_p10 = pnand %p12692_p9, %p12686_p4 }
  0x56   : > { %12696 = shalt.err (!%p12693_p10)
}
  0x57   : > { %12291 = dma.hbm_to_vmem [thread:$0]  (!%p13193_p5), %s16280_s5, 16, %s13189_s0, [#allocation10]  }
  0x58   : > { %s16281_s28 = sld [smem:[#allocation39_spill]] }
  0x5e   : > { %s12697_s29 = scalar_lea.hbm %s16281_s28, 16 }
  0x5f   : > { %p12698_p11 = scmp.ne.s32.totalorder %s16281_s28, %s12697_s29  ;;  %p12704_p0 = scmp.lt.u32.totalorder %s12697_s29, %s16281_s28 }
  0x61   : > { %p12700_p12 = pnand %p12698_p11, %p13209_p7 }
  0x63   : > { %p12701_p13 = pneg %p12700_p12 }
  0x65   : > { %p12706_p1 = pnand %p12704_p0, %p12701_p13 }
  0x67   : > { %12709 = shalt.err (!%p12706_p1)
}
  0x68   : > { %s12710_s0 = scalar_lea.vmem %s13197_s30, 16  ;;  %s12717_s23 = scalar_lea.vmem %s13197_s30, 32 }
  0x69   : > { %p12711_p4 = scmp.ne.s32.totalorder %s13197_s30, %s12710_s0  ;;  %p12718_p9 = scmp.lt.s32.totalorder %s13197_s30, %s13197_s30 }
  0x6a   : > { %p12719_p10 = scmp.lt.s32.totalorder %s12717_s23, %s12710_s0 }
  0x6b   : > { %p12713_p6 = pnand %p12711_p4, %p13209_p7 }
  0x6c   : > { %p12720_p11 = por %p12719_p10, %p12718_p9 }
  0x6d   : > { %p12714_p8 = pneg %p12713_p6 }
  0x6f   : > { %p12721_p12 = pnand %p12720_p11, %p12714_p8 }
  0x71   : > { %12724 = shalt.err (!%p12721_p12)
}
  0x72   : > { %12297 = dma.hbm_to_vmem [thread:$0]  (!%p13193_p5), %s16281_s28, 16, %s13197_s30, [#allocation13]  }
  0x73   : > { %s16282_s11 = sld [smem:[#allocation42_spill]] }
  0x79   : > { %s12725_s6 = scalar_lea.hbm %s16282_s11, 16 }
  0x7a   : > { %p12726_p13 = scmp.ne.s32.totalorder %s16282_s11, %s12725_s6  ;;  %p12732_p4 = scmp.lt.u32.totalorder %s12725_s6, %s16282_s11 }
  0x7c   : > { %p12728_p0 = pnand %p12726_p13, %p13209_p7 }
  0x7e   : > { %p12729_p1 = pneg %p12728_p0 }
  0x80   : > { %p12734_p6 = pnand %p12732_p4, %p12729_p1 }
  0x82   : > { %12737 = shalt.err (!%p12734_p6)
}
  0x83   : > { %s12738_s30 = scalar_lea.vmem %s13199_s10, 16  ;;  %s12745_s23 = scalar_lea.vmem %s13199_s10, 32 }
  0x84   : > { %p12739_p8 = scmp.ne.s32.totalorder %s13199_s10, %s12738_s30  ;;  %p12746_p11 = scmp.lt.s32.totalorder %s13199_s10, %s13199_s10 }
  0x85   : > { %p12747_p12 = scmp.lt.s32.totalorder %s12745_s23, %s12738_s30 }
  0x86   : > { %p12741_p9 = pnand %p12739_p8, %p13209_p7 }
  0x87   : > { %p12748_p13 = por %p12747_p12, %p12746_p11 }
  0x88   : > { %p12742_p10 = pneg %p12741_p9 }
  0x8a   : > { %p12749_p0 = pnand %p12748_p13, %p12742_p10 }
  0x8c   : > { %12752 = shalt.err (!%p12749_p0)
}
  0x8d   : > { %12303 = dma.hbm_to_vmem [thread:$0]  (!%p13193_p5), %s16282_s11, 16, %s13199_s10, [#allocation16]  }
  0x8e   : > { %s13017_s3 = smov [#allocation18]   ;;  %s13018_s6 = smov [#allocation4]  }
  0x8f   : > { %s763_s29 = sshll.u32 %s13017_s3, 4  ;;  %s639_s1 = sshll.u32 %s13018_s6, 4  ;;  %s764_s29 = int_to_ptr.vmem [resolvable:$true] %s763_s29  ;;  %s640_s1 = int_to_ptr.vmem [resolvable:$true] %s639_s1 }
  0x90   : > { %s16283_s16 = sld [smem:[#allocation43_spill]] }
  0x96   : > { %s12753_s0 = scalar_lea.hbm %s16283_s16, 16 }
  0x97   : > { %p12754_p1 = scmp.ne.s32.totalorder %s16283_s16, %s12753_s0  ;;  %p12760_p8 = scmp.lt.u32.totalorder %s12753_s0, %s16283_s16 }
  0x99   : > { %p12756_p4 = pnand %p12754_p1, %p13209_p7 }
  0x9b   : > { %p12757_p6 = pneg %p12756_p4 }
  0x9d   : > { %p12762_p9 = pnand %p12760_p8, %p12757_p6 }
  0x9f   : > { %12765 = shalt.err (!%p12762_p9)
}
  0xa0   : > { %s12766_s10 = scalar_lea.vmem %s764_s29, 16  ;;  %s12773_s7 = scalar_lea.vmem %s764_s29, 32 }
  0xa1   : > { %p12767_p10 = scmp.ne.s32.totalorder %s764_s29, %s12766_s10  ;;  %p12774_p13 = scmp.lt.s32.totalorder %s764_s29, %s764_s29 }
  0xa2   : > { %p12775_p0 = scmp.lt.s32.totalorder %s12773_s7, %s12766_s10 }
  0xa3   : > { %p12769_p11 = pnand %p12767_p10, %p13209_p7 }
  0xa4   : > { %p12776_p2 = por %p12775_p0, %p12774_p13 }
  0xa5   : > { %p12770_p12 = pneg %p12769_p11 }
  0xa7   : > { %p12777_p3 = pnand %p12776_p2, %p12770_p12 }
  0xa9   : > { %12780 = shalt.err (!%p12777_p3)
}
  0xaa   : > { %12309 = dma.hbm_to_vmem [thread:$0]  (!%p13193_p5), %s16283_s16, 16, %s764_s29, [#allocation19]  }
  0xab   : > { %s16284_s21 = sld [smem:[#allocation32_spill]] }
  0xb1   : > { %s12781_s0 = scalar_lea.hbm %s16284_s21, 768 }
  0xb2   : > { %p12782_p1 = scmp.ne.s32.totalorder %s16284_s21, %s12781_s0  ;;  %p12788_p3 = scmp.lt.u32.totalorder %s12781_s0, %s16284_s21 }
  0xb4   : > { %p12784_p4 = pnand %p12782_p1, %p13209_p7 }
  0xb6   : > { %p12785_p2 = pneg %p12784_p4 }
  0xb8   : > { %p12790_p6 = pnand %p12788_p3, %p12785_p2 }
  0xba   : > { %12793 = shalt.err (!%p12790_p6)
}
  0xbb   : > { %s12794_s7 = scalar_lea.vmem %s640_s1, 768  ;;  %p12802_p11 = scmp.lt.s32.totalorder %s640_s1, %s640_s1 }
  0xbc   : > { %p12795_p8 = scmp.ne.s32.totalorder %s640_s1, %s12794_s7  ;;  %p12803_p12 = scmp.lt.s32.totalorder %s12794_s7, %s12794_s7 }
  0xbe   : > { %p12797_p9 = pnand %p12795_p8, %p13209_p7  ;;  %p12804_p13 = por %p12803_p12, %p12802_p11 }
  0xc0   : > { %p12798_p10 = pneg %p12797_p9 }
  0xc2   : > { %p12805_p0 = pnand %p12804_p13, %p12798_p10 }
  0xc4   : > { %12808 = shalt.err (!%p12805_p0)
}
  0xc5   : > { %s13019_s29 = smov 128   ;;  %s13020_s3 = smov 8  }
  0xc6   : > { %12282 = dma.hbm_to_vmem [thread:$0]  (!%p13193_p5), %s16284_s21, 768, %s640_s1, [#allocation5], %s13019_s29, %s13019_s29, %s13020_s3  }
  0xc7   : > { %s13021_s25 = smov [#allocation8]   ;;  %s13022_s30 = smov [#allocation11]  }
  0xc8   : > { %s669_s0 = sshll.u32 %s13021_s25, 4  ;;  %s694_s23 = sshll.u32 %s13022_s30, 4  ;;  %s670_s0 = int_to_ptr.vmem [resolvable:$true] %s669_s0  ;;  %s695_s23 = int_to_ptr.vmem [resolvable:$true] %s694_s23 }
  0xc9   : > { %s16285_s7 = sld [smem:[#allocation36_spill]] }
  0xcf   : > { %s16286_s11 = smov %s16285_s7  ;;  %s12809_s16 = scalar_lea.hbm %s16285_s7, 1536 }
  0xd0   : > { %p12810_p1 = scmp.ne.s32.totalorder %s16286_s11, %s12809_s16  ;;  %p12816_p3 = scmp.lt.u32.totalorder %s12809_s16, %s16286_s11 }
  0xd2   : > { %p12812_p4 = pnand %p12810_p1, %p13209_p7 }
  0xd4   : > { %p12813_p2 = pneg %p12812_p4 }
  0xd6   : > { %p12818_p6 = pnand %p12816_p3, %p12813_p2 }
  0xd8   : > { %12821 = shalt.err (!%p12818_p6)
}
  0xd9   : > { %s12822_s1 = scalar_lea.vmem %s670_s0, 1536  ;;  %p12830_p11 = scmp.lt.s32.totalorder %s670_s0, %s670_s0 }
  0xda   : > { %p12823_p8 = scmp.ne.s32.totalorder %s670_s0, %s12822_s1  ;;  %p12831_p12 = scmp.lt.s32.totalorder %s12822_s1, %s12822_s1 }
  0xdc   : > { %p12825_p9 = pnand %p12823_p8, %p13209_p7  ;;  %p12832_p13 = por %p12831_p12, %p12830_p11 }
  0xde   : > { %p12826_p10 = pneg %p12825_p9 }
  0xe0   : > { %p12833_p0 = pnand %p12832_p13, %p12826_p10 }
  0xe2   : > { %12836 = shalt.err (!%p12833_p0)
}
  0xe3   : > { %12288 = dma.hbm_to_vmem [thread:$0]  (!%p13193_p5), %s16286_s11, 1536, %s670_s0, [#allocation7], %s13019_s29, %s13019_s29, %s13020_s3  }
  0xe4   : > { %s16287_s28 = sld [smem:[#allocation38_spill]] }
  0xea   : > { %s12837_s6 = scalar_lea.hbm %s16287_s28, 16 }
  0xeb   : > { %p12838_p1 = scmp.ne.s32.totalorder %s16287_s28, %s12837_s6  ;;  %p12844_p3 = scmp.lt.u32.totalorder %s12837_s6, %s16287_s28 }
  0xed   : > { %p12840_p4 = pnand %p12838_p1, %p13209_p7 }
  0xef   : > { %p12841_p2 = pneg %p12840_p4 }
  0xf1   : > { %p12846_p6 = pnand %p12844_p3, %p12841_p2 }
  0xf3   : > { %12849 = shalt.err (!%p12846_p6)
}
  0xf4   : > { %s12850_s10 = scalar_lea.vmem %s695_s23, 16  ;;  %s12857_s0 = scalar_lea.vmem %s695_s23, 32 }
  0xf5   : > { %p12851_p8 = scmp.ne.s32.totalorder %s695_s23, %s12850_s10  ;;  %p12858_p11 = scmp.lt.s32.totalorder %s695_s23, %s695_s23 }
  0xf6   : > { %p12859_p12 = scmp.lt.s32.totalorder %s12857_s0, %s12850_s10 }
  0xf7   : > { %p12853_p9 = pnand %p12851_p8, %p13209_p7 }
  0xf8   : > { %p12860_p13 = por %p12859_p12, %p12858_p11 }
  0xf9   : > { %p12854_p10 = pneg %p12853_p9 }
  0xfb   : > { %p12861_p0 = pnand %p12860_p13, %p12854_p10 }
  0xfd   : > { %12864 = shalt.err (!%p12861_p0)
}
  0xfe   : > { %12294 = dma.hbm_to_vmem [thread:$0]  (!%p13193_p5), %s16287_s28, 16, %s695_s23, [#allocation10]  }
  0xff   : > { %s13023_s19 = smov [#allocation14]   ;;  %s13024_s20 = smov [#allocation17]  }
 0x100   : > { %s718_s16 = sshll.u32 %s13023_s19, 4  ;;  %s752_s27 = sshll.u32 %s13024_s20, 4  ;;  %s719_s16 = int_to_ptr.vmem [resolvable:$true] %s718_s16  ;;  %s753_s27 = int_to_ptr.vmem [resolvable:$true] %s752_s27 }
 0x101   : > { %s16288_s25 = sld [smem:[#allocation41_spill]] }
 0x107   : > { %s12865_s30 = scalar_lea.hbm %s16288_s25, 768 }
 0x108   : > { %p12866_p1 = scmp.ne.s32.totalorder %s16288_s25, %s12865_s30  ;;  %p12872_p3 = scmp.lt.u32.totalorder %s12865_s30, %s16288_s25 }
 0x10a   : > { %p12868_p4 = pnand %p12866_p1, %p13209_p7 }
 0x10c   : > { %p12869_p2 = pneg %p12868_p4 }
 0x10e   : > { %p12874_p6 = pnand %p12872_p3, %p12869_p2 }
 0x110   : > { %12877 = shalt.err (!%p12874_p6)
}
 0x111   : > { %s12878_s23 = scalar_lea.vmem %s719_s16, 768  ;;  %p12886_p11 = scmp.lt.s32.totalorder %s719_s16, %s719_s16 }
 0x112   : > { %p12879_p8 = scmp.ne.s32.totalorder %s719_s16, %s12878_s23  ;;  %p12887_p12 = scmp.lt.s32.totalorder %s12878_s23, %s12878_s23 }
 0x114   : > { %p12881_p9 = pnand %p12879_p8, %p13209_p7  ;;  %p12888_p13 = por %p12887_p12, %p12886_p11 }
 0x116   : > { %p12882_p10 = pneg %p12881_p9 }
 0x118   : > { %p12889_p0 = pnand %p12888_p13, %p12882_p10 }
 0x11a   : > { %12892 = shalt.err (!%p12889_p0)
}
 0x11b   : > { %12300 = dma.hbm_to_vmem [thread:$0]  (!%p13193_p5), %s16288_s25, 768, %s719_s16, [#allocation13], %s13019_s29, %s13019_s29, %s13020_s3  }
 0x11c   : > { %s12893_s5 = scalar_lea.hbm %s16229_s15, 16 }
 0x11d   : > { %p12894_p1 = scmp.ne.s32.totalorder %s16229_s15, %s12893_s5  ;;  %p12900_p3 = scmp.lt.u32.totalorder %s12893_s5, %s16229_s15 }
 0x11f   : > { %p12896_p4 = pnand %p12894_p1, %p13209_p7 }
 0x121   : > { %p12897_p2 = pneg %p12896_p4 }
 0x123   : > { %p12902_p6 = pnand %p12900_p3, %p12897_p2 }
 0x125   : > { %12905 = shalt.err (!%p12902_p6)
}
 0x126   : > { %s12906_s7 = scalar_lea.vmem %s753_s27, 16  ;;  %s12913_s29 = scalar_lea.vmem %s753_s27, 32 }
 0x127   : > { %p12907_p8 = scmp.ne.s32.totalorder %s753_s27, %s12906_s7  ;;  %p12914_p11 = scmp.lt.s32.totalorder %s753_s27, %s753_s27 }
 0x128   : > { %p12915_p12 = scmp.lt.s32.totalorder %s12913_s29, %s12906_s7 }
 0x129   : > { %p12909_p9 = pnand %p12907_p8, %p13209_p7 }
 0x12a   : > { %p12916_p13 = por %p12915_p12, %p12914_p11 }
 0x12b   : > { %p12910_p10 = pneg %p12909_p9 }
 0x12d   : > { %p12917_p0 = pnand %p12916_p13, %p12910_p10 }
 0x12f   : > { %12920 = shalt.err (!%p12917_p0)
}
 0x130   : > { %12306 = dma.hbm_to_vmem [thread:$0]  (!%p13193_p5), %s16229_s15, 16, %s753_s27, [#allocation16]  }
 0x131   : > { %s13025_s23 = smov [#allocation20]   ;;  %s13026_s19 = smov [#allocation21]  }
 0x132   : > { %s774_s1 = sshll.u32 %s13025_s23, 4  ;;  %s784_s20 = sshll.u32 %s13026_s19, 4  ;;  %s775_s1 = int_to_ptr.vmem [resolvable:$true] %s774_s1  ;;  %s785_s20 = int_to_ptr.vmem [resolvable:$true] %s784_s20 }
 0x133   : > { %s12921_s30 = scalar_lea.hbm %s16231_s17, 16 }
 0x134   : > { %p12922_p1 = scmp.ne.s32.totalorder %s16231_s17, %s12921_s30  ;;  %p12928_p3 = scmp.lt.u32.totalorder %s12921_s30, %s16231_s17 }
 0x136   : > { %p12924_p4 = pnand %p12922_p1, %p13209_p7 }
 0x138   : > { %p12925_p2 = pneg %p12924_p4 }
 0x13a   : > { %p12930_p6 = pnand %p12928_p3, %p12925_p2 }
 0x13c   : > { %12933 = shalt.err (!%p12930_p6)
}
 0x13d   : > { %s12934_s27 = scalar_lea.vmem %s775_s1, 16  ;;  %s12941_s29 = scalar_lea.vmem %s775_s1, 32 }
 0x13e   : > { %p12935_p8 = scmp.ne.s32.totalorder %s775_s1, %s12934_s27  ;;  %p12942_p11 = scmp.lt.s32.totalorder %s775_s1, %s775_s1 }
 0x13f   : > { %p12943_p12 = scmp.lt.s32.totalorder %s12941_s29, %s12934_s27 }
 0x140   : > { %p12937_p9 = pnand %p12935_p8, %p13209_p7 }
 0x141   : > { %p12944_p13 = por %p12943_p12, %p12942_p11 }
 0x142   : > { %p12938_p10 = pneg %p12937_p9 }
 0x144   : > { %p12945_p0 = pnand %p12944_p13, %p12938_p10 }
 0x146   : > { %12948 = shalt.err (!%p12945_p0)
}
 0x147   : > { %12312 = dma.hbm_to_vmem [thread:$0]  (!%p13193_p5), %s16231_s17, 16, %s775_s1, [#allocation19]  }
 0x148   : > { %s12949_s6 = scalar_lea.hbm %s16232_s18, 32768 }
 0x149   : > { %p12950_p1 = scmp.ne.s32.totalorder %s16232_s18, %s12949_s6  ;;  %p12956_p3 = scmp.lt.u32.totalorder %s12949_s6, %s16232_s18 }
 0x14b   : > { %p12952_p4 = pnand %p12950_p1, %p13209_p7 }
 0x14d   : > { %p12953_p2 = pneg %p12952_p4 }
 0x14f   : > { %p12958_p6 = pnand %p12956_p3, %p12953_p2 }
 0x151   : > { %12961 = shalt.err (!%p12958_p6)
}
 0x152   : > { %s12962_s0 = scalar_lea.vmem %s785_s20, 32768  ;;  %p12970_p11 = scmp.lt.s32.totalorder %s785_s20, %s785_s20 }
 0x153   : > { %p12963_p8 = scmp.ne.s32.totalorder %s785_s20, %s12962_s0  ;;  %p12971_p12 = scmp.lt.s32.totalorder %s12962_s0, %s12962_s0 }
 0x155   : > { %p12965_p9 = pnand %p12963_p8, %p13209_p7  ;;  %p12972_p13 = por %p12971_p12, %p12970_p11 }
 0x157   : > { %p12966_p10 = pneg %p12965_p9 }
 0x159   : > { %p12973_p0 = pnand %p12972_p13, %p12966_p10 }
 0x15b   : > { %12976 = shalt.err (!%p12973_p0)
}
 0x15c   : > { %s13027_s1 = smov 256   ;;  %s13028_s7 = smov 16  }
 0x15d   : > { %12315 = dma.hbm_to_vmem [thread:$0]  (!%p13193_p5), %s16232_s18, 32768, %s785_s20, [#allocation22], %s13027_s1, %s13027_s1, %s13028_s7  }
 0x15e   : > { %p16289_p1 = scmp.ne.s32.totalorder %s16276_s4, 0 }
 0x15f   : > { %p16290_p4 = scmp.eq.s32.totalorder (!%p16289_p1), %s13176_s8, 0 }
 0x160   : > { %829 = sbr.rel (%p16289_p1) target bundleno = 4532 (0x11b4), region = 124 }
 0x167   : > { %12982 = dma.done.wait (%p16290_p4), [#allocation5], 768   ;;  %p16291_p7 = pmov %p16290_p4 }
 0x168   : > { %p16292_p2 = pmov %p16290_p4 }
 0x169   : > { %12984 = vsyncadd (%p16291_p7), [#allocation5], 4294966528 }
 0x16a   : > { %12986 = dma.done.wait (%p16292_p2), [#allocation7], 1552   ;;  %p16293_p3 = pmov %p16292_p2 }
 0x16b   : > { %p16294_p6 = pmov %p16292_p2 }
 0x16c   : > { %12988 = vsyncadd (%p16293_p3), [#allocation7], 4294965744 }
 0x16d   : > { %12990 = dma.done.wait (%p16294_p6), [#allocation10], 32   ;;  %p16295_p5 = pmov %p16292_p2 }
 0x16e   : > { %p16296_p8 = pmov %p16292_p2 }
 0x16f   : > { %12992 = vsyncadd (%p16295_p5), [#allocation10], 4294967264 }
 0x170   : > { %12994 = dma.done.wait (%p16296_p8), [#allocation13], 784   ;;  %p16297_p9 = pmov %p16292_p2 }
 0x171   : > { %p16298_p10 = pmov %p16292_p2 }
 0x172   : > { %12996 = vsyncadd (%p16297_p9), [#allocation13], 4294966512 }
 0x173   : > { %12998 = dma.done.wait (%p16298_p10), [#allocation16], 32   ;;  %p16299_p11 = pmov %p16292_p2 }
 0x174   : > { %p16300_p12 = pmov %p16292_p2 }
 0x175   : > { %13000 = vsyncadd (%p16299_p11), [#allocation16], 4294967264 }
 0x176   : > { %13002 = dma.done.wait (%p16300_p12), [#allocation19], 32   ;;  %p16301_p13 = pmov %p16292_p2 }
 0x177   : > { %p16302_p0 = pmov %p16292_p2 }
 0x178   : > { %13004 = vsyncadd (%p16301_p13), [#allocation19], 4294967264 }
 0x179   : > { %13006 = dma.done.wait (%p16302_p0), [#allocation22], 32768   ;;  %p16303_p1 = pmov %p16302_p0 }
 0x17a   : > { %p943_p4 = scmp.lt.s32.totalorder %s13176_s8, 1  ;;  %vm969_vm0 = vcmask 130048   ;;  %v13029_v1 = vmov 0.0   ;;  %s16304_s20 = sld [smem:[#allocation31_spill]]  ;;  %vm990_vm1 = vcmask 7168   ;;  %v1028_v2 = vld [vmem:[#allocation4 + $0x10] sm:$0xff] }
 0x17b   : > { %13008 = vsyncadd (%p16303_p1), [#allocation22], 4294934528  ;;  %972 = vst.msk [vmem:[#allocation2 + $0x10] sm:$0xff] %vm969_vm0, %v13029_v1  ;;  %v1029_v3 = vld [vmem:[#allocation4 + $0x18] sm:$0xff]  ;;  %v1023_v7 = vld [vmem:[#allocation4] sm:$0xff]  ;;  %vm2624_vm2 = vcmask 261120  }
 0x17c   : > { %970 = vst.msk [vmem:[#allocation2] sm:$0xff] %vm969_vm0, %v13029_v1  ;;  %971 = vst.msk [vmem:[#allocation2 + $0x8] sm:$0xff] %vm969_vm0, %v13029_v1  ;;  %s16315_s8 = smov (!%p943_p4, %s13176_s8), 1  ;;  %v10959_v5 = vpack.c.bf16 %v1029_v3, %v1028_v2  ;;  %v1024_v8 = vld [vmem:[#allocation4 + $0x8] sm:$0xff]  ;;  %v1391_v26 = vld [vmem:[#allocation4 + $0x20] sm:$0xff]  ;;  %s13030_s16 = smov 112  }
 0x17d   : > { %973 = vst.msk [vmem:[#allocation2 + $0x18] sm:$0xff] %vm969_vm0, %v13029_v1  ;;  %974 = vst.msk [vmem:[#allocation2 + $0x20] sm:$0xff] %vm969_vm0, %v13029_v1  ;;  %s9505_s4 = sshll.u32 %s16315_s8, 7  ;;  %v10963_v9 = vpack.c.bf16 %v1024_v8, %v1023_v7  ;;  %v1392_v27 = vld [vmem:[#allocation4 + $0x28] sm:$0xff]  ;;  %v13670_v47 = vld [vmem:[#allocation6] ss:$0 sm:$0xff] }
 0x17e   : > { %975 = vst.msk [vmem:[#allocation2 + $0x28] sm:$0xff] %vm969_vm0, %v13029_v1  ;;  %976 = vst.msk [vmem:[#allocation2 + $0x30] sm:$0xff] %vm969_vm0, %v13029_v1  ;;  %10960 = vmatprep.subr.bf16.mxu0 %v10959_v5  ;;  %v10967_v29 = vpack.c.bf16 %v1392_v27, %v1391_v26  ;;  %s16305_s6 = sld [smem:[#allocation34_spill]]  ;;  %s16306_s26 = sld [smem:[#allocation35_spill]] }
 0x17f   : > { %977 = vst.msk [vmem:[#allocation2 + $0x38] sm:$0xff] %vm969_vm0, %v13029_v1  ;;  %978 = vst.msk [vmem:[#allocation2 + $0x40] sm:$0xff] %vm969_vm0, %v13029_v1  ;;  %10962 = vmatpush3.bf16.msra.mxu0 %v10959_v5  ;;  %s16308_s29 = sld [smem:[#allocation44_spill]]  ;;  %s16311_s10 = sld [smem:[#allocation47_spill]] }
 0x180   : > { %979 = vst.msk [vmem:[#allocation2 + $0x48] sm:$0xff] %vm969_vm0, %v13029_v1  ;;  %980 = vst.msk [vmem:[#allocation2 + $0x50] sm:$0xff] %vm969_vm0, %v13029_v1  ;;  %s13539_s3 = scalar_lea.vmem %s16304_s20, %s9505_s4  ;;  %10964 = vmatprep.subr.bf16.mxu0 %v10963_v9  ;;  %s16307_s20 = sld [smem:[#allocation40_spill]] }
 0x181   : > { %981 = vst.msk [vmem:[#allocation2 + $0x58] sm:$0xff] %vm969_vm0, %v13029_v1  ;;  %982 = vst.msk [vmem:[#allocation2 + $0x60] sm:$0xff] %vm969_vm0, %v13029_v1  ;;  %v953_v4 = vld [vmem:[%s13539_s3] sm:$0xff]  ;;  %v954_v6 = vld [vmem:[%s13539_s3 + $0x8] sm:$0xff]  ;;  %s16312_s7 = sld [smem:[#allocation48_spill]] }
 0x182   : > { %983 = vst.msk [vmem:[#allocation2 + $0x68] sm:$0xff] %vm969_vm0, %v13029_v1  ;;  %984 = vst.msk [vmem:[#allocation2 + $0x70] sm:$0xff] %vm969_vm0, %v13029_v1  ;;  %v955_v10 = vld [vmem:[%s13539_s3 + $0x10] sm:$0xff]  ;;  %v956_v11 = vld [vmem:[%s13539_s3 + $0x18] sm:$0xff] }
 0x183   : > { %985 = vst.msk [vmem:[#allocation2 + $0x78] sm:$0xff] %vm969_vm0, %v13029_v1  ;;  %986 = vst.msk [vmem:[#allocation2 + $0x80] sm:$0xff] %vm969_vm0, %v13029_v1  ;;  %v957_v12 = vld [vmem:[%s13539_s3 + $0x20] sm:$0xff]  ;;  %v958_v13 = vld [vmem:[%s13539_s3 + $0x28] sm:$0xff] }
 0x184   : > { %987 = vst.msk [vmem:[#allocation2 + $0x88] sm:$0xff] %vm969_vm0, %v13029_v1  ;;  %988 = vst.msk [vmem:[#allocation2 + $0x90] sm:$0xff] %vm969_vm0, %v13029_v1  ;;  %v959_v14 = vld [vmem:[%s13539_s3 + $0x30] sm:$0xff]  ;;  %v960_v15 = vld [vmem:[%s13539_s3 + $0x38] sm:$0xff] }
 0x185   : > { %989 = vst.msk [vmem:[#allocation2 + $0x98] sm:$0xff] %vm969_vm0, %v13029_v1  ;;  %5875 = vst [vmem:[#allocation2 + $0xb0] sm:$0xff] %v13029_v1  ;;  %v961_v16 = vld [vmem:[%s13539_s3 + $0x40] sm:$0xff]  ;;  %v962_v17 = vld [vmem:[%s13539_s3 + $0x48] sm:$0xff] }
 0x186   : > { %991 = vst.msk [vmem:[#allocation2 + $0x10] sm:$0xff] %vm990_vm1, %v953_v4  ;;  %992 = vst.msk [vmem:[#allocation2 + $0x18] sm:$0xff] %vm990_vm1, %v954_v6  ;;  %v963_v18 = vld [vmem:[%s13539_s3 + $0x50] sm:$0xff]  ;;  %v964_v19 = vld [vmem:[%s13539_s3 + $0x58] sm:$0xff] }
 0x187   : > { %993 = vst.msk [vmem:[#allocation2 + $0x20] sm:$0xff] %vm990_vm1, %v955_v10  ;;  %994 = vst.msk [vmem:[#allocation2 + $0x28] sm:$0xff] %vm990_vm1, %v956_v11  ;;  %v965_v20 = vld [vmem:[%s13539_s3 + $0x60] sm:$0xff]  ;;  %v966_v21 = vld [vmem:[%s13539_s3 + $0x68] sm:$0xff]  ;;  %s16177_s27 = scalar_lea.vmem %s16312_s7, %s9505_s4 }
 0x188   : > { %995 = vst.msk [vmem:[#allocation2 + $0x30] sm:$0xff] %vm990_vm1, %v957_v12  ;;  %996 = vst.msk [vmem:[#allocation2 + $0x38] sm:$0xff] %vm990_vm1, %v958_v13  ;;  %v967_v22 = vld [vmem:[%s13539_s3 + $0x70] sm:$0xff]  ;;  %v968_v23 = vld [vmem:[%s13539_s3 + $0x78] sm:$0xff]  ;;  %s16309_s3 = sld [smem:[#allocation45_spill]] }
 0x189   : > { %997 = vst.msk [vmem:[#allocation2 + $0x40] sm:$0xff] %vm990_vm1, %v959_v14  ;;  %998 = vst.msk [vmem:[#allocation2 + $0x48] sm:$0xff] %vm990_vm1, %v960_v15  ;;  %v13571_v24 = vld [vmem:[#allocation2] sm:$0xff]  ;;  %v1008_v25 = vld [vmem:[#allocation2 + $0x8] sm:$0xff] }
 0x18a   : > { %999 = vst.msk [vmem:[#allocation2 + $0x50] sm:$0xff] %vm990_vm1, %v961_v16  ;;  %1000 = vst.msk [vmem:[#allocation2 + $0x58] sm:$0xff] %vm990_vm1, %v962_v17 }
 0x18b   : > { %1001 = vst.msk [vmem:[#allocation2 + $0x60] sm:$0xff] %vm990_vm1, %v963_v18  ;;  %1002 = vst.msk [vmem:[#allocation2 + $0x68] sm:$0xff] %vm990_vm1, %v964_v19  ;;  %v13579_v30 = vld [vmem:[#allocation2 + $0x90] sm:$0xff] }
 0x18c   : > { %1003 = vst.msk [vmem:[#allocation2 + $0x70] sm:$0xff] %vm990_vm1, %v965_v20  ;;  %1004 = vst.msk [vmem:[#allocation2 + $0x78] sm:$0xff] %vm990_vm1, %v966_v21  ;;  %v13581_v31 = vld [vmem:[#allocation2 + $0x98] sm:$0xff] }
 0x18d   : > { %1005 = vst.msk [vmem:[#allocation2 + $0x80] sm:$0xff] %vm990_vm1, %v967_v22  ;;  %1006 = vst.msk [vmem:[#allocation2 + $0x88] sm:$0xff] %vm990_vm1, %v968_v23  ;;  %v1009_v28 = vld [vmem:[#allocation2 + $0x10] sm:$0xff]  ;;  %v1010_v32 = vld [vmem:[#allocation2 + $0x18] sm:$0xff] }
 0x18e   : > { %2625 = vst.msk [vmem:[#allocation2] sm:$0xff] %vm2624_vm2, %v13029_v1  ;;  %2626 = vst.msk [vmem:[#allocation2 + $0x8] sm:$0xff] %vm2624_vm2, %v13029_v1  ;;  %10051 = vmatprep.mubr.msk.f32.mxu0 %vm969_vm0, %v1009_v28  ;;  %v1011_v33 = vld [vmem:[#allocation2 + $0x20] sm:$0xff]  ;;  %v1012_v34 = vld [vmem:[#allocation2 + $0x28] sm:$0xff] }
 0x18f   : > { %2627 = vst.msk [vmem:[#allocation2 + $0x10] sm:$0xff] %vm2624_vm2, %v13029_v1  ;;  %2643 = vst.msk [vmem:[#allocation2 + $0x90] sm:$0xff] %vm2624_vm2, %v13029_v1  ;;  %10052 = vmatmul.mubr.msk.f32.vlgmr.msra.gmra.mrb[0].mxu0 %vm969_vm0, %v1010_v32  ;;  %v1013_v35 = vld [vmem:[#allocation2 + $0x30] sm:$0xff]  ;;  %v1014_v36 = vld [vmem:[#allocation2 + $0x38] sm:$0xff] }
 0x190   : > { %2644 = vst.msk [vmem:[#allocation2 + $0x98] sm:$0xff] %vm2624_vm2, %v13029_v1  ;;  %2628 = vst.msk [vmem:[#allocation2 + $0x18] sm:$0xff] %vm2624_vm2, %v13029_v1  ;;  %10966 = vmatpush3.bf16.msra.mxu0 %v10963_v9  ;;  %10054 = vmatprep.mubr.msk.f32.mxu0 %vm969_vm0, %v1011_v33  ;;  %v1015_v37 = vld [vmem:[#allocation2 + $0x40] sm:$0xff]  ;;  %v1016_v38 = vld [vmem:[#allocation2 + $0x48] sm:$0xff] }
 0x191   : > { %2629 = vst.msk [vmem:[#allocation2 + $0x20] sm:$0xff] %vm2624_vm2, %v13029_v1  ;;  %2630 = vst.msk [vmem:[#allocation2 + $0x28] sm:$0xff] %vm2624_vm2, %v13029_v1  ;;  %v1017_v39 = vld [vmem:[#allocation2 + $0x50] sm:$0xff]  ;;  %v1018_v40 = vld [vmem:[#allocation2 + $0x58] sm:$0xff]  ;;  %10968 = vmatprep.subr.bf16.mxu0 %v10967_v29 }
 0x192   : > { %2631 = vst.msk [vmem:[#allocation2 + $0x30] sm:$0xff] %vm2624_vm2, %v13029_v1  ;;  %v1019_v41 = vld [vmem:[#allocation2 + $0x60] sm:$0xff]  ;;  %2632 = vst.msk [vmem:[#allocation2 + $0x38] sm:$0xff] %vm2624_vm2, %v13029_v1  ;;  %v1020_v42 = vld [vmem:[#allocation2 + $0x68] sm:$0xff] }
 0x193   : > { %2633 = vst.msk [vmem:[#allocation2 + $0x40] sm:$0xff] %vm2624_vm2, %v13029_v1  ;;  %2634 = vst.msk [vmem:[#allocation2 + $0x48] sm:$0xff] %vm2624_vm2, %v13029_v1  ;;  %v1021_v43 = vld [vmem:[#allocation2 + $0x70] sm:$0xff]  ;;  %v1022_v44 = vld [vmem:[#allocation2 + $0x78] sm:$0xff]  ;;  %10055 = vmatmul.mubr.msk.f32.gmra.mrb[2].mxu0 %vm969_vm0, %v1012_v34 }
 0x194   : > { %2635 = vst.msk [vmem:[#allocation2 + $0x50] sm:$0xff] %vm2624_vm2, %v13029_v1  ;;  %2636 = vst.msk [vmem:[#allocation2 + $0x58] sm:$0xff] %vm2624_vm2, %v13029_v1  ;;  %v1025_v45 = vld [vmem:[#allocation2 + $0x80] sm:$0xff]  ;;  %v1026_v46 = vld [vmem:[#allocation2 + $0x88] sm:$0xff]  ;;  %10057 = vmatprep.mubr.msk.f32.mxu0 %vm969_vm0, %v1013_v35 }
 0x195   : > { %2637 = vst.msk [vmem:[#allocation2 + $0x60] sm:$0xff] %vm2624_vm2, %v13029_v1  ;;  %2638 = vst.msk [vmem:[#allocation2 + $0x68] sm:$0xff] %vm2624_vm2, %v13029_v1 }
 0x196   : > { %2639 = vst.msk [vmem:[#allocation2 + $0x70] sm:$0xff] %vm2624_vm2, %v13029_v1  ;;  %2640 = vst.msk [vmem:[#allocation2 + $0x78] sm:$0xff] %vm2624_vm2, %v13029_v1 }
 0x197   : > { %2641 = vst.msk [vmem:[#allocation2 + $0x80] sm:$0xff] %vm2624_vm2, %v13029_v1  ;;  %2642 = vst.msk [vmem:[#allocation2 + $0x88] sm:$0xff] %vm2624_vm2, %v13029_v1  ;;  %10058 = vmatmul.mubr.msk.f32.gmra.mrb[4].mxu0 %vm969_vm0, %v1014_v36 }
 0x198   : > { %10060 = vmatprep.mubr.msk.f32.mxu0 %vm969_vm0, %v1015_v37 }
 0x19b   : > { %10061 = vmatmul.mubr.msk.f32.gmra.mrb[6].mxu0 %vm969_vm0, %v1016_v38 }
 0x19c   : > { %10063 = vmatprep.mubr.msk.f32.mxu0 %vm969_vm0, %v1017_v39 }
 0x19f   : > { %10064 = vmatmul.mubr.msk.f32.gmra.mrb[8].mxu0 %vm969_vm0, %v1018_v40 }
 0x1a0   : > { %10066 = vmatprep.mubr.msk.f32.mxu0 %vm969_vm0, %v1019_v41 }
 0x1a3   : > { %10067 = vmatmul.mubr.msk.f32.gmra.mrb[10].mxu0 %vm969_vm0, %v1020_v42 }
 0x1a4   : > { %10069 = vmatprep.mubr.msk.f32.mxu0 %vm969_vm0, %v1021_v43 }
 0x1a7   : > { %10070 = vmatmul.mubr.msk.f32.gmra.mrb[12].mxu0 %vm969_vm0, %v1022_v44 }
 0x1a8   : > { %10072 = vmatprep.mubr.msk.f32.mxu0 %vm969_vm0, %v1025_v45 }
 0x1ab   : > { %10073 = vmatmul.mubr.msk.f32.gmra.mrb[14].mxu0 %vm969_vm0, %v1026_v46 }
 0x1ac   : > { %10079 = vmatprep.mubr.msk.f32.mxu0 %vm969_vm0, %v13571_v24 }
 0x1af   : > { %10080 = vmatmul.mubr.msk.f32.vlgmr.msra.gmra.mrb[0].mxu0 %vm969_vm0, %v1008_v25 }
 0x1b0   : > { %10970 = vmatpush3.bf16.msra.mxu0 %v10967_v29  ;;  %10082 = vmatprep.mubr.msk.f32.mxu0 %vm969_vm0, %v1009_v28 }
 0x1b3   : > { %10083 = vmatmul.mubr.msk.f32.gmra.mrb[2].mxu0 %vm969_vm0, %v1010_v32 }
 0x1b4   : > { %10085 = vmatprep.mubr.msk.f32.mxu0 %vm969_vm0, %v1011_v33 }
 0x1b7   : > { %10086 = vmatmul.mubr.msk.f32.gmra.mrb[4].mxu0 %vm969_vm0, %v1012_v34 }
 0x1b8   : > { %10088 = vmatprep.mubr.msk.f32.mxu0 %vm969_vm0, %v1013_v35 }
 0x1bb   : > { %10089 = vmatmul.mubr.msk.f32.gmra.mrb[6].mxu0 %vm969_vm0, %v1014_v36 }
 0x1bc   : > { %10091 = vmatprep.mubr.msk.f32.mxu0 %vm969_vm0, %v1015_v37 }
 0x1bf   : > { %10092 = vmatmul.mubr.msk.f32.gmra.mrb[8].mxu0 %vm969_vm0, %v1016_v38 }
 0x1c0   : > { %10094 = vmatprep.mubr.msk.f32.mxu0 %vm969_vm0, %v1017_v39 }
 0x1c3   : > { %10095 = vmatmul.mubr.msk.f32.gmra.mrb[10].mxu0 %vm969_vm0, %v1018_v40 }
 0x1c4   : > { %10097 = vmatprep.mubr.msk.f32.mxu0 %vm969_vm0, %v1019_v41 }
 0x1c7   : > { %10098 = vmatmul.mubr.msk.f32.gmra.mrb[12].mxu0 %vm969_vm0, %v1020_v42 }
 0x1c8   : > { %10100 = vmatprep.mubr.msk.f32.mxu0 %vm969_vm0, %v1021_v43 }
 0x1cb   : > { %10101 = vmatmul.mubr.msk.f32.gmra.mrb[14].mxu0 %vm969_vm0, %v1022_v44 }
 0x1cc   : > { %10107 = vmatprep.mubr.msk.f32.mxu0 %vm969_vm0, %v1011_v33 }
 0x1cf   : > { %10108 = vmatmul.mubr.msk.f32.vlgmr.msra.gmra.mrb[0].mxu0 %vm969_vm0, %v1012_v34 }
 0x1d0   : > { %10110 = vmatprep.mubr.msk.f32.mxu0 %vm969_vm0, %v1013_v35 }
 0x1d3   : > { %10111 = vmatmul.mubr.msk.f32.gmra.mrb[2].mxu0 %vm969_vm0, %v1014_v36 }
 0x1d4   : > { %10113 = vmatprep.mubr.msk.f32.mxu0 %vm969_vm0, %v1015_v37 }
 0x1d7   : > { %10114 = vmatmul.mubr.msk.f32.gmra.mrb[4].mxu0 %vm969_vm0, %v1016_v38 }
 0x1d8   : > { %10116 = vmatprep.mubr.msk.f32.mxu0 %vm969_vm0, %v1017_v39 }
 0x1db   : > { %10117 = vmatmul.mubr.msk.f32.gmra.mrb[6].mxu0 %vm969_vm0, %v1018_v40 }
 0x1dc   : > { %10119 = vmatprep.mubr.msk.f32.mxu0 %vm969_vm0, %v1019_v41 }
 0x1df   : > { %10120 = vmatmul.mubr.msk.f32.gmra.mrb[8].mxu0 %vm969_vm0, %v1020_v42 }
 0x1e0   : > { %10122 = vmatprep.mubr.msk.f32.mxu0 %vm969_vm0, %v1021_v43 }
 0x1e3   : > { %10123 = vmatmul.mubr.msk.f32.gmra.mrb[10].mxu0 %vm969_vm0, %v1022_v44 }
 0x1e4   : > { %10125 = vmatprep.mubr.msk.f32.mxu0 %vm969_vm0, %v1025_v45 }
 0x1e7   : > { %10126 = vmatmul.mubr.msk.f32.gmra.mrb[12].mxu0 %vm969_vm0, %v1026_v46 }
 0x1e8   : > { %10128 = vmatprep.mubr.msk.f32.mxu0 %vm969_vm0, %v13579_v30 }
 0x1eb   : > { %10129 = vmatmul.mubr.msk.f32.gmra.mrb[14].mxu0 %vm969_vm0, %v13581_v31 }
 0x2a2   : > { %v10109_v48 = vpop.f32.mrb[0].mxu0 }
 0x2a3   : > { %v13673_v49 = vadd.f32 %v10109_v48, %v13670_v47  ;;  %v1507_v50 = vpop.f32.mrb[1].mxu0 }
 0x2a4   : > { %v13676_v51 = vadd.f32 %v13670_v47, %v1507_v50 }
 0x2a5   : > { %v9157_v52 = vmul.f32 -1.442695, %v13673_v49 }
 0x2a6   : > { %v9156_v53 = vmul.f32 -1.442695, %v13676_v51  ;;  %v10112_v54 = vpop.f32.mrb[2].mxu0 }
 0x2a7   : > { %12369 = vpow2.f32 %v9157_v52  ;;  %v13681_v55 = vadd.f32 %v10112_v54, %v13670_v47  ;;  %v1517_v56 = vpop.f32.mrb[3].mxu0 }
 0x2a8   : > { %12371 = vpow2.f32 %v9156_v53  ;;  %v13684_v57 = vadd.f32 %v13670_v47, %v1517_v56 }
 0x2a9   : > { %v9159_v58 = vmul.f32 -1.442695, %v13681_v55 }
 0x2aa   : > { %v9158_v59 = vmul.f32 -1.442695, %v13684_v57  ;;  %v10115_v60 = vpop.f32.mrb[4].mxu0 }
 0x2ab   : > { %12373 = vpow2.f32 %v9159_v58  ;;  %v13689_v61 = vadd.f32 %v10115_v60, %v13670_v47  ;;  %v1527_v62 = vpop.f32.mrb[5].mxu0 }
 0x2ac   : > { %12375 = vpow2.f32 %v9158_v59  ;;  %v13692_v63 = vadd.f32 %v13670_v47, %v1527_v62 }
 0x2ad   : > { %v9161_v0 = vmul.f32 -1.442695, %v13689_v61 }
 0x2ae   : > { %v9160_v1 = vmul.f32 -1.442695, %v13692_v63  ;;  %v10118_v2 = vpop.f32.mrb[6].mxu0 }
 0x2af   : > { %12377 = vpow2.f32 %v9161_v0  ;;  %v13697_v3 = vadd.f32 %v10118_v2, %v13670_v47  ;;  %v1537_v4 = vpop.f32.mrb[7].mxu0 }
 0x2b0   : > { %12379 = vpow2.f32 %v9160_v1  ;;  %v13700_v5 = vadd.f32 %v13670_v47, %v1537_v4 }
 0x2b1   : > { %v12370_v6 = vpop.eup %12369  ;;  %v9163_v7 = vmul.f32 -1.442695, %v13697_v3 }
 0x2b2   : > { %v12372_v8 = vpop.eup %12371  ;;  %v9162_v9 = vmul.f32 -1.442695, %v13700_v5  ;;  %v10121_v10 = vpop.f32.mrb[8].mxu0  ;;  %v1674_v16 = vadd.f32 1.0, %v12370_v6 }
 0x2b3   : > { %v1673_v11 = vadd.f32 1.0, %v12372_v8  ;;  %12381 = vpow2.f32 %v9163_v7  ;;  %v13705_v12 = vadd.f32 %v10121_v10, %v13670_v47  ;;  %v1547_v13 = vpop.f32.mrb[9].mxu0 }
 0x2b4   : > { %v13708_v14 = vadd.f32 %v13670_v47, %v1547_v13 }
 0x2b5   : > { %v12374_v15 = vpop.eup %12373  ;;  %12383 = vrcp.f32 %v1673_v11  ;;  %v9165_v17 = vmul.f32 -1.442695, %v13705_v12 }
 0x2b6   : > { %v12376_v18 = vpop.eup %12375  ;;  %v1676_v19 = vadd.f32 1.0, %v12374_v15  ;;  %12385 = vpow2.f32 %v9162_v9  ;;  %v9164_v20 = vmul.f32 -1.442695, %v13708_v14  ;;  %v10124_v21 = vpop.f32.mrb[10].mxu0 }
 0x2b7   : > { %12387 = vpow2.f32 %v9165_v17  ;;  %v13713_v22 = vadd.f32 %v10124_v21, %v13670_v47  ;;  %v1557_v23 = vpop.f32.mrb[11].mxu0  ;;  %v1675_v24 = vadd.f32 1.0, %v12376_v18  ;;  %v13031_v21 = vmov 0  }
 0x2b8   : > { %12389 = vrcp.f32 %v1676_v19  ;;  %v13716_v25 = vadd.f32 %v13670_v47, %v1557_v23  ;;  %12368 = vset.pattern.permute.xlu1 %v13031_v21  ;;  %12367 = vset.pattern.permute.xlu0 %v13031_v21  ;;  %v9228_v21 = vld [vmem:[%s16306_s26 + $0x140] sm:$0xff] }
 0x2b9   : > { %v12378_v26 = vpop.eup %12377  ;;  %12391 = vrcp.f32 %v1674_v16  ;;  %v9167_v27 = vmul.f32 -1.442695, %v13713_v22 }
 0x2ba   : > { %v12380_v28 = vpop.eup %12379  ;;  %12393 = vpow2.f32 %v9164_v20  ;;  %v9166_v29 = vmul.f32 -1.442695, %v13716_v25  ;;  %v10127_v30 = vpop.f32.mrb[12].mxu0  ;;  %v1678_v34 = vadd.f32 1.0, %v12378_v26  ;;  %v1801_v26 = vld [vmem:[%s16305_s6] sm:$0xff] }
 0x2bb   : > { %v1677_v31 = vadd.f32 1.0, %v12380_v28  ;;  %12395 = vpow2.f32 %v9167_v27  ;;  %v13721_v32 = vadd.f32 %v10127_v30, %v13670_v47  ;;  %v1567_v33 = vpop.f32.mrb[13].mxu0  ;;  %10163 = vmatprep.mubr.f32.mxu1 %v1801_v26  ;;  %v1817_v30 = vld [vmem:[%s16306_s26] sm:$0xff]  ;;  %v9230_v26 = vld [vmem:[%s16306_s26 + $0x150] sm:$0xff] }
 0x2bc   : > { %12397 = vrcp.f32 %v1675_v24  ;;  %v13724_v35 = vadd.f32 %v13670_v47, %v1567_v33  ;;  %v1820_v33 = vld [vmem:[%s16306_s26 + $0x18] sm:$0xff] }
 0x2bd   : > { %v12382_v36 = vpop.eup %12381  ;;  %12399 = vrcp.f32 %v1677_v31  ;;  %v9169_v37 = vmul.f32 -1.442695, %v13721_v32  ;;  %v1818_v31 = vld [vmem:[%s16306_s26 + $0x8] sm:$0xff] }
 0x2be   : > { %12401 = vpow2.f32 %v9166_v29  ;;  %v9168_v38 = vmul.f32 -1.442695, %v13724_v35  ;;  %v10130_v39 = vpop.f32.mrb[14].mxu0  ;;  %v1680_v44 = vadd.f32 1.0, %v12382_v36  ;;  %v1822_v36 = vld [vmem:[%s16306_s26 + $0x28] sm:$0xff] }
 0x2bf   : > { %v12384_v40 = vpop.eup %12383  ;;  %12403 = vpow2.f32 %v9169_v37  ;;  %v13729_v41 = vadd.f32 %v10130_v39, %v13670_v47  ;;  %v1577_v42 = vpop.f32.mrb[15].mxu0  ;;  %v1821_v37 = vld [vmem:[%s16306_s26 + $0x20] sm:$0xff]  ;;  %v1823_v39 = vld [vmem:[%s16306_s26 + $0x30] sm:$0xff] }
 0x2c0   : > { %v12386_v43 = vpop.eup %12385  ;;  %12405 = vrcp.f32 %v1678_v34  ;;  %v13732_v45 = vadd.f32 %v13670_v47, %v1577_v42  ;;  %1737 = vrot.lane.b32.xlu0 %v12384_v40, %s13030_s16  ;;  %v1819_v34 = vld [vmem:[%s16306_s26 + $0x10] sm:$0xff]  ;;  %v1826_v40 = vld [vmem:[%s16306_s26 + $0x48] sm:$0xff]  ;;  %v1825_v42 = vld [vmem:[%s16306_s26 + $0x40] sm:$0xff] }
 0x2c1   : > { %v12388_v46 = vpop.eup %12387  ;;  %v1679_v48 = vadd.f32 1.0, %v12386_v43  ;;  %12407 = vpow2.f32 %v9168_v38  ;;  %v9171_v50 = vmul.f32 -1.442695, %v13729_v41  ;;  %v1824_v38 = vld [vmem:[%s16306_s26 + $0x38] sm:$0xff] }
 0x2c2   : > { %v12390_v52 = vpop.eup %12389  ;;  %v9170_v53 = vmul.f32 -1.442695, %v13732_v45  ;;  %v1682_v58 = vadd.f32 1.0, %v12388_v46  ;;  %v1828_v43 = vld [vmem:[%s16306_s26 + $0x58] sm:$0xff]  ;;  %v1830_v46 = vld [vmem:[%s16306_s26 + $0x68] sm:$0xff] }
 0x2c3   : > { %v12392_v54 = vpop.eup %12391  ;;  %12409 = vrcp.f32 %v1679_v48  ;;  %1743 = vrot.lane.b32.xlu1 %v12390_v52, %s13030_s16  ;;  %v1829_v48 = vld [vmem:[%s16306_s26 + $0x60] sm:$0xff]  ;;  %v1831_v52 = vld [vmem:[%s16306_s26 + $0x70] sm:$0xff] }
 0x2c4   : > { %v12394_v56 = vpop.eup %12393  ;;  %12411 = vrcp.f32 %v1680_v44  ;;  %1739 = vrot.lane.b32.xlu0 %v12392_v54, %s13030_s16  ;;  %v1827_v44 = vld [vmem:[%s16306_s26 + $0x50] sm:$0xff]  ;;  %v9188_v54 = vld [vmem:[%s16306_s26 + $0x80] sm:$0xff] }
 0x2c5   : > { %v12396_v47 = vpop.eup %12395  ;;  %v1681_v59 = vadd.f32 1.0, %v12394_v56  ;;  %12413 = vpow2.f32 %v9171_v50  ;;  %v1832_v50 = vld [vmem:[%s16306_s26 + $0x78] sm:$0xff] }
 0x2c6   : > { %v12398_v60 = vpop.eup %12397  ;;  %12415 = vpow2.f32 %v9170_v53  ;;  %v1684_v1 = vadd.f32 1.0, %v12396_v47  ;;  %v9189_v53 = vld [vmem:[%s16306_s26 + $0x88] sm:$0xff]  ;;  %v9191_v56 = vld [vmem:[%s16306_s26 + $0x98] sm:$0xff] }
 0x2c7   : > { %v12400_v62 = vpop.eup %12399  ;;  %12417 = vrcp.f32 %v1681_v59  ;;  %1741 = vrot.lane.b32.xlu1 %v12398_v60, %s13030_s16  ;;  %v9193_v47 = vld [vmem:[%s16306_s26 + $0xa8] sm:$0xff]  ;;  %v9192_v59 = vld [vmem:[%s16306_s26 + $0xa0] sm:$0xff]  ;;  %v9195_v60 = vld [vmem:[%s16306_s26 + $0xb8] sm:$0xff] }
 0x2c8   : > { %v12402_v0 = vpop.eup %12401  ;;  %12419 = vrcp.f32 %v1682_v58  ;;  %1745 = vrot.lane.b32.xlu0 %v12400_v62, %s13030_s16  ;;  %v9190_v58 = vld [vmem:[%s16306_s26 + $0x90] sm:$0xff] }
 0x2c9   : > { %v12404_v2 = vpop.eup %12403  ;;  %v1683_v4 = vadd.f32 1.0, %v12402_v0  ;;  %v9194_v62 = vld [vmem:[%s16306_s26 + $0xb0] sm:$0xff]  ;;  %v9197_v0 = vld [vmem:[%s16306_s26 + $0xc8] sm:$0xff] }
 0x2ca   : > { %v12406_v6 = vpop.eup %12405  ;;  %v1686_v8 = vadd.f32 1.0, %v12404_v2  ;;  %v9199_v2 = vld [vmem:[%s16306_s26 + $0xd8] sm:$0xff] }
 0x2cb   : > { %v12408_v7 = vpop.eup %12407  ;;  %12421 = vrcp.f32 %v1683_v4  ;;  %1747 = vrot.lane.b32.xlu1 %v12406_v6, %s13030_s16  ;;  %v9198_v4 = vld [vmem:[%s16306_s26 + $0xd0] sm:$0xff]  ;;  %v9201_v6 = vld [vmem:[%s16306_s26 + $0xe8] sm:$0xff] }
 0x2cc   : > { %12423 = vrcp.f32 %v1684_v1  ;;  %v1685_v9 = vadd.f32 1.0, %v12408_v7  ;;  %v9196_v1 = vld [vmem:[%s16306_s26 + $0xc0] sm:$0xff] }
 0x2cd   : > { %v12410_v10 = vpop.eup %12409  ;;  %v9200_v7 = vld [vmem:[%s16306_s26 + $0xe0] sm:$0xff] }
 0x2ce   : > { %v12412_v11 = vpop.eup %12411  ;;  %12425 = vrcp.f32 %v1685_v9  ;;  %1749 = vrot.lane.b32.xlu0 %v12410_v10, %s13030_s16  ;;  %v9202_v9 = vld [vmem:[%s16306_s26 + $0xf0] sm:$0xff]  ;;  %v9221_v10 = vld [vmem:[%s16306_s26 + $0x108] sm:$0xff] }
 0x2cf   : > { %v12414_v13 = vpop.eup %12413  ;;  %1751 = vrot.lane.b32.xlu1 %v12412_v11, %s13030_s16  ;;  %12427 = vrcp.f32 %v1686_v8  ;;  %v9203_v8 = vld [vmem:[%s16306_s26 + $0xf8] sm:$0xff]  ;;  %v9220_v11 = vld [vmem:[%s16306_s26 + $0x100] sm:$0xff] }
 0x2d0   : > { %v12416_v15 = vpop.eup %12415  ;;  %v1688_v16 = vadd.f32 1.0, %v12414_v13  ;;  %v9223_v13 = vld [vmem:[%s16306_s26 + $0x118] sm:$0xff] }
 0x2d1   : > { %v12418_v17 = vpop.eup %12417  ;;  %v1687_v18 = vadd.f32 1.0, %v12416_v15  ;;  %v9222_v15 = vld [vmem:[%s16306_s26 + $0x110] sm:$0xff] }
 0x2d2   : > { %v12420_v19 = vpop.eup %12419  ;;  %1753 = vrot.lane.b32.xlu0 %v12418_v17, %s13030_s16  ;;  %v9224_v17 = vld [vmem:[%s16306_s26 + $0x120] sm:$0xff] }
 0x2d3   : > { %12429 = vrcp.f32 %v1687_v18  ;;  %1755 = vrot.lane.b32.xlu1 %v12420_v19, %s13030_s16  ;;  %v9227_v18 = vld [vmem:[%s16306_s26 + $0x138] sm:$0xff]  ;;  %v9226_v19 = vld [vmem:[%s16306_s26 + $0x130] sm:$0xff] }
 0x2d4   : > { %12431 = vrcp.f32 %v1688_v16  ;;  %v9225_v16 = vld [vmem:[%s16306_s26 + $0x128] sm:$0xff] }
 0x2d5   : > { %v12422_v20 = vpop.eup %12421 }
 0x2d6   : > { %v12424_v23 = vpop.eup %12423  ;;  %1757 = vrot.lane.b32.xlu0 %v12422_v20, %s13030_s16  ;;  %v9229_v20 = vld [vmem:[%s16306_s26 + $0x148] sm:$0xff] }
 0x2d7   : > { %1759 = vrot.lane.b32.xlu1 %v12424_v23, %s13030_s16 }
 0x2d8   : > { %v12426_v24 = vpop.eup %12425 }
 0x2d9   : > { %v12428_v27 = vpop.eup %12427 }
 0x2da   : > { %1761 = vrot.lane.b32.xlu0 %v12426_v24, %s13030_s16  ;;  %v9231_v24 = vld [vmem:[%s16306_s26 + $0x158] sm:$0xff] }
 0x2db   : > { %1763 = vrot.lane.b32.xlu1 %v12428_v27, %s13030_s16 }
 0x2dd   : > { %v12430_v28 = vpop.eup %12429 }
 0x2de   : > { %v12432_v29 = vpop.eup %12431  ;;  %1765 = vrot.lane.b32.xlu0 %v12430_v28, %s13030_s16 }
 0x2df   : > { %1767 = vrot.lane.b32.xlu1 %v12432_v29, %s13030_s16 }
 0x2e2   : > { %1835 = vperm.xlu0 %12367, %v1817_v30  }
 0x2e3   : > { %1840 = vperm.xlu1 %12368, %v1818_v31   ;;  %v9233_v31 = vld [vmem:[%s16306_s26 + $0x168] sm:$0xff] }
 0x2e6   : > { %1850 = vperm.xlu0 %12367, %v1820_v33   ;;  %v9232_v33 = vld [vmem:[%s16306_s26 + $0x160] sm:$0xff] }
 0x2e7   : > { %1845 = vperm.xlu1 %12368, %v1819_v34  }
 0x2ea   : > { %1860 = vperm.xlu0 %12367, %v1822_v36  }
 0x2eb   : > { %1855 = vperm.xlu1 %12368, %v1821_v37  }
 0x2ee   : > { %1870 = vperm.xlu0 %12367, %v1824_v38  }
 0x2ef   : > { %1865 = vperm.xlu1 %12368, %v1823_v39  }
 0x2f2   : > { %1880 = vperm.xlu0 %12367, %v1826_v40   ;;  %v9234_v40 = vld [vmem:[%s16306_s26 + $0x170] sm:$0xff] }
 0x2f3   : > { %1875 = vperm.xlu1 %12368, %v1825_v42  }
 0x2f6   : > { %1890 = vperm.xlu0 %12367, %v1828_v43  }
 0x2f7   : > { %1885 = vperm.xlu1 %12368, %v1827_v44  }
 0x2fa   : > { %1900 = vperm.xlu0 %12367, %v1830_v46  }
 0x2fb   : > { %1895 = vperm.xlu1 %12368, %v1829_v48  }
 0x2fe   : > { %1910 = vperm.xlu0 %12367, %v1832_v50  }
 0x2ff   : > { %1905 = vperm.xlu1 %12368, %v1831_v52  }
 0x302   : > { %2115 = vperm.xlu0 %12367, %v9189_v53  }
 0x303   : > { %2110 = vperm.xlu1 %12368, %v9188_v54  }
 0x306   : > { %2125 = vperm.xlu0 %12367, %v9191_v56  }
 0x307   : > { %2120 = vperm.xlu1 %12368, %v9190_v58  }
 0x30a   : > { %2135 = vperm.xlu0 %12367, %v9193_v47  }
 0x30b   : > { %2130 = vperm.xlu1 %12368, %v9192_v59  }
 0x30e   : > { %2145 = vperm.xlu0 %12367, %v9195_v60  }
 0x30f   : > { %2140 = vperm.xlu1 %12368, %v9194_v62  }
 0x312   : > { %2155 = vperm.xlu0 %12367, %v9197_v0  }
 0x313   : > { %2150 = vperm.xlu1 %12368, %v9196_v1  }
 0x316   : > { %2165 = vperm.xlu0 %12367, %v9199_v2  }
 0x317   : > { %2160 = vperm.xlu1 %12368, %v9198_v4  }
 0x31a   : > { %2175 = vperm.xlu0 %12367, %v9201_v6   ;;  %v1806_v6 = vld [vmem:[%s16305_s6 + $0x28] sm:$0xff] }
 0x31b   : > { %2170 = vperm.xlu1 %12368, %v9200_v7   ;;  %v1807_v7 = vld [vmem:[%s16305_s6 + $0x30] sm:$0xff] }
 0x31e   : > { %2185 = vperm.xlu0 %12367, %v9203_v8   ;;  %v1808_v8 = vld [vmem:[%s16305_s6 + $0x38] sm:$0xff] }
 0x31f   : > { %2180 = vperm.xlu1 %12368, %v9202_v9   ;;  %v1809_v9 = vld [vmem:[%s16305_s6 + $0x40] sm:$0xff] }
 0x322   : > { %2390 = vperm.xlu0 %12367, %v9221_v10   ;;  %v1810_v10 = vld [vmem:[%s16305_s6 + $0x48] sm:$0xff] }
 0x323   : > { %2385 = vperm.xlu1 %12368, %v9220_v11   ;;  %v1811_v11 = vld [vmem:[%s16305_s6 + $0x50] sm:$0xff] }
 0x326   : > { %2400 = vperm.xlu0 %12367, %v9223_v13   ;;  %v1812_v13 = vld [vmem:[%s16305_s6 + $0x58] sm:$0xff] }
 0x327   : > { %2395 = vperm.xlu1 %12368, %v9222_v15   ;;  %v1813_v15 = vld [vmem:[%s16305_s6 + $0x60] sm:$0xff] }
 0x32a   : > { %2410 = vperm.xlu0 %12367, %v9225_v16   ;;  %v1814_v16 = vld [vmem:[%s16305_s6 + $0x68] sm:$0xff] }
 0x32b   : > { %2405 = vperm.xlu1 %12368, %v9224_v17   ;;  %v1815_v17 = vld [vmem:[%s16305_s6 + $0x70] sm:$0xff] }
 0x32e   : > { %2420 = vperm.xlu0 %12367, %v9227_v18   ;;  %v1816_v18 = vld [vmem:[%s16305_s6 + $0x78] sm:$0xff] }
 0x32f   : > { %2415 = vperm.xlu1 %12368, %v9226_v19   ;;  %v9172_v19 = vld [vmem:[%s16305_s6 + $0x80] sm:$0xff] }
 0x332   : > { %v1738_v23 = vpop.permute.xlu0 %1737  ;;  %2430 = vperm.xlu0 %12367, %v9229_v20  }
 0x333   : > { %2425 = vperm.xlu1 %12368, %v9228_v21   ;;  %v1785_v29 = vmul.f32 %v1738_v23, %v13676_v51 }
 0x335   : > { %v1744_v27 = vpop.permute.xlu1 %1743 }
 0x336   : > { %v1740_v28 = vpop.permute.xlu0 %1739  ;;  %2440 = vperm.xlu0 %12367, %v9231_v24   ;;  %v1788_v37 = vmul.f32 %v1744_v27, %v13681_v55 }
 0x337   : > { %v1786_v30 = vmul.f32 %v1740_v28, %v13673_v49  ;;  %2435 = vperm.xlu1 %12368, %v9230_v26   ;;  %v9235_v49 = vld [vmem:[%s16306_s26 + $0x178] sm:$0xff] }
 0x339   : > { %v1742_v34 = vpop.permute.xlu1 %1741  ;;  %v10971_v36 = vpack.c.bf16 %v1786_v30, %v1785_v29 }
 0x33a   : > { %v1787_v38 = vmul.f32 %v1742_v34, %v13684_v57  ;;  %v1746_v39 = vpop.permute.xlu0 %1745  ;;  %2450 = vperm.xlu0 %12367, %v9233_v31  }
 0x33b   : > { %10972 = vmatprep.subr.bf16.mxu1 %v10971_v36  ;;  %2445 = vperm.xlu1 %12368, %v9232_v33   ;;  %v1789_v43 = vmul.f32 %v1746_v39, %v13692_v63 }
 0x33c   : > { %v10975_v51 = vpack.c.bf16 %v1788_v37, %v1787_v38  ;;  %10974 = vmatpush3.bf16.msra.mxu1 %v10971_v36 }
 0x33d   : > { %v1748_v42 = vpop.permute.xlu1 %1747 }
 0x33e   : > { %v1790_v55 = vmul.f32 %v1748_v42, %v13689_v61  ;;  %10976 = vmatprep.subr.bf16.mxu1 %v10975_v51  ;;  %2460 = vperm.xlu0 %12367, %v9235_v49  }
 0x33f   : > { %2455 = vperm.xlu1 %12368, %v9234_v40  }
 0x340   : > { %v10979_v57 = vpack.c.bf16 %v1790_v55, %v1789_v43  ;;  %v1750_v44 = vpop.permute.xlu0 %1749  ;;  %10978 = vmatpush3.bf16.msra.mxu1 %v10975_v51 }
 0x341   : > { %v1752_v46 = vpop.permute.xlu1 %1751  ;;  %v1791_v48 = vmul.f32 %v1750_v44, %v13700_v5 }
 0x342   : > { %v1792_v50 = vmul.f32 %v1752_v46, %v13697_v3  ;;  %10980 = vmatprep.subr.bf16.mxu1 %v10979_v57 }
 0x344   : > { %v10983_v52 = vpack.c.bf16 %v1792_v50, %v1791_v48  ;;  %v1754_v53 = vpop.permute.xlu0 %1753  ;;  %10982 = vmatpush3.bf16.msra.mxu1 %v10979_v57 }
 0x345   : > { %v1756_v54 = vpop.permute.xlu1 %1755  ;;  %v1793_v63 = vmul.f32 %v1754_v53, %v13708_v14 }
 0x346   : > { %v1794_v61 = vmul.f32 %v1756_v54, %v13705_v12  ;;  %10984 = vmatprep.subr.bf16.mxu1 %v10983_v52 }
 0x348   : > { %v10987_v56 = vpack.c.bf16 %v1794_v61, %v1793_v63  ;;  %v1758_v58 = vpop.permute.xlu0 %1757  ;;  %10986 = vmatpush3.bf16.msra.mxu1 %v10983_v52 }
 0x349   : > { %v1760_v47 = vpop.permute.xlu1 %1759  ;;  %v1795_v59 = vmul.f32 %v1758_v58, %v13716_v25 }
 0x34a   : > { %v1796_v5 = vmul.f32 %v1760_v47, %v13713_v22  ;;  %10988 = vmatprep.subr.bf16.mxu1 %v10987_v56 }
 0x34c   : > { %v10991_v3 = vpack.c.bf16 %v1796_v5, %v1795_v59  ;;  %v1762_v60 = vpop.permute.xlu0 %1761  ;;  %10990 = vmatpush3.bf16.msra.mxu1 %v10987_v56 }
 0x34d   : > { %v1764_v62 = vpop.permute.xlu1 %1763  ;;  %v1797_v0 = vmul.f32 %v1762_v60, %v13724_v35  ;;  %v1802_v35 = vld [vmem:[%s16305_s6 + $0x8] sm:$0xff] }
 0x34e   : > { %v1798_v14 = vmul.f32 %v1764_v62, %v13721_v32  ;;  %10992 = vmatprep.subr.bf16.mxu1 %v10991_v3  ;;  %v1803_v32 = vld [vmem:[%s16305_s6 + $0x10] sm:$0xff] }
 0x350   : > { %v10995_v12 = vpack.c.bf16 %v1798_v14, %v1797_v0  ;;  %v1766_v1 = vpop.permute.xlu0 %1765  ;;  %10994 = vmatpush3.bf16.msra.mxu1 %v10991_v3 }
 0x351   : > { %v1768_v2 = vpop.permute.xlu1 %1767  ;;  %v1799_v4 = vmul.f32 %v1766_v1, %v13732_v45  ;;  %v1804_v45 = vld [vmem:[%s16305_s6 + $0x18] sm:$0xff] }
 0x352   : > { %v1800_v25 = vmul.f32 %v1768_v2, %v13729_v41  ;;  %10996 = vmatprep.subr.bf16.mxu1 %v10995_v12  ;;  %v1805_v41 = vld [vmem:[%s16305_s6 + $0x20] sm:$0xff] }
 0x354   : > { %v10999_v22 = vpack.c.bf16 %v1800_v25, %v1799_v4  ;;  %10998 = vmatpush3.bf16.msra.mxu1 %v10995_v12 }
 0x356   : > { %11000 = vmatprep.subr.bf16.mxu1 %v10999_v22 }
 0x358   : > { %11002 = vmatpush3.bf16.msra.mxu1 %v10999_v22 }
 0x35b   : > { %10164 = vmatmul.mubr.f32.vlgmr.msra.gmra.mrb[0].mxu1 %v1802_v35 }
 0x35c   : > { %10166 = vmatprep.mubr.f32.mxu1 %v1803_v32 }
 0x35f   : > { %10167 = vmatmul.mubr.f32.gmra.mrb[2].mxu1 %v1804_v45 }
 0x360   : > { %10169 = vmatprep.mubr.f32.mxu1 %v1805_v41 }
 0x361   : > { %v1836_v20 = vpop.permute.xlu0 %1835 }
 0x362   : > { %v1841_v21 = vpop.permute.xlu1 %1840 }
 0x363   : > { %10170 = vmatmul.mubr.f32.gmra.mrb[4].mxu1 %v1806_v6 }
 0x364   : > { %10172 = vmatprep.mubr.f32.mxu1 %v1807_v7 }
 0x365   : > { %v1851_v23 = vpop.permute.xlu0 %1850 }
 0x366   : > { %v1846_v24 = vpop.permute.xlu1 %1845 }
 0x367   : > { %10173 = vmatmul.mubr.f32.gmra.mrb[6].mxu1 %v1808_v8 }
 0x368   : > { %10175 = vmatprep.mubr.f32.mxu1 %v1809_v9 }
 0x369   : > { %v1861_v26 = vpop.permute.xlu0 %1860 }
 0x36a   : > { %v1856_v27 = vpop.permute.xlu1 %1855 }
 0x36b   : > { %10176 = vmatmul.mubr.f32.gmra.mrb[8].mxu1 %v1810_v10 }
 0x36c   : > { %10178 = vmatprep.mubr.f32.mxu1 %v1811_v11 }
 0x36d   : > { %v1871_v34 = vpop.permute.xlu0 %1870 }
 0x36e   : > { %v1866_v38 = vpop.permute.xlu1 %1865 }
 0x36f   : > { %10179 = vmatmul.mubr.f32.gmra.mrb[10].mxu1 %v1812_v13 }
 0x370   : > { %10181 = vmatprep.mubr.f32.mxu1 %v1813_v15 }
 0x371   : > { %v1881_v46 = vpop.permute.xlu0 %1880 }
 0x372   : > { %v1876_v52 = vpop.permute.xlu1 %1875 }
 0x373   : > { %10182 = vmatmul.mubr.f32.gmra.mrb[12].mxu1 %v1814_v16 }
 0x374   : > { %10184 = vmatprep.mubr.f32.mxu1 %v1815_v17 }
 0x375   : > { %v1891_v5 = vpop.permute.xlu0 %1890 }
 0x376   : > { %v1886_v62 = vpop.permute.xlu1 %1885 }
 0x377   : > { %10185 = vmatmul.mubr.f32.gmra.mrb[14].mxu1 %v1816_v18 }
 0x378   : > { %10219 = vmatprep.mubr.f32.mxu1 %v9172_v19 }
 0x379   : > { %v1901_v32 = vpop.permute.xlu0 %1900 }
 0x37a   : > { %v1896_v6 = vpop.permute.xlu1 %1895 }
 0x37d   : > { %v1911_v17 = vpop.permute.xlu0 %1910 }
 0x42e   : > { %v10165_v28 = vpop.f32.mrb[0].mxu1 }
 0x42f   : > { %v1985_v29 = vadd.f32 %v10165_v28, %v1841_v21  ;;  %v1979_v30 = vpop.f32.mrb[1].mxu1 }
 0x430   : > { %v1980_v31 = vadd.f32 %v1979_v30, %v1836_v20  ;;  %v1906_v20 = vpop.permute.xlu1 %1905  ;;  %v9173_v30 = vld [vmem:[%s16305_s6 + $0x88] sm:$0xff] }
 0x431   : > { %v2059_v33 = vmax.f32 %v1985_v29, 0.0 }
 0x432   : > { %v2058_v36 = vmax.f32 %v1980_v31, 0.0  ;;  %v10168_v37 = vpop.f32.mrb[2].mxu1  ;;  %v9174_v31 = vld [vmem:[%s16305_s6 + $0x90] sm:$0xff] }
 0x433   : > { %v1995_v39 = vadd.f32 %v10168_v37, %v1851_v23  ;;  %v1989_v49 = vpop.f32.mrb[3].mxu1  ;;  %v9178_v37 = vld [vmem:[%s16305_s6 + $0xb0] sm:$0xff] }
 0x434   : > { %v11003_v51 = vpack.c.bf16 %v2059_v33, %v2058_v36  ;;  %v1990_v40 = vadd.f32 %v1989_v49, %v1846_v24  ;;  %v9175_v33 = vld [vmem:[%s16305_s6 + $0x98] sm:$0xff]  ;;  %v9177_v36 = vld [vmem:[%s16305_s6 + $0xa8] sm:$0xff] }
 0x435   : > { %v2061_v42 = vmax.f32 %v1995_v39, 0.0  ;;  %v9180_v39 = vld [vmem:[%s16305_s6 + $0xc0] sm:$0xff]  ;;  %v9181_v49 = vld [vmem:[%s16305_s6 + $0xc8] sm:$0xff] }
 0x436   : > { %v2060_v43 = vmax.f32 %v1990_v40, 0.0  ;;  %v10171_v55 = vpop.f32.mrb[4].mxu1  ;;  %11004 = vmatprep.subr.bf16.mxu1 %v11003_v51  ;;  %v9183_v40 = vld [vmem:[%s16305_s6 + $0xd8] sm:$0xff] }
 0x437   : > { %v2005_v57 = vadd.f32 %v10171_v55, %v1861_v26  ;;  %v1999_v44 = vpop.f32.mrb[5].mxu1  ;;  %11006 = vmatpush3.bf16.msra.mxu1 %v11003_v51  ;;  %v9182_v51 = vld [vmem:[%s16305_s6 + $0xd0] sm:$0xff] }
 0x438   : > { %v11007_v48 = vpack.c.bf16 %v2061_v42, %v2060_v43  ;;  %v2000_v50 = vadd.f32 %v1999_v44, %v1856_v27  ;;  %v9184_v42 = vld [vmem:[%s16305_s6 + $0xe0] sm:$0xff]  ;;  %v9185_v43 = vld [vmem:[%s16305_s6 + $0xe8] sm:$0xff]  ;;  %v9186_v55 = vld [vmem:[%s16305_s6 + $0xf0] sm:$0xff] }
 0x439   : > { %v2063_v53 = vmax.f32 %v2005_v57, 0.0  ;;  %v9187_v57 = vld [vmem:[%s16305_s6 + $0xf8] sm:$0xff]  ;;  %v9204_v44 = vld [vmem:[%s16305_s6 + $0x100] sm:$0xff] }
 0x43a   : > { %v2062_v54 = vmax.f32 %v2000_v50, 0.0  ;;  %v10174_v63 = vpop.f32.mrb[6].mxu1  ;;  %11008 = vmatprep.subr.bf16.mxu1 %v11007_v48  ;;  %v2686_v50 = vld [vmem:[#allocation8 + $0x30] sm:$0xff] }
 0x43b   : > { %v2015_v61 = vadd.f32 %v10174_v63, %v1871_v34  ;;  %v2009_v56 = vpop.f32.mrb[7].mxu1  ;;  %11010 = vmatpush3.bf16.msra.mxu1 %v11007_v48  ;;  %v9176_v34 = vld [vmem:[%s16305_s6 + $0xa0] sm:$0xff]  ;;  %v2685_v48 = vld [vmem:[#allocation8 + $0x28] sm:$0xff]  ;;  %v2116_v63 = vpop.permute.xlu0 %2115 }
 0x43c   : > { %v11011_v58 = vpack.c.bf16 %v2063_v53, %v2062_v54  ;;  %v2010_v47 = vadd.f32 %v2009_v56, %v1866_v38  ;;  %v9179_v38 = vld [vmem:[%s16305_s6 + $0xb8] sm:$0xff] }
 0x43d   : > { %v2065_v59 = vmax.f32 %v2015_v61, 0.0  ;;  %v2687_v53 = vld [vmem:[#allocation8 + $0x38] sm:$0xff]  ;;  %v2111_v61 = vpop.permute.xlu1 %2110 }
 0x43e   : > { %v2064_v3 = vmax.f32 %v2010_v47, 0.0  ;;  %v10177_v60 = vpop.f32.mrb[8].mxu1  ;;  %11012 = vmatprep.subr.bf16.mxu1 %v11011_v58  ;;  %v11071_v54 = vpack.c.bf16 %v2687_v53, %v2686_v50 }
 0x43f   : > { %v2025_v0 = vadd.f32 %v10177_v60, %v1881_v46  ;;  %v2019_v14 = vpop.f32.mrb[9].mxu1  ;;  %11014 = vmatpush3.bf16.msra.mxu1 %v11011_v58  ;;  %v2684_v46 = vld [vmem:[#allocation8 + $0x20] sm:$0xff]  ;;  %v2126_v56 = vpop.permute.xlu0 %2125 }
 0x440   : > { %v11015_v12 = vpack.c.bf16 %v2065_v59, %v2064_v3  ;;  %v2020_v1 = vadd.f32 %v2019_v14, %v1876_v52  ;;  %v11067_v52 = vpack.c.bf16 %v2685_v48, %v2684_v46 }
 0x441   : > { %v2067_v2 = vmax.f32 %v2025_v0, 0.0  ;;  %v2121_v58 = vpop.permute.xlu1 %2120 }
 0x442   : > { %v2066_v4 = vmax.f32 %v2020_v1, 0.0  ;;  %v10180_v25 = vpop.f32.mrb[10].mxu1  ;;  %11016 = vmatprep.subr.bf16.mxu1 %v11015_v12  ;;  %11068 = vmatprep.subr.bf16.mxu0 %v11067_v52 }
 0x443   : > { %v2035_v22 = vadd.f32 %v10180_v25, %v1891_v5  ;;  %v2029_v35 = vpop.f32.mrb[11].mxu1  ;;  %11018 = vmatpush3.bf16.msra.mxu1 %v11015_v12  ;;  %11070 = vmatpush3.bf16.msra.mxu0 %v11067_v52  ;;  %v2136_v47 = vpop.permute.xlu0 %2135 }
 0x444   : > { %v11019_v45 = vpack.c.bf16 %v2067_v2, %v2066_v4  ;;  %v2030_v41 = vadd.f32 %v2029_v35, %v1886_v62  ;;  %11072 = vmatprep.subr.bf16.mxu0 %v11071_v54 }
 0x445   : > { %v2069_v7 = vmax.f32 %v2035_v22, 0.0  ;;  %v2131_v59 = vpop.permute.xlu1 %2130 }
 0x446   : > { %v2068_v8 = vmax.f32 %v2030_v41, 0.0  ;;  %v10183_v9 = vpop.f32.mrb[12].mxu1  ;;  %11020 = vmatprep.subr.bf16.mxu1 %v11019_v45 }
 0x447   : > { %v2045_v10 = vadd.f32 %v10183_v9, %v1901_v32  ;;  %v2039_v11 = vpop.f32.mrb[13].mxu1  ;;  %11022 = vmatpush3.bf16.msra.mxu1 %v11019_v45  ;;  %11074 = vmatpush3.bf16.msra.mxu0 %v11071_v54  ;;  %v2146_v14 = vpop.permute.xlu0 %2145 }
 0x448   : > { %v11023_v13 = vpack.c.bf16 %v2069_v7, %v2068_v8  ;;  %v2040_v15 = vadd.f32 %v2039_v11, %v1896_v6 }
 0x449   : > { %v2071_v16 = vmax.f32 %v2045_v10, 0.0  ;;  %v2141_v2 = vpop.permute.xlu1 %2140 }
 0x44a   : > { %v2070_v18 = vmax.f32 %v2040_v15, 0.0  ;;  %v10186_v19 = vpop.f32.mrb[14].mxu1  ;;  %11024 = vmatprep.subr.bf16.mxu1 %v11023_v13 }
 0x44b   : > { %v2055_v21 = vadd.f32 %v10186_v19, %v1911_v17  ;;  %v2049_v23 = vpop.f32.mrb[15].mxu1  ;;  %11026 = vmatpush3.bf16.msra.mxu1 %v11023_v13  ;;  %v2156_v8 = vpop.permute.xlu0 %2155 }
 0x44c   : > { %v11027_v24 = vpack.c.bf16 %v2071_v16, %v2070_v18  ;;  %v2050_v26 = vadd.f32 %v2049_v23, %v1906_v20 }
 0x44d   : > { %v2073_v27 = vmax.f32 %v2055_v21, 0.0  ;;  %v2151_v11 = vpop.permute.xlu1 %2150 }
 0x44e   : > { %v2072_v28 = vmax.f32 %v2050_v26, 0.0  ;;  %11028 = vmatprep.subr.bf16.mxu1 %v11027_v24 }
 0x44f   : > { %11030 = vmatpush3.bf16.msra.mxu1 %v11027_v24  ;;  %v2166_v23 = vpop.permute.xlu0 %2165 }
 0x450   : > { %v11031_v29 = vpack.c.bf16 %v2073_v27, %v2072_v28 }
 0x451   : > { %v2161_v27 = vpop.permute.xlu1 %2160 }
 0x452   : > { %11032 = vmatprep.subr.bf16.mxu1 %v11031_v29 }
 0x453   : > { %11034 = vmatpush3.bf16.msra.mxu1 %v11031_v29 }
 0x456   : > { %10220 = vmatmul.mubr.f32.vlgmr.msra.gmra.mrb[16].mxu1 %v9173_v30 }
 0x457   : > { %10222 = vmatprep.mubr.f32.mxu1 %v9174_v31 }
 0x45a   : > { %10223 = vmatmul.mubr.f32.gmra.mrb[18].mxu1 %v9175_v33 }
 0x45b   : > { %10225 = vmatprep.mubr.f32.mxu1 %v9176_v34 }
 0x45e   : > { %10226 = vmatmul.mubr.f32.gmra.mrb[20].mxu1 %v9177_v36 }
 0x45f   : > { %10228 = vmatprep.mubr.f32.mxu1 %v9178_v37 }
 0x462   : > { %10229 = vmatmul.mubr.f32.gmra.mrb[22].mxu1 %v9179_v38 }
 0x463   : > { %10231 = vmatprep.mubr.f32.mxu1 %v9180_v39  ;;  %v2176_v39 = vpop.permute.xlu0 %2175 }
 0x466   : > { %10232 = vmatmul.mubr.f32.gmra.mrb[24].mxu1 %v9181_v49 }
 0x467   : > { %10234 = vmatprep.mubr.f32.mxu1 %v9182_v51  ;;  %v2186_v52 = vpop.permute.xlu0 %2185 }
 0x46a   : > { %10235 = vmatmul.mubr.f32.gmra.mrb[26].mxu1 %v9183_v40  ;;  %v2171_v40 = vpop.permute.xlu1 %2170 }
 0x46b   : > { %10237 = vmatprep.mubr.f32.mxu1 %v9184_v42 }
 0x46e   : > { %10238 = vmatmul.mubr.f32.gmra.mrb[28].mxu1 %v9185_v43 }
 0x46f   : > { %10240 = vmatprep.mubr.f32.mxu1 %v9186_v55 }
 0x472   : > { %10241 = vmatmul.mubr.f32.gmra.mrb[30].mxu1 %v9187_v57 }
 0x473   : > { %10275 = vmatprep.mubr.f32.mxu1 %v9204_v44 }
 0x529   : > { %v10221_v5 = vpop.f32.mrb[16].mxu1 }
 0x52a   : > { %v2260_v3 = vadd.f32 %v10221_v5, %v2116_v63  ;;  %v2254_v60 = vpop.f32.mrb[17].mxu1  ;;  %v2181_v63 = vpop.permute.xlu1 %2180 }
 0x52b   : > { %v2255_v62 = vadd.f32 %v2254_v60, %v2111_v61  ;;  %v9205_v60 = vld [vmem:[%s16305_s6 + $0x108] sm:$0xff] }
 0x52c   : > { %v2334_v0 = vmax.f32 %v2260_v3, 0.0 }
 0x52d   : > { %v2333_v12 = vmax.f32 %v2255_v62, 0.0  ;;  %v10224_v1 = vpop.f32.mrb[18].mxu1  ;;  %v9206_v62 = vld [vmem:[%s16305_s6 + $0x110] sm:$0xff] }
 0x52e   : > { %v2270_v4 = vadd.f32 %v10224_v1, %v2126_v56  ;;  %v2264_v25 = vpop.f32.mrb[19].mxu1  ;;  %v9210_v1 = vld [vmem:[%s16305_s6 + $0x130] sm:$0xff] }
 0x52f   : > { %v11035_v22 = vpack.c.bf16 %v2334_v0, %v2333_v12  ;;  %v2265_v35 = vadd.f32 %v2264_v25, %v2121_v58  ;;  %v9207_v0 = vld [vmem:[%s16305_s6 + $0x118] sm:$0xff]  ;;  %v9209_v12 = vld [vmem:[%s16305_s6 + $0x128] sm:$0xff] }
 0x530   : > { %v2336_v32 = vmax.f32 %v2270_v4, 0.0  ;;  %v9212_v4 = vld [vmem:[%s16305_s6 + $0x140] sm:$0xff]  ;;  %v9213_v25 = vld [vmem:[%s16305_s6 + $0x148] sm:$0xff] }
 0x531   : > { %v2335_v45 = vmax.f32 %v2265_v35, 0.0  ;;  %v10227_v41 = vpop.f32.mrb[20].mxu1  ;;  %11036 = vmatprep.subr.bf16.mxu1 %v11035_v22  ;;  %v9215_v35 = vld [vmem:[%s16305_s6 + $0x158] sm:$0xff] }
 0x532   : > { %v2280_v6 = vadd.f32 %v10227_v41, %v2136_v47  ;;  %v2274_v7 = vpop.f32.mrb[21].mxu1  ;;  %11038 = vmatpush3.bf16.msra.mxu1 %v11035_v22  ;;  %v9214_v22 = vld [vmem:[%s16305_s6 + $0x150] sm:$0xff] }
 0x533   : > { %v11039_v9 = vpack.c.bf16 %v2336_v32, %v2335_v45  ;;  %v2275_v10 = vadd.f32 %v2274_v7, %v2131_v59  ;;  %v9216_v32 = vld [vmem:[%s16305_s6 + $0x160] sm:$0xff]  ;;  %v9217_v45 = vld [vmem:[%s16305_s6 + $0x168] sm:$0xff]  ;;  %v9218_v41 = vld [vmem:[%s16305_s6 + $0x170] sm:$0xff] }
 0x534   : > { %v2338_v13 = vmax.f32 %v2280_v6, 0.0  ;;  %v9219_v6 = vld [vmem:[%s16305_s6 + $0x178] sm:$0xff]  ;;  %v2677_v7 = vld [vmem:[#allocation8] sm:$0xff] }
 0x535   : > { %v2337_v15 = vmax.f32 %v2275_v10, 0.0  ;;  %v10230_v16 = vpop.f32.mrb[22].mxu1  ;;  %11040 = vmatprep.subr.bf16.mxu1 %v11039_v9  ;;  %v14059_v10 = vld [vmem:[#allocation2] sm:$0xff] }
 0x536   : > { %v2290_v17 = vadd.f32 %v10230_v16, %v2146_v14  ;;  %v2284_v18 = vpop.f32.mrb[23].mxu1  ;;  %11042 = vmatpush3.bf16.msra.mxu1 %v11039_v9  ;;  %v9208_v14 = vld [vmem:[%s16305_s6 + $0x120] sm:$0xff]  ;;  %v14073_v16 = vld [vmem:[#allocation2 + $0x98] sm:$0xff] }
 0x537   : > { %v11043_v19 = vpack.c.bf16 %v2338_v13, %v2337_v15  ;;  %v2285_v20 = vadd.f32 %v2284_v18, %v2141_v2  ;;  %v9211_v2 = vld [vmem:[%s16305_s6 + $0x138] sm:$0xff]  ;;  %v14065_v13 = vld [vmem:[#allocation2 + $0x8] sm:$0xff]  ;;  %v14069_v15 = vld [vmem:[#allocation2 + $0x90] sm:$0xff] }
 0x538   : > { %v2340_v21 = vmax.f32 %v2290_v17, 0.0  ;;  %v3347_v17 = vld [vmem:[%s16307_s20] sm:$0xff]  ;;  %v3348_v18 = vld [vmem:[%s16307_s20 + $0x8] sm:$0xff] }
 0x539   : > { %v2339_v24 = vmax.f32 %v2285_v20, 0.0  ;;  %v10233_v26 = vpop.f32.mrb[24].mxu1  ;;  %11044 = vmatprep.subr.bf16.mxu1 %v11043_v19  ;;  %v11091_v20 = vpack.c.bf16 %v3348_v18, %v3347_v17 }
 0x53a   : > { %v2300_v28 = vadd.f32 %v10233_v26, %v2156_v8  ;;  %v2294_v29 = vpop.f32.mrb[25].mxu1  ;;  %11046 = vmatpush3.bf16.msra.mxu1 %v11043_v19  ;;  %v2678_v8 = vld [vmem:[#allocation8 + $0x8] sm:$0xff]  ;;  %v2386_v26 = vpop.permute.xlu1 %2385 }
 0x53b   : > { %v11047_v30 = vpack.c.bf16 %v2340_v21, %v2339_v24  ;;  %v2295_v31 = vadd.f32 %v2294_v29, %v2151_v11  ;;  %v14056_v9 = vpack.c.bf16 %v2678_v8, %v2677_v7  ;;  %v14061_v11 = vld [vmem:[#allocation2 + $0xb0] sm:$0xff]  ;;  %v3350_v21 = vld [vmem:[%s16307_s20 + $0x18] sm:$0xff]  ;;  %v2391_v24 = vpop.permute.xlu0 %2390 }
 0x53c   : > { %v2342_v33 = vmax.f32 %v2300_v28, 0.0  ;;  %3544 = vst.msk [vmem:[#allocation2] sm:$0xff] %vm969_vm0, %v14061_v11  ;;  %3545 = vst.msk [vmem:[#allocation2 + $0x8] sm:$0xff] %vm969_vm0, %v14061_v11  ;;  %v3349_v19 = vld [vmem:[%s16307_s20 + $0x10] sm:$0xff] }
 0x53d   : > { %v2341_v34 = vmax.f32 %v2295_v31, 0.0  ;;  %v10236_v36 = vpop.f32.mrb[26].mxu1  ;;  %11048 = vmatprep.subr.bf16.mxu1 %v11047_v30  ;;  %11076 = vmatprep.subr.bf16.mxu0 %v14056_v9  ;;  %3562 = vst.msk [vmem:[#allocation2 + $0x90] sm:$0xff] %vm969_vm0, %v14061_v11  ;;  %3563 = vst.msk [vmem:[#allocation2 + $0x98] sm:$0xff] %vm969_vm0, %v14061_v11 }
 0x53e   : > { %v2310_v37 = vadd.f32 %v10236_v36, %v2166_v23  ;;  %v2304_v38 = vpop.f32.mrb[27].mxu1  ;;  %11050 = vmatpush3.bf16.msra.mxu1 %v11047_v30  ;;  %v11095_v23 = vpack.c.bf16 %v3350_v21, %v3349_v19  ;;  %v2396_v28 = vpop.permute.xlu1 %2395 }
 0x53f   : > { %v11051_v49 = vpack.c.bf16 %v2342_v33, %v2341_v34  ;;  %v2305_v51 = vadd.f32 %v2304_v38, %v2161_v27  ;;  %v2401_v27 = vpop.permute.xlu0 %2400 }
 0x540   : > { %v2344_v42 = vmax.f32 %v2310_v37, 0.0 }
 0x541   : > { %v2343_v43 = vmax.f32 %v2305_v51, 0.0  ;;  %v10239_v55 = vpop.f32.mrb[28].mxu1  ;;  %11052 = vmatprep.subr.bf16.mxu1 %v11051_v49 }
 0x542   : > { %v2320_v57 = vadd.f32 %v10239_v55, %v2176_v39  ;;  %v2314_v44 = vpop.f32.mrb[29].mxu1  ;;  %11054 = vmatpush3.bf16.msra.mxu1 %v11051_v49  ;;  %v2406_v30 = vpop.permute.xlu1 %2405 }
 0x543   : > { %v11055_v46 = vpack.c.bf16 %v2344_v42, %v2343_v43  ;;  %v2315_v48 = vadd.f32 %v2314_v44, %v2171_v40  ;;  %v2411_v29 = vpop.permute.xlu0 %2410 }
 0x544   : > { %v2346_v50 = vmax.f32 %v2320_v57, 0.0 }
 0x545   : > { %v2345_v53 = vmax.f32 %v2315_v48, 0.0  ;;  %v10242_v54 = vpop.f32.mrb[30].mxu1  ;;  %11056 = vmatprep.subr.bf16.mxu1 %v11055_v46 }
 0x546   : > { %v2330_v61 = vadd.f32 %v10242_v54, %v2186_v52  ;;  %v2324_v56 = vpop.f32.mrb[31].mxu1  ;;  %11058 = vmatpush3.bf16.msra.mxu1 %v11055_v46  ;;  %v2416_v51 = vpop.permute.xlu1 %2415  ;;  %v2680_v54 = vld [vmem:[#allocation8 + $0x18] sm:$0xff] }
 0x547   : > { %v11059_v58 = vpack.c.bf16 %v2346_v50, %v2345_v53  ;;  %v2325_v47 = vadd.f32 %v2324_v56, %v2181_v63  ;;  %v2421_v38 = vpop.permute.xlu0 %2420  ;;  %v2679_v53 = vld [vmem:[#allocation8 + $0x10] sm:$0xff] }
 0x548   : > { %v2348_v59 = vmax.f32 %v2330_v61, 0.0 }
 0x549   : > { %v2347_v5 = vmax.f32 %v2325_v47, 0.0  ;;  %11060 = vmatprep.subr.bf16.mxu1 %v11059_v58 }
 0x54a   : > { %11062 = vmatpush3.bf16.msra.mxu1 %v11059_v58  ;;  %v2426_v63 = vpop.permute.xlu1 %2425 }
 0x54b   : > { %v11063_v3 = vpack.c.bf16 %v2348_v59, %v2347_v5  ;;  %v2431_v50 = vpop.permute.xlu0 %2430 }
 0x54d   : > { %11064 = vmatprep.subr.bf16.mxu1 %v11063_v3 }
 0x54e   : > { %11066 = vmatpush3.bf16.msra.mxu1 %v11063_v3 }
 0x54f   : > { %11092 = vmatprep.subr.bf16.mxu1 %v11091_v20 }
 0x551   : > { %10276 = vmatmul.mubr.f32.vlgmr.msra.gmra.mrb[32].mxu1 %v9205_v60  ;;  %v11079_v60 = vpack.c.bf16 %v2680_v54, %v2679_v53 }
 0x552   : > { %10278 = vmatprep.mubr.f32.mxu1 %v9206_v62  ;;  %11094 = vmatpush3.bf16.msra.mxu1 %v11091_v20 }
 0x553   : > { %11096 = vmatprep.subr.bf16.mxu1 %v11095_v23 }
 0x555   : > { %10279 = vmatmul.mubr.f32.gmra.mrb[34].mxu1 %v9207_v0  ;;  %v3049_v0 = vld [vmem:[#allocation8 + $0x40] sm:$0xff] }
 0x556   : > { %10281 = vmatprep.mubr.f32.mxu1 %v9208_v14  ;;  %11098 = vmatpush3.bf16.msra.mxu1 %v11095_v23  ;;  %v3050_v14 = vld [vmem:[#allocation8 + $0x48] sm:$0xff] }
 0x559   : > { %10282 = vmatmul.mubr.f32.gmra.mrb[36].mxu1 %v9209_v12 }
 0x55a   : > { %10284 = vmatprep.mubr.f32.mxu1 %v9210_v1  ;;  %v2441_v1 = vpop.permute.xlu0 %2440 }
 0x55d   : > { %10285 = vmatmul.mubr.f32.gmra.mrb[38].mxu1 %v9211_v2 }
 0x55e   : > { %10287 = vmatprep.mubr.f32.mxu1 %v9212_v4  ;;  %v2451_v21 = vpop.permute.xlu0 %2450 }
 0x561   : > { %10288 = vmatmul.mubr.f32.gmra.mrb[40].mxu1 %v9213_v25 }
 0x562   : > { %10290 = vmatprep.mubr.f32.mxu1 %v9214_v22  ;;  %v2436_v22 = vpop.permute.xlu1 %2435 }
 0x565   : > { %10291 = vmatmul.mubr.f32.gmra.mrb[42].mxu1 %v9215_v35 }
 0x566   : > { %10293 = vmatprep.mubr.f32.mxu1 %v9216_v32 }
 0x569   : > { %10294 = vmatmul.mubr.f32.gmra.mrb[44].mxu1 %v9217_v45 }
 0x56a   : > { %10296 = vmatprep.mubr.f32.mxu1 %v9218_v41  ;;  %v14113_v41 = vpack.c.bf16 %v3050_v14, %v3049_v0 }
 0x56d   : > { %10297 = vmatmul.mubr.f32.gmra.mrb[46].mxu1 %v9219_v6 }
 0x624   : > { %v10277_v31 = vpop.f32.mrb[32].mxu1 }
 0x625   : > { %v2535_v33 = vadd.f32 %v10277_v31, %v2391_v24  ;;  %v2529_v34 = vpop.f32.mrb[33].mxu1  ;;  %v2446_v24 = vpop.permute.xlu1 %2445 }
 0x626   : > { %v2530_v36 = vadd.f32 %v2529_v34, %v2386_v26 }
 0x627   : > { %v2609_v37 = vmax.f32 %v2535_v33, 0.0 }
 0x628   : > { %v2608_v39 = vmax.f32 %v2530_v36, 0.0  ;;  %v10280_v49 = vpop.f32.mrb[34].mxu1 }
 0x629   : > { %2646 = vst.msk [vmem:[#allocation2 + $0x18] sm:$0xff] %vm969_vm0, %v2609_v37  ;;  %v2545_v40 = vadd.f32 %v10280_v49, %v2401_v27  ;;  %v2539_v42 = vpop.f32.mrb[35].mxu1  ;;  %v2461_v37 = vpop.permute.xlu0 %2460 }
 0x62a   : > { %2645 = vst.msk [vmem:[#allocation2 + $0x10] sm:$0xff] %vm969_vm0, %v2608_v39  ;;  %v2540_v43 = vadd.f32 %v2539_v42, %v2396_v28 }
 0x62b   : > { %v2611_v55 = vmax.f32 %v2545_v40, 0.0 }
 0x62c   : > { %v2610_v57 = vmax.f32 %v2540_v43, 0.0  ;;  %v10283_v44 = vpop.f32.mrb[36].mxu1 }
 0x62d   : > { %2648 = vst.msk [vmem:[#allocation2 + $0x28] sm:$0xff] %vm969_vm0, %v2611_v55  ;;  %v2555_v46 = vadd.f32 %v10283_v44, %v2411_v29  ;;  %v2549_v48 = vpop.f32.mrb[37].mxu1 }
 0x62e   : > { %2647 = vst.msk [vmem:[#allocation2 + $0x20] sm:$0xff] %vm969_vm0, %v2610_v57  ;;  %v2550_v52 = vadd.f32 %v2549_v48, %v2406_v30 }
 0x62f   : > { %v2613_v61 = vmax.f32 %v2555_v46, 0.0 }
 0x630   : > { %v2612_v56 = vmax.f32 %v2550_v52, 0.0  ;;  %v10286_v58 = vpop.f32.mrb[38].mxu1  ;;  %v14093_v47 = vld [vmem:[#allocation2 + $0x18] sm:$0xff] }
 0x631   : > { %2650 = vst.msk [vmem:[#allocation2 + $0x38] sm:$0xff] %vm969_vm0, %v2613_v61  ;;  %v2565_v59 = vadd.f32 %v10286_v58, %v2421_v38  ;;  %v2559_v5 = vpop.f32.mrb[39].mxu1  ;;  %v14096_v3 = vld [vmem:[#allocation2 + $0x10] sm:$0xff]  ;;  %3547 = vst.msk [vmem:[#allocation2 + $0x18] sm:$0xff] %vm969_vm0, %v14061_v11  ;;  %v3052_v61 = vld [vmem:[#allocation8 + $0x58] sm:$0xff] }
 0x632   : > { %2649 = vst.msk [vmem:[#allocation2 + $0x30] sm:$0xff] %vm969_vm0, %v2612_v56  ;;  %v2560_v62 = vadd.f32 %v2559_v5, %v2416_v51  ;;  %10307 = vmatprep.mubr.msk.f32.mxu0 %vm2624_vm2, %v14096_v3  ;;  %3546 = vst.msk [vmem:[#allocation2 + $0x10] sm:$0xff] %vm969_vm0, %v14061_v11  ;;  %v2456_v51 = vpop.permute.xlu1 %2455 }
 0x633   : > { %v2615_v12 = vmax.f32 %v2565_v59, 0.0  ;;  %10308 = vmatmul.mubr.msk.f32.vlgmr.msra.gmra.mrb[16].mxu0 %vm2624_vm2, %v14093_v47 }
 0x634   : > { %v2614_v2 = vmax.f32 %v2560_v62, 0.0  ;;  %v10289_v4 = vpop.f32.mrb[40].mxu1  ;;  %11078 = vmatpush3.bf16.msra.mxu0 %v14056_v9  ;;  %v14108_v25 = vld [vmem:[#allocation2 + $0x28] sm:$0xff] }
 0x635   : > { %2652 = vst.msk [vmem:[#allocation2 + $0x48] sm:$0xff] %vm969_vm0, %v2615_v12  ;;  %v2575_v35 = vadd.f32 %v10289_v4, %v2431_v50  ;;  %v2569_v32 = vpop.f32.mrb[41].mxu1  ;;  %v14111_v45 = vld [vmem:[#allocation2 + $0x20] sm:$0xff]  ;;  %11080 = vmatprep.subr.bf16.mxu0 %v11079_v60  ;;  %3549 = vst.msk [vmem:[#allocation2 + $0x28] sm:$0xff] %vm969_vm0, %v14061_v11 }
 0x636   : > { %2651 = vst.msk [vmem:[#allocation2 + $0x40] sm:$0xff] %vm969_vm0, %v2614_v2  ;;  %v2570_v6 = vadd.f32 %v2569_v32, %v2426_v63  ;;  %10310 = vmatprep.mubr.msk.f32.mxu0 %vm2624_vm2, %v14111_v45  ;;  %3548 = vst.msk [vmem:[#allocation2 + $0x20] sm:$0xff] %vm969_vm0, %v14061_v11  ;;  %v3051_v63 = vld [vmem:[#allocation8 + $0x50] sm:$0xff] }
 0x637   : > { %v2617_v7 = vmax.f32 %v2575_v35, 0.0  ;;  %10311 = vmatmul.mubr.msk.f32.gmra.mrb[18].mxu0 %vm2624_vm2, %v14108_v25  ;;  %v11087_v56 = vpack.c.bf16 %v3052_v61, %v3051_v63 }
 0x638   : > { %v2616_v8 = vmax.f32 %v2570_v6, 0.0  ;;  %v10292_v9 = vpop.f32.mrb[42].mxu1  ;;  %v14124_v17 = vld [vmem:[#allocation2 + $0x38] sm:$0xff]  ;;  %11082 = vmatpush3.bf16.msra.mxu0 %v11079_v60  ;;  %v14240_v60 = vld [vmem:[#allocation11] ss:$0 sm:$0xff] }
 0x639   : > { %2654 = vst.msk [vmem:[#allocation2 + $0x58] sm:$0xff] %vm969_vm0, %v2617_v7  ;;  %v2585_v18 = vadd.f32 %v10292_v9, %v2441_v1  ;;  %v2579_v19 = vpop.f32.mrb[43].mxu1  ;;  %v14127_v20 = vld [vmem:[#allocation2 + $0x30] sm:$0xff]  ;;  %11084 = vmatprep.subr.bf16.mxu0 %v14113_v41  ;;  %3551 = vst.msk [vmem:[#allocation2 + $0x38] sm:$0xff] %vm969_vm0, %v14061_v11 }
 0x63a   : > { %2653 = vst.msk [vmem:[#allocation2 + $0x50] sm:$0xff] %vm969_vm0, %v2616_v8  ;;  %v2580_v23 = vadd.f32 %v2579_v19, %v2436_v22  ;;  %10313 = vmatprep.mubr.msk.f32.mxu0 %vm2624_vm2, %v14127_v20  ;;  %3550 = vst.msk [vmem:[#allocation2 + $0x30] sm:$0xff] %vm969_vm0, %v14061_v11 }
 0x63b   : > { %v2619_v26 = vmax.f32 %v2585_v18, 0.0  ;;  %10314 = vmatmul.mubr.msk.f32.gmra.mrb[20].mxu0 %vm2624_vm2, %v14124_v17 }
 0x63c   : > { %v2618_v27 = vmax.f32 %v2580_v23, 0.0  ;;  %v10295_v28 = vpop.f32.mrb[44].mxu1  ;;  %v14139_v29 = vld [vmem:[#allocation2 + $0x48] sm:$0xff] }
 0x63d   : > { %2656 = vst.msk [vmem:[#allocation2 + $0x68] sm:$0xff] %vm969_vm0, %v2619_v26  ;;  %v2595_v30 = vadd.f32 %v10295_v28, %v2451_v21  ;;  %v2589_v31 = vpop.f32.mrb[45].mxu1  ;;  %v14142_v33 = vld [vmem:[#allocation2 + $0x40] sm:$0xff]  ;;  %3553 = vst.msk [vmem:[#allocation2 + $0x48] sm:$0xff] %vm969_vm0, %v14061_v11 }
 0x63e   : > { %2655 = vst.msk [vmem:[#allocation2 + $0x60] sm:$0xff] %vm969_vm0, %v2618_v27  ;;  %v2590_v34 = vadd.f32 %v2589_v31, %v2446_v24  ;;  %10316 = vmatprep.mubr.msk.f32.mxu0 %vm2624_vm2, %v14142_v33  ;;  %3552 = vst.msk [vmem:[#allocation2 + $0x40] sm:$0xff] %vm969_vm0, %v14061_v11 }
 0x63f   : > { %v2621_v36 = vmax.f32 %v2595_v30, 0.0  ;;  %10317 = vmatmul.mubr.msk.f32.gmra.mrb[22].mxu0 %vm2624_vm2, %v14139_v29 }
 0x640   : > { %v2620_v38 = vmax.f32 %v2590_v34, 0.0  ;;  %v10298_v39 = vpop.f32.mrb[46].mxu1  ;;  %v14153_v49 = vld [vmem:[#allocation2 + $0x58] sm:$0xff] }
 0x641   : > { %2658 = vst.msk [vmem:[#allocation2 + $0x78] sm:$0xff] %vm969_vm0, %v2621_v36  ;;  %v2605_v40 = vadd.f32 %v10298_v39, %v2461_v37  ;;  %v2599_v42 = vpop.f32.mrb[47].mxu1  ;;  %v2671_v43 = vld [vmem:[#allocation2 + $0x50] sm:$0xff]  ;;  %3555 = vst.msk [vmem:[#allocation2 + $0x58] sm:$0xff] %vm969_vm0, %v14061_v11 }
 0x642   : > { %2657 = vst.msk [vmem:[#allocation2 + $0x70] sm:$0xff] %vm969_vm0, %v2620_v38  ;;  %v2600_v55 = vadd.f32 %v2599_v42, %v2456_v51  ;;  %10319 = vmatprep.mubr.msk.f32.mxu0 %vm2624_vm2, %v2671_v43  ;;  %3554 = vst.msk [vmem:[#allocation2 + $0x50] sm:$0xff] %vm969_vm0, %v14061_v11 }
 0x643   : > { %v2623_v57 = vmax.f32 %v2605_v40, 0.0  ;;  %10320 = vmatmul.mubr.msk.f32.gmra.mrb[24].mxu0 %vm2624_vm2, %v14153_v49 }
 0x644   : > { %v2622_v44 = vmax.f32 %v2600_v55, 0.0  ;;  %v2674_v46 = vld [vmem:[#allocation2 + $0x68] sm:$0xff] }
 0x645   : > { %2660 = vst.msk [vmem:[#allocation2 + $0x88] sm:$0xff] %vm969_vm0, %v2623_v57  ;;  %v2673_v48 = vld [vmem:[#allocation2 + $0x60] sm:$0xff]  ;;  %3557 = vst.msk [vmem:[#allocation2 + $0x68] sm:$0xff] %vm969_vm0, %v14061_v11 }
 0x646   : > { %2659 = vst.msk [vmem:[#allocation2 + $0x80] sm:$0xff] %vm969_vm0, %v2622_v44  ;;  %10322 = vmatprep.mubr.msk.f32.mxu0 %vm2624_vm2, %v2673_v48  ;;  %3556 = vst.msk [vmem:[#allocation2 + $0x60] sm:$0xff] %vm969_vm0, %v14061_v11 }
 0x647   : > { %10323 = vmatmul.mubr.msk.f32.gmra.mrb[26].mxu0 %vm2624_vm2, %v2674_v46 }
 0x648   : > { %v2676_v50 = vld [vmem:[#allocation2 + $0x78] sm:$0xff] }
 0x649   : > { %v2675_v52 = vld [vmem:[#allocation2 + $0x70] sm:$0xff]  ;;  %3559 = vst.msk [vmem:[#allocation2 + $0x78] sm:$0xff] %vm969_vm0, %v14061_v11 }
 0x64a   : > { %10325 = vmatprep.mubr.msk.f32.mxu0 %vm2624_vm2, %v2675_v52  ;;  %3558 = vst.msk [vmem:[#allocation2 + $0x70] sm:$0xff] %vm969_vm0, %v14061_v11 }
 0x64b   : > { %10326 = vmatmul.mubr.msk.f32.gmra.mrb[28].mxu0 %vm2624_vm2, %v2676_v50 }
 0x64c   : > { %v2682_v53 = vld [vmem:[#allocation2 + $0x88] sm:$0xff] }
 0x64d   : > { %v2681_v54 = vld [vmem:[#allocation2 + $0x80] sm:$0xff]  ;;  %3561 = vst.msk [vmem:[#allocation2 + $0x88] sm:$0xff] %vm969_vm0, %v14061_v11 }
 0x64e   : > { %10328 = vmatprep.mubr.msk.f32.mxu0 %vm2624_vm2, %v2681_v54  ;;  %3560 = vst.msk [vmem:[#allocation2 + $0x80] sm:$0xff] %vm969_vm0, %v14061_v11 }
 0x64f   : > { %10329 = vmatmul.mubr.msk.f32.gmra.mrb[30].mxu0 %vm2624_vm2, %v2682_v53 }
 0x650   : > { %10339 = vmatprep.mubr.msk.f32.mxu0 %vm2624_vm2, %v14059_v10  ;;  %v3601_v10 = vld [vmem:[#allocation14 + $0x10] sm:$0xff] }
 0x653   : > { %10340 = vmatmul.mubr.msk.f32.vlgmr.msra.gmra.mrb[16].mxu0 %vm2624_vm2, %v14065_v13  ;;  %v3602_v13 = vld [vmem:[#allocation14 + $0x18] sm:$0xff] }
 0x654   : > { %10342 = vmatprep.mubr.msk.f32.mxu0 %vm2624_vm2, %v14096_v3  ;;  %11086 = vmatpush3.bf16.msra.mxu0 %v14113_v41  ;;  %v11099_v58 = vpack.c.bf16 %v3602_v13, %v3601_v10 }
 0x655   : > { %11088 = vmatprep.subr.bf16.mxu0 %v11087_v56 }
 0x656   : > { %11100 = vmatprep.subr.bf16.mxu1 %v11099_v58 }
 0x657   : > { %10343 = vmatmul.mubr.msk.f32.gmra.mrb[18].mxu0 %vm2624_vm2, %v14093_v47  ;;  %v14237_v47 = vld [vmem:[#allocation9] ss:$0 sm:$0xff] }
 0x658   : > { %10345 = vmatprep.mubr.msk.f32.mxu0 %vm2624_vm2, %v14111_v45  ;;  %11090 = vmatpush3.bf16.msra.mxu0 %v11087_v56 }
 0x65b   : > { %10346 = vmatmul.mubr.msk.f32.gmra.mrb[20].mxu0 %vm2624_vm2, %v14108_v25 }
 0x65c   : > { %10348 = vmatprep.mubr.msk.f32.mxu0 %vm2624_vm2, %v14127_v20 }
 0x65f   : > { %10349 = vmatmul.mubr.msk.f32.gmra.mrb[22].mxu0 %vm2624_vm2, %v14124_v17 }
 0x660   : > { %10351 = vmatprep.mubr.msk.f32.mxu0 %vm2624_vm2, %v14142_v33 }
 0x663   : > { %10352 = vmatmul.mubr.msk.f32.gmra.mrb[24].mxu0 %vm2624_vm2, %v14139_v29 }
 0x664   : > { %10354 = vmatprep.mubr.msk.f32.mxu0 %vm2624_vm2, %v2671_v43 }
 0x667   : > { %10355 = vmatmul.mubr.msk.f32.gmra.mrb[26].mxu0 %vm2624_vm2, %v14153_v49 }
 0x668   : > { %10357 = vmatprep.mubr.msk.f32.mxu0 %vm2624_vm2, %v2673_v48 }
 0x66b   : > { %10358 = vmatmul.mubr.msk.f32.gmra.mrb[28].mxu0 %vm2624_vm2, %v2674_v46 }
 0x66c   : > { %10360 = vmatprep.mubr.msk.f32.mxu0 %vm2624_vm2, %v2675_v52 }
 0x66f   : > { %10361 = vmatmul.mubr.msk.f32.gmra.mrb[30].mxu0 %vm2624_vm2, %v2676_v50 }
 0x670   : > { %10371 = vmatprep.mubr.msk.f32.mxu0 %vm2624_vm2, %v14111_v45 }
 0x673   : > { %10372 = vmatmul.mubr.msk.f32.vlgmr.msra.gmra.mrb[16].mxu0 %vm2624_vm2, %v14108_v25 }
 0x674   : > { %10374 = vmatprep.mubr.msk.f32.mxu0 %vm2624_vm2, %v14127_v20 }
 0x677   : > { %10375 = vmatmul.mubr.msk.f32.gmra.mrb[18].mxu0 %vm2624_vm2, %v14124_v17 }
 0x678   : > { %10377 = vmatprep.mubr.msk.f32.mxu0 %vm2624_vm2, %v14142_v33 }
 0x67b   : > { %10378 = vmatmul.mubr.msk.f32.gmra.mrb[20].mxu0 %vm2624_vm2, %v14139_v29 }
 0x67c   : > { %10380 = vmatprep.mubr.msk.f32.mxu0 %vm2624_vm2, %v2671_v43 }
 0x67f   : > { %10381 = vmatmul.mubr.msk.f32.gmra.mrb[22].mxu0 %vm2624_vm2, %v14153_v49 }
 0x680   : > { %10383 = vmatprep.mubr.msk.f32.mxu0 %vm2624_vm2, %v2673_v48 }
 0x683   : > { %10384 = vmatmul.mubr.msk.f32.gmra.mrb[24].mxu0 %vm2624_vm2, %v2674_v46 }
 0x684   : > { %10386 = vmatprep.mubr.msk.f32.mxu0 %vm2624_vm2, %v2675_v52 }
 0x687   : > { %10387 = vmatmul.mubr.msk.f32.gmra.mrb[26].mxu0 %vm2624_vm2, %v2676_v50 }
 0x688   : > { %10389 = vmatprep.mubr.msk.f32.mxu0 %vm2624_vm2, %v2681_v54 }
 0x68b   : > { %10390 = vmatmul.mubr.msk.f32.gmra.mrb[28].mxu0 %vm2624_vm2, %v2682_v53 }
 0x68c   : > { %10392 = vmatprep.mubr.msk.f32.mxu0 %vm2624_vm2, %v14069_v15 }
 0x68f   : > { %10393 = vmatmul.mubr.msk.f32.gmra.mrb[30].mxu0 %vm2624_vm2, %v14073_v16  ;;  %v14244_v16 = vld [vmem:[#allocation12] ss:$0 sm:$0xff] }
 0x746   : > { %v10373_v59 = vpop.f32.mrb[16].mxu0 }
 0x747   : > { %v3270_v5 = vadd.f32 %v10373_v59, %v14237_v47  ;;  %v3167_v3 = vpop.f32.mrb[17].mxu0 }
 0x748   : > { %v3269_v62 = vadd.f32 %v14237_v47, %v3167_v3 }
 0x749   : > { %v3286_v0 = vmax.f32 %v3270_v5, 0.0 }
 0x74a   : > { %v3285_v14 = vmax.f32 %v3269_v62, 0.0  ;;  %v10376_v15 = vpop.f32.mrb[18].mxu0 }
 0x74b   : > { %v3309_v12 = vmul.f32 %v14240_v60, %v3286_v0  ;;  %v3272_v1 = vadd.f32 %v10376_v15, %v14237_v47  ;;  %v3177_v2 = vpop.f32.mrb[19].mxu0 }
 0x74c   : > { %v3308_v4 = vmul.f32 %v14240_v60, %v3285_v14  ;;  %v3271_v25 = vadd.f32 %v14237_v47, %v3177_v2 }
 0x74d   : > { %v3288_v22 = vmax.f32 %v3272_v1, 0.0  ;;  %v3332_v41 = vadd.f32 %v14244_v16, %v3309_v12 }
 0x74e   : > { %v3331_v35 = vadd.f32 %v14244_v16, %v3308_v4  ;;  %v3287_v32 = vmax.f32 %v3271_v25, 0.0  ;;  %v10379_v45 = vpop.f32.mrb[20].mxu0 }
 0x74f   : > { %v3311_v6 = vmul.f32 %v14240_v60, %v3288_v22  ;;  %v3274_v7 = vadd.f32 %v10379_v45, %v14237_v47  ;;  %v3187_v8 = vpop.f32.mrb[21].mxu0 }
 0x750   : > { %v3310_v9 = vmul.f32 %v14240_v60, %v3287_v32  ;;  %v3273_v17 = vadd.f32 %v14237_v47, %v3187_v8  ;;  %10403 = vmatprep.mubr.msk.f32.mxu1 %vm2624_vm2, %v3331_v35  ;;  %v3596_v8 = vld [vmem:[#allocation14] sm:$0xff] }
 0x751   : > { %v3290_v18 = vmax.f32 %v3274_v7, 0.0  ;;  %10404 = vmatmul.mubr.msk.f32.vlgmr.msra.gmra.mrb[48].mxu1 %vm2624_vm2, %v3332_v41  ;;  %v3334_v23 = vadd.f32 %v14244_v16, %v3311_v6 }
 0x752   : > { %v3333_v19 = vadd.f32 %v14244_v16, %v3310_v9  ;;  %v3289_v20 = vmax.f32 %v3273_v17, 0.0  ;;  %v10382_v21 = vpop.f32.mrb[22].mxu0  ;;  %11102 = vmatpush3.bf16.msra.mxu1 %v11099_v58  ;;  %v3597_v9 = vld [vmem:[#allocation14 + $0x8] sm:$0xff] }
 0x753   : > { %v3313_v24 = vmul.f32 %v14240_v60, %v3290_v18  ;;  %v3276_v26 = vadd.f32 %v10382_v21, %v14237_v47  ;;  %v3197_v27 = vpop.f32.mrb[23].mxu0  ;;  %v11103_v17 = vpack.c.bf16 %v3597_v9, %v3596_v8  ;;  %v14307_v18 = vld [vmem:[#allocation2] sm:$0xff] }
 0x754   : > { %v3312_v28 = vmul.f32 %v14240_v60, %v3289_v20  ;;  %v3275_v29 = vadd.f32 %v14237_v47, %v3197_v27  ;;  %10406 = vmatprep.mubr.msk.f32.mxu1 %vm2624_vm2, %v3333_v19  ;;  %v14309_v19 = vld [vmem:[#allocation2 + $0x8] sm:$0xff]  ;;  %5853 = vst [vmem:[#allocation2] sm:$0xff] %v14061_v11 }
 0x755   : > { %v3292_v30 = vmax.f32 %v3276_v26, 0.0  ;;  %10407 = vmatmul.mubr.msk.f32.gmra.mrb[50].mxu1 %vm2624_vm2, %v3334_v23  ;;  %v3336_v36 = vadd.f32 %v14244_v16, %v3313_v24  ;;  %11104 = vmatprep.subr.bf16.mxu1 %v11103_v17  ;;  %5854 = vst [vmem:[#allocation2 + $0x8] sm:$0xff] %v14061_v11  ;;  %v3964_v23 = vld [vmem:[#allocation14 + $0x20] sm:$0xff]  ;;  %v3965_v24 = vld [vmem:[#allocation14 + $0x28] sm:$0xff] }
 0x756   : > { %v3335_v31 = vadd.f32 %v14244_v16, %v3312_v28  ;;  %v3291_v33 = vmax.f32 %v3275_v29, 0.0  ;;  %v10385_v34 = vpop.f32.mrb[24].mxu0 }
 0x757   : > { %v3315_v37 = vmul.f32 %v14240_v60, %v3292_v30  ;;  %v3278_v38 = vadd.f32 %v10385_v34, %v14237_v47  ;;  %v3207_v39 = vpop.f32.mrb[25].mxu0  ;;  %v14323_v30 = vpack.c.bf16 %v3965_v24, %v3964_v23 }
 0x758   : > { %v3314_v49 = vmul.f32 %v14240_v60, %v3291_v33  ;;  %v3277_v51 = vadd.f32 %v14237_v47, %v3207_v39  ;;  %10409 = vmatprep.mubr.msk.f32.mxu1 %vm2624_vm2, %v3335_v31 }
 0x759   : > { %v3294_v40 = vmax.f32 %v3278_v38, 0.0  ;;  %10410 = vmatmul.mubr.msk.f32.gmra.mrb[52].mxu1 %vm2624_vm2, %v3336_v36  ;;  %v3338_v57 = vadd.f32 %v14244_v16, %v3315_v37 }
 0x75a   : > { %v3337_v42 = vadd.f32 %v14244_v16, %v3314_v49  ;;  %v3293_v43 = vmax.f32 %v3277_v51, 0.0  ;;  %v10388_v55 = vpop.f32.mrb[26].mxu0 }
 0x75b   : > { %v3317_v44 = vmul.f32 %v14240_v60, %v3294_v40  ;;  %v3280_v46 = vadd.f32 %v10388_v55, %v14237_v47  ;;  %v3217_v48 = vpop.f32.mrb[27].mxu0 }
 0x75c   : > { %v3316_v50 = vmul.f32 %v14240_v60, %v3293_v43  ;;  %v3279_v52 = vadd.f32 %v14237_v47, %v3217_v48  ;;  %10412 = vmatprep.mubr.msk.f32.mxu1 %vm2624_vm2, %v3337_v42 }
 0x75d   : > { %v3296_v53 = vmax.f32 %v3280_v46, 0.0  ;;  %10413 = vmatmul.mubr.msk.f32.gmra.mrb[54].mxu1 %vm2624_vm2, %v3338_v57  ;;  %v3340_v56 = vadd.f32 %v14244_v16, %v3317_v44 }
 0x75e   : > { %v3339_v54 = vadd.f32 %v14244_v16, %v3316_v50  ;;  %v3295_v63 = vmax.f32 %v3279_v52, 0.0  ;;  %v10391_v61 = vpop.f32.mrb[28].mxu0 }
 0x75f   : > { %v3319_v10 = vmul.f32 %v14240_v60, %v3296_v53  ;;  %v3282_v13 = vadd.f32 %v10391_v61, %v14237_v47  ;;  %v3227_v58 = vpop.f32.mrb[29].mxu0 }
 0x760   : > { %v3318_v59 = vmul.f32 %v14240_v60, %v3295_v63  ;;  %v3281_v5 = vadd.f32 %v14237_v47, %v3227_v58  ;;  %10415 = vmatprep.mubr.msk.f32.mxu1 %vm2624_vm2, %v3339_v54 }
 0x761   : > { %v3298_v3 = vmax.f32 %v3282_v13, 0.0  ;;  %10416 = vmatmul.mubr.msk.f32.gmra.mrb[56].mxu1 %vm2624_vm2, %v3340_v56  ;;  %v3342_v15 = vadd.f32 %v14244_v16, %v3319_v10  ;;  %v3962_v10 = vld [vmem:[#allocation2 + $0x98] sm:$0xff] }
 0x762   : > { %v3341_v62 = vadd.f32 %v14244_v16, %v3318_v59  ;;  %v3297_v0 = vmax.f32 %v3281_v5, 0.0  ;;  %v10394_v14 = vpop.f32.mrb[30].mxu0  ;;  %v14432_v13 = vld [vmem:[#allocation15] ss:$0 sm:$0xff] }
 0x763   : > { %v3321_v12 = vmul.f32 %v14240_v60, %v3298_v3  ;;  %v3284_v1 = vadd.f32 %v10394_v14, %v14237_v47  ;;  %v3237_v2 = vpop.f32.mrb[31].mxu0 }
 0x764   : > { %v3320_v4 = vmul.f32 %v14240_v60, %v3297_v0  ;;  %v3283_v25 = vadd.f32 %v14237_v47, %v3237_v2  ;;  %10418 = vmatprep.mubr.msk.f32.mxu1 %vm2624_vm2, %v3341_v62 }
 0x765   : > { %v3300_v22 = vmax.f32 %v3284_v1, 0.0  ;;  %10419 = vmatmul.mubr.msk.f32.gmra.mrb[58].mxu1 %vm2624_vm2, %v3342_v15  ;;  %v3344_v45 = vadd.f32 %v14244_v16, %v3321_v12 }
 0x766   : > { %v3343_v35 = vadd.f32 %v14244_v16, %v3320_v4  ;;  %v3299_v32 = vmax.f32 %v3283_v25, 0.0 }
 0x767   : > { %v3323_v41 = vmul.f32 %v14240_v60, %v3300_v22 }
 0x768   : > { %v3322_v6 = vmul.f32 %v14240_v60, %v3299_v32  ;;  %10421 = vmatprep.mubr.msk.f32.mxu1 %vm2624_vm2, %v3343_v35 }
 0x769   : > { %10422 = vmatmul.mubr.msk.f32.gmra.mrb[60].mxu1 %vm2624_vm2, %v3344_v45  ;;  %v3346_v7 = vadd.f32 %v14244_v16, %v3323_v41 }
 0x76a   : > { %v3345_v47 = vadd.f32 %v14244_v16, %v3322_v6 }
 0x76c   : > { %10424 = vmatprep.mubr.msk.f32.mxu1 %vm2624_vm2, %v3345_v47 }
 0x76d   : > { %10425 = vmatmul.mubr.msk.f32.gmra.mrb[62].mxu1 %vm2624_vm2, %v3346_v7 }
 0x824   : > { %v10405_v60 = vpop.f32.mrb[48].mxu1 }
 0x825   : > { %3565 = vst.msk [vmem:[#allocation2 + $0x18] sm:$0xff] %vm969_vm0, %v10405_v60  ;;  %v3465_v16 = vpop.f32.mrb[49].mxu1 }
 0x826   : > { %3564 = vst.msk [vmem:[#allocation2 + $0x10] sm:$0xff] %vm969_vm0, %v3465_v16 }
 0x828   : > { %v10408_v20 = vpop.f32.mrb[50].mxu1 }
 0x829   : > { %3567 = vst.msk [vmem:[#allocation2 + $0x28] sm:$0xff] %vm969_vm0, %v10408_v20  ;;  %v3475_v21 = vpop.f32.mrb[51].mxu1 }
 0x82a   : > { %3566 = vst.msk [vmem:[#allocation2 + $0x20] sm:$0xff] %vm969_vm0, %v3475_v21 }
 0x82c   : > { %v14317_v26 = vld [vmem:[#allocation2 + $0x18] sm:$0xff]  ;;  %v10411_v27 = vpop.f32.mrb[52].mxu1 }
 0x82d   : > { %5200 = vst [vmem:[#allocation2 + $0x18] sm:$0xff] %v14061_v11  ;;  %3569 = vst.msk [vmem:[#allocation2 + $0x38] sm:$0xff] %vm969_vm0, %v10411_v27  ;;  %v3485_v28 = vpop.f32.mrb[53].mxu1  ;;  %v14321_v29 = vld [vmem:[#allocation2 + $0x10] sm:$0xff] }
 0x82e   : > { %3568 = vst.msk [vmem:[#allocation2 + $0x30] sm:$0xff] %vm969_vm0, %v3485_v28  ;;  %10431 = vmatprep.mubr.msk.f32.mxu1 %vm969_vm0, %v14321_v29  ;;  %5199 = vst [vmem:[#allocation2 + $0x10] sm:$0xff] %v14061_v11 }
 0x82f   : > { %10432 = vmatmul.mubr.msk.f32.vlgmr.msra.gmra.mrb[64].mxu1 %vm969_vm0, %v14317_v26 }
 0x830   : > { %v10414_v31 = vpop.f32.mrb[54].mxu1  ;;  %11106 = vmatpush3.bf16.msra.mxu1 %v11103_v17  ;;  %v14331_v33 = vld [vmem:[#allocation2 + $0x28] sm:$0xff] }
 0x831   : > { %3571 = vst.msk [vmem:[#allocation2 + $0x48] sm:$0xff] %vm969_vm0, %v10414_v31  ;;  %v3495_v34 = vpop.f32.mrb[55].mxu1  ;;  %v14334_v36 = vld [vmem:[#allocation2 + $0x20] sm:$0xff]  ;;  %11108 = vmatprep.subr.bf16.mxu1 %v14323_v30  ;;  %5202 = vst [vmem:[#allocation2 + $0x28] sm:$0xff] %v14061_v11 }
 0x832   : > { %3570 = vst.msk [vmem:[#allocation2 + $0x40] sm:$0xff] %vm969_vm0, %v3495_v34  ;;  %10434 = vmatprep.mubr.msk.f32.mxu1 %vm969_vm0, %v14334_v36  ;;  %5201 = vst [vmem:[#allocation2 + $0x20] sm:$0xff] %v14061_v11 }
 0x833   : > { %10435 = vmatmul.mubr.msk.f32.gmra.mrb[66].mxu1 %vm969_vm0, %v14331_v33 }
 0x834   : > { %v10417_v37 = vpop.f32.mrb[56].mxu1  ;;  %v14344_v38 = vld [vmem:[#allocation2 + $0x38] sm:$0xff] }
 0x835   : > { %3573 = vst.msk [vmem:[#allocation2 + $0x58] sm:$0xff] %vm969_vm0, %v10417_v37  ;;  %v3505_v39 = vpop.f32.mrb[57].mxu1  ;;  %v14347_v49 = vld [vmem:[#allocation2 + $0x30] sm:$0xff]  ;;  %5204 = vst [vmem:[#allocation2 + $0x38] sm:$0xff] %v14061_v11 }
 0x836   : > { %3572 = vst.msk [vmem:[#allocation2 + $0x50] sm:$0xff] %vm969_vm0, %v3505_v39  ;;  %10437 = vmatprep.mubr.msk.f32.mxu1 %vm969_vm0, %v14347_v49  ;;  %5203 = vst [vmem:[#allocation2 + $0x30] sm:$0xff] %v14061_v11 }
 0x837   : > { %10438 = vmatmul.mubr.msk.f32.gmra.mrb[68].mxu1 %vm969_vm0, %v14344_v38 }
 0x838   : > { %v10420_v51 = vpop.f32.mrb[58].mxu1  ;;  %v14356_v40 = vld [vmem:[#allocation2 + $0x48] sm:$0xff] }
 0x839   : > { %3575 = vst.msk [vmem:[#allocation2 + $0x68] sm:$0xff] %vm969_vm0, %v10420_v51  ;;  %v3515_v42 = vpop.f32.mrb[59].mxu1  ;;  %v3588_v43 = vld [vmem:[#allocation2 + $0x40] sm:$0xff]  ;;  %5206 = vst [vmem:[#allocation2 + $0x48] sm:$0xff] %v14061_v11 }
 0x83a   : > { %3574 = vst.msk [vmem:[#allocation2 + $0x60] sm:$0xff] %vm969_vm0, %v3515_v42  ;;  %10440 = vmatprep.mubr.msk.f32.mxu1 %vm969_vm0, %v3588_v43  ;;  %5205 = vst [vmem:[#allocation2 + $0x40] sm:$0xff] %v14061_v11 }
 0x83b   : > { %10441 = vmatmul.mubr.msk.f32.gmra.mrb[70].mxu1 %vm969_vm0, %v14356_v40 }
 0x83c   : > { %v10423_v55 = vpop.f32.mrb[60].mxu1  ;;  %v3591_v57 = vld [vmem:[#allocation2 + $0x58] sm:$0xff] }
 0x83d   : > { %3577 = vst.msk [vmem:[#allocation2 + $0x78] sm:$0xff] %vm969_vm0, %v10423_v55  ;;  %v3525_v44 = vpop.f32.mrb[61].mxu1  ;;  %v3590_v46 = vld [vmem:[#allocation2 + $0x50] sm:$0xff]  ;;  %5208 = vst [vmem:[#allocation2 + $0x58] sm:$0xff] %v14061_v11 }
 0x83e   : > { %3576 = vst.msk [vmem:[#allocation2 + $0x70] sm:$0xff] %vm969_vm0, %v3525_v44  ;;  %10443 = vmatprep.mubr.msk.f32.mxu1 %vm969_vm0, %v3590_v46  ;;  %5207 = vst [vmem:[#allocation2 + $0x50] sm:$0xff] %v14061_v11 }
 0x83f   : > { %10444 = vmatmul.mubr.msk.f32.gmra.mrb[72].mxu1 %vm969_vm0, %v3591_v57 }
 0x840   : > { %v10426_v48 = vpop.f32.mrb[62].mxu1  ;;  %v3593_v50 = vld [vmem:[#allocation2 + $0x68] sm:$0xff] }
 0x841   : > { %3579 = vst.msk [vmem:[#allocation2 + $0x88] sm:$0xff] %vm969_vm0, %v10426_v48  ;;  %v3535_v52 = vpop.f32.mrb[63].mxu1  ;;  %v3592_v53 = vld [vmem:[#allocation2 + $0x60] sm:$0xff]  ;;  %5210 = vst [vmem:[#allocation2 + $0x68] sm:$0xff] %v14061_v11 }
 0x842   : > { %3578 = vst.msk [vmem:[#allocation2 + $0x80] sm:$0xff] %vm969_vm0, %v3535_v52  ;;  %10446 = vmatprep.mubr.msk.f32.mxu1 %vm969_vm0, %v3592_v53  ;;  %5209 = vst [vmem:[#allocation2 + $0x60] sm:$0xff] %v14061_v11 }
 0x843   : > { %10447 = vmatmul.mubr.msk.f32.gmra.mrb[74].mxu1 %vm969_vm0, %v3593_v50 }
 0x844   : > { %v3595_v54 = vld [vmem:[#allocation2 + $0x78] sm:$0xff] }
 0x845   : > { %v3594_v63 = vld [vmem:[#allocation2 + $0x70] sm:$0xff]  ;;  %5212 = vst [vmem:[#allocation2 + $0x78] sm:$0xff] %v14061_v11 }
 0x846   : > { %10449 = vmatprep.mubr.msk.f32.mxu1 %vm969_vm0, %v3594_v63  ;;  %5211 = vst [vmem:[#allocation2 + $0x70] sm:$0xff] %v14061_v11 }
 0x847   : > { %10450 = vmatmul.mubr.msk.f32.gmra.mrb[76].mxu1 %vm969_vm0, %v3595_v54 }
 0x848   : > { %v3599_v61 = vld [vmem:[#allocation2 + $0x88] sm:$0xff] }
 0x849   : > { %v3598_v56 = vld [vmem:[#allocation2 + $0x80] sm:$0xff]  ;;  %5214 = vst [vmem:[#allocation2 + $0x88] sm:$0xff] %v14061_v11 }
 0x84a   : > { %10452 = vmatprep.mubr.msk.f32.mxu1 %vm969_vm0, %v3598_v56  ;;  %5213 = vst [vmem:[#allocation2 + $0x80] sm:$0xff] %v14061_v11  ;;  %v3961_v11 = vld [vmem:[#allocation2 + $0x90] sm:$0xff] }
 0x84b   : > { %10453 = vmatmul.mubr.msk.f32.gmra.mrb[78].mxu1 %vm969_vm0, %v3599_v61 }
 0x84c   : > { %10459 = vmatprep.mubr.msk.f32.mxu1 %vm969_vm0, %v14307_v18 }
 0x84f   : > { %10460 = vmatmul.mubr.msk.f32.vlgmr.msra.gmra.mrb[64].mxu1 %vm969_vm0, %v14309_v19 }
 0x850   : > { %10462 = vmatprep.mubr.msk.f32.mxu1 %vm969_vm0, %v14321_v29  ;;  %11110 = vmatpush3.bf16.msra.mxu1 %v14323_v30 }
 0x853   : > { %10463 = vmatmul.mubr.msk.f32.gmra.mrb[66].mxu1 %vm969_vm0, %v14317_v26 }
 0x854   : > { %10465 = vmatprep.mubr.msk.f32.mxu1 %vm969_vm0, %v14334_v36 }
 0x857   : > { %10466 = vmatmul.mubr.msk.f32.gmra.mrb[68].mxu1 %vm969_vm0, %v14331_v33 }
 0x858   : > { %10468 = vmatprep.mubr.msk.f32.mxu1 %vm969_vm0, %v14347_v49 }
 0x85b   : > { %10469 = vmatmul.mubr.msk.f32.gmra.mrb[70].mxu1 %vm969_vm0, %v14344_v38 }
 0x85c   : > { %10471 = vmatprep.mubr.msk.f32.mxu1 %vm969_vm0, %v3588_v43 }
 0x85f   : > { %10472 = vmatmul.mubr.msk.f32.gmra.mrb[72].mxu1 %vm969_vm0, %v14356_v40 }
 0x860   : > { %10474 = vmatprep.mubr.msk.f32.mxu1 %vm969_vm0, %v3590_v46 }
 0x863   : > { %10475 = vmatmul.mubr.msk.f32.gmra.mrb[74].mxu1 %vm969_vm0, %v3591_v57 }
 0x864   : > { %10477 = vmatprep.mubr.msk.f32.mxu1 %vm969_vm0, %v3592_v53 }
 0x867   : > { %10478 = vmatmul.mubr.msk.f32.gmra.mrb[76].mxu1 %vm969_vm0, %v3593_v50 }
 0x868   : > { %10480 = vmatprep.mubr.msk.f32.mxu1 %vm969_vm0, %v3594_v63 }
 0x86b   : > { %10481 = vmatmul.mubr.msk.f32.gmra.mrb[78].mxu1 %vm969_vm0, %v3595_v54 }
 0x86c   : > { %10487 = vmatprep.mubr.msk.f32.mxu1 %vm969_vm0, %v14334_v36 }
 0x86f   : > { %10488 = vmatmul.mubr.msk.f32.vlgmr.msra.gmra.mrb[64].mxu1 %vm969_vm0, %v14331_v33 }
 0x870   : > { %10490 = vmatprep.mubr.msk.f32.mxu1 %vm969_vm0, %v14347_v49 }
 0x873   : > { %10491 = vmatmul.mubr.msk.f32.gmra.mrb[66].mxu1 %vm969_vm0, %v14344_v38 }
 0x874   : > { %10493 = vmatprep.mubr.msk.f32.mxu1 %vm969_vm0, %v3588_v43 }
 0x877   : > { %10494 = vmatmul.mubr.msk.f32.gmra.mrb[68].mxu1 %vm969_vm0, %v14356_v40 }
 0x878   : > { %10496 = vmatprep.mubr.msk.f32.mxu1 %vm969_vm0, %v3590_v46 }
 0x87b   : > { %10497 = vmatmul.mubr.msk.f32.gmra.mrb[70].mxu1 %vm969_vm0, %v3591_v57 }
 0x87c   : > { %10499 = vmatprep.mubr.msk.f32.mxu1 %vm969_vm0, %v3592_v53 }
 0x87f   : > { %10500 = vmatmul.mubr.msk.f32.gmra.mrb[72].mxu1 %vm969_vm0, %v3593_v50 }
 0x880   : > { %10502 = vmatprep.mubr.msk.f32.mxu1 %vm969_vm0, %v3594_v63 }
 0x883   : > { %10503 = vmatmul.mubr.msk.f32.gmra.mrb[74].mxu1 %vm969_vm0, %v3595_v54 }
 0x884   : > { %10505 = vmatprep.mubr.msk.f32.mxu1 %vm969_vm0, %v3598_v56 }
 0x887   : > { %10506 = vmatmul.mubr.msk.f32.gmra.mrb[76].mxu1 %vm969_vm0, %v3599_v61 }
 0x888   : > { %10508 = vmatprep.mubr.msk.f32.mxu1 %vm969_vm0, %v3961_v11 }
 0x88b   : > { %10509 = vmatmul.mubr.msk.f32.gmra.mrb[78].mxu1 %vm969_vm0, %v3962_v10 }
 0x942   : > { %v10489_v58 = vpop.f32.mrb[64].mxu1 }
 0x943   : > { %v14435_v59 = vadd.f32 %v10489_v58, %v14432_v13  ;;  %v4080_v5 = vpop.f32.mrb[65].mxu1 }
 0x944   : > { %v14438_v3 = vadd.f32 %v14432_v13, %v4080_v5 }
 0x945   : > { %v9353_v62 = vmul.f32 -1.442695, %v14435_v59 }
 0x946   : > { %v9352_v0 = vmul.f32 -1.442695, %v14438_v3  ;;  %v10492_v14 = vpop.f32.mrb[66].mxu1 }
 0x947   : > { %12433 = vpow2.f32 %v9353_v62  ;;  %v14443_v15 = vadd.f32 %v10492_v14, %v14432_v13  ;;  %v4090_v12 = vpop.f32.mrb[67].mxu1 }
 0x948   : > { %12435 = vpow2.f32 %v9352_v0  ;;  %v14446_v1 = vadd.f32 %v14432_v13, %v4090_v12 }
 0x949   : > { %v9355_v2 = vmul.f32 -1.442695, %v14443_v15 }
 0x94a   : > { %v9354_v4 = vmul.f32 -1.442695, %v14446_v1  ;;  %v10495_v25 = vpop.f32.mrb[68].mxu1 }
 0x94b   : > { %12437 = vpow2.f32 %v9355_v2  ;;  %v14451_v22 = vadd.f32 %v10495_v25, %v14432_v13  ;;  %v4100_v35 = vpop.f32.mrb[69].mxu1 }
 0x94c   : > { %12439 = vpow2.f32 %v9354_v4  ;;  %v14454_v32 = vadd.f32 %v14432_v13, %v4100_v35 }
 0x94d   : > { %v9357_v45 = vmul.f32 -1.442695, %v14451_v22 }
 0x94e   : > { %v9356_v41 = vmul.f32 -1.442695, %v14454_v32  ;;  %v10498_v6 = vpop.f32.mrb[70].mxu1 }
 0x94f   : > { %12441 = vpow2.f32 %v9357_v45  ;;  %v14459_v47 = vadd.f32 %v10498_v6, %v14432_v13  ;;  %v4110_v7 = vpop.f32.mrb[71].mxu1 }
 0x950   : > { %12443 = vpow2.f32 %v9356_v41  ;;  %v14462_v8 = vadd.f32 %v14432_v13, %v4110_v7 }
 0x951   : > { %v12434_v9 = vpop.eup %12433  ;;  %v9359_v17 = vmul.f32 -1.442695, %v14459_v47 }
 0x952   : > { %v12436_v18 = vpop.eup %12435  ;;  %v4247_v19 = vadd.f32 1.0, %v12434_v9  ;;  %v9358_v60 = vmul.f32 -1.442695, %v14462_v8  ;;  %v10501_v16 = vpop.f32.mrb[72].mxu1 }
 0x953   : > { %v4246_v20 = vadd.f32 1.0, %v12436_v18  ;;  %12445 = vpow2.f32 %v9359_v17  ;;  %v14467_v21 = vadd.f32 %v10501_v16, %v14432_v13  ;;  %v4120_v23 = vpop.f32.mrb[73].mxu1 }
 0x954   : > { %12447 = vrcp.f32 %v4247_v19  ;;  %v14470_v24 = vadd.f32 %v14432_v13, %v4120_v23 }
 0x955   : > { %v12438_v26 = vpop.eup %12437  ;;  %12449 = vrcp.f32 %v4246_v20  ;;  %v9361_v27 = vmul.f32 -1.442695, %v14467_v21 }
 0x956   : > { %v12440_v28 = vpop.eup %12439  ;;  %v4249_v29 = vadd.f32 1.0, %v12438_v26  ;;  %12451 = vpow2.f32 %v9358_v60  ;;  %v9360_v30 = vmul.f32 -1.442695, %v14470_v24  ;;  %v10504_v31 = vpop.f32.mrb[74].mxu1 }
 0x957   : > { %v4248_v33 = vadd.f32 1.0, %v12440_v28  ;;  %12453 = vpow2.f32 %v9361_v27  ;;  %v14475_v34 = vadd.f32 %v10504_v31, %v14432_v13  ;;  %v4130_v36 = vpop.f32.mrb[75].mxu1 }
 0x958   : > { %12455 = vrcp.f32 %v4249_v29  ;;  %v14478_v37 = vadd.f32 %v14432_v13, %v4130_v36  ;;  %v4374_v36 = vld [vmem:[%s16226_s12] sm:$0xff] }
 0x959   : > { %v12442_v38 = vpop.eup %12441  ;;  %12457 = vrcp.f32 %v4248_v33  ;;  %v9363_v39 = vmul.f32 -1.442695, %v14475_v34  ;;  %10543 = vmatprep.mubr.f32.mxu0 %v4374_v36 }
 0x95a   : > { %v12444_v49 = vpop.eup %12443  ;;  %v4251_v51 = vadd.f32 1.0, %v12442_v38  ;;  %12459 = vpow2.f32 %v9360_v30  ;;  %v9362_v40 = vmul.f32 -1.442695, %v14478_v37  ;;  %v10507_v42 = vpop.f32.mrb[76].mxu1 }
 0x95b   : > { %v4250_v43 = vadd.f32 1.0, %v12444_v49  ;;  %12461 = vpow2.f32 %v9363_v39  ;;  %v14483_v55 = vadd.f32 %v10507_v42, %v14432_v13  ;;  %v4140_v57 = vpop.f32.mrb[77].mxu1  ;;  %v4393_v42 = vld [vmem:[%s16227_s13 + $0x18] sm:$0xff] }
 0x95c   : > { %12463 = vrcp.f32 %v4251_v51  ;;  %v14486_v44 = vadd.f32 %v14432_v13, %v4140_v57  ;;  %v4391_v51 = vld [vmem:[%s16227_s13 + $0x8] sm:$0xff] }
 0x95d   : > { %v12446_v46 = vpop.eup %12445  ;;  %12465 = vrcp.f32 %v4250_v43  ;;  %v9365_v48 = vmul.f32 -1.442695, %v14483_v55  ;;  %v4392_v43 = vld [vmem:[%s16227_s13 + $0x10] sm:$0xff]  ;;  %v4395_v57 = vld [vmem:[%s16227_s13 + $0x28] sm:$0xff] }
 0x95e   : > { %v12448_v50 = vpop.eup %12447  ;;  %v4253_v52 = vadd.f32 1.0, %v12446_v46  ;;  %12467 = vpow2.f32 %v9362_v40  ;;  %v9364_v53 = vmul.f32 -1.442695, %v14486_v44  ;;  %v10510_v54 = vpop.f32.mrb[78].mxu1  ;;  %v4390_v40 = vld [vmem:[%s16227_s13] sm:$0xff] }
 0x95f   : > { %v12450_v63 = vpop.eup %12449  ;;  %12469 = vpow2.f32 %v9365_v48  ;;  %v14491_v61 = vadd.f32 %v10510_v54, %v14432_v13  ;;  %4312 = vrot.lane.b32.xlu0 %v12448_v50, %s13030_s16  ;;  %v4150_v56 = vpop.f32.mrb[79].mxu1  ;;  %v4394_v46 = vld [vmem:[%s16227_s13 + $0x20] sm:$0xff]  ;;  %v4397_v48 = vld [vmem:[%s16227_s13 + $0x38] sm:$0xff]  ;;  %v4396_v50 = vld [vmem:[%s16227_s13 + $0x30] sm:$0xff] }
 0x960   : > { %v12452_v11 = vpop.eup %12451  ;;  %12471 = vrcp.f32 %v4253_v52  ;;  %v14495_v10 = vadd.f32 %v14432_v13, %v4150_v56  ;;  %4310 = vrot.lane.b32.xlu1 %v12450_v63, %s13030_s16  ;;  %v4399_v52 = vld [vmem:[%s16227_s13 + $0x48] sm:$0xff]  ;;  %v4401_v54 = vld [vmem:[%s16227_s13 + $0x58] sm:$0xff]  ;;  %v4400_v63 = vld [vmem:[%s16227_s13 + $0x50] sm:$0xff] }
 0x961   : > { %v12454_v58 = vpop.eup %12453  ;;  %v4252_v5 = vadd.f32 1.0, %v12452_v11  ;;  %12473 = vpow2.f32 %v9364_v53  ;;  %v9367_v62 = vmul.f32 -1.442695, %v14491_v61  ;;  %v4398_v53 = vld [vmem:[%s16227_s13 + $0x40] sm:$0xff]  ;;  %v4403_v56 = vld [vmem:[%s16227_s13 + $0x68] sm:$0xff] }
 0x962   : > { %v12456_v0 = vpop.eup %12455  ;;  %v4255_v14 = vadd.f32 1.0, %v12454_v58  ;;  %v9366_v12 = vmul.f32 -1.442695, %v14495_v10  ;;  %v4402_v11 = vld [vmem:[%s16227_s13 + $0x60] sm:$0xff]  ;;  %v4405_v58 = vld [vmem:[%s16227_s13 + $0x78] sm:$0xff] }
 0x963   : > { %v12458_v2 = vpop.eup %12457  ;;  %12475 = vrcp.f32 %v4252_v5  ;;  %4316 = vrot.lane.b32.xlu0 %v12456_v0, %s13030_s16  ;;  %v4404_v5 = vld [vmem:[%s16227_s13 + $0x70] sm:$0xff]  ;;  %v9384_v0 = vld [vmem:[%s16227_s13 + $0x80] sm:$0xff] }
 0x964   : > { %v12460_v4 = vpop.eup %12459  ;;  %12477 = vrcp.f32 %v4255_v14  ;;  %4314 = vrot.lane.b32.xlu1 %v12458_v2, %s13030_s16  ;;  %v9387_v14 = vld [vmem:[%s16227_s13 + $0x98] sm:$0xff]  ;;  %v9389_v2 = vld [vmem:[%s16227_s13 + $0xa8] sm:$0xff] }
 0x965   : > { %v12462_v13 = vpop.eup %12461  ;;  %v4254_v25 = vadd.f32 1.0, %v12460_v4  ;;  %12479 = vpow2.f32 %v9367_v62  ;;  %v9385_v62 = vld [vmem:[%s16227_s13 + $0x88] sm:$0xff]  ;;  %v9388_v4 = vld [vmem:[%s16227_s13 + $0xa0] sm:$0xff] }
 0x966   : > { %v12464_v35 = vpop.eup %12463  ;;  %v4257_v45 = vadd.f32 1.0, %v12462_v13  ;;  %12481 = vpow2.f32 %v9366_v12  ;;  %v9386_v12 = vld [vmem:[%s16227_s13 + $0x90] sm:$0xff]  ;;  %v9391_v13 = vld [vmem:[%s16227_s13 + $0xb8] sm:$0xff] }
 0x967   : > { %v12466_v41 = vpop.eup %12465  ;;  %12483 = vrcp.f32 %v4254_v25  ;;  %4320 = vrot.lane.b32.xlu0 %v12464_v35, %s13030_s16  ;;  %v9390_v25 = vld [vmem:[%s16227_s13 + $0xb0] sm:$0xff]  ;;  %v9393_v35 = vld [vmem:[%s16227_s13 + $0xc8] sm:$0xff] }
 0x968   : > { %v12468_v6 = vpop.eup %12467  ;;  %12485 = vrcp.f32 %v4257_v45  ;;  %4318 = vrot.lane.b32.xlu1 %v12466_v41, %s13030_s16  ;;  %v9392_v45 = vld [vmem:[%s16227_s13 + $0xc0] sm:$0xff]  ;;  %v9395_v41 = vld [vmem:[%s16227_s13 + $0xd8] sm:$0xff] }
 0x969   : > { %v12470_v7 = vpop.eup %12469  ;;  %v4256_v9 = vadd.f32 1.0, %v12468_v6  ;;  %v9394_v6 = vld [vmem:[%s16227_s13 + $0xd0] sm:$0xff] }
 0x96a   : > { %v12472_v17 = vpop.eup %12471  ;;  %v4259_v18 = vadd.f32 1.0, %v12470_v7  ;;  %v9397_v7 = vld [vmem:[%s16227_s13 + $0xe8] sm:$0xff] }
 0x96b   : > { %v12474_v19 = vpop.eup %12473  ;;  %12487 = vrcp.f32 %v4256_v9  ;;  %4324 = vrot.lane.b32.xlu0 %v12472_v17, %s13030_s16  ;;  %v9396_v9 = vld [vmem:[%s16227_s13 + $0xe0] sm:$0xff]  ;;  %v9399_v17 = vld [vmem:[%s16227_s13 + $0xf8] sm:$0xff] }
 0x96c   : > { %12489 = vrcp.f32 %v4259_v18  ;;  %v4258_v60 = vadd.f32 1.0, %v12474_v19  ;;  %v9398_v18 = vld [vmem:[%s16227_s13 + $0xf0] sm:$0xff]  ;;  %v9417_v19 = vld [vmem:[%s16227_s13 + $0x108] sm:$0xff] }
 0x96d   : > { %v12476_v16 = vpop.eup %12475 }
 0x96e   : > { %v12478_v20 = vpop.eup %12477  ;;  %12491 = vrcp.f32 %v4258_v60  ;;  %4322 = vrot.lane.b32.xlu1 %v12476_v16, %s13030_s16  ;;  %v9416_v60 = vld [vmem:[%s16227_s13 + $0x100] sm:$0xff]  ;;  %v9419_v16 = vld [vmem:[%s16227_s13 + $0x118] sm:$0xff] }
 0x96f   : > { %v12480_v23 = vpop.eup %12479  ;;  %4328 = vrot.lane.b32.xlu0 %v12478_v20, %s13030_s16  ;;  %v9418_v20 = vld [vmem:[%s16227_s13 + $0x110] sm:$0xff] }
 0x970   : > { %v12482_v26 = vpop.eup %12481  ;;  %v4261_v27 = vadd.f32 1.0, %v12480_v23  ;;  %v9421_v23 = vld [vmem:[%s16227_s13 + $0x128] sm:$0xff] }
 0x971   : > { %v12484_v28 = vpop.eup %12483  ;;  %v4260_v29 = vadd.f32 1.0, %v12482_v26  ;;  %v9420_v26 = vld [vmem:[%s16227_s13 + $0x120] sm:$0xff] }
 0x972   : > { %v12486_v30 = vpop.eup %12485  ;;  %12493 = vrcp.f32 %v4261_v27  ;;  %4326 = vrot.lane.b32.xlu1 %v12484_v28, %s13030_s16  ;;  %v9423_v27 = vld [vmem:[%s16227_s13 + $0x138] sm:$0xff]  ;;  %v9422_v28 = vld [vmem:[%s16227_s13 + $0x130] sm:$0xff] }
 0x973   : > { %12495 = vrcp.f32 %v4260_v29  ;;  %4332 = vrot.lane.b32.xlu0 %v12486_v30, %s13030_s16  ;;  %v9425_v29 = vld [vmem:[%s16227_s13 + $0x148] sm:$0xff]  ;;  %v9424_v30 = vld [vmem:[%s16227_s13 + $0x140] sm:$0xff] }
 0x975   : > { %v12488_v31 = vpop.eup %12487 }
 0x976   : > { %v12490_v33 = vpop.eup %12489  ;;  %4330 = vrot.lane.b32.xlu1 %v12488_v31, %s13030_s16 }
 0x977   : > { %4336 = vrot.lane.b32.xlu0 %v12490_v33, %s13030_s16 }
 0x978   : > { %v12492_v38 = vpop.eup %12491 }
 0x97a   : > { %4334 = vrot.lane.b32.xlu1 %v12492_v38, %s13030_s16  ;;  %v9427_v38 = vld [vmem:[%s16227_s13 + $0x158] sm:$0xff] }
 0x97c   : > { %v12494_v39 = vpop.eup %12493 }
 0x97d   : > { %v12496_v49 = vpop.eup %12495  ;;  %4340 = vrot.lane.b32.xlu0 %v12494_v39, %s13030_s16 }
 0x97e   : > { %4338 = vrot.lane.b32.xlu1 %v12496_v49, %s13030_s16  ;;  %v9426_v49 = vld [vmem:[%s16227_s13 + $0x150] sm:$0xff]  ;;  %s16310_s16 = sld [smem:[#allocation46_spill]] }
 0x981   : > { %4413 = vperm.xlu0 %12367, %v4391_v51  }
 0x982   : > { %4408 = vperm.xlu1 %12368, %v4390_v40  }
 0x985   : > { %4423 = vperm.xlu0 %12367, %v4393_v42  }
 0x986   : > { %4418 = vperm.xlu1 %12368, %v4392_v43  }
 0x989   : > { %4433 = vperm.xlu0 %12367, %v4395_v57  }
 0x98a   : > { %4428 = vperm.xlu1 %12368, %v4394_v46  }
 0x98d   : > { %4443 = vperm.xlu0 %12367, %v4397_v48  }
 0x98e   : > { %4438 = vperm.xlu1 %12368, %v4396_v50  }
 0x991   : > { %4453 = vperm.xlu0 %12367, %v4399_v52   ;;  %v9431_v52 = vld [vmem:[%s16227_s13 + $0x178] sm:$0xff] }
 0x992   : > { %4448 = vperm.xlu1 %12368, %v4398_v53  }
 0x995   : > { %4463 = vperm.xlu0 %12367, %v4401_v54  }
 0x996   : > { %4458 = vperm.xlu1 %12368, %v4400_v63  }
 0x999   : > { %4473 = vperm.xlu0 %12367, %v4403_v56  }
 0x99a   : > { %4468 = vperm.xlu1 %12368, %v4402_v11  }
 0x99d   : > { %4483 = vperm.xlu0 %12367, %v4405_v58  }
 0x99e   : > { %4478 = vperm.xlu1 %12368, %v4404_v5  }
 0x9a1   : > { %4688 = vperm.xlu0 %12367, %v9385_v62  }
 0x9a2   : > { %4683 = vperm.xlu1 %12368, %v9384_v0  }
 0x9a5   : > { %4698 = vperm.xlu0 %12367, %v9387_v14  }
 0x9a6   : > { %4693 = vperm.xlu1 %12368, %v9386_v12  }
 0x9a9   : > { %4708 = vperm.xlu0 %12367, %v9389_v2  }
 0x9aa   : > { %4703 = vperm.xlu1 %12368, %v9388_v4  }
 0x9ad   : > { %4718 = vperm.xlu0 %12367, %v9391_v13  }
 0x9ae   : > { %4713 = vperm.xlu1 %12368, %v9390_v25  }
 0x9b1   : > { %4728 = vperm.xlu0 %12367, %v9393_v35  }
 0x9b2   : > { %4723 = vperm.xlu1 %12368, %v9392_v45  }
 0x9b5   : > { %4738 = vperm.xlu0 %12367, %v9395_v41  }
 0x9b6   : > { %4733 = vperm.xlu1 %12368, %v9394_v6  }
 0x9b9   : > { %4748 = vperm.xlu0 %12367, %v9397_v7   ;;  %v4379_v7 = vld [vmem:[%s16226_s12 + $0x28] sm:$0xff] }
 0x9ba   : > { %4743 = vperm.xlu1 %12368, %v9396_v9   ;;  %v4380_v9 = vld [vmem:[%s16226_s12 + $0x30] sm:$0xff] }
 0x9bd   : > { %4758 = vperm.xlu0 %12367, %v9399_v17   ;;  %v4381_v17 = vld [vmem:[%s16226_s12 + $0x38] sm:$0xff] }
 0x9be   : > { %4753 = vperm.xlu1 %12368, %v9398_v18   ;;  %v4382_v18 = vld [vmem:[%s16226_s12 + $0x40] sm:$0xff] }
 0x9c1   : > { %4963 = vperm.xlu0 %12367, %v9417_v19   ;;  %v4383_v19 = vld [vmem:[%s16226_s12 + $0x48] sm:$0xff] }
 0x9c2   : > { %4958 = vperm.xlu1 %12368, %v9416_v60   ;;  %v4384_v60 = vld [vmem:[%s16226_s12 + $0x50] sm:$0xff] }
 0x9c5   : > { %4973 = vperm.xlu0 %12367, %v9419_v16   ;;  %v4385_v16 = vld [vmem:[%s16226_s12 + $0x58] sm:$0xff] }
 0x9c6   : > { %4968 = vperm.xlu1 %12368, %v9418_v20   ;;  %v4386_v20 = vld [vmem:[%s16226_s12 + $0x60] sm:$0xff] }
 0x9c9   : > { %4983 = vperm.xlu0 %12367, %v9421_v23   ;;  %v4387_v23 = vld [vmem:[%s16226_s12 + $0x68] sm:$0xff] }
 0x9ca   : > { %4978 = vperm.xlu1 %12368, %v9420_v26   ;;  %v4388_v26 = vld [vmem:[%s16226_s12 + $0x70] sm:$0xff] }
 0x9cd   : > { %4993 = vperm.xlu0 %12367, %v9423_v27   ;;  %v4389_v27 = vld [vmem:[%s16226_s12 + $0x78] sm:$0xff] }
 0x9ce   : > { %4988 = vperm.xlu1 %12368, %v9422_v28   ;;  %v9368_v28 = vld [vmem:[%s16226_s12 + $0x80] sm:$0xff] }
 0x9d1   : > { %5003 = vperm.xlu0 %12367, %v9425_v29   ;;  %v4313_v31 = vpop.permute.xlu0 %4312 }
 0x9d2   : > { %4998 = vperm.xlu1 %12368, %v9424_v30   ;;  %v4359_v33 = vmul.f32 %v4313_v31, %v14435_v59  ;;  %v4311_v36 = vpop.permute.xlu1 %4310  ;;  %v9429_v59 = vld [vmem:[%s16227_s13 + $0x168] sm:$0xff] }
 0x9d3   : > { %v4358_v39 = vmul.f32 %v4311_v36, %v14438_v3  ;;  %v9428_v3 = vld [vmem:[%s16227_s13 + $0x160] sm:$0xff] }
 0x9d5   : > { %v11111_v51 = vpack.c.bf16 %v4359_v33, %v4358_v39  ;;  %5013 = vperm.xlu0 %12367, %v9427_v38   ;;  %v4317_v40 = vpop.permute.xlu0 %4316 }
 0x9d6   : > { %5008 = vperm.xlu1 %12368, %v9426_v49   ;;  %v4361_v42 = vmul.f32 %v4317_v40, %v14443_v15  ;;  %v4315_v43 = vpop.permute.xlu1 %4314 }
 0x9d7   : > { %v4360_v57 = vmul.f32 %v4315_v43, %v14446_v1  ;;  %11112 = vmatprep.subr.bf16.mxu0 %v11111_v51  ;;  %v9430_v1 = vld [vmem:[%s16227_s13 + $0x170] sm:$0xff] }
 0x9d8   : > { %11114 = vmatpush3.bf16.msra.mxu0 %v11111_v51 }
 0x9d9   : > { %v11115_v46 = vpack.c.bf16 %v4361_v42, %v4360_v57  ;;  %5023 = vperm.xlu0 %12367, %v9429_v59   ;;  %v4321_v48 = vpop.permute.xlu0 %4320 }
 0x9da   : > { %5018 = vperm.xlu1 %12368, %v9428_v3   ;;  %v4363_v50 = vmul.f32 %v4321_v48, %v14451_v22  ;;  %v4319_v15 = vpop.permute.xlu1 %4318 }
 0x9db   : > { %v4362_v53 = vmul.f32 %v4319_v15, %v14454_v32  ;;  %11116 = vmatprep.subr.bf16.mxu0 %v11115_v46 }
 0x9dc   : > { %11118 = vmatpush3.bf16.msra.mxu0 %v11115_v46 }
 0x9dd   : > { %v11119_v54 = vpack.c.bf16 %v4363_v50, %v4362_v53  ;;  %5033 = vperm.xlu0 %12367, %v9431_v52   ;;  %v4325_v63 = vpop.permute.xlu0 %4324 }
 0x9de   : > { %5028 = vperm.xlu1 %12368, %v9430_v1   ;;  %v4365_v56 = vmul.f32 %v4325_v63, %v14459_v47 }
 0x9df   : > { %11120 = vmatprep.subr.bf16.mxu0 %v11119_v54 }
 0x9e0   : > { %v4323_v22 = vpop.permute.xlu1 %4322  ;;  %11122 = vmatpush3.bf16.msra.mxu0 %v11119_v54 }
 0x9e1   : > { %v4364_v11 = vmul.f32 %v4323_v22, %v14462_v8  ;;  %v4329_v58 = vpop.permute.xlu0 %4328 }
 0x9e2   : > { %v4367_v32 = vmul.f32 %v4329_v58, %v14467_v21 }
 0x9e3   : > { %v11123_v5 = vpack.c.bf16 %v4365_v56, %v4364_v11 }
 0x9e4   : > { %v4327_v62 = vpop.permute.xlu1 %4326 }
 0x9e5   : > { %v4366_v0 = vmul.f32 %v4327_v62, %v14470_v24  ;;  %11124 = vmatprep.subr.bf16.mxu0 %v11123_v5  ;;  %v4333_v14 = vpop.permute.xlu0 %4332 }
 0x9e6   : > { %11126 = vmatpush3.bf16.msra.mxu0 %v11123_v5  ;;  %v4369_v2 = vmul.f32 %v4333_v14, %v14475_v34 }
 0x9e7   : > { %v11127_v12 = vpack.c.bf16 %v4367_v32, %v4366_v0 }
 0x9e8   : > { %v4331_v4 = vpop.permute.xlu1 %4330 }
 0x9e9   : > { %v4368_v47 = vmul.f32 %v4331_v4, %v14478_v37  ;;  %11128 = vmatprep.subr.bf16.mxu0 %v11127_v12  ;;  %v4337_v13 = vpop.permute.xlu0 %4336 }
 0x9ea   : > { %11130 = vmatpush3.bf16.msra.mxu0 %v11127_v12  ;;  %v4371_v25 = vmul.f32 %v4337_v13, %v14483_v55  ;;  %v4375_v55 = vld [vmem:[%s16226_s12 + $0x8] sm:$0xff] }
 0x9eb   : > { %v11131_v8 = vpack.c.bf16 %v4369_v2, %v4368_v47 }
 0x9ec   : > { %v4335_v35 = vpop.permute.xlu1 %4334 }
 0x9ed   : > { %v4370_v21 = vmul.f32 %v4335_v35, %v14486_v44  ;;  %11132 = vmatprep.subr.bf16.mxu0 %v11131_v8  ;;  %v4376_v44 = vld [vmem:[%s16226_s12 + $0x10] sm:$0xff] }
 0x9ee   : > { %11134 = vmatpush3.bf16.msra.mxu0 %v11131_v8 }
 0x9ef   : > { %v11135_v24 = vpack.c.bf16 %v4371_v25, %v4370_v21  ;;  %v4341_v45 = vpop.permute.xlu0 %4340 }
 0x9f0   : > { %v4373_v41 = vmul.f32 %v4341_v45, %v14491_v61  ;;  %v4339_v6 = vpop.permute.xlu1 %4338  ;;  %v4377_v61 = vld [vmem:[%s16226_s12 + $0x18] sm:$0xff] }
 0x9f1   : > { %v4372_v34 = vmul.f32 %v4339_v6, %v14495_v10  ;;  %11136 = vmatprep.subr.bf16.mxu0 %v11135_v24  ;;  %v4378_v10 = vld [vmem:[%s16226_s12 + $0x20] sm:$0xff] }
 0x9f2   : > { %11138 = vmatpush3.bf16.msra.mxu0 %v11135_v24 }
 0x9f3   : > { %v11139_v37 = vpack.c.bf16 %v4373_v41, %v4372_v34 }
 0x9f5   : > { %11140 = vmatprep.subr.bf16.mxu0 %v11139_v37 }
 0x9f6   : > { %11142 = vmatpush3.bf16.msra.mxu0 %v11139_v37 }
 0x9f9   : > { %10544 = vmatmul.mubr.f32.vlgmr.msra.gmra.mrb[32].mxu0 %v4375_v55 }
 0x9fa   : > { %10546 = vmatprep.mubr.f32.mxu0 %v4376_v44 }
 0x9fd   : > { %10547 = vmatmul.mubr.f32.gmra.mrb[34].mxu0 %v4377_v61 }
 0x9fe   : > { %10549 = vmatprep.mubr.f32.mxu0 %v4378_v10 }
 0xa00   : > { %v4414_v29 = vpop.permute.xlu0 %4413 }
 0xa01   : > { %10550 = vmatmul.mubr.f32.gmra.mrb[36].mxu0 %v4379_v7  ;;  %v4409_v30 = vpop.permute.xlu1 %4408 }
 0xa02   : > { %10552 = vmatprep.mubr.f32.mxu0 %v4380_v9 }
 0xa04   : > { %v4424_v31 = vpop.permute.xlu0 %4423 }
 0xa05   : > { %10553 = vmatmul.mubr.f32.gmra.mrb[38].mxu0 %v4381_v17  ;;  %v4419_v33 = vpop.permute.xlu1 %4418 }
 0xa06   : > { %10555 = vmatprep.mubr.f32.mxu0 %v4382_v18 }
 0xa08   : > { %v4434_v36 = vpop.permute.xlu0 %4433 }
 0xa09   : > { %10556 = vmatmul.mubr.f32.gmra.mrb[40].mxu0 %v4383_v19  ;;  %v4429_v38 = vpop.permute.xlu1 %4428 }
 0xa0a   : > { %10558 = vmatprep.mubr.f32.mxu0 %v4384_v60 }
 0xa0c   : > { %v4444_v43 = vpop.permute.xlu0 %4443 }
 0xa0d   : > { %10559 = vmatmul.mubr.f32.gmra.mrb[42].mxu0 %v4385_v16  ;;  %v4439_v3 = vpop.permute.xlu1 %4438 }
 0xa0e   : > { %10561 = vmatprep.mubr.f32.mxu0 %v4386_v20 }
 0xa10   : > { %v4454_v56 = vpop.permute.xlu0 %4453 }
 0xa11   : > { %10562 = vmatmul.mubr.f32.gmra.mrb[44].mxu0 %v4387_v23  ;;  %v4449_v58 = vpop.permute.xlu1 %4448 }
 0xa12   : > { %10564 = vmatprep.mubr.f32.mxu0 %v4388_v26 }
 0xa14   : > { %v4464_v47 = vpop.permute.xlu0 %4463 }
 0xa15   : > { %10565 = vmatmul.mubr.f32.gmra.mrb[46].mxu0 %v4389_v27  ;;  %v4459_v25 = vpop.permute.xlu1 %4458 }
 0xa16   : > { %10599 = vmatprep.mubr.f32.mxu0 %v9368_v28 }
 0xa18   : > { %v4474_v44 = vpop.permute.xlu0 %4473 }
 0xa19   : > { %v4469_v7 = vpop.permute.xlu1 %4468 }
 0xa1c   : > { %v4484_v26 = vpop.permute.xlu0 %4483 }
 0xacc   : > { %v10545_v39 = vpop.f32.mrb[32].mxu0 }
 0xacd   : > { %v4558_v49 = vadd.f32 %v10545_v39, %v4414_v29  ;;  %v4552_v51 = vpop.f32.mrb[33].mxu0  ;;  %v4479_v29 = vpop.permute.xlu1 %4478 }
 0xace   : > { %v4553_v40 = vadd.f32 %v4552_v51, %v4409_v30  ;;  %v9369_v51 = vld [vmem:[%s16226_s12 + $0x88] sm:$0xff] }
 0xacf   : > { %v4632_v42 = vmax.f32 %v4558_v49, 0.0 }
 0xad0   : > { %v4631_v59 = vmax.f32 %v4553_v40, 0.0  ;;  %v10548_v57 = vpop.f32.mrb[34].mxu0  ;;  %v9370_v40 = vld [vmem:[%s16226_s12 + $0x90] sm:$0xff] }
 0xad1   : > { %v4568_v46 = vadd.f32 %v10548_v57, %v4424_v31  ;;  %v4562_v48 = vpop.f32.mrb[35].mxu0  ;;  %v9374_v57 = vld [vmem:[%s16226_s12 + $0xb0] sm:$0xff] }
 0xad2   : > { %v11143_v50 = vpack.c.bf16 %v4632_v42, %v4631_v59  ;;  %v4563_v15 = vadd.f32 %v4562_v48, %v4419_v33  ;;  %v9371_v42 = vld [vmem:[%s16226_s12 + $0x98] sm:$0xff]  ;;  %v9373_v59 = vld [vmem:[%s16226_s12 + $0xa8] sm:$0xff] }
 0xad3   : > { %v4634_v52 = vmax.f32 %v4568_v46, 0.0  ;;  %v9376_v46 = vld [vmem:[%s16226_s12 + $0xc0] sm:$0xff]  ;;  %v9377_v48 = vld [vmem:[%s16226_s12 + $0xc8] sm:$0xff] }
 0xad4   : > { %v4633_v53 = vmax.f32 %v4563_v15, 0.0  ;;  %v10551_v1 = vpop.f32.mrb[36].mxu0  ;;  %11144 = vmatprep.subr.bf16.mxu0 %v11143_v50  ;;  %v9379_v15 = vld [vmem:[%s16226_s12 + $0xd8] sm:$0xff] }
 0xad5   : > { %v4578_v54 = vadd.f32 %v10551_v1, %v4434_v36  ;;  %v4572_v63 = vpop.f32.mrb[37].mxu0  ;;  %11146 = vmatpush3.bf16.msra.mxu0 %v11143_v50  ;;  %v9378_v50 = vld [vmem:[%s16226_s12 + $0xd0] sm:$0xff] }
 0xad6   : > { %v11147_v22 = vpack.c.bf16 %v4634_v52, %v4633_v53  ;;  %v4573_v11 = vadd.f32 %v4572_v63, %v4429_v38  ;;  %v9380_v52 = vld [vmem:[%s16226_s12 + $0xe0] sm:$0xff]  ;;  %v9381_v53 = vld [vmem:[%s16226_s12 + $0xe8] sm:$0xff]  ;;  %v9382_v1 = vld [vmem:[%s16226_s12 + $0xf0] sm:$0xff] }
 0xad7   : > { %v4636_v5 = vmax.f32 %v4578_v54, 0.0  ;;  %v9383_v54 = vld [vmem:[%s16226_s12 + $0xf8] sm:$0xff]  ;;  %v9400_v63 = vld [vmem:[%s16226_s12 + $0x100] sm:$0xff] }
 0xad8   : > { %v4635_v32 = vmax.f32 %v4573_v11, 0.0  ;;  %v10554_v62 = vpop.f32.mrb[38].mxu0  ;;  %11148 = vmatprep.subr.bf16.mxu0 %v11147_v22  ;;  %10655 = vmatprep.mubr.f32.mxu1 %v9400_v63  ;;  %v9434_v11 = vld [vmem:[%s16228_s14 + $0x90] sm:$0xff] }
 0xad9   : > { %v4588_v0 = vadd.f32 %v10554_v62, %v4444_v43  ;;  %v4582_v14 = vpop.f32.mrb[39].mxu0  ;;  %11150 = vmatpush3.bf16.msra.mxu0 %v11147_v22  ;;  %v9372_v43 = vld [vmem:[%s16226_s12 + $0xa0] sm:$0xff]  ;;  %v9433_v22 = vld [vmem:[%s16228_s14 + $0x88] sm:$0xff] }
 0xada   : > { %v11151_v12 = vpack.c.bf16 %v4636_v5, %v4635_v32  ;;  %v4583_v2 = vadd.f32 %v4582_v14, %v4439_v3  ;;  %v9375_v3 = vld [vmem:[%s16226_s12 + $0xb8] sm:$0xff]  ;;  %v9436_v62 = vld [vmem:[%s16228_s14 + $0xa0] sm:$0xff] }
 0xadb   : > { %v4638_v4 = vmax.f32 %v4588_v0, 0.0  ;;  %v9435_v5 = vld [vmem:[%s16228_s14 + $0x98] sm:$0xff]  ;;  %v9437_v0 = vld [vmem:[%s16228_s14 + $0xa8] sm:$0xff] }
 0xadc   : > { %v4637_v13 = vmax.f32 %v4583_v2, 0.0  ;;  %v10557_v8 = vpop.f32.mrb[40].mxu0  ;;  %11152 = vmatprep.subr.bf16.mxu0 %v11151_v12  ;;  %v11211_v32 = vpack.c.bf16 %v9435_v5, %v9434_v11  ;;  %v11215_v14 = vpack.c.bf16 %v9437_v0, %v9436_v62  ;;  %v9439_v2 = vld [vmem:[%s16228_s14 + $0xb8] sm:$0xff] }
 0xadd   : > { %v4598_v35 = vadd.f32 %v10557_v8, %v4454_v56  ;;  %v4592_v21 = vpop.f32.mrb[41].mxu0  ;;  %11154 = vmatpush3.bf16.msra.mxu0 %v11151_v12  ;;  %v9432_v56 = vld [vmem:[%s16228_s14 + $0x80] sm:$0xff]  ;;  %v9438_v12 = vld [vmem:[%s16228_s14 + $0xb0] sm:$0xff] }
 0xade   : > { %v11155_v24 = vpack.c.bf16 %v4638_v4, %v4637_v13  ;;  %v4593_v45 = vadd.f32 %v4592_v21, %v4449_v58  ;;  %v11207_v58 = vpack.c.bf16 %v9433_v22, %v9432_v56  ;;  %v11219_v4 = vpack.c.bf16 %v9439_v2, %v9438_v12  ;;  %v9441_v13 = vld [vmem:[%s16228_s14 + $0xc8] sm:$0xff] }
 0xadf   : > { %v4640_v41 = vmax.f32 %v4598_v35, 0.0  ;;  %v4684_v35 = vpop.permute.xlu1 %4683 }
 0xae0   : > { %v4639_v6 = vmax.f32 %v4593_v45, 0.0  ;;  %v10560_v34 = vpop.f32.mrb[42].mxu0  ;;  %11156 = vmatprep.subr.bf16.mxu0 %v11155_v24 }
 0xae1   : > { %v4608_v37 = vadd.f32 %v10560_v34, %v4464_v47  ;;  %v4602_v55 = vpop.f32.mrb[43].mxu0  ;;  %11158 = vmatpush3.bf16.msra.mxu0 %v11155_v24  ;;  %v9440_v47 = vld [vmem:[%s16228_s14 + $0xc0] sm:$0xff] }
 0xae2   : > { %v11159_v61 = vpack.c.bf16 %v4640_v41, %v4639_v6  ;;  %v4603_v10 = vadd.f32 %v4602_v55, %v4459_v25  ;;  %v11223_v8 = vpack.c.bf16 %v9441_v13, %v9440_v47  ;;  %v4689_v25 = vpop.permute.xlu0 %4688 }
 0xae3   : > { %v4642_v9 = vmax.f32 %v4608_v37, 0.0  ;;  %v4694_v24 = vpop.permute.xlu1 %4693 }
 0xae4   : > { %v4641_v17 = vmax.f32 %v4603_v10, 0.0  ;;  %v10563_v18 = vpop.f32.mrb[44].mxu0  ;;  %11160 = vmatprep.subr.bf16.mxu0 %v11159_v61 }
 0xae5   : > { %v4618_v19 = vadd.f32 %v10563_v18, %v4474_v44  ;;  %v4612_v60 = vpop.f32.mrb[45].mxu0  ;;  %11162 = vmatpush3.bf16.msra.mxu0 %v11159_v61 }
 0xae6   : > { %v11163_v16 = vpack.c.bf16 %v4642_v9, %v4641_v17  ;;  %v4613_v20 = vadd.f32 %v4612_v60, %v4469_v7  ;;  %v4699_v21 = vpop.permute.xlu0 %4698 }
 0xae7   : > { %v4644_v23 = vmax.f32 %v4618_v19, 0.0  ;;  %v4704_v41 = vpop.permute.xlu1 %4703 }
 0xae8   : > { %v4643_v27 = vmax.f32 %v4613_v20, 0.0  ;;  %v10566_v28 = vpop.f32.mrb[46].mxu0  ;;  %11164 = vmatprep.subr.bf16.mxu0 %v11163_v16 }
 0xae9   : > { %v4628_v30 = vadd.f32 %v10566_v28, %v4484_v26  ;;  %v4622_v31 = vpop.f32.mrb[47].mxu0  ;;  %11166 = vmatpush3.bf16.msra.mxu0 %v11163_v16 }
 0xaea   : > { %v11167_v33 = vpack.c.bf16 %v4644_v23, %v4643_v27  ;;  %v4623_v36 = vadd.f32 %v4622_v31, %v4479_v29  ;;  %v4709_v45 = vpop.permute.xlu0 %4708 }
 0xaeb   : > { %v4646_v38 = vmax.f32 %v4628_v30, 0.0  ;;  %v4714_v9 = vpop.permute.xlu1 %4713 }
 0xaec   : > { %v4645_v39 = vmax.f32 %v4623_v36, 0.0  ;;  %11168 = vmatprep.subr.bf16.mxu0 %v11167_v33 }
 0xaed   : > { %11170 = vmatpush3.bf16.msra.mxu0 %v11167_v33 }
 0xaee   : > { %v11171_v49 = vpack.c.bf16 %v4646_v38, %v4645_v39  ;;  %v4719_v61 = vpop.permute.xlu0 %4718 }
 0xaef   : > { %v4724_v31 = vpop.permute.xlu1 %4723 }
 0xaf0   : > { %11172 = vmatprep.subr.bf16.mxu0 %v11171_v49 }
 0xaf1   : > { %11174 = vmatpush3.bf16.msra.mxu0 %v11171_v49 }
 0xaf2   : > { %11208 = vmatprep.subr.bf16.mxu0 %v11207_v58  ;;  %v4729_v28 = vpop.permute.xlu0 %4728 }
 0xaf4   : > { %10600 = vmatmul.mubr.f32.vlgmr.msra.gmra.mrb[48].mxu0 %v9369_v51 }
 0xaf5   : > { %10602 = vmatprep.mubr.f32.mxu0 %v9370_v40  ;;  %11210 = vmatpush3.bf16.msra.mxu0 %v11207_v58 }
 0xaf6   : > { %11212 = vmatprep.subr.bf16.mxu0 %v11211_v32 }
 0xaf8   : > { %10603 = vmatmul.mubr.f32.gmra.mrb[50].mxu0 %v9371_v42 }
 0xaf9   : > { %10605 = vmatprep.mubr.f32.mxu0 %v9372_v43  ;;  %11214 = vmatpush3.bf16.msra.mxu0 %v11211_v32  ;;  %v4739_v43 = vpop.permute.xlu0 %4738 }
 0xafa   : > { %11216 = vmatprep.subr.bf16.mxu0 %v11215_v14 }
 0xafc   : > { %10606 = vmatmul.mubr.f32.gmra.mrb[52].mxu0 %v9373_v59 }
 0xafd   : > { %10608 = vmatprep.mubr.f32.mxu0 %v9374_v57  ;;  %11218 = vmatpush3.bf16.msra.mxu0 %v11215_v14  ;;  %v4749_v56 = vpop.permute.xlu0 %4748 }
 0xafe   : > { %11220 = vmatprep.subr.bf16.mxu0 %v11219_v4 }
 0xb00   : > { %10609 = vmatmul.mubr.f32.gmra.mrb[54].mxu0 %v9375_v3  ;;  %v4734_v3 = vpop.permute.xlu1 %4733 }
 0xb01   : > { %10611 = vmatprep.mubr.f32.mxu0 %v9376_v46  ;;  %11222 = vmatpush3.bf16.msra.mxu0 %v11219_v4  ;;  %v4759_v47 = vpop.permute.xlu0 %4758 }
 0xb02   : > { %11224 = vmatprep.subr.bf16.mxu0 %v11223_v8 }
 0xb04   : > { %10612 = vmatmul.mubr.f32.gmra.mrb[56].mxu0 %v9377_v48  ;;  %v4744_v58 = vpop.permute.xlu1 %4743 }
 0xb05   : > { %10614 = vmatprep.mubr.f32.mxu0 %v9378_v50  ;;  %11226 = vmatpush3.bf16.msra.mxu0 %v11223_v8 }
 0xb08   : > { %10615 = vmatmul.mubr.f32.gmra.mrb[58].mxu0 %v9379_v15 }
 0xb09   : > { %10617 = vmatprep.mubr.f32.mxu0 %v9380_v52 }
 0xb0c   : > { %10618 = vmatmul.mubr.f32.gmra.mrb[60].mxu0 %v9381_v53 }
 0xb0d   : > { %10620 = vmatprep.mubr.f32.mxu0 %v9382_v1 }
 0xb10   : > { %10621 = vmatmul.mubr.f32.gmra.mrb[62].mxu0 %v9383_v54 }
 0xbc7   : > { %v10601_v6 = vpop.f32.mrb[48].mxu0 }
 0xbc8   : > { %v4833_v34 = vadd.f32 %v10601_v6, %v4689_v25  ;;  %v4827_v37 = vpop.f32.mrb[49].mxu0  ;;  %v4754_v25 = vpop.permute.xlu1 %4753 }
 0xbc9   : > { %v4828_v55 = vadd.f32 %v4827_v37, %v4684_v35  ;;  %v9401_v37 = vld [vmem:[%s16226_s12 + $0x108] sm:$0xff] }
 0xbca   : > { %v4907_v44 = vmax.f32 %v4833_v34, 0.0 }
 0xbcb   : > { %v4906_v10 = vmax.f32 %v4828_v55, 0.0  ;;  %v10604_v7 = vpop.f32.mrb[50].mxu0  ;;  %v9402_v55 = vld [vmem:[%s16226_s12 + $0x110] sm:$0xff] }
 0xbcc   : > { %v4843_v17 = vadd.f32 %v10604_v7, %v4699_v21  ;;  %v4837_v18 = vpop.f32.mrb[51].mxu0  ;;  %v9406_v7 = vld [vmem:[%s16226_s12 + $0x130] sm:$0xff] }
 0xbcd   : > { %v11175_v19 = vpack.c.bf16 %v4907_v44, %v4906_v10  ;;  %v4838_v60 = vadd.f32 %v4837_v18, %v4694_v24  ;;  %v9403_v44 = vld [vmem:[%s16226_s12 + $0x118] sm:$0xff]  ;;  %v9405_v10 = vld [vmem:[%s16226_s12 + $0x128] sm:$0xff] }
 0xbce   : > { %v4909_v16 = vmax.f32 %v4843_v17, 0.0  ;;  %v9408_v17 = vld [vmem:[%s16226_s12 + $0x140] sm:$0xff]  ;;  %v9409_v18 = vld [vmem:[%s16226_s12 + $0x148] sm:$0xff] }
 0xbcf   : > { %v4908_v20 = vmax.f32 %v4838_v60, 0.0  ;;  %v10607_v23 = vpop.f32.mrb[52].mxu0  ;;  %11176 = vmatprep.subr.bf16.mxu1 %v11175_v19  ;;  %v9411_v60 = vld [vmem:[%s16226_s12 + $0x158] sm:$0xff] }
 0xbd0   : > { %v4853_v26 = vadd.f32 %v10607_v23, %v4709_v45  ;;  %v4847_v27 = vpop.f32.mrb[53].mxu0  ;;  %11178 = vmatpush3.bf16.msra.mxu1 %v11175_v19  ;;  %v9410_v19 = vld [vmem:[%s16226_s12 + $0x150] sm:$0xff] }
 0xbd1   : > { %v11179_v29 = vpack.c.bf16 %v4909_v16, %v4908_v20  ;;  %v4848_v30 = vadd.f32 %v4847_v27, %v4704_v41  ;;  %v9412_v16 = vld [vmem:[%s16226_s12 + $0x160] sm:$0xff]  ;;  %v9413_v20 = vld [vmem:[%s16226_s12 + $0x168] sm:$0xff]  ;;  %v9414_v23 = vld [vmem:[%s16226_s12 + $0x170] sm:$0xff] }
 0xbd2   : > { %v4911_v33 = vmax.f32 %v4853_v26, 0.0  ;;  %v9415_v26 = vld [vmem:[%s16226_s12 + $0x178] sm:$0xff]  ;;  %v14848_v27 = vld [vmem:[#allocation2 + $0xb0] sm:$0xff] }
 0xbd3   : > { %v4910_v36 = vmax.f32 %v4848_v30, 0.0  ;;  %v10610_v38 = vpop.f32.mrb[54].mxu0  ;;  %11180 = vmatprep.subr.bf16.mxu1 %v11179_v29 }
 0xbd4   : > { %v4863_v39 = vadd.f32 %v10610_v38, %v4719_v61  ;;  %v4857_v49 = vpop.f32.mrb[55].mxu0  ;;  %11182 = vmatpush3.bf16.msra.mxu1 %v11179_v29  ;;  %v9404_v61 = vld [vmem:[%s16226_s12 + $0x120] sm:$0xff]  ;;  %v9443_v29 = vld [vmem:[%s16228_s14 + $0xd8] sm:$0xff]  ;;  %v9446_v38 = vld [vmem:[%s16228_s14 + $0xf0] sm:$0xff] }
 0xbd5   : > { %v11183_v51 = vpack.c.bf16 %v4911_v33, %v4910_v36  ;;  %v4858_v40 = vadd.f32 %v4857_v49, %v4714_v9  ;;  %v9407_v9 = vld [vmem:[%s16226_s12 + $0x138] sm:$0xff]  ;;  %v9445_v33 = vld [vmem:[%s16228_s14 + $0xe8] sm:$0xff] }
 0xbd6   : > { %v4913_v42 = vmax.f32 %v4863_v39, 0.0  ;;  %v9447_v39 = vld [vmem:[%s16228_s14 + $0xf8] sm:$0xff] }
 0xbd7   : > { %v4912_v59 = vmax.f32 %v4858_v40, 0.0  ;;  %v10613_v57 = vpop.f32.mrb[56].mxu0  ;;  %11184 = vmatprep.subr.bf16.mxu1 %v11183_v51  ;;  %v11235_v49 = vpack.c.bf16 %v9447_v39, %v9446_v38  ;;  %v5250_v40 = vld [vmem:[%s16228_s14 + $0x8] sm:$0xff] }
 0xbd8   : > { %v4873_v46 = vadd.f32 %v10613_v57, %v4729_v28  ;;  %v4867_v48 = vpop.f32.mrb[57].mxu0  ;;  %11186 = vmatpush3.bf16.msra.mxu1 %v11183_v51  ;;  %v9442_v28 = vld [vmem:[%s16228_s14 + $0xd0] sm:$0xff]  ;;  %v5249_v51 = vld [vmem:[%s16228_s14] sm:$0xff] }
 0xbd9   : > { %v11187_v50 = vpack.c.bf16 %v4913_v42, %v4912_v59  ;;  %v4868_v15 = vadd.f32 %v4867_v48, %v4724_v31  ;;  %v11227_v30 = vpack.c.bf16 %v9443_v29, %v9442_v28  ;;  %v9444_v31 = vld [vmem:[%s16228_s14 + $0xe0] sm:$0xff]  ;;  %v14875_v42 = vpack.c.bf16 %v5250_v40, %v5249_v51  ;;  %v5947_v48 = vld [vmem:[#allocation21 + $0x128] sm:$0xff]  ;;  %v5972_v51 = vld [vmem:[#allocation21 + $0x1f0] sm:$0xff] }
 0xbda   : > { %v4915_v52 = vmax.f32 %v4873_v46, 0.0  ;;  %v11231_v36 = vpack.c.bf16 %v9445_v33, %v9444_v31  ;;  %v5945_v59 = vld [vmem:[#allocation21 + $0x118] sm:$0xff]  ;;  %v5942_v57 = vld [vmem:[#allocation21 + $0x100] sm:$0xff]  ;;  %v5944_v46 = vld [vmem:[#allocation21 + $0x110] sm:$0xff] }
 0xbdb   : > { %v4914_v53 = vmax.f32 %v4868_v15, 0.0  ;;  %v10616_v1 = vpop.f32.mrb[58].mxu0  ;;  %11188 = vmatprep.subr.bf16.mxu1 %v11187_v50  ;;  %11228 = vmatprep.subr.bf16.mxu0 %v11227_v30  ;;  %v14880_v15 = vpack.c.bf16 %v5944_v46, %v5942_v57  ;;  %v5973_v28 = vld [vmem:[#allocation21 + $0x1f8] sm:$0xff] }
 0xbdc   : > { %v4883_v54 = vadd.f32 %v10616_v1, %v4739_v43  ;;  %v4877_v63 = vpop.f32.mrb[59].mxu0  ;;  %11190 = vmatpush3.bf16.msra.mxu1 %v11187_v50  ;;  %11230 = vmatpush3.bf16.msra.mxu0 %v11227_v30  ;;  %v5943_v43 = vld [vmem:[#allocation21 + $0x108] sm:$0xff]  ;;  %v5949_v50 = vld [vmem:[#allocation21 + $0x138] sm:$0xff]  ;;  %v5948_v1 = vld [vmem:[#allocation21 + $0x130] sm:$0xff] }
 0xbdd   : > { %v11191_v22 = vpack.c.bf16 %v4915_v52, %v4914_v53  ;;  %v4878_v11 = vadd.f32 %v4877_v63, %v4734_v3  ;;  %11232 = vmatprep.subr.bf16.mxu0 %v11231_v36  ;;  %v14878_v3 = vpack.c.bf16 %v5945_v59, %v5943_v43  ;;  %v14882_v52 = vpack.c.bf16 %v5949_v50, %v5947_v48  ;;  %v5946_v53 = vld [vmem:[#allocation21 + $0x120] sm:$0xff]  ;;  %v5953_v63 = vld [vmem:[#allocation21 + $0x158] sm:$0xff] }
 0xbde   : > { %v4917_v5 = vmax.f32 %v4883_v54, 0.0  ;;  %v5951_v54 = vld [vmem:[#allocation21 + $0x148] sm:$0xff] }
 0xbdf   : > { %v4916_v32 = vmax.f32 %v4878_v11, 0.0  ;;  %v10619_v62 = vpop.f32.mrb[60].mxu0  ;;  %11192 = vmatprep.subr.bf16.mxu1 %v11191_v22  ;;  %v5950_v11 = vld [vmem:[#allocation21 + $0x140] sm:$0xff] }
 0xbe0   : > { %v4893_v0 = vadd.f32 %v10619_v62, %v4749_v56  ;;  %v4887_v14 = vpop.f32.mrb[61].mxu0  ;;  %11194 = vmatpush3.bf16.msra.mxu1 %v11191_v22  ;;  %11234 = vmatpush3.bf16.msra.mxu0 %v11231_v36  ;;  %v14886_v56 = vpack.c.bf16 %v5948_v1, %v5946_v53  ;;  %v14889_v22 = vpack.c.bf16 %v5953_v63, %v5951_v54  ;;  %v4964_v62 = vpop.permute.xlu0 %4963 }
 0xbe1   : > { %v11195_v12 = vpack.c.bf16 %v4917_v5, %v4916_v32  ;;  %v4888_v2 = vadd.f32 %v4887_v14, %v4744_v58  ;;  %11236 = vmatprep.subr.bf16.mxu0 %v11235_v49  ;;  %v5952_v58 = vld [vmem:[#allocation21 + $0x150] sm:$0xff]  ;;  %v5955_v5 = vld [vmem:[#allocation21 + $0x168] sm:$0xff]  ;;  %v5957_v32 = vld [vmem:[#allocation21 + $0x178] sm:$0xff] }
 0xbe2   : > { %v4919_v4 = vmax.f32 %v4893_v0, 0.0  ;;  %v4959_v0 = vpop.permute.xlu1 %4958  ;;  %v14892_v14 = vpack.c.bf16 %v5952_v58, %v5950_v11  ;;  %v5251_v58 = vld [vmem:[%s16228_s14 + $0x10] sm:$0xff] }
 0xbe3   : > { %v4918_v13 = vmax.f32 %v4888_v2, 0.0  ;;  %v10622_v8 = vpop.f32.mrb[62].mxu0  ;;  %11196 = vmatprep.subr.bf16.mxu1 %v11195_v12  ;;  %v5954_v2 = vld [vmem:[#allocation21 + $0x160] sm:$0xff] }
 0xbe4   : > { %v4903_v35 = vadd.f32 %v10622_v8, %v4759_v47  ;;  %v4897_v21 = vpop.f32.mrb[63].mxu0  ;;  %11198 = vmatpush3.bf16.msra.mxu1 %v11195_v12  ;;  %11238 = vmatpush3.bf16.msra.mxu0 %v11235_v49  ;;  %v14895_v12 = vpack.c.bf16 %v5957_v32, %v5955_v5  ;;  %v5959_v47 = vld [vmem:[#allocation21 + $0x188] sm:$0xff]  ;;  %v5970_v49 = vld [vmem:[#allocation21 + $0x1e0] sm:$0xff]  ;;  %v5252_v5 = vld [vmem:[%s16228_s14 + $0x18] sm:$0xff] }
 0xbe5   : > { %v11199_v24 = vpack.c.bf16 %v4919_v4, %v4918_v13  ;;  %v4898_v45 = vadd.f32 %v4897_v21, %v4754_v25  ;;  %11240 = vmatprep.subr.bf16.mxu0 %v14875_v42  ;;  %v5956_v4 = vld [vmem:[#allocation21 + $0x170] sm:$0xff]  ;;  %v5961_v13 = vld [vmem:[#allocation21 + $0x198] sm:$0xff]  ;;  %v4974_v25 = vpop.permute.xlu0 %4973  ;;  %v5958_v21 = vld [vmem:[#allocation21 + $0x180] sm:$0xff]  ;;  %v14924_v48 = vpack.c.bf16 %v5972_v51, %v5970_v49 }
 0xbe6   : > { %v4921_v41 = vmax.f32 %v4903_v35, 0.0  ;;  %v14898_v8 = vpack.c.bf16 %v5956_v4, %v5954_v2  ;;  %v14901_v35 = vpack.c.bf16 %v5961_v13, %v5959_v47 }
 0xbe7   : > { %v4920_v6 = vmax.f32 %v4898_v45, 0.0  ;;  %11200 = vmatprep.subr.bf16.mxu1 %v11199_v24  ;;  %v4969_v45 = vpop.permute.xlu1 %4968 }
 0xbe8   : > { %11202 = vmatpush3.bf16.msra.mxu1 %v11199_v24  ;;  %v5960_v24 = vld [vmem:[#allocation21 + $0x190] sm:$0xff] }
 0xbe9   : > { %v11203_v34 = vpack.c.bf16 %v4921_v41, %v4920_v6  ;;  %v5963_v41 = vld [vmem:[#allocation21 + $0x1a8] sm:$0xff]  ;;  %v5965_v6 = vld [vmem:[#allocation21 + $0x1b8] sm:$0xff] }
 0xbeb   : > { %11204 = vmatprep.subr.bf16.mxu1 %v11203_v34 }
 0xbec   : > { %11206 = vmatpush3.bf16.msra.mxu1 %v11203_v34  ;;  %v14904_v34 = vpack.c.bf16 %v5960_v24, %v5958_v21  ;;  %v11243_v21 = vpack.c.bf16 %v5252_v5, %v5251_v58 }
 0xbed   : > { %11304 = vmatprep.subr.bf16.mxu1 %v14878_v3 }
 0xbef   : > { %10656 = vmatmul.mubr.f32.vlgmr.msra.gmra.mrb[80].mxu1 %v9401_v37  ;;  %v14907_v37 = vpack.c.bf16 %v5965_v6, %v5963_v41  ;;  %v5254_v41 = vld [vmem:[%s16228_s14 + $0x28] sm:$0xff] }
 0xbf0   : > { %10658 = vmatprep.mubr.f32.mxu1 %v9402_v55  ;;  %11306 = vmatpush1.bf16.msra.mxu1 %v14880_v15  ;;  %v5962_v55 = vld [vmem:[#allocation21 + $0x1a0] sm:$0xff] }
 0xbf1   : > { %11308 = vmatprep.subr.bf16.mxu1 %v14882_v52 }
 0xbf3   : > { %10659 = vmatmul.mubr.f32.gmra.mrb[82].mxu1 %v9403_v44  ;;  %v5964_v44 = vld [vmem:[#allocation21 + $0x1b0] sm:$0xff] }
 0xbf4   : > { %10661 = vmatprep.mubr.f32.mxu1 %v9404_v61  ;;  %11310 = vmatpush1.bf16.msra.mxu1 %v14886_v56  ;;  %v5967_v61 = vld [vmem:[#allocation21 + $0x1c8] sm:$0xff] }
 0xbf5   : > { %11312 = vmatprep.subr.bf16.mxu1 %v14889_v22 }
 0xbf7   : > { %10662 = vmatmul.mubr.f32.gmra.mrb[84].mxu1 %v9405_v10  ;;  %v5969_v10 = vld [vmem:[#allocation21 + $0x1d8] sm:$0xff] }
 0xbf8   : > { %10664 = vmatprep.mubr.f32.mxu1 %v9406_v7  ;;  %11314 = vmatpush1.bf16.msra.mxu1 %v14892_v14  ;;  %v4984_v7 = vpop.permute.xlu0 %4983 }
 0xbf9   : > { %11316 = vmatprep.subr.bf16.mxu1 %v14895_v12 }
 0xbfb   : > { %10665 = vmatmul.mubr.f32.gmra.mrb[86].mxu1 %v9407_v9  ;;  %v4979_v9 = vpop.permute.xlu1 %4978 }
 0xbfc   : > { %10667 = vmatprep.mubr.f32.mxu1 %v9408_v17  ;;  %11318 = vmatpush1.bf16.msra.mxu1 %v14898_v8  ;;  %v14910_v17 = vpack.c.bf16 %v5964_v44, %v5962_v55  ;;  %v4994_v33 = vpop.permute.xlu0 %4993 }
 0xbfd   : > { %11320 = vmatprep.subr.bf16.mxu1 %v14901_v35 }
 0xbff   : > { %10668 = vmatmul.mubr.f32.gmra.mrb[88].mxu1 %v9409_v18  ;;  %v4989_v40 = vpop.permute.xlu1 %4988 }
 0xc00   : > { %10670 = vmatprep.mubr.f32.mxu1 %v9410_v19  ;;  %11322 = vmatpush1.bf16.msra.mxu1 %v14904_v34  ;;  %v14913_v19 = vpack.c.bf16 %v5969_v10, %v5967_v61  ;;  %v5004_v63 = vpop.permute.xlu0 %5003 }
 0xc01   : > { %11324 = vmatprep.subr.bf16.mxu1 %v14907_v37 }
 0xc03   : > { %10671 = vmatmul.mubr.f32.gmra.mrb[90].mxu1 %v9411_v60  ;;  %v5966_v60 = vld [vmem:[#allocation21 + $0x1c0] sm:$0xff]  ;;  %v4999_v32 = vpop.permute.xlu1 %4998 }
 0xc04   : > { %10673 = vmatprep.mubr.f32.mxu1 %v9412_v16  ;;  %v5968_v16 = vld [vmem:[#allocation21 + $0x1d0] sm:$0xff]  ;;  %11326 = vmatpush1.bf16.msra.mxu1 %v14910_v17  ;;  %v5014_v55 = vpop.permute.xlu0 %5013 }
 0xc05   : > { %v14916_v31 = vpack.c.bf16 %v5968_v16, %v5966_v60  ;;  %11328 = vmatprep.subr.bf16.mxu1 %v14913_v19 }
 0xc07   : > { %10674 = vmatmul.mubr.f32.gmra.mrb[92].mxu1 %v9413_v20 }
 0xc08   : > { %10676 = vmatprep.mubr.f32.mxu1 %v9414_v23  ;;  %11330 = vmatpush1.bf16.msra.mxu1 %v14916_v31  ;;  %v5024_v49 = vpop.permute.xlu0 %5023 }
 0xc0b   : > { %10677 = vmatmul.mubr.f32.gmra.mrb[94].mxu1 %v9415_v26  ;;  %v5971_v26 = vld [vmem:[#allocation21 + $0x1e8] sm:$0xff] }
 0xc0c   : > { %6038 = vmatprep.mubr.f32.mxu1 %v14848_v27  ;;  %v14919_v39 = vpack.c.bf16 %v5973_v28, %v5971_v26 }
 0xc0e   : > { %11332 = vmatprep.subr.bf16.mxu1 %v14919_v39 }
 0xc0f   : > { %11334 = vmatpush1.bf16.msra.mxu1 %v14924_v48 }
 0xc12   : > { %6039 = vmatmul.mubr.f32.vlgmr.msra.gmra.mrb[96].mxu1 %v14848_v27 }
 0xc13   : > { %6044 = vmatprep.mubr.f32.mxu1 %v14848_v27 }
 0xc16   : > { %6045 = vmatmul.mubr.f32.gmra.mrb[98].mxu1 %v14848_v27 }
 0xc17   : > { %6050 = vmatprep.mubr.f32.mxu1 %v14848_v27 }
 0xc1a   : > { %6051 = vmatmul.mubr.f32.gmra.mrb[100].mxu1 %v14848_v27 }
 0xc1b   : > { %6056 = vmatprep.mubr.f32.mxu1 %v14848_v27 }
 0xc1e   : > { %6057 = vmatmul.mubr.f32.gmra.mrb[102].mxu1 %v14848_v27 }
 0xc1f   : > { %6062 = vmatprep.mubr.f32.mxu1 %v14848_v27 }
 0xcc2   : > { %v10657_v18 = vpop.f32.mrb[80].mxu1 }
 0xcc3   : > { %v5108_v20 = vadd.f32 %v10657_v18, %v4964_v62  ;;  %v5102_v23 = vpop.f32.mrb[81].mxu1 }
 0xcc4   : > { %v5103_v29 = vadd.f32 %v5102_v23, %v4959_v0  ;;  %v5256_v23 = vld [vmem:[%s16228_s14 + $0x38] sm:$0xff] }
 0xcc5   : > { %v5182_v30 = vmax.f32 %v5108_v20, 0.0 }
 0xcc6   : > { %v5181_v36 = vmax.f32 %v5103_v29, 0.0  ;;  %v10660_v38 = vpop.f32.mrb[82].mxu1 }
 0xcc7   : > { %5218 = vst.msk [vmem:[#allocation2 + $0x18] sm:$0xff] %vm969_vm0, %v5182_v30  ;;  %v5118_v43 = vadd.f32 %v10660_v38, %v4974_v25  ;;  %v5112_v59 = vpop.f32.mrb[83].mxu1 }
 0xcc8   : > { %5217 = vst.msk [vmem:[#allocation2 + $0x10] sm:$0xff] %vm969_vm0, %v5181_v36  ;;  %v5113_v57 = vadd.f32 %v5112_v59, %v4969_v45  ;;  %v5253_v45 = vld [vmem:[%s16228_s14 + $0x20] sm:$0xff]  ;;  %v5258_v59 = vld [vmem:[%s16228_s14 + $0x48] sm:$0xff] }
 0xcc9   : > { %v5184_v46 = vmax.f32 %v5118_v43, 0.0  ;;  %v11247_v16 = vpack.c.bf16 %v5254_v41, %v5253_v45  ;;  %v5257_v43 = vld [vmem:[%s16228_s14 + $0x40] sm:$0xff] }
 0xcca   : > { %v5183_v50 = vmax.f32 %v5113_v57, 0.0  ;;  %v10663_v53 = vpop.f32.mrb[84].mxu1 }
 0xccb   : > { %5220 = vst.msk [vmem:[#allocation2 + $0x28] sm:$0xff] %vm969_vm0, %v5184_v46  ;;  %v5128_v1 = vadd.f32 %v10663_v53, %v4984_v7  ;;  %v5122_v54 = vpop.f32.mrb[85].mxu1  ;;  %v5009_v7 = vpop.permute.xlu1 %5008 }
 0xccc   : > { %5219 = vst.msk [vmem:[#allocation2 + $0x20] sm:$0xff] %vm969_vm0, %v5183_v50  ;;  %v5123_v11 = vadd.f32 %v5122_v54, %v4979_v9 }
 0xccd   : > { %v5186_v62 = vmax.f32 %v5128_v1, 0.0 }
 0xcce   : > { %v5185_v0 = vmax.f32 %v5123_v11, 0.0  ;;  %v10666_v2 = vpop.f32.mrb[86].mxu1  ;;  %v14936_v4 = vld [vmem:[#allocation2 + $0x18] sm:$0xff]  ;;  %v11255_v11 = vpack.c.bf16 %v5258_v59, %v5257_v43  ;;  %v9450_v59 = vld [vmem:[%s16228_s14 + $0x110] sm:$0xff] }
 0xccf   : > { %5222 = vst.msk [vmem:[#allocation2 + $0x38] sm:$0xff] %vm969_vm0, %v5186_v62  ;;  %v5138_v47 = vadd.f32 %v10666_v2, %v4994_v33  ;;  %v5132_v13 = vpop.f32.mrb[87].mxu1  ;;  %v14939_v25 = vld [vmem:[#allocation2 + $0x10] sm:$0xff]  ;;  %5856 = vst [vmem:[#allocation2 + $0x18] sm:$0xff] %v14848_v27  ;;  %v5019_v57 = vpop.permute.xlu1 %5018  ;;  %v5260_v62 = vld [vmem:[%s16228_s14 + $0x58] sm:$0xff] }
 0xcd0   : > { %5221 = vst.msk [vmem:[#allocation2 + $0x30] sm:$0xff] %vm969_vm0, %v5185_v0  ;;  %v5133_v24 = vadd.f32 %v5132_v13, %v4989_v40  ;;  %10711 = vmatprep.mubr.f32.mxu0 %v14939_v25  ;;  %5855 = vst [vmem:[#allocation2 + $0x10] sm:$0xff] %v14848_v27  ;;  %v5034_v2 = vpop.permute.xlu0 %5033 }
 0xcd1   : > { %v5188_v6 = vmax.f32 %v5138_v47, 0.0  ;;  %10712 = vmatmul.mubr.f32.vlgmr.msra.gmra.mrb[64].mxu0 %v14936_v4 }
 0xcd2   : > { %v5187_v44 = vmax.f32 %v5133_v24, 0.0  ;;  %v10669_v61 = vpop.f32.mrb[88].mxu1  ;;  %11242 = vmatpush3.bf16.msra.mxu0 %v14875_v42  ;;  %v14955_v10 = vld [vmem:[#allocation2 + $0x28] sm:$0xff]  ;;  %v5255_v42 = vld [vmem:[%s16228_s14 + $0x30] sm:$0xff] }
 0xcd3   : > { %5224 = vst.msk [vmem:[#allocation2 + $0x48] sm:$0xff] %vm969_vm0, %v5188_v6  ;;  %v5148_v9 = vadd.f32 %v10669_v61, %v5004_v63  ;;  %v5142_v18 = vpop.f32.mrb[89].mxu1  ;;  %v14958_v60 = vld [vmem:[#allocation2 + $0x20] sm:$0xff]  ;;  %11244 = vmatprep.subr.bf16.mxu0 %v11243_v21  ;;  %5858 = vst [vmem:[#allocation2 + $0x28] sm:$0xff] %v14848_v27  ;;  %v11251_v38 = vpack.c.bf16 %v5256_v23, %v5255_v42  ;;  %v5263_v23 = vld [vmem:[%s16228_s14 + $0x70] sm:$0xff] }
 0xcd4   : > { %5223 = vst.msk [vmem:[#allocation2 + $0x40] sm:$0xff] %vm969_vm0, %v5187_v44  ;;  %v5143_v20 = vadd.f32 %v5142_v18, %v4999_v32  ;;  %10714 = vmatprep.mubr.f32.mxu0 %v14958_v60  ;;  %5857 = vst [vmem:[#allocation2 + $0x20] sm:$0xff] %v14848_v27  ;;  %v5259_v32 = vld [vmem:[%s16228_s14 + $0x50] sm:$0xff]  ;;  %v5261_v61 = vld [vmem:[%s16228_s14 + $0x60] sm:$0xff] }
 0xcd5   : > { %v5190_v26 = vmax.f32 %v5148_v9, 0.0  ;;  %10715 = vmatmul.mubr.f32.gmra.mrb[66].mxu0 %v14955_v10  ;;  %v11259_v6 = vpack.c.bf16 %v5260_v62, %v5259_v32  ;;  %v9457_v32 = vld [vmem:[%s16228_s14 + $0x148] sm:$0xff]  ;;  %v9458_v62 = vld [vmem:[%s16228_s14 + $0x150] sm:$0xff] }
 0xcd6   : > { %v5189_v28 = vmax.f32 %v5143_v20, 0.0  ;;  %v10672_v29 = vpop.f32.mrb[90].mxu1  ;;  %11246 = vmatpush3.bf16.msra.mxu0 %v11243_v21  ;;  %v14978_v40 = vld [vmem:[#allocation2 + $0x38] sm:$0xff]  ;;  %v5029_v21 = vpop.permute.xlu1 %5028 }
 0xcd7   : > { %5226 = vst.msk [vmem:[#allocation2 + $0x58] sm:$0xff] %vm969_vm0, %v5190_v26  ;;  %v5158_v30 = vadd.f32 %v10672_v29, %v5014_v55  ;;  %v5152_v33 = vpop.f32.mrb[91].mxu1  ;;  %v14974_v36 = vld [vmem:[#allocation2 + $0x30] sm:$0xff]  ;;  %11248 = vmatprep.subr.bf16.mxu0 %v11247_v16  ;;  %v5264_v26 = vld [vmem:[%s16228_s14 + $0x78] sm:$0xff] }
 0xcd8   : > { %5225 = vst.msk [vmem:[#allocation2 + $0x50] sm:$0xff] %vm969_vm0, %v5189_v28  ;;  %v5153_v51 = vadd.f32 %v5152_v33, %v5009_v7  ;;  %10717 = vmatprep.mubr.f32.mxu0 %v14974_v36  ;;  %v5262_v7 = vld [vmem:[%s16228_s14 + $0x68] sm:$0xff]  ;;  %v11267_v29 = vpack.c.bf16 %v5264_v26, %v5263_v23  ;;  %v9448_v33 = vld [vmem:[%s16228_s14 + $0x100] sm:$0xff] }
 0xcd9   : > { %v5192_v46 = vmax.f32 %v5158_v30, 0.0  ;;  %10718 = vmatmul.mubr.f32.gmra.mrb[68].mxu0 %v14978_v40  ;;  %v11263_v20 = vpack.c.bf16 %v5262_v7, %v5261_v61  ;;  %v5926_v61 = vld [vmem:[#allocation21 + $0x98] sm:$0xff]  ;;  %v5927_v26 = vld [vmem:[#allocation21 + $0xa0] sm:$0xff] }
 0xcda   : > { %v5191_v50 = vmax.f32 %v5153_v51, 0.0  ;;  %v10675_v53 = vpop.f32.mrb[92].mxu1  ;;  %11250 = vmatpush3.bf16.msra.mxu0 %v11247_v16  ;;  %v14994_v5 = vld [vmem:[#allocation2 + $0x48] sm:$0xff] }
 0xcdb   : > { %5228 = vst.msk [vmem:[#allocation2 + $0x68] sm:$0xff] %vm969_vm0, %v5192_v46  ;;  %v5168_v1 = vadd.f32 %v10675_v53, %v5024_v49  ;;  %v5162_v54 = vpop.f32.mrb[93].mxu1  ;;  %v14990_v63 = vld [vmem:[#allocation2 + $0x40] sm:$0xff]  ;;  %11252 = vmatprep.subr.bf16.mxu0 %v11251_v38  ;;  %v9453_v53 = vld [vmem:[%s16228_s14 + $0x128] sm:$0xff] }
 0xcdc   : > { %5227 = vst.msk [vmem:[#allocation2 + $0x60] sm:$0xff] %vm969_vm0, %v5191_v50  ;;  %v5163_v58 = vadd.f32 %v5162_v54, %v5019_v57  ;;  %10720 = vmatprep.mubr.f32.mxu0 %v14990_v63  ;;  %v9451_v57 = vld [vmem:[%s16228_s14 + $0x118] sm:$0xff]  ;;  %v9452_v50 = vld [vmem:[%s16228_s14 + $0x120] sm:$0xff]  ;;  %v9454_v54 = vld [vmem:[%s16228_s14 + $0x130] sm:$0xff] }
 0xcdd   : > { %v5194_v0 = vmax.f32 %v5168_v1, 0.0  ;;  %10721 = vmatmul.mubr.f32.gmra.mrb[70].mxu0 %v14994_v5  ;;  %v11275_v46 = vpack.c.bf16 %v9451_v57, %v9450_v59  ;;  %v11279_v1 = vpack.c.bf16 %v9453_v53, %v9452_v50  ;;  %v5936_v59 = vld [vmem:[#allocation21 + $0xe8] sm:$0xff]  ;;  %v5938_v57 = vld [vmem:[#allocation21 + $0xf8] sm:$0xff]  ;;  %v5935_v50 = vld [vmem:[#allocation21 + $0xe0] sm:$0xff] }
 0xcde   : > { %v5193_v47 = vmax.f32 %v5163_v58, 0.0  ;;  %v10678_v13 = vpop.f32.mrb[94].mxu1  ;;  %11254 = vmatpush3.bf16.msra.mxu0 %v11251_v38  ;;  %v15010_v44 = vld [vmem:[#allocation2 + $0x58] sm:$0xff]  ;;  %v9449_v38 = vld [vmem:[%s16228_s14 + $0x108] sm:$0xff] }
 0xcdf   : > { %5230 = vst.msk [vmem:[#allocation2 + $0x78] sm:$0xff] %vm969_vm0, %v5194_v0  ;;  %v5178_v24 = vadd.f32 %v10678_v13, %v5034_v2  ;;  %v5172_v45 = vpop.f32.mrb[95].mxu1  ;;  %v15006_v41 = vld [vmem:[#allocation2 + $0x50] sm:$0xff]  ;;  %11256 = vmatprep.subr.bf16.mxu0 %v11255_v11  ;;  %v11271_v51 = vpack.c.bf16 %v9449_v38, %v9448_v33  ;;  %v9459_v0 = vld [vmem:[%s16228_s14 + $0x158] sm:$0xff]  ;;  %v9461_v13 = vld [vmem:[%s16228_s14 + $0x168] sm:$0xff] }
 0xce0   : > { %5229 = vst.msk [vmem:[#allocation2 + $0x70] sm:$0xff] %vm969_vm0, %v5193_v47  ;;  %v5173_v55 = vadd.f32 %v5172_v45, %v5029_v21  ;;  %10723 = vmatprep.mubr.f32.mxu0 %v15006_v41  ;;  %v11291_v2 = vpack.c.bf16 %v9459_v0, %v9458_v62  ;;  %v9460_v47 = vld [vmem:[%s16228_s14 + $0x160] sm:$0xff]  ;;  %v9463_v45 = vld [vmem:[%s16228_s14 + $0x178] sm:$0xff] }
 0xce1   : > { %v5196_v9 = vmax.f32 %v5178_v24, 0.0  ;;  %10724 = vmatmul.mubr.f32.gmra.mrb[72].mxu0 %v15010_v44  ;;  %v11295_v21 = vpack.c.bf16 %v9461_v13, %v9460_v47  ;;  %v9462_v24 = vld [vmem:[%s16228_s14 + $0x170] sm:$0xff]  ;;  %v5934_v33 = vld [vmem:[#allocation21 + $0xd8] sm:$0xff] }
 0xce2   : > { %v5195_v18 = vmax.f32 %v5173_v55, 0.0  ;;  %11258 = vmatpush3.bf16.msra.mxu0 %v11255_v11  ;;  %v15024_v42 = vld [vmem:[#allocation2 + $0x68] sm:$0xff]  ;;  %v9455_v11 = vld [vmem:[%s16228_s14 + $0x138] sm:$0xff] }
 0xce3   : > { %5232 = vst.msk [vmem:[#allocation2 + $0x88] sm:$0xff] %vm969_vm0, %v5196_v9  ;;  %v15020_v16 = vld [vmem:[#allocation2 + $0x60] sm:$0xff]  ;;  %11260 = vmatprep.subr.bf16.mxu0 %v11259_v6  ;;  %v11283_v58 = vpack.c.bf16 %v9455_v11, %v9454_v54  ;;  %v5937_v53 = vld [vmem:[#allocation21 + $0xf0] sm:$0xff]  ;;  %v6210_v54 = vld [vmem:[#allocation21 + $0x208] sm:$0xff] }
 0xce4   : > { %5231 = vst.msk [vmem:[#allocation2 + $0x80] sm:$0xff] %vm969_vm0, %v5195_v18  ;;  %10726 = vmatprep.mubr.f32.mxu0 %v15020_v16  ;;  %v5923_v9 = vld [vmem:[#allocation21 + $0x80] sm:$0xff]  ;;  %v5925_v18 = vld [vmem:[#allocation21 + $0x90] sm:$0xff]  ;;  %v6212_v11 = vld [vmem:[#allocation21 + $0x218] sm:$0xff] }
 0xce5   : > { %10727 = vmatmul.mubr.f32.gmra.mrb[74].mxu0 %v15024_v42  ;;  %v15193_v0 = vld [vmem:[#allocation18] ss:$0 sm:$0xff]  ;;  %v15196_v13 = vld [vmem:[#allocation20] ss:$0 sm:$0xff] }
 0xce6   : > { %11262 = vmatpush3.bf16.msra.mxu0 %v11259_v6  ;;  %v15036_v30 = vld [vmem:[#allocation2 + $0x78] sm:$0xff]  ;;  %v11299_v6 = vpack.c.bf16 %v9463_v45, %v9462_v24 }
 0xce7   : > { %v15033_v28 = vld [vmem:[#allocation2 + $0x70] sm:$0xff]  ;;  %11264 = vmatprep.subr.bf16.mxu0 %v11263_v20 }
 0xce8   : > { %10729 = vmatprep.mubr.f32.mxu0 %v15033_v28 }
 0xce9   : > { %10730 = vmatmul.mubr.f32.gmra.mrb[76].mxu0 %v15036_v30 }
 0xcea   : > { %11266 = vmatpush3.bf16.msra.mxu0 %v11263_v20  ;;  %v15048_v43 = vld [vmem:[#allocation2 + $0x88] sm:$0xff] }
 0xceb   : > { %v15045_v49 = vld [vmem:[#allocation2 + $0x80] sm:$0xff]  ;;  %11268 = vmatprep.subr.bf16.mxu0 %v11267_v29  ;;  %v5928_v20 = vld [vmem:[#allocation21 + $0xa8] sm:$0xff] }
 0xcec   : > { %10732 = vmatprep.mubr.f32.mxu0 %v15045_v49 }
 0xced   : > { %10733 = vmatmul.mubr.f32.gmra.mrb[78].mxu0 %v15048_v43 }
 0xcee   : > { %11270 = vmatpush3.bf16.msra.mxu0 %v11267_v29  ;;  %10767 = vmatprep.mubr.f32.mxu0 %v14848_v27 }
 0xcef   : > { %11272 = vmatprep.subr.bf16.mxu0 %v11271_v51 }
 0xcf1   : > { %10768 = vmatmul.mubr.f32.vlgmr.msra.gmra.mrb[64].mxu0 %v14848_v27 }
 0xcf2   : > { %10770 = vmatprep.mubr.f32.mxu0 %v14939_v25  ;;  %11274 = vmatpush3.bf16.msra.mxu0 %v11271_v51  ;;  %v9456_v25 = vld [vmem:[%s16228_s14 + $0x140] sm:$0xff]  ;;  %v5933_v51 = vld [vmem:[#allocation21 + $0xd0] sm:$0xff] }
 0xcf3   : > { %11276 = vmatprep.subr.bf16.mxu0 %v11275_v46 }
 0xcf5   : > { %10771 = vmatmul.mubr.f32.gmra.mrb[66].mxu0 %v14936_v4  ;;  %v11287_v4 = vpack.c.bf16 %v9457_v32, %v9456_v25  ;;  %v15190_v25 = vld [vmem:[#allocation17] ss:$0 sm:$0xff] }
 0xcf6   : > { %10773 = vmatprep.mubr.f32.mxu0 %v14958_v60  ;;  %11278 = vmatpush3.bf16.msra.mxu0 %v11275_v46  ;;  %v15181_v46 = vpack.c.bf16 %v5938_v57, %v5936_v59 }
 0xcf7   : > { %11280 = vmatprep.subr.bf16.mxu0 %v11279_v1 }
 0xcf9   : > { %10774 = vmatmul.mubr.f32.gmra.mrb[68].mxu0 %v14955_v10 }
 0xcfa   : > { %10776 = vmatprep.mubr.f32.mxu0 %v14974_v36  ;;  %11282 = vmatpush3.bf16.msra.mxu0 %v11279_v1  ;;  %v15183_v1 = vpack.c.bf16 %v5937_v53, %v5935_v50 }
 0xcfb   : > { %11284 = vmatprep.subr.bf16.mxu0 %v11283_v58 }
 0xcfd   : > { %10777 = vmatmul.mubr.f32.gmra.mrb[70].mxu0 %v14978_v40 }
 0xcfe   : > { %10779 = vmatprep.mubr.f32.mxu0 %v14990_v63  ;;  %11286 = vmatpush3.bf16.msra.mxu0 %v11283_v58  ;;  %v15187_v58 = vpack.c.bf16 %v6212_v11, %v6210_v54 }
 0xcff   : > { %11288 = vmatprep.subr.bf16.mxu0 %v11287_v4 }
 0xd01   : > { %10780 = vmatmul.mubr.f32.gmra.mrb[72].mxu0 %v14994_v5 }
 0xd02   : > { %10782 = vmatprep.mubr.f32.mxu0 %v15006_v41  ;;  %11290 = vmatpush3.bf16.msra.mxu0 %v11287_v4 }
 0xd03   : > { %11292 = vmatprep.subr.bf16.mxu0 %v11291_v2 }
 0xd05   : > { %10783 = vmatmul.mubr.f32.gmra.mrb[74].mxu0 %v15010_v44 }
 0xd06   : > { %10785 = vmatprep.mubr.f32.mxu0 %v15020_v16  ;;  %11294 = vmatpush3.bf16.msra.mxu0 %v11291_v2 }
 0xd07   : > { %11296 = vmatprep.subr.bf16.mxu0 %v11295_v21 }
 0xd09   : > { %10786 = vmatmul.mubr.f32.gmra.mrb[76].mxu0 %v15024_v42 }
 0xd0a   : > { %10788 = vmatprep.mubr.f32.mxu0 %v15033_v28  ;;  %11298 = vmatpush3.bf16.msra.mxu0 %v11295_v21 }
 0xd0b   : > { %11300 = vmatprep.subr.bf16.mxu0 %v11299_v6 }
 0xd0d   : > { %10789 = vmatmul.mubr.f32.gmra.mrb[78].mxu0 %v15036_v30 }
 0xd0e   : > { %11302 = vmatpush3.bf16.msra.mxu0 %v11299_v6  ;;  %10823 = vmatprep.mubr.f32.mxu0 %v14958_v60 }
 0xd0f   : > { %11560 = vmatprep.subr.bf16.mxu0 %v14878_v3  ;;  %v5908_v3 = vld [vmem:[#allocation21 + $0x8] sm:$0xff] }
 0xd11   : > { %10824 = vmatmul.mubr.f32.vlgmr.msra.gmra.mrb[64].mxu0 %v14955_v10  ;;  %v5917_v10 = vld [vmem:[#allocation21 + $0x50] sm:$0xff] }
 0xd12   : > { %10826 = vmatprep.mubr.f32.mxu0 %v14974_v36  ;;  %11562 = vmatpush1.bf16.msra.mxu0 %v14880_v15  ;;  %v5910_v15 = vld [vmem:[#allocation21 + $0x18] sm:$0xff]  ;;  %v5920_v36 = vld [vmem:[#allocation21 + $0x68] sm:$0xff] }
 0xd13   : > { %11564 = vmatprep.subr.bf16.mxu0 %v14882_v52  ;;  %v11335_v52 = vpack.c.bf16 %v5910_v15, %v5908_v3 }
 0xd15   : > { %10827 = vmatmul.mubr.f32.gmra.mrb[66].mxu0 %v14978_v40  ;;  %11336 = vmatprep.subr.bf16.mxu1 %v11335_v52  ;;  %v5922_v40 = vld [vmem:[#allocation21 + $0x78] sm:$0xff] }
 0xd16   : > { %10829 = vmatprep.mubr.f32.mxu0 %v14990_v63  ;;  %11566 = vmatpush1.bf16.msra.mxu0 %v14886_v56  ;;  %v5907_v56 = vld [vmem:[#allocation21] sm:$0xff]  ;;  %v15157_v63 = vpack.c.bf16 %v5922_v40, %v5920_v36 }
 0xd17   : > { %11568 = vmatprep.subr.bf16.mxu0 %v14889_v22  ;;  %v5909_v22 = vld [vmem:[#allocation21 + $0x10] sm:$0xff] }
 0xd19   : > { %10830 = vmatmul.mubr.f32.gmra.mrb[68].mxu0 %v14994_v5  ;;  %v5919_v5 = vld [vmem:[#allocation21 + $0x60] sm:$0xff] }
 0xd1a   : > { %10832 = vmatprep.mubr.f32.mxu0 %v15006_v41  ;;  %11570 = vmatpush1.bf16.msra.mxu0 %v14892_v14  ;;  %v15142_v14 = vpack.c.bf16 %v5909_v22, %v5907_v56  ;;  %v5921_v41 = vld [vmem:[#allocation21 + $0x70] sm:$0xff] }
 0xd1b   : > { %11572 = vmatprep.subr.bf16.mxu0 %v14895_v12  ;;  %v5912_v12 = vld [vmem:[#allocation21 + $0x28] sm:$0xff]  ;;  %v15159_v55 = vpack.c.bf16 %v5921_v41, %v5919_v5 }
 0xd1c   : > { %11338 = vmatpush1.bf16.msra.mxu1 %v15142_v14 }
 0xd1d   : > { %10833 = vmatmul.mubr.f32.gmra.mrb[70].mxu0 %v15010_v44  ;;  %v5924_v44 = vld [vmem:[#allocation21 + $0x88] sm:$0xff] }
 0xd1e   : > { %10835 = vmatprep.mubr.f32.mxu0 %v15020_v16  ;;  %11574 = vmatpush1.bf16.msra.mxu0 %v14898_v8  ;;  %v5914_v8 = vld [vmem:[#allocation21 + $0x38] sm:$0xff]  ;;  %v15163_v7 = vpack.c.bf16 %v5926_v61, %v5924_v44  ;;  %v15165_v16 = vpack.c.bf16 %v5925_v18, %v5923_v9 }
 0xd1f   : > { %11576 = vmatprep.subr.bf16.mxu0 %v14901_v35  ;;  %v15145_v35 = vpack.c.bf16 %v5914_v8, %v5912_v12 }
 0xd21   : > { %10836 = vmatmul.mubr.f32.gmra.mrb[72].mxu0 %v15024_v42  ;;  %11340 = vmatprep.subr.bf16.mxu1 %v15145_v35  ;;  %v5930_v42 = vld [vmem:[#allocation21 + $0xb8] sm:$0xff] }
 0xd22   : > { %10838 = vmatprep.mubr.f32.mxu0 %v15033_v28  ;;  %11578 = vmatpush1.bf16.msra.mxu0 %v14904_v34  ;;  %v5911_v34 = vld [vmem:[#allocation21 + $0x20] sm:$0xff]  ;;  %v15169_v23 = vpack.c.bf16 %v5930_v42, %v5928_v20  ;;  %v5929_v28 = vld [vmem:[#allocation21 + $0xb0] sm:$0xff] }
 0xd23   : > { %11580 = vmatprep.subr.bf16.mxu0 %v14907_v37  ;;  %v5913_v37 = vld [vmem:[#allocation21 + $0x30] sm:$0xff]  ;;  %v15171_v29 = vpack.c.bf16 %v5929_v28, %v5927_v26 }
 0xd25   : > { %10839 = vmatmul.mubr.f32.gmra.mrb[74].mxu0 %v15036_v30  ;;  %v5932_v30 = vld [vmem:[#allocation21 + $0xc8] sm:$0xff] }
 0xd26   : > { %10841 = vmatprep.mubr.f32.mxu0 %v15045_v49  ;;  %11582 = vmatpush1.bf16.msra.mxu0 %v14910_v17  ;;  %v15147_v17 = vpack.c.bf16 %v5913_v37, %v5911_v34  ;;  %v15175_v38 = vpack.c.bf16 %v5934_v33, %v5932_v30  ;;  %v5931_v49 = vld [vmem:[#allocation21 + $0xc0] sm:$0xff] }
 0xd27   : > { %11584 = vmatprep.subr.bf16.mxu0 %v14913_v19  ;;  %v5916_v19 = vld [vmem:[#allocation21 + $0x48] sm:$0xff] }
 0xd28   : > { %11342 = vmatpush1.bf16.msra.mxu1 %v15147_v17 }
 0xd29   : > { %10842 = vmatmul.mubr.f32.gmra.mrb[76].mxu0 %v15048_v43  ;;  %v15177_v43 = vpack.c.bf16 %v5933_v51, %v5931_v49 }
 0xd2a   : > { %10844 = vmatprep.mubr.f32.mxu0 %v14848_v27  ;;  %11586 = vmatpush1.bf16.msra.mxu0 %v14916_v31  ;;  %v5918_v31 = vld [vmem:[#allocation21 + $0x58] sm:$0xff] }
 0xd2b   : > { %11588 = vmatprep.subr.bf16.mxu0 %v14919_v39  ;;  %v15151_v39 = vpack.c.bf16 %v5918_v31, %v5916_v19 }
 0xd2d   : > { %10845 = vmatmul.mubr.f32.gmra.mrb[78].mxu0 %v14848_v27  ;;  %11344 = vmatprep.subr.bf16.mxu1 %v15151_v39 }
 0xd2e   : > { %11590 = vmatpush1.bf16.msra.mxu0 %v14924_v48  ;;  %7368 = vmatprep.mubr.f32.mxu0 %v14848_v27  ;;  %v5915_v48 = vld [vmem:[#allocation21 + $0x40] sm:$0xff] }
 0xd2f   : > { %11592 = vmatprep.subr.bf16.mxu0 %v11335_v52  ;;  %v15153_v60 = vpack.c.bf16 %v5917_v10, %v5915_v48 }
 0xd31   : > { %11346 = vmatpush1.bf16.msra.mxu1 %v15153_v60 }
 0xd32   : > { %11348 = vmatprep.subr.bf16.mxu1 %v15157_v63 }
 0xd35   : > { %11350 = vmatpush1.bf16.msra.mxu1 %v15159_v55 }
 0xd36   : > { %11352 = vmatprep.subr.bf16.mxu1 %v15163_v7 }
 0xd39   : > { %11354 = vmatpush1.bf16.msra.mxu1 %v15165_v16 }
 0xd3a   : > { %11356 = vmatprep.subr.bf16.mxu1 %v15169_v23 }
 0xd3d   : > { %11358 = vmatpush1.bf16.msra.mxu1 %v15171_v29 }
 0xd3e   : > { %11360 = vmatprep.subr.bf16.mxu1 %v15175_v38 }
 0xd41   : > { %11362 = vmatpush1.bf16.msra.mxu1 %v15177_v43 }
 0xd42   : > { %11364 = vmatprep.subr.bf16.mxu1 %v15181_v46 }
 0xd45   : > { %11366 = vmatpush1.bf16.msra.mxu1 %v15183_v1 }
 0xd46   : > { %11368 = vmatprep.subr.bf16.mxu1 %v15187_v58 }
 0xde4   : > { %v10825_v32 = vpop.f32.mrb[64].mxu0 }
 0xde5   : > { %v5776_v4 = vadd.f32 %v10825_v32, %v15190_v25  ;;  %v5673_v62 = vpop.f32.mrb[65].mxu0 }
 0xde6   : > { %v5775_v2 = vadd.f32 %v15190_v25, %v5673_v62 }
 0xde7   : > { %v5792_v47 = vmax.f32 %v5776_v4, 0.0 }
 0xde8   : > { %v5791_v21 = vmax.f32 %v5775_v2, 0.0  ;;  %v10828_v24 = vpop.f32.mrb[66].mxu0  ;;  %v6209_v2 = vld [vmem:[#allocation21 + $0x200] sm:$0xff] }
 0xde9   : > { %v5815_v45 = vmul.f32 %v15193_v0, %v5792_v47  ;;  %v5778_v6 = vadd.f32 %v10828_v24, %v15190_v25  ;;  %v5683_v3 = vpop.f32.mrb[67].mxu0  ;;  %v6211_v47 = vld [vmem:[#allocation21 + $0x210] sm:$0xff] }
 0xdea   : > { %v5814_v15 = vmul.f32 %v15193_v0, %v5791_v21  ;;  %v5777_v52 = vadd.f32 %v15190_v25, %v5683_v3  ;;  %v6216_v3 = vld [vmem:[#allocation21 + $0x238] sm:$0xff] }
 0xdeb   : > { %v15203_v56 = vadd.f32 %v15196_v13, %v5815_v45  ;;  %v5794_v22 = vmax.f32 %v5778_v6, 0.0 }
 0xdec   : > { %v15206_v12 = vadd.f32 %v15196_v13, %v5814_v15  ;;  %v5793_v8 = vmax.f32 %v5777_v52, 0.0  ;;  %v10831_v34 = vpop.f32.mrb[68].mxu0 }
 0xded   : > { %5884 = vst [vmem:[#allocation2 + $0x38] sm:$0xff] %v15203_v56  ;;  %v5817_v37 = vmul.f32 %v15193_v0, %v5794_v22  ;;  %v5780_v19 = vadd.f32 %v10831_v34, %v15190_v25  ;;  %v5693_v31 = vpop.f32.mrb[69].mxu0  ;;  %v15267_v22 = vpack.c.bf16 %v6211_v47, %v6209_v2 }
 0xdee   : > { %5883 = vst [vmem:[#allocation2 + $0x30] sm:$0xff] %v15206_v12  ;;  %v5816_v48 = vmul.f32 %v15193_v0, %v5793_v8  ;;  %v5779_v10 = vadd.f32 %v15190_v25, %v5693_v31  ;;  %6063 = vmatmul.mubr.f32.gmra.mrb[104].mxu1 %v15206_v12  ;;  %v6215_v31 = vld [vmem:[#allocation21 + $0x230] sm:$0xff] }
 0xdef   : > { %v15216_v36 = vadd.f32 %v15196_v13, %v5817_v37  ;;  %v5796_v40 = vmax.f32 %v5780_v19, 0.0  ;;  %6068 = vmatprep.mubr.f32.mxu1 %v14848_v27  ;;  %v6213_v19 = vld [vmem:[#allocation21 + $0x220] sm:$0xff] }
 0xdf0   : > { %v15220_v5 = vadd.f32 %v15196_v13, %v5816_v48  ;;  %v5795_v41 = vmax.f32 %v5779_v10, 0.0  ;;  %v10834_v44 = vpop.f32.mrb[70].mxu0 }
 0xdf1   : > { %5886 = vst [vmem:[#allocation2 + $0x48] sm:$0xff] %v15216_v36  ;;  %v5819_v61 = vmul.f32 %v15193_v0, %v5796_v40  ;;  %v5782_v9 = vadd.f32 %v10834_v44, %v15190_v25  ;;  %v5703_v18 = vpop.f32.mrb[71].mxu0 }
 0xdf2   : > { %5885 = vst [vmem:[#allocation2 + $0x40] sm:$0xff] %v15220_v5  ;;  %v5818_v20 = vmul.f32 %v15193_v0, %v5795_v41  ;;  %v5781_v42 = vadd.f32 %v15190_v25, %v5703_v18  ;;  %6069 = vmatmul.mubr.f32.gmra.mrb[106].mxu1 %v15203_v56 }
 0xdf3   : > { %v15230_v26 = vadd.f32 %v15196_v13, %v5819_v61  ;;  %v5798_v28 = vmax.f32 %v5782_v9, 0.0  ;;  %6074 = vmatprep.mubr.f32.mxu1 %v14848_v27  ;;  %v6220_v61 = vld [vmem:[#allocation21 + $0x258] sm:$0xff] }
 0xdf4   : > { %v15234_v30 = vadd.f32 %v15196_v13, %v5818_v20  ;;  %v5797_v33 = vmax.f32 %v5781_v42, 0.0  ;;  %v10837_v49 = vpop.f32.mrb[72].mxu0  ;;  %v15289_v20 = vpack.c.bf16 %v6215_v31, %v6213_v19 }
 0xdf5   : > { %5888 = vst [vmem:[#allocation2 + $0x58] sm:$0xff] %v15230_v26  ;;  %v5821_v51 = vmul.f32 %v15193_v0, %v5798_v28  ;;  %v5784_v59 = vadd.f32 %v10837_v49, %v15190_v25  ;;  %v5713_v57 = vpop.f32.mrb[73].mxu0  ;;  %v6217_v49 = vld [vmem:[#allocation21 + $0x240] sm:$0xff] }
 0xdf6   : > { %5887 = vst [vmem:[#allocation2 + $0x50] sm:$0xff] %v15234_v30  ;;  %v5820_v50 = vmul.f32 %v15193_v0, %v5797_v33  ;;  %v5783_v53 = vadd.f32 %v15190_v25, %v5713_v57  ;;  %6075 = vmatmul.mubr.f32.gmra.mrb[108].mxu1 %v15220_v5  ;;  %7369 = vmatmul.mubr.f32.vlgmr.msra.gmra.mrb[80].mxu0 %v15234_v30 }
 0xdf7   : > { %v15245_v54 = vadd.f32 %v15196_v13, %v5821_v51  ;;  %v5800_v11 = vmax.f32 %v5784_v59, 0.0  ;;  %11594 = vmatpush1.bf16.msra.mxu0 %v15142_v14  ;;  %6080 = vmatprep.mubr.f32.mxu1 %v14848_v27  ;;  %v6219_v51 = vld [vmem:[#allocation21 + $0x250] sm:$0xff] }
 0xdf8   : > { %v15250_v32 = vadd.f32 %v15196_v13, %v5820_v50  ;;  %v5799_v4 = vmax.f32 %v5783_v53, 0.0  ;;  %v10840_v62 = vpop.f32.mrb[74].mxu0  ;;  %7374 = vmatprep.mubr.f32.mxu0 %v14848_v27  ;;  %11596 = vmatprep.subr.bf16.mxu0 %v15145_v35  ;;  %v6214_v35 = vld [vmem:[#allocation21 + $0x228] sm:$0xff] }
 0xdf9   : > { %5890 = vst [vmem:[#allocation2 + $0x68] sm:$0xff] %v15245_v54  ;;  %v5823_v21 = vmul.f32 %v15193_v0, %v5800_v11  ;;  %v5786_v24 = vadd.f32 %v10840_v62, %v15190_v25  ;;  %v5723_v14 = vpop.f32.mrb[75].mxu0  ;;  %v15277_v40 = vpack.c.bf16 %v6216_v3, %v6214_v35  ;;  %v6224_v62 = vld [vmem:[#allocation21 + $0x278] sm:$0xff]  ;;  %v6226_v35 = vld [vmem:[#allocation21 + $0x288] sm:$0xff] }
 0xdfa   : > { %5889 = vst [vmem:[#allocation2 + $0x60] sm:$0xff] %v15250_v32  ;;  %v5822_v45 = vmul.f32 %v15193_v0, %v5799_v4  ;;  %v5785_v6 = vadd.f32 %v15190_v25, %v5723_v14  ;;  %6081 = vmatmul.mubr.f32.gmra.mrb[110].mxu1 %v15216_v36  ;;  %7375 = vmatmul.mubr.f32.gmra.mrb[82].mxu0 %v15230_v26  ;;  %v6222_v4 = vld [vmem:[#allocation21 + $0x268] sm:$0xff]  ;;  %v6223_v14 = vld [vmem:[#allocation21 + $0x270] sm:$0xff]  ;;  %v6228_v3 = vld [vmem:[#allocation21 + $0x298] sm:$0xff] }
 0xdfb   : > { %v15263_v15 = vadd.f32 %v15196_v13, %v5823_v21  ;;  %v5802_v52 = vmax.f32 %v5786_v24, 0.0  ;;  %11598 = vmatpush1.bf16.msra.mxu0 %v15147_v17  ;;  %6151 = vmatprep.mubr.f32.mxu1 %v14848_v27  ;;  %v6221_v24 = vld [vmem:[#allocation21 + $0x260] sm:$0xff]  ;;  %v15347_v19 = vpack.c.bf16 %v6228_v3, %v6226_v35  ;;  %v6396_v3 = vld [vmem:[#allocation21 + $0x388] sm:$0xff] }
 0xdfc   : > { %v15270_v8 = vadd.f32 %v15196_v13, %v5822_v45  ;;  %v5801_v34 = vmax.f32 %v5785_v6, 0.0  ;;  %v10843_v37 = vpop.f32.mrb[76].mxu0  ;;  %7380 = vmatprep.mubr.f32.mxu0 %v14848_v27  ;;  %11600 = vmatprep.subr.bf16.mxu0 %v15151_v39  ;;  %v6218_v39 = vld [vmem:[#allocation21 + $0x248] sm:$0xff] }
 0xdfd   : > { %5892 = vst [vmem:[#allocation2 + $0x78] sm:$0xff] %v15263_v15  ;;  %v5825_v48 = vmul.f32 %v15193_v0, %v5802_v52  ;;  %v5788_v17 = vadd.f32 %v10843_v37, %v15190_v25  ;;  %v5733_v10 = vpop.f32.mrb[77].mxu0  ;;  %v15303_v50 = vpack.c.bf16 %v6220_v61, %v6218_v39  ;;  %v6227_v37 = vld [vmem:[#allocation21 + $0x290] sm:$0xff]  ;;  %v6238_v61 = vld [vmem:[#allocation21 + $0x2e8] sm:$0xff] }
 0xdfe   : > { %5891 = vst [vmem:[#allocation2 + $0x70] sm:$0xff] %v15270_v8  ;;  %v5824_v41 = vmul.f32 %v15193_v0, %v5801_v34  ;;  %v5787_v44 = vadd.f32 %v15190_v25, %v5733_v10  ;;  %6152 = vmatmul.mubr.f32.vlgmr.msra.gmra.mrb[96].mxu1 %v14848_v27  ;;  %7381 = vmatmul.mubr.f32.gmra.mrb[84].mxu0 %v15250_v32  ;;  %v15294_v27 = vld [vmem:[#allocation2 + $0xb0] sm:$0xff] }
 0xdff   : > { %v15285_v9 = vadd.f32 %v15196_v13, %v5825_v48  ;;  %v5804_v18 = vmax.f32 %v5788_v17, 0.0  ;;  %11370 = vmatpush1.bf16.msra.mxu1 %v15267_v22  ;;  %11602 = vmatpush1.bf16.msra.mxu0 %v15153_v60  ;;  %v6231_v48 = vld [vmem:[#allocation21 + $0x2b0] sm:$0xff]  ;;  %v6234_v10 = vld [vmem:[#allocation21 + $0x2c8] sm:$0xff] }
 0xe00   : > { %v15292_v42 = vadd.f32 %v15196_v13, %v5824_v41  ;;  %v5803_v28 = vmax.f32 %v5787_v44, 0.0  ;;  %v10846_v33 = vpop.f32.mrb[78].mxu0  ;;  %6157 = vmatprep.mubr.f32.mxu1 %v15294_v27  ;;  %7386 = vmatprep.mubr.f32.mxu0 %v15294_v27  ;;  %v6233_v44 = vld [vmem:[#allocation21 + $0x2c0] sm:$0xff] }
 0xe01   : > { %5894 = vst [vmem:[#allocation2 + $0x88] sm:$0xff] %v15285_v9  ;;  %v5827_v59 = vmul.f32 %v15193_v0, %v5804_v18  ;;  %v5790_v60 = vadd.f32 %v10846_v33, %v15190_v25  ;;  %v5743_v57 = vpop.f32.mrb[79].mxu0  ;;  %11372 = vmatprep.subr.bf16.mxu1 %v15277_v40  ;;  %11604 = vmatprep.subr.bf16.mxu0 %v15157_v63 }
 0xe02   : > { %5893 = vst [vmem:[#allocation2 + $0x80] sm:$0xff] %v15292_v42  ;;  %v5826_v53 = vmul.f32 %v15193_v0, %v5803_v28  ;;  %v5789_v11 = vadd.f32 %v15190_v25, %v5743_v57  ;;  %6158 = vmatmul.mubr.f32.gmra.mrb[98].mxu1 %v15294_v27  ;;  %7387 = vmatmul.mubr.f32.gmra.mrb[86].mxu0 %v15245_v54  ;;  %v6237_v28 = vld [vmem:[#allocation21 + $0x2e0] sm:$0xff]  ;;  %v6384_v57 = vld [vmem:[#allocation21 + $0x328] sm:$0xff] }
 0xe03   : > { %v15311_v2 = vadd.f32 %v15196_v13, %v5827_v59  ;;  %v5806_v47 = vmax.f32 %v5790_v60, 0.0  ;;  %11374 = vmatpush1.bf16.msra.mxu1 %v15289_v20  ;;  %11606 = vmatpush1.bf16.msra.mxu0 %v15159_v55  ;;  %v15315_v63 = vpack.c.bf16 %v6219_v51, %v6217_v49  ;;  %v15326_v55 = vpack.c.bf16 %v6224_v62, %v6222_v4  ;;  %v6380_v49 = vld [vmem:[#allocation21 + $0x308] sm:$0xff]  ;;  %v6379_v59 = vld [vmem:[#allocation21 + $0x300] sm:$0xff] }
 0xe04   : > { %v15318_v21 = vadd.f32 %v15196_v13, %v5826_v53  ;;  %v5805_v25 = vmax.f32 %v5789_v11, 0.0  ;;  %6163 = vmatprep.mubr.f32.mxu1 %v15294_v27  ;;  %7392 = vmatprep.mubr.f32.mxu0 %v15294_v27  ;;  %v6383_v11 = vld [vmem:[#allocation21 + $0x320] sm:$0xff]  ;;  %v6388_v62 = vld [vmem:[#allocation21 + $0x348] sm:$0xff] }
 0xe05   : > { %5896 = vst [vmem:[#allocation2 + $0x98] sm:$0xff] %v15311_v2  ;;  %v5829_v45 = vmul.f32 %v15193_v0, %v5806_v47  ;;  %11376 = vmatprep.subr.bf16.mxu1 %v15303_v50  ;;  %11608 = vmatprep.subr.bf16.mxu0 %v15163_v7  ;;  %v15337_v7 = vpack.c.bf16 %v6223_v14, %v6221_v24  ;;  %v6392_v14 = vld [vmem:[#allocation21 + $0x368] sm:$0xff] }
 0xe06   : > { %5895 = vst [vmem:[#allocation2 + $0x90] sm:$0xff] %v15318_v21  ;;  %v5828_v6 = vmul.f32 %v15193_v0, %v5805_v25  ;;  %6164 = vmatmul.mubr.f32.gmra.mrb[100].mxu1 %v15294_v27  ;;  %7393 = vmatmul.mubr.f32.gmra.mrb[88].mxu0 %v15270_v8  ;;  %v6225_v0 = vld [vmem:[#allocation21 + $0x280] sm:$0xff] }
 0xe07   : > { %v15333_v52 = vadd.f32 %v15196_v13, %v5829_v45  ;;  %11378 = vmatpush1.bf16.msra.mxu1 %v15315_v63  ;;  %11610 = vmatpush1.bf16.msra.mxu0 %v15165_v16  ;;  %v6230_v16 = vld [vmem:[#allocation21 + $0x2a8] sm:$0xff]  ;;  %v15354_v31 = vpack.c.bf16 %v6227_v37, %v6225_v0  ;;  %v6387_v25 = vld [vmem:[#allocation21 + $0x340] sm:$0xff] }
 0xe08   : > { %v15340_v34 = vadd.f32 %v15196_v13, %v5828_v6  ;;  %6169 = vmatprep.mubr.f32.mxu1 %v15294_v27  ;;  %7398 = vmatprep.mubr.f32.mxu0 %v15294_v27  ;;  %v6232_v13 = vld [vmem:[#allocation21 + $0x2b8] sm:$0xff]  ;;  %v6391_v6 = vld [vmem:[#allocation21 + $0x360] sm:$0xff] }
 0xe09   : > { %5898 = vst [vmem:[#allocation2 + $0xa8] sm:$0xff] %v15333_v52  ;;  %11380 = vmatprep.subr.bf16.mxu1 %v15326_v55  ;;  %11612 = vmatprep.subr.bf16.mxu0 %v15169_v23  ;;  %v6229_v23 = vld [vmem:[#allocation21 + $0x2a0] sm:$0xff]  ;;  %v15360_v17 = vpack.c.bf16 %v6232_v13, %v6230_v16  ;;  %v6400_v13 = vld [vmem:[#allocation21 + $0x3a8] sm:$0xff] }
 0xe0a   : > { %5897 = vst [vmem:[#allocation2 + $0xa0] sm:$0xff] %v15340_v34  ;;  %6170 = vmatmul.mubr.f32.gmra.mrb[102].mxu1 %v15294_v27  ;;  %7399 = vmatmul.mubr.f32.gmra.mrb[90].mxu0 %v15263_v15  ;;  %v15366_v41 = vpack.c.bf16 %v6231_v48, %v6229_v23  ;;  %v6395_v37 = vld [vmem:[#allocation21 + $0x380] sm:$0xff] }
 0xe0b   : > { %11382 = vmatpush1.bf16.msra.mxu1 %v15337_v7  ;;  %11614 = vmatpush1.bf16.msra.mxu0 %v15171_v29  ;;  %v6236_v29 = vld [vmem:[#allocation21 + $0x2d8] sm:$0xff]  ;;  %v6399_v48 = vld [vmem:[#allocation21 + $0x3a0] sm:$0xff] }
 0xe0c   : > { %6175 = vmatprep.mubr.f32.mxu1 %v15294_v27  ;;  %7404 = vmatprep.mubr.f32.mxu0 %v15294_v27  ;;  %v15372_v39 = vpack.c.bf16 %v6236_v29, %v6234_v10  ;;  %v6404_v29 = vld [vmem:[#allocation21 + $0x3c8] sm:$0xff] }
 0xe0d   : > { %11384 = vmatprep.subr.bf16.mxu1 %v15347_v19  ;;  %11616 = vmatprep.subr.bf16.mxu0 %v15175_v38  ;;  %v6235_v38 = vld [vmem:[#allocation21 + $0x2d0] sm:$0xff] }
 0xe0e   : > { %6176 = vmatmul.mubr.f32.gmra.mrb[104].mxu1 %v15294_v27  ;;  %7405 = vmatmul.mubr.f32.gmra.mrb[92].mxu0 %v15292_v42  ;;  %v15378_v18 = vpack.c.bf16 %v6235_v38, %v6233_v44  ;;  %v6403_v38 = vld [vmem:[#allocation21 + $0x3c0] sm:$0xff] }
 0xe0f   : > { %11386 = vmatpush1.bf16.msra.mxu1 %v15354_v31  ;;  %11618 = vmatpush1.bf16.msra.mxu0 %v15177_v43  ;;  %v6240_v43 = vld [vmem:[#allocation21 + $0x2f8] sm:$0xff] }
 0xe10   : > { %6181 = vmatprep.mubr.f32.mxu1 %v15294_v27  ;;  %7410 = vmatprep.mubr.f32.mxu0 %v15294_v27  ;;  %v15384_v33 = vpack.c.bf16 %v6240_v43, %v6238_v61  ;;  %v6408_v43 = vld [vmem:[#allocation21 + $0x3e8] sm:$0xff] }
 0xe11   : > { %11388 = vmatprep.subr.bf16.mxu1 %v15360_v17  ;;  %11620 = vmatprep.subr.bf16.mxu0 %v15181_v46  ;;  %v6239_v46 = vld [vmem:[#allocation21 + $0x2f0] sm:$0xff] }
 0xe12   : > { %6182 = vmatmul.mubr.f32.gmra.mrb[106].mxu1 %v15294_v27  ;;  %7411 = vmatmul.mubr.f32.gmra.mrb[94].mxu0 %v15285_v9  ;;  %v15390_v51 = vpack.c.bf16 %v6239_v46, %v6237_v28  ;;  %v6407_v46 = vld [vmem:[#allocation21 + $0x3e0] sm:$0xff] }
 0xe13   : > { %11390 = vmatpush1.bf16.msra.mxu1 %v15366_v41  ;;  %11622 = vmatpush1.bf16.msra.mxu0 %v15183_v1  ;;  %v6382_v1 = vld [vmem:[#allocation21 + $0x318] sm:$0xff] }
 0xe14   : > { %6187 = vmatprep.mubr.f32.mxu1 %v15294_v27  ;;  %7481 = vmatprep.mubr.f32.mxu0 %v15294_v27  ;;  %v15396_v60 = vpack.c.bf16 %v6382_v1, %v6380_v49  ;;  %v6550_v1 = vld [vmem:[#allocation21 + $0x408] sm:$0xff] }
 0xe15   : > { %11392 = vmatprep.subr.bf16.mxu1 %v15372_v39  ;;  %11624 = vmatprep.subr.bf16.mxu0 %v15187_v58  ;;  %v6381_v58 = vld [vmem:[#allocation21 + $0x310] sm:$0xff] }
 0xe16   : > { %6188 = vmatmul.mubr.f32.gmra.mrb[108].mxu1 %v15206_v12  ;;  %7482 = vmatmul.mubr.f32.vlgmr.msra.gmra.mrb[80].mxu0 %v15220_v5  ;;  %v15402_v53 = vpack.c.bf16 %v6381_v58, %v6379_v59  ;;  %v6549_v58 = vld [vmem:[#allocation21 + $0x400] sm:$0xff] }
 0xe17   : > { %11394 = vmatpush1.bf16.msra.mxu1 %v15378_v18  ;;  %11626 = vmatpush1.bf16.msra.mxu0 %v15267_v22  ;;  %v6386_v22 = vld [vmem:[#allocation21 + $0x338] sm:$0xff] }
 0xe18   : > { %6193 = vmatprep.mubr.f32.mxu1 %v15294_v27  ;;  %7487 = vmatprep.mubr.f32.mxu0 %v15294_v27  ;;  %v15408_v4 = vpack.c.bf16 %v6386_v22, %v6384_v57  ;;  %v6554_v22 = vld [vmem:[#allocation21 + $0x428] sm:$0xff] }
 0xe19   : > { %11396 = vmatprep.subr.bf16.mxu1 %v15384_v33  ;;  %11628 = vmatprep.subr.bf16.mxu0 %v15277_v40  ;;  %v6385_v40 = vld [vmem:[#allocation21 + $0x330] sm:$0xff] }
 0xe1a   : > { %6194 = vmatmul.mubr.f32.gmra.mrb[110].mxu1 %v15203_v56  ;;  %7488 = vmatmul.mubr.f32.gmra.mrb[82].mxu0 %v15216_v36  ;;  %v15414_v47 = vpack.c.bf16 %v6385_v40, %v6383_v11  ;;  %v6553_v40 = vld [vmem:[#allocation21 + $0x420] sm:$0xff] }
 0xe1b   : > { %11398 = vmatpush1.bf16.msra.mxu1 %v15390_v51  ;;  %11630 = vmatpush1.bf16.msra.mxu0 %v15289_v20  ;;  %v6390_v20 = vld [vmem:[#allocation21 + $0x358] sm:$0xff] }
 0xe1c   : > { %6305 = vmatprep.mubr.f32.mxu1 %v15294_v27  ;;  %7493 = vmatprep.mubr.f32.mxu0 %v15294_v27  ;;  %v15420_v24 = vpack.c.bf16 %v6390_v20, %v6388_v62  ;;  %v6558_v20 = vld [vmem:[#allocation21 + $0x448] sm:$0xff] }
 0xe1d   : > { %11400 = vmatprep.subr.bf16.mxu1 %v15396_v60  ;;  %11632 = vmatprep.subr.bf16.mxu0 %v15303_v50  ;;  %v6389_v50 = vld [vmem:[#allocation21 + $0x350] sm:$0xff] }
 0xe1e   : > { %6306 = vmatmul.mubr.f32.vlgmr.msra.gmra.mrb[96].mxu1 %v15294_v27  ;;  %7494 = vmatmul.mubr.f32.gmra.mrb[84].mxu0 %v15234_v30  ;;  %v15426_v45 = vpack.c.bf16 %v6389_v50, %v6387_v25  ;;  %v6557_v50 = vld [vmem:[#allocation21 + $0x440] sm:$0xff] }
 0xe1f   : > { %11402 = vmatpush1.bf16.msra.mxu1 %v15402_v53  ;;  %11634 = vmatpush1.bf16.msra.mxu0 %v15315_v63  ;;  %v6394_v63 = vld [vmem:[#allocation21 + $0x378] sm:$0xff] }
 0xe20   : > { %6311 = vmatprep.mubr.f32.mxu1 %v15294_v27  ;;  %7499 = vmatprep.mubr.f32.mxu0 %v15294_v27  ;;  %v15432_v35 = vpack.c.bf16 %v6394_v63, %v6392_v14  ;;  %v6562_v14 = vld [vmem:[#allocation21 + $0x468] sm:$0xff]  ;;  %v6564_v63 = vld [vmem:[#allocation21 + $0x478] sm:$0xff] }
 0xe21   : > { %11404 = vmatprep.subr.bf16.mxu1 %v15408_v4  ;;  %11636 = vmatprep.subr.bf16.mxu0 %v15326_v55  ;;  %v6393_v55 = vld [vmem:[#allocation21 + $0x370] sm:$0xff] }
 0xe22   : > { %6312 = vmatmul.mubr.f32.gmra.mrb[98].mxu1 %v15294_v27  ;;  %7500 = vmatmul.mubr.f32.gmra.mrb[86].mxu0 %v15230_v26  ;;  %v15438_v0 = vpack.c.bf16 %v6393_v55, %v6391_v6  ;;  %v6561_v6 = vld [vmem:[#allocation21 + $0x460] sm:$0xff]  ;;  %v6563_v55 = vld [vmem:[#allocation21 + $0x470] sm:$0xff] }
 0xe23   : > { %11406 = vmatpush1.bf16.msra.mxu1 %v15414_v47  ;;  %11638 = vmatpush1.bf16.msra.mxu0 %v15337_v7  ;;  %v6398_v7 = vld [vmem:[#allocation21 + $0x398] sm:$0xff] }
 0xe24   : > { %6317 = vmatprep.mubr.f32.mxu1 %v15294_v27  ;;  %7505 = vmatprep.mubr.f32.mxu0 %v15294_v27  ;;  %v15444_v16 = vpack.c.bf16 %v6398_v7, %v6396_v3  ;;  %v6568_v3 = vld [vmem:[#allocation21 + $0x498] sm:$0xff]  ;;  %v15534_v7 = vpack.c.bf16 %v6563_v55, %v6561_v6  ;;  %v6735_v55 = vld [vmem:[#allocation21 + $0x580] sm:$0xff] }
 0xe25   : > { %11408 = vmatprep.subr.bf16.mxu1 %v15420_v24  ;;  %11640 = vmatprep.subr.bf16.mxu0 %v15347_v19  ;;  %v6397_v19 = vld [vmem:[#allocation21 + $0x390] sm:$0xff] }
 0xe26   : > { %6318 = vmatmul.mubr.f32.gmra.mrb[100].mxu1 %v15206_v12  ;;  %7506 = vmatmul.mubr.f32.gmra.mrb[88].mxu0 %v15250_v32  ;;  %v15450_v23 = vpack.c.bf16 %v6397_v19, %v6395_v37  ;;  %v6567_v37 = vld [vmem:[#allocation21 + $0x490] sm:$0xff] }
 0xe27   : > { %11410 = vmatpush1.bf16.msra.mxu1 %v15426_v45  ;;  %11642 = vmatpush1.bf16.msra.mxu0 %v15354_v31  ;;  %v6402_v31 = vld [vmem:[#allocation21 + $0x3b8] sm:$0xff] }
 0xe28   : > { %6323 = vmatprep.mubr.f32.mxu1 %v15294_v27  ;;  %7511 = vmatprep.mubr.f32.mxu0 %v15294_v27  ;;  %v15456_v10 = vpack.c.bf16 %v6402_v31, %v6400_v13  ;;  %v6572_v13 = vld [vmem:[#allocation21 + $0x4b8] sm:$0xff] }
 0xe29   : > { %11412 = vmatprep.subr.bf16.mxu1 %v15432_v35  ;;  %11644 = vmatprep.subr.bf16.mxu0 %v15360_v17  ;;  %v6401_v17 = vld [vmem:[#allocation21 + $0x3b0] sm:$0xff] }
 0xe2a   : > { %6324 = vmatmul.mubr.f32.gmra.mrb[102].mxu1 %v15203_v56  ;;  %7512 = vmatmul.mubr.f32.gmra.mrb[90].mxu0 %v15245_v54  ;;  %v15462_v44 = vpack.c.bf16 %v6401_v17, %v6399_v48  ;;  %v6571_v48 = vld [vmem:[#allocation21 + $0x4b0] sm:$0xff] }
 0xe2b   : > { %11414 = vmatpush1.bf16.msra.mxu1 %v15438_v0  ;;  %11646 = vmatpush1.bf16.msra.mxu0 %v15366_v41  ;;  %v6406_v41 = vld [vmem:[#allocation21 + $0x3d8] sm:$0xff] }
 0xe2c   : > { %6329 = vmatprep.mubr.f32.mxu1 %v15294_v27  ;;  %7517 = vmatprep.mubr.f32.mxu0 %v15294_v27  ;;  %v15468_v61 = vpack.c.bf16 %v6406_v41, %v6404_v29  ;;  %v6576_v29 = vld [vmem:[#allocation21 + $0x4d8] sm:$0xff] }
 0xe2d   : > { %11416 = vmatprep.subr.bf16.mxu1 %v15444_v16  ;;  %11648 = vmatprep.subr.bf16.mxu0 %v15372_v39  ;;  %v6405_v39 = vld [vmem:[#allocation21 + $0x3d0] sm:$0xff] }
 0xe2e   : > { %6330 = vmatmul.mubr.f32.gmra.mrb[104].mxu1 %v15220_v5  ;;  %7518 = vmatmul.mubr.f32.gmra.mrb[92].mxu0 %v15270_v8  ;;  %v15474_v28 = vpack.c.bf16 %v6405_v39, %v6403_v38  ;;  %v6575_v38 = vld [vmem:[#allocation21 + $0x4d0] sm:$0xff] }
 0xe2f   : > { %11418 = vmatpush1.bf16.msra.mxu1 %v15450_v23  ;;  %11650 = vmatpush1.bf16.msra.mxu0 %v15378_v18  ;;  %v6410_v18 = vld [vmem:[#allocation21 + $0x3f8] sm:$0xff] }
 0xe30   : > { %6335 = vmatprep.mubr.f32.mxu1 %v15294_v27  ;;  %7523 = vmatprep.mubr.f32.mxu0 %v15294_v27  ;;  %v15480_v49 = vpack.c.bf16 %v6410_v18, %v6408_v43  ;;  %v6580_v43 = vld [vmem:[#allocation21 + $0x4f8] sm:$0xff] }
 0xe31   : > { %11420 = vmatprep.subr.bf16.mxu1 %v15456_v10  ;;  %11652 = vmatprep.subr.bf16.mxu0 %v15384_v33  ;;  %v6409_v33 = vld [vmem:[#allocation21 + $0x3f0] sm:$0xff] }
 0xe32   : > { %6336 = vmatmul.mubr.f32.gmra.mrb[106].mxu1 %v15216_v36  ;;  %7524 = vmatmul.mubr.f32.gmra.mrb[94].mxu0 %v15263_v15  ;;  %v15486_v59 = vpack.c.bf16 %v6409_v33, %v6407_v46  ;;  %v6579_v46 = vld [vmem:[#allocation21 + $0x4f0] sm:$0xff] }
 0xe33   : > { %11422 = vmatpush1.bf16.msra.mxu1 %v15462_v44  ;;  %11654 = vmatpush1.bf16.msra.mxu0 %v15390_v51  ;;  %v6552_v51 = vld [vmem:[#allocation21 + $0x418] sm:$0xff] }
 0xe34   : > { %6341 = vmatprep.mubr.f32.mxu1 %v15294_v27  ;;  %7594 = vmatprep.mubr.f32.mxu0 %v15294_v27  ;;  %v15492_v57 = vpack.c.bf16 %v6552_v51, %v6550_v1  ;;  %v6722_v1 = vld [vmem:[#allocation21 + $0x518] sm:$0xff] }
 0xe35   : > { %11424 = vmatprep.subr.bf16.mxu1 %v15468_v61  ;;  %11656 = vmatprep.subr.bf16.mxu0 %v15396_v60  ;;  %v6551_v60 = vld [vmem:[#allocation21 + $0x410] sm:$0xff] }
 0xe36   : > { %6342 = vmatmul.mubr.f32.gmra.mrb[108].mxu1 %v15234_v30  ;;  %7595 = vmatmul.mubr.f32.vlgmr.msra.gmra.mrb[80].mxu0 %v15250_v32  ;;  %v15498_v11 = vpack.c.bf16 %v6551_v60, %v6549_v58  ;;  %v6721_v58 = vld [vmem:[#allocation21 + $0x510] sm:$0xff] }
 0xe37   : > { %11426 = vmatpush1.bf16.msra.mxu1 %v15474_v28  ;;  %11658 = vmatpush1.bf16.msra.mxu0 %v15402_v53  ;;  %v6556_v53 = vld [vmem:[#allocation21 + $0x438] sm:$0xff] }
 0xe38   : > { %6347 = vmatprep.mubr.f32.mxu1 %v15294_v27  ;;  %7600 = vmatprep.mubr.f32.mxu0 %v15294_v27  ;;  %v15504_v62 = vpack.c.bf16 %v6556_v53, %v6554_v22  ;;  %v6726_v22 = vld [vmem:[#allocation21 + $0x538] sm:$0xff] }
 0xe39   : > { %11428 = vmatprep.subr.bf16.mxu1 %v15480_v49  ;;  %11660 = vmatprep.subr.bf16.mxu0 %v15408_v4  ;;  %v6555_v4 = vld [vmem:[#allocation21 + $0x430] sm:$0xff] }
 0xe3a   : > { %6348 = vmatmul.mubr.f32.gmra.mrb[110].mxu1 %v15230_v26  ;;  %7601 = vmatmul.mubr.f32.gmra.mrb[82].mxu0 %v15245_v54  ;;  %v15510_v25 = vpack.c.bf16 %v6555_v4, %v6553_v40  ;;  %v6725_v40 = vld [vmem:[#allocation21 + $0x530] sm:$0xff] }
 0xe3b   : > { %11430 = vmatpush1.bf16.msra.mxu1 %v15486_v59  ;;  %11662 = vmatpush1.bf16.msra.mxu0 %v15414_v47  ;;  %v6560_v47 = vld [vmem:[#allocation21 + $0x458] sm:$0xff] }
 0xe3c   : > { %6475 = vmatprep.mubr.f32.mxu1 %v15294_v27  ;;  %7606 = vmatprep.mubr.f32.mxu0 %v15294_v27 }
 0xe3d   : > { %11432 = vmatprep.subr.bf16.mxu1 %v15492_v57  ;;  %11664 = vmatprep.subr.bf16.mxu0 %v15420_v24  ;;  %v6559_v24 = vld [vmem:[#allocation21 + $0x450] sm:$0xff] }
 0xe3e   : > { %6476 = vmatmul.mubr.f32.vlgmr.msra.gmra.mrb[96].mxu1 %v15206_v12  ;;  %7607 = vmatmul.mubr.f32.gmra.mrb[84].mxu0 %v15270_v8  ;;  %v15516_v12 = vpack.c.bf16 %v6560_v47, %v6558_v20  ;;  %v6730_v20 = vld [vmem:[#allocation21 + $0x558] sm:$0xff] }
 0xe3f   : > { %11434 = vmatpush1.bf16.msra.mxu1 %v15498_v11  ;;  %11666 = vmatpush1.bf16.msra.mxu0 %v15426_v45  ;;  %v15522_v45 = vpack.c.bf16 %v6559_v24, %v6557_v50  ;;  %v6729_v50 = vld [vmem:[#allocation21 + $0x550] sm:$0xff]  ;;  %v6734_v24 = vld [vmem:[#allocation21 + $0x578] sm:$0xff] }
 0xe40   : > { %6481 = vmatprep.mubr.f32.mxu1 %v15294_v27  ;;  %7612 = vmatprep.mubr.f32.mxu0 %v15294_v27 }
 0xe41   : > { %11436 = vmatprep.subr.bf16.mxu1 %v15504_v62  ;;  %11668 = vmatprep.subr.bf16.mxu0 %v15432_v35  ;;  %v6566_v35 = vld [vmem:[#allocation21 + $0x488] sm:$0xff] }
 0xe42   : > { %6482 = vmatmul.mubr.f32.gmra.mrb[98].mxu1 %v15203_v56  ;;  %7613 = vmatmul.mubr.f32.gmra.mrb[86].mxu0 %v15263_v15  ;;  %v15528_v56 = vpack.c.bf16 %v6564_v63, %v6562_v14  ;;  %v15540_v19 = vpack.c.bf16 %v6568_v3, %v6566_v35  ;;  %v6731_v14 = vld [vmem:[#allocation21 + $0x560] sm:$0xff]  ;;  %v6733_v63 = vld [vmem:[#allocation21 + $0x570] sm:$0xff]  ;;  %v6742_v35 = vld [vmem:[#allocation21 + $0x5b8] sm:$0xff] }
 0xe43   : > { %11438 = vmatpush1.bf16.msra.mxu1 %v15510_v25  ;;  %11670 = vmatpush1.bf16.msra.mxu0 %v15438_v0  ;;  %v6565_v0 = vld [vmem:[#allocation21 + $0x480] sm:$0xff]  ;;  %v15630_v6 = vpack.c.bf16 %v6733_v63, %v6731_v14  ;;  %v6907_v14 = vld [vmem:[#allocation21 + $0x690] sm:$0xff] }
 0xe44   : > { %6487 = vmatprep.mubr.f32.mxu1 %v15294_v27  ;;  %7618 = vmatprep.mubr.f32.mxu0 %v15294_v27  ;;  %v15546_v31 = vpack.c.bf16 %v6567_v37, %v6565_v0  ;;  %v6741_v0 = vld [vmem:[#allocation21 + $0x5b0] sm:$0xff]  ;;  %v6746_v37 = vld [vmem:[#allocation21 + $0x5d8] sm:$0xff]  ;;  %v15735_v63 = vld [vmem:[#allocation2 + $0xa8] sm:$0xff] }
 0xe45   : > { %11440 = vmatprep.subr.bf16.mxu1 %v15516_v12  ;;  %11672 = vmatprep.subr.bf16.mxu0 %v15444_v16  ;;  %v6570_v16 = vld [vmem:[#allocation21 + $0x4a8] sm:$0xff] }
 0xe46   : > { %6488 = vmatmul.mubr.f32.gmra.mrb[100].mxu1 %v15220_v5  ;;  %7619 = vmatmul.mubr.f32.gmra.mrb[88].mxu0 %v15292_v42  ;;  %v15552_v17 = vpack.c.bf16 %v6572_v13, %v6570_v16  ;;  %v6743_v16 = vld [vmem:[#allocation21 + $0x5c0] sm:$0xff]  ;;  %v6745_v13 = vld [vmem:[#allocation21 + $0x5d0] sm:$0xff] }
 0xe47   : > { %11442 = vmatpush1.bf16.msra.mxu1 %v15522_v45  ;;  %11674 = vmatpush1.bf16.msra.mxu0 %v15450_v23  ;;  %v6569_v23 = vld [vmem:[#allocation21 + $0x4a0] sm:$0xff] }
 0xe48   : > { %6493 = vmatprep.mubr.f32.mxu1 %v15294_v27  ;;  %7624 = vmatprep.mubr.f32.mxu0 %v15294_v27  ;;  %v15558_v41 = vpack.c.bf16 %v6571_v48, %v6569_v23  ;;  %v15666_v23 = vpack.c.bf16 %v6745_v13, %v6743_v16  ;;  %v6747_v48 = vld [vmem:[#allocation21 + $0x5e0] sm:$0xff]  ;;  %v6918_v16 = vld [vmem:[#allocation21 + $0x6e8] sm:$0xff]  ;;  %v6920_v13 = vld [vmem:[#allocation21 + $0x6f8] sm:$0xff] }
 0xe49   : > { %11444 = vmatprep.subr.bf16.mxu1 %v15528_v56  ;;  %11676 = vmatprep.subr.bf16.mxu0 %v15456_v10  ;;  %v6574_v10 = vld [vmem:[#allocation21 + $0x4c8] sm:$0xff] }
 0xe4a   : > { %6494 = vmatmul.mubr.f32.gmra.mrb[102].mxu1 %v15216_v36  ;;  %7625 = vmatmul.mubr.f32.gmra.mrb[90].mxu0 %v15285_v9  ;;  %v15564_v39 = vpack.c.bf16 %v6576_v29, %v6574_v10  ;;  %v7788_v10 = vld [vmem:[#allocation2 + $0x80] sm:$0xff] }
 0xe4b   : > { %11446 = vmatpush1.bf16.msra.mxu1 %v15534_v7  ;;  %11678 = vmatpush1.bf16.msra.mxu0 %v15462_v44  ;;  %v6573_v44 = vld [vmem:[#allocation21 + $0x4c0] sm:$0xff]  ;;  %v6892_v29 = vld [vmem:[#allocation21 + $0x618] sm:$0xff] }
 0xe4c   : > { %6499 = vmatprep.mubr.f32.mxu1 %v15294_v27  ;;  %7630 = vmatprep.mubr.f32.mxu0 %v15294_v27  ;;  %v15570_v18 = vpack.c.bf16 %v6575_v38, %v6573_v44  ;;  %v6889_v44 = vld [vmem:[#allocation21 + $0x600] sm:$0xff]  ;;  %v6891_v38 = vld [vmem:[#allocation21 + $0x610] sm:$0xff] }
 0xe4d   : > { %11448 = vmatprep.subr.bf16.mxu1 %v15540_v19  ;;  %11680 = vmatprep.subr.bf16.mxu0 %v15468_v61  ;;  %v6578_v61 = vld [vmem:[#allocation21 + $0x4e8] sm:$0xff] }
 0xe4e   : > { %6500 = vmatmul.mubr.f32.gmra.mrb[104].mxu1 %v15234_v30  ;;  %7631 = vmatmul.mubr.f32.gmra.mrb[92].mxu0 %v15318_v21  ;;  %v15576_v33 = vpack.c.bf16 %v6580_v43, %v6578_v61  ;;  %v6894_v61 = vld [vmem:[#allocation21 + $0x628] sm:$0xff]  ;;  %v6896_v43 = vld [vmem:[#allocation21 + $0x638] sm:$0xff] }
 0xe4f   : > { %11450 = vmatpush1.bf16.msra.mxu1 %v15546_v31  ;;  %11682 = vmatpush1.bf16.msra.mxu0 %v15474_v28  ;;  %v6577_v28 = vld [vmem:[#allocation21 + $0x4e0] sm:$0xff] }
 0xe50   : > { %6505 = vmatprep.mubr.f32.mxu1 %v15294_v27  ;;  %7636 = vmatprep.mubr.f32.mxu0 %v15294_v27  ;;  %v15582_v51 = vpack.c.bf16 %v6579_v46, %v6577_v28  ;;  %v6893_v28 = vld [vmem:[#allocation21 + $0x620] sm:$0xff]  ;;  %v6895_v46 = vld [vmem:[#allocation21 + $0x630] sm:$0xff] }
 0xe51   : > { %11452 = vmatprep.subr.bf16.mxu1 %v15552_v17  ;;  %11684 = vmatprep.subr.bf16.mxu0 %v15480_v49  ;;  %v6720_v49 = vld [vmem:[#allocation21 + $0x508] sm:$0xff] }
 0xe52   : > { %6506 = vmatmul.mubr.f32.gmra.mrb[106].mxu1 %v15230_v26  ;;  %7637 = vmatmul.mubr.f32.gmra.mrb[94].mxu0 %v15311_v2  ;;  %v15588_v60 = vpack.c.bf16 %v6722_v1, %v6720_v49  ;;  %v12628_v49 = vld [vmem:[#allocation2 + $0x50] sm:$0xff] }
 0xe53   : > { %11454 = vmatpush1.bf16.msra.mxu1 %v15558_v41  ;;  %11686 = vmatpush1.bf16.msra.mxu0 %v15486_v59  ;;  %v6719_v59 = vld [vmem:[#allocation21 + $0x500] sm:$0xff]  ;;  %v6898_v1 = vld [vmem:[#allocation21 + $0x648] sm:$0xff] }
 0xe54   : > { %6511 = vmatprep.mubr.f32.mxu1 %v15294_v27  ;;  %7723 = vmatprep.mubr.f32.mxu0 %v15294_v27  ;;  %v15594_v53 = vpack.c.bf16 %v6721_v58, %v6719_v59  ;;  %v15701_v59 = vpack.c.bf16 %v6895_v46, %v6893_v28  ;;  %v6897_v58 = vld [vmem:[#allocation21 + $0x640] sm:$0xff]  ;;  %v7068_v28 = vld [vmem:[#allocation21 + $0x748] sm:$0xff]  ;;  %v7070_v46 = vld [vmem:[#allocation21 + $0x758] sm:$0xff] }
 0xe55   : > { %11456 = vmatprep.subr.bf16.mxu1 %v15564_v39  ;;  %11688 = vmatprep.subr.bf16.mxu0 %v15492_v57  ;;  %v6724_v57 = vld [vmem:[#allocation21 + $0x528] sm:$0xff] }
 0xe56   : > { %6512 = vmatmul.mubr.f32.gmra.mrb[108].mxu1 %v15250_v32  ;;  %7724 = vmatmul.mubr.f32.vlgmr.msra.gmra.mrb[80].mxu0 %v15270_v8  ;;  %v15600_v4 = vpack.c.bf16 %v6726_v22, %v6724_v57  ;;  %v15706_v57 = vld [vmem:[#allocation2 + $0x98] sm:$0xff] }
 0xe57   : > { %11458 = vmatpush1.bf16.msra.mxu1 %v15570_v18  ;;  %11690 = vmatpush1.bf16.msra.mxu0 %v15498_v11  ;;  %v6723_v11 = vld [vmem:[#allocation21 + $0x520] sm:$0xff] }
 0xe58   : > { %6517 = vmatprep.mubr.f32.mxu1 %v15294_v27  ;;  %7729 = vmatprep.mubr.f32.mxu0 %v15294_v27  ;;  %v15606_v47 = vpack.c.bf16 %v6725_v40, %v6723_v11  ;;  %v6902_v11 = vld [vmem:[#allocation21 + $0x668] sm:$0xff]  ;;  %v6904_v40 = vld [vmem:[#allocation21 + $0x678] sm:$0xff] }
 0xe59   : > { %11460 = vmatprep.subr.bf16.mxu1 %v15576_v33  ;;  %11692 = vmatprep.subr.bf16.mxu0 %v15504_v62  ;;  %v6728_v62 = vld [vmem:[#allocation21 + $0x548] sm:$0xff] }
 0xe5a   : > { %6518 = vmatmul.mubr.f32.gmra.mrb[110].mxu1 %v15245_v54  ;;  %7730 = vmatmul.mubr.f32.gmra.mrb[82].mxu0 %v15263_v15 }
 0xe5b   : > { %11462 = vmatpush1.bf16.msra.mxu1 %v15582_v51  ;;  %11694 = vmatpush1.bf16.msra.mxu0 %v15510_v25  ;;  %v6727_v25 = vld [vmem:[#allocation21 + $0x540] sm:$0xff] }
 0xe5c   : > { %6645 = vmatprep.mubr.f32.mxu1 %v15294_v27  ;;  %7735 = vmatprep.mubr.f32.mxu0 %v15294_v27 }
 0xe5d   : > { %11464 = vmatprep.subr.bf16.mxu1 %v15588_v60  ;;  %11696 = vmatprep.subr.bf16.mxu0 %v15516_v12  ;;  %v15618_v12 = vpack.c.bf16 %v6729_v50, %v6727_v25  ;;  %v15722_v25 = vpack.c.bf16 %v6904_v40, %v6902_v11  ;;  %v15724_v50 = vld [vmem:[#allocation2 + $0x60] sm:$0xff] }
 0xe5e   : > { %6646 = vmatmul.mubr.f32.vlgmr.msra.gmra.mrb[96].mxu1 %v15220_v5  ;;  %7736 = vmatmul.mubr.f32.gmra.mrb[84].mxu0 %v15292_v42  ;;  %v15612_v5 = vpack.c.bf16 %v6730_v20, %v6728_v62  ;;  %v6732_v42 = vld [vmem:[#allocation21 + $0x568] sm:$0xff]  ;;  %v6901_v62 = vld [vmem:[#allocation21 + $0x660] sm:$0xff]  ;;  %v6903_v20 = vld [vmem:[#allocation21 + $0x670] sm:$0xff] }
 0xe5f   : > { %11466 = vmatpush1.bf16.msra.mxu1 %v15594_v53  ;;  %11698 = vmatpush1.bf16.msra.mxu0 %v15522_v45  ;;  %v6738_v45 = vld [vmem:[#allocation21 + $0x598] sm:$0xff] }
 0xe60   : > { %6651 = vmatprep.mubr.f32.mxu1 %v15294_v27  ;;  %7741 = vmatprep.mubr.f32.mxu0 %v15294_v27  ;;  %v7078_v11 = vld [vmem:[#allocation21 + $0x798] sm:$0xff] }
 0xe61   : > { %11468 = vmatprep.subr.bf16.mxu1 %v15600_v4  ;;  %11700 = vmatprep.subr.bf16.mxu0 %v15528_v56  ;;  %v6737_v56 = vld [vmem:[#allocation21 + $0x590] sm:$0xff] }
 0xe62   : > { %6652 = vmatmul.mubr.f32.gmra.mrb[98].mxu1 %v15216_v36  ;;  %7742 = vmatmul.mubr.f32.gmra.mrb[86].mxu0 %v15285_v9  ;;  %v15624_v36 = vpack.c.bf16 %v6734_v24, %v6732_v42  ;;  %v6736_v9 = vld [vmem:[#allocation21 + $0x588] sm:$0xff]  ;;  %v15642_v3 = vpack.c.bf16 %v6737_v56, %v6735_v55  ;;  %v6908_v42 = vld [vmem:[#allocation21 + $0x698] sm:$0xff]  ;;  %v15730_v24 = vpack.c.bf16 %v6903_v20, %v6901_v62  ;;  %v6909_v56 = vld [vmem:[#allocation21 + $0x6a0] sm:$0xff] }
 0xe63   : > { %11470 = vmatpush1.bf16.msra.mxu1 %v15606_v47  ;;  %11702 = vmatpush1.bf16.msra.mxu0 %v15534_v7  ;;  %v6739_v7 = vld [vmem:[#allocation21 + $0x5a0] sm:$0xff]  ;;  %v15748_v55 = vld [vmem:[#allocation2 + $0xb0] sm:$0xff] }
 0xe64   : > { %6657 = vmatprep.mubr.f32.mxu1 %v15294_v27  ;;  %7747 = vmatprep.mubr.f32.mxu0 %v15294_v27  ;;  %v7077_v62 = vld [vmem:[#allocation21 + $0x790] sm:$0xff] }
 0xe65   : > { %11472 = vmatprep.subr.bf16.mxu1 %v15612_v5  ;;  %11704 = vmatprep.subr.bf16.mxu0 %v15540_v19  ;;  %v15654_v19 = vpack.c.bf16 %v6741_v0, %v6739_v7  ;;  %v6916_v7 = vld [vmem:[#allocation21 + $0x6d8] sm:$0xff] }
 0xe66   : > { %6658 = vmatmul.mubr.f32.gmra.mrb[100].mxu1 %v15234_v30  ;;  %7748 = vmatmul.mubr.f32.gmra.mrb[88].mxu0 %v15318_v21  ;;  %v15636_v30 = vpack.c.bf16 %v6738_v45, %v6736_v9  ;;  %v6740_v21 = vld [vmem:[#allocation21 + $0x5a8] sm:$0xff] }
 0xe67   : > { %11474 = vmatpush1.bf16.msra.mxu1 %v15618_v12  ;;  %11706 = vmatpush1.bf16.msra.mxu0 %v15546_v31  ;;  %v6750_v31 = vld [vmem:[#allocation21 + $0x5f8] sm:$0xff]  ;;  %v15740_v9 = vld [vmem:[#allocation2 + $0x68] sm:$0xff] }
 0xe68   : > { %6663 = vmatprep.mubr.f32.mxu1 %v15294_v27  ;;  %7753 = vmatprep.mubr.f32.mxu0 %v15294_v27  ;;  %v6910_v45 = vld [vmem:[#allocation21 + $0x6a8] sm:$0xff] }
 0xe69   : > { %11476 = vmatprep.subr.bf16.mxu1 %v15624_v36  ;;  %11708 = vmatprep.subr.bf16.mxu0 %v15552_v17  ;;  %v6749_v17 = vld [vmem:[#allocation21 + $0x5f0] sm:$0xff] }
 0xe6a   : > { %6664 = vmatmul.mubr.f32.gmra.mrb[102].mxu1 %v15230_v26  ;;  %7754 = vmatmul.mubr.f32.gmra.mrb[90].mxu0 %v15311_v2  ;;  %v15648_v26 = vpack.c.bf16 %v6742_v35, %v6740_v21  ;;  %v6744_v2 = vld [vmem:[#allocation21 + $0x5c8] sm:$0xff] }
 0xe6b   : > { %11478 = vmatpush1.bf16.msra.mxu1 %v15630_v6  ;;  %11710 = vmatpush1.bf16.msra.mxu0 %v15558_v41  ;;  %v15677_v41 = vpack.c.bf16 %v6749_v17, %v6747_v48  ;;  %v15756_v35 = vld [vmem:[#allocation2 + $0x70] sm:$0xff]  ;;  %v15784_v48 = vld [vmem:[#allocation2 + $0x80] sm:$0xff] }
 0xe6c   : > { %6669 = vmatprep.mubr.f32.mxu1 %v15294_v27  ;;  %7759 = vmatprep.mubr.f32.mxu0 %v15294_v27  ;;  %v7060_v17 = vld [vmem:[#allocation21 + $0x708] sm:$0xff] }
 0xe6d   : > { %11480 = vmatprep.subr.bf16.mxu1 %v15636_v30  ;;  %11712 = vmatprep.subr.bf16.mxu0 %v15564_v39  ;;  %v7789_v39 = vld [vmem:[#allocation2 + $0x88] sm:$0xff] }
 0xe6e   : > { %6670 = vmatmul.mubr.f32.gmra.mrb[104].mxu1 %v15250_v32  ;;  %7760 = vmatmul.mubr.f32.gmra.mrb[92].mxu0 %v15340_v34  ;;  %v15660_v32 = vpack.c.bf16 %v6746_v37, %v6744_v2  ;;  %v6748_v34 = vld [vmem:[#allocation21 + $0x5e8] sm:$0xff]  ;;  %v6915_v2 = vld [vmem:[#allocation21 + $0x6d0] sm:$0xff] }
 0xe6f   : > { %11482 = vmatpush1.bf16.msra.mxu1 %v15642_v3  ;;  %11714 = vmatpush1.bf16.msra.mxu0 %v15570_v18  ;;  %v15688_v18 = vpack.c.bf16 %v6891_v38, %v6889_v44  ;;  %v15798_v44 = vld [vmem:[#allocation2 + $0x88] sm:$0xff] }
 0xe70   : > { %6675 = vmatprep.mubr.f32.mxu1 %v15294_v27  ;;  %7765 = vmatprep.mubr.f32.mxu0 %v15294_v27  ;;  %v7064_v38 = vld [vmem:[#allocation21 + $0x728] sm:$0xff] }
 0xe71   : > { %11484 = vmatprep.subr.bf16.mxu1 %v15648_v26  ;;  %11716 = vmatprep.subr.bf16.mxu0 %v15576_v33  ;;  %v15693_v33 = vld [vmem:[#allocation2 + $0x90] sm:$0xff] }
 0xe72   : > { %6676 = vmatmul.mubr.f32.gmra.mrb[106].mxu1 %v15245_v54  ;;  %7766 = vmatmul.mubr.f32.gmra.mrb[94].mxu0 %v15333_v52  ;;  %v15672_v54 = vpack.c.bf16 %v6750_v31, %v6748_v34  ;;  %v6890_v52 = vld [vmem:[#allocation21 + $0x608] sm:$0xff]  ;;  %v6917_v34 = vld [vmem:[#allocation21 + $0x6e0] sm:$0xff]  ;;  %v6919_v31 = vld [vmem:[#allocation21 + $0x6f0] sm:$0xff] }
 0xe73   : > { %11486 = vmatpush1.bf16.msra.mxu1 %v15654_v19  ;;  %11718 = vmatpush1.bf16.msra.mxu0 %v15582_v51  ;;  %v6900_v51 = vld [vmem:[#allocation21 + $0x658] sm:$0xff] }
 0xe74   : > { %6681 = vmatprep.mubr.f32.mxu1 %v15294_v27  ;;  %7860 = vmatprep.mubr.f32.mxu0 %v15294_v27  ;;  %v15709_v22 = vpack.c.bf16 %v6900_v51, %v6898_v1  ;;  %v15822_v1 = vpack.c.bf16 %v7070_v46, %v7068_v28  ;;  %v7072_v51 = vld [vmem:[#allocation21 + $0x768] sm:$0xff]  ;;  %v8718_v46 = vld [vmem:[%s16238_s24] sm:$0xff] }
 0xe75   : > { %11488 = vmatprep.subr.bf16.mxu1 %v15660_v32  ;;  %11720 = vmatprep.subr.bf16.mxu0 %v15588_v60  ;;  %v6899_v60 = vld [vmem:[#allocation21 + $0x650] sm:$0xff] }
 0xe76   : > { %6682 = vmatmul.mubr.f32.gmra.mrb[108].mxu1 %v15270_v8  ;;  %7861 = vmatmul.mubr.f32.vlgmr.msra.gmra.mrb[80].mxu0 %v7788_v10  ;;  %v15683_v8 = vpack.c.bf16 %v6892_v29, %v6890_v52  ;;  %v7062_v10 = vld [vmem:[#allocation21 + $0x718] sm:$0xff]  ;;  %v7059_v52 = vld [vmem:[#allocation21 + $0x700] sm:$0xff]  ;;  %v7061_v29 = vld [vmem:[#allocation21 + $0x710] sm:$0xff] }
 0xe77   : > { %11490 = vmatpush1.bf16.msra.mxu1 %v15666_v23  ;;  %11722 = vmatpush1.bf16.msra.mxu0 %v15594_v53  ;;  %v12629_v53 = vld [vmem:[#allocation2 + $0x58] sm:$0xff] }
 0xe78   : > { %6687 = vmatprep.mubr.f32.mxu1 %v15294_v27  ;;  %7866 = vmatprep.mubr.f32.mxu0 %v15294_v27 }
 0xe79   : > { %11492 = vmatprep.subr.bf16.mxu1 %v15672_v54  ;;  %11724 = vmatprep.subr.bf16.mxu0 %v15600_v4  ;;  %v15714_v4 = vpack.c.bf16 %v6899_v60, %v6897_v58  ;;  %v7071_v60 = vld [vmem:[#allocation21 + $0x760] sm:$0xff] }
 0xe7a   : > { %6688 = vmatmul.mubr.f32.gmra.mrb[110].mxu1 %v15263_v15  ;;  %7867 = vmatmul.mubr.f32.gmra.mrb[82].mxu0 %v7789_v39  ;;  %v15696_v15 = vpack.c.bf16 %v6896_v43, %v6894_v61  ;;  %v7066_v39 = vld [vmem:[#allocation21 + $0x738] sm:$0xff]  ;;  %v7063_v61 = vld [vmem:[#allocation21 + $0x720] sm:$0xff]  ;;  %v7065_v43 = vld [vmem:[#allocation21 + $0x730] sm:$0xff] }
 0xe7b   : > { %11494 = vmatpush1.bf16.msra.mxu1 %v15677_v41  ;;  %11726 = vmatpush1.bf16.msra.mxu0 %v15606_v47  ;;  %v15719_v47 = vld [vmem:[#allocation2 + $0xa0] sm:$0xff] }
 0xe7c   : > { %6815 = vmatprep.mubr.f32.mxu1 %v15294_v27  ;;  %7872 = vmatprep.mubr.f32.mxu0 %v15294_v27 }
 0xe7d   : > { %11496 = vmatprep.subr.bf16.mxu1 %v15683_v8  ;;  %11728 = vmatprep.subr.bf16.mxu0 %v15612_v5  ;;  %v6906_v5 = vld [vmem:[#allocation21 + $0x688] sm:$0xff] }
 0xe7e   : > { %6816 = vmatmul.mubr.f32.vlgmr.msra.gmra.mrb[96].mxu1 %v12628_v49  ;;  %7873 = vmatmul.mubr.f32.gmra.mrb[84].mxu0 %v15693_v33  ;;  %v7069_v49 = vld [vmem:[#allocation21 + $0x750] sm:$0xff] }
 0xe7f   : > { %11498 = vmatpush1.bf16.msra.mxu1 %v15688_v18  ;;  %11730 = vmatpush1.bf16.msra.mxu0 %v15618_v12  ;;  %v6905_v12 = vld [vmem:[#allocation21 + $0x680] sm:$0xff] }
 0xe80   : > { %6821 = vmatprep.mubr.f32.mxu1 %v15294_v27  ;;  %7878 = vmatprep.mubr.f32.mxu0 %v15294_v27 }
 0xe81   : > { %11500 = vmatprep.subr.bf16.mxu1 %v15696_v15  ;;  %11732 = vmatprep.subr.bf16.mxu0 %v15624_v36  ;;  %v15738_v36 = vpack.c.bf16 %v6908_v42, %v6906_v5  ;;  %v7079_v42 = vld [vmem:[#allocation21 + $0x7a0] sm:$0xff] }
 0xe82   : > { %6822 = vmatmul.mubr.f32.gmra.mrb[98].mxu1 %v12629_v53  ;;  %7879 = vmatmul.mubr.f32.gmra.mrb[86].mxu0 %v15706_v57  ;;  %v7076_v53 = vld [vmem:[#allocation21 + $0x788] sm:$0xff] }
 0xe83   : > { %11502 = vmatpush1.bf16.msra.mxu1 %v15701_v59  ;;  %11734 = vmatpush1.bf16.msra.mxu0 %v15630_v6  ;;  %v6912_v6 = vld [vmem:[#allocation21 + $0x6b8] sm:$0xff]  ;;  %v15846_v20 = vpack.c.bf16 %v7078_v11, %v7076_v53 }
 0xe84   : > { %6827 = vmatprep.mubr.f32.mxu1 %v15294_v27  ;;  %7884 = vmatprep.mubr.f32.mxu0 %v15294_v27  ;;  %v15754_v21 = vpack.c.bf16 %v6912_v6, %v6910_v45  ;;  %v7083_v45 = vld [vmem:[#allocation21 + $0x7c0] sm:$0xff]  ;;  %v7085_v6 = vld [vmem:[#allocation21 + $0x7d0] sm:$0xff] }
 0xe85   : > { %11504 = vmatprep.subr.bf16.mxu1 %v15709_v22  ;;  %11736 = vmatprep.subr.bf16.mxu0 %v15636_v30  ;;  %v6911_v30 = vld [vmem:[#allocation21 + $0x6b0] sm:$0xff] }
 0xe86   : > { %6828 = vmatmul.mubr.f32.gmra.mrb[100].mxu1 %v15724_v50  ;;  %7885 = vmatmul.mubr.f32.gmra.mrb[88].mxu0 %v15719_v47  ;;  %v15762_v0 = vpack.c.bf16 %v6911_v30, %v6909_v56  ;;  %v7088_v56 = vld [vmem:[#allocation21 + $0x7e8] sm:$0xff]  ;;  %v7090_v30 = vld [vmem:[#allocation21 + $0x7f8] sm:$0xff] }
 0xe87   : > { %11506 = vmatpush1.bf16.msra.mxu1 %v15714_v4  ;;  %11738 = vmatpush1.bf16.msra.mxu0 %v15642_v3  ;;  %v6914_v3 = vld [vmem:[#allocation21 + $0x6c8] sm:$0xff] }
 0xe88   : > { %6833 = vmatprep.mubr.f32.mxu1 %v15294_v27  ;;  %7890 = vmatprep.mubr.f32.mxu0 %v15294_v27  ;;  %v15746_v27 = vpack.c.bf16 %v6907_v14, %v6905_v12  ;;  %v15768_v37 = vpack.c.bf16 %v6916_v7, %v6914_v3  ;;  %v7084_v14 = vld [vmem:[#allocation21 + $0x7c8] sm:$0xff]  ;;  %v7087_v3 = vld [vmem:[#allocation21 + $0x7e0] sm:$0xff]  ;;  %v7089_v7 = vld [vmem:[#allocation21 + $0x7f0] sm:$0xff] }
 0xe89   : > { %11508 = vmatprep.subr.bf16.mxu1 %v15722_v25  ;;  %11740 = vmatprep.subr.bf16.mxu0 %v15648_v26  ;;  %v6913_v26 = vld [vmem:[#allocation21 + $0x6c0] sm:$0xff] }
 0xe8a   : > { %6834 = vmatmul.mubr.f32.gmra.mrb[102].mxu1 %v15740_v9  ;;  %7891 = vmatmul.mubr.f32.gmra.mrb[90].mxu0 %v15735_v63 }
 0xe8b   : > { %11510 = vmatpush1.bf16.msra.mxu1 %v15730_v24  ;;  %11742 = vmatpush1.bf16.msra.mxu0 %v15654_v19  ;;  %v15770_v19 = vld [vmem:[#allocation2 + $0x78] sm:$0xff] }
 0xe8c   : > { %6839 = vmatprep.mubr.f32.mxu1 %v15748_v55  ;;  %7896 = vmatprep.mubr.f32.mxu0 %v15748_v55 }
 0xe8d   : > { %11512 = vmatprep.subr.bf16.mxu1 %v15738_v36  ;;  %11744 = vmatprep.subr.bf16.mxu0 %v15660_v32  ;;  %v15776_v32 = vpack.c.bf16 %v6915_v2, %v6913_v26  ;;  %v12637_v26 = vld [vmem:[#allocation2 + $0x90] sm:$0xff]  ;;  %v11557_v2 = vpack.c.bf16 %v7089_v7, %v7087_v3 }
 0xe8e   : > { %6840 = vmatmul.mubr.f32.gmra.mrb[104].mxu1 %v15756_v35  ;;  %7897 = vmatmul.mubr.f32.gmra.mrb[92].mxu0 %v15748_v55 }
 0xe8f   : > { %11514 = vmatpush1.bf16.msra.mxu1 %v15746_v27  ;;  %11746 = vmatpush1.bf16.msra.mxu0 %v15666_v23  ;;  %v15782_v23 = vpack.c.bf16 %v6920_v13, %v6918_v16  ;;  %v8456_v13 = vld [vmem:[%s16236_s22 + $0x10] sm:$0xff] }
 0xe90   : > { %6845 = vmatprep.mubr.f32.mxu1 %v15748_v55  ;;  %7902 = vmatprep.mubr.f32.mxu0 %v15748_v55 }
 0xe91   : > { %11516 = vmatprep.subr.bf16.mxu1 %v15754_v21  ;;  %11748 = vmatprep.subr.bf16.mxu0 %v15672_v54  ;;  %v15790_v54 = vpack.c.bf16 %v6919_v31, %v6917_v34  ;;  %v8458_v34 = vld [vmem:[%s16236_s22 + $0x20] sm:$0xff]  ;;  %v8459_v31 = vld [vmem:[%s16236_s22 + $0x28] sm:$0xff] }
 0xe92   : > { %6846 = vmatmul.mubr.f32.gmra.mrb[106].mxu1 %v15770_v19  ;;  %7903 = vmatmul.mubr.f32.gmra.mrb[94].mxu0 %v15748_v55 }
 0xe93   : > { %11518 = vmatpush1.bf16.msra.mxu1 %v15762_v0  ;;  %11750 = vmatpush1.bf16.msra.mxu0 %v15677_v41  ;;  %v15796_v41 = vpack.c.bf16 %v7062_v10, %v7060_v17  ;;  %v8461_v17 = vld [vmem:[%s16236_s22 + $0x38] sm:$0xff] }
 0xe94   : > { %6851 = vmatprep.mubr.f32.mxu1 %v15748_v55  ;;  %7997 = vmatprep.mubr.f32.mxu0 %v15748_v55 }
 0xe95   : > { %11520 = vmatprep.subr.bf16.mxu1 %v15768_v37  ;;  %11752 = vmatprep.subr.bf16.mxu0 %v15683_v8  ;;  %v15804_v8 = vpack.c.bf16 %v7061_v29, %v7059_v52  ;;  %v8463_v52 = vld [vmem:[%s16236_s22 + $0x48] sm:$0xff] }
 0xe96   : > { %6852 = vmatmul.mubr.f32.gmra.mrb[108].mxu1 %v15784_v48  ;;  %7998 = vmatmul.mubr.f32.vlgmr.msra.gmra.mrb[80].mxu0 %v15693_v33  ;;  %v15816_v33 = vpack.c.bf16 %v7065_v43, %v7063_v61  ;;  %v8468_v43 = vld [vmem:[%s16236_s22 + $0x70] sm:$0xff] }
 0xe97   : > { %11522 = vmatpush1.bf16.msra.mxu1 %v15776_v32  ;;  %11754 = vmatpush1.bf16.msra.mxu0 %v15688_v18  ;;  %v15810_v18 = vpack.c.bf16 %v7066_v39, %v7064_v38  ;;  %v8466_v39 = vld [vmem:[%s16236_s22 + $0x60] sm:$0xff] }
 0xe98   : > { %6857 = vmatprep.mubr.f32.mxu1 %v15748_v55  ;;  %8003 = vmatprep.mubr.f32.mxu0 %v15748_v55 }
 0xe99   : > { %11524 = vmatprep.subr.bf16.mxu1 %v15782_v23  ;;  %11756 = vmatprep.subr.bf16.mxu0 %v15696_v15  ;;  %v7067_v15 = vld [vmem:[#allocation21 + $0x740] sm:$0xff] }
 0xe9a   : > { %6858 = vmatmul.mubr.f32.gmra.mrb[110].mxu1 %v15798_v44  ;;  %8004 = vmatmul.mubr.f32.gmra.mrb[82].mxu0 %v15706_v57  ;;  %v15828_v58 = vpack.c.bf16 %v7069_v49, %v7067_v15  ;;  %v7073_v57 = vld [vmem:[#allocation21 + $0x770] sm:$0xff]  ;;  %v7222_v49 = vlaneseq }
 0xe9b   : > { %11526 = vmatpush1.bf16.msra.mxu1 %v15790_v54  ;;  %11758 = vmatpush1.bf16.msra.mxu0 %v15701_v59  ;;  %v7074_v59 = vld [vmem:[#allocation21 + $0x778] sm:$0xff]  ;;  %v15840_v40 = vpack.c.bf16 %v7073_v57, %v7071_v60 }
 0xe9c   : > { %6985 = vmatprep.mubr.f32.mxu1 %v15748_v55  ;;  %8009 = vmatprep.mubr.f32.mxu0 %v15748_v55 }
 0xe9d   : > { %11528 = vmatprep.subr.bf16.mxu1 %v15796_v41  ;;  %11760 = vmatprep.subr.bf16.mxu0 %v15709_v22  ;;  %v15834_v22 = vpack.c.bf16 %v7074_v59, %v7072_v51  ;;  %v7220_v59 = vld [vmem:[%s16308_s29] sm:$0x3] }
 0xe9e   : > { %6986 = vmatmul.mubr.f32.vlgmr.msra.gmra.mrb[96].mxu1 %v15724_v50  ;;  %8010 = vmatmul.mubr.f32.gmra.mrb[84].mxu0 %v15719_v47  ;;  %v7082_v50 = vld [vmem:[#allocation21 + $0x7b8] sm:$0xff] }
 0xe9f   : > { %11530 = vmatpush1.bf16.msra.mxu1 %v15804_v8  ;;  %11762 = vmatpush1.bf16.msra.mxu0 %v15714_v4  ;;  %v7075_v4 = vld [vmem:[#allocation21 + $0x780] sm:$0xff] }
 0xea0   : > { %6991 = vmatprep.mubr.f32.mxu1 %v15748_v55  ;;  %8015 = vmatprep.mubr.f32.mxu0 %v15748_v55  ;;  %v15852_v5 = vpack.c.bf16 %v7077_v62, %v7075_v4 }
 0xea1   : > { %11532 = vmatprep.subr.bf16.mxu1 %v15810_v18  ;;  %11764 = vmatprep.subr.bf16.mxu0 %v15722_v25  ;;  %v7080_v25 = vld [vmem:[#allocation21 + $0x7a8] sm:$0xff] }
 0xea2   : > { %6992 = vmatmul.mubr.f32.gmra.mrb[98].mxu1 %v15740_v9  ;;  %8016 = vmatmul.mubr.f32.gmra.mrb[86].mxu0 %v15735_v63  ;;  %v15858_v12 = vpack.c.bf16 %v7082_v50, %v7080_v25 }
 0xea3   : > { %11534 = vmatpush1.bf16.msra.mxu1 %v15816_v33  ;;  %11766 = vmatpush1.bf16.msra.mxu0 %v15730_v24  ;;  %v7081_v24 = vld [vmem:[#allocation21 + $0x7b0] sm:$0xff] }
 0xea4   : > { %6997 = vmatprep.mubr.f32.mxu1 %v15748_v55  ;;  %8021 = vmatprep.mubr.f32.mxu0 %v15748_v55  ;;  %v11549_v9 = vpack.c.bf16 %v7081_v24, %v7079_v42 }
 0xea5   : > { %11536 = vmatprep.subr.bf16.mxu1 %v15822_v1  ;;  %11768 = vmatprep.subr.bf16.mxu0 %v15738_v36  ;;  %v7086_v36 = vld [vmem:[#allocation21 + $0x7d8] sm:$0xff] }
 0xea6   : > { %6998 = vmatmul.mubr.f32.gmra.mrb[100].mxu1 %v15756_v35  ;;  %8022 = vmatmul.mubr.f32.gmra.mrb[88].mxu0 %v15748_v55 }
 0xea7   : > { %11538 = vmatpush1.bf16.msra.mxu1 %v15828_v58  ;;  %11770 = vmatpush1.bf16.msra.mxu0 %v15746_v27  ;;  %v11551_v27 = vpack.c.bf16 %v7086_v36, %v7084_v14 }
 0xea8   : > { %7003 = vmatprep.mubr.f32.mxu1 %v15748_v55  ;;  %8027 = vmatprep.mubr.f32.mxu0 %v15748_v55 }
 0xea9   : > { %11540 = vmatprep.subr.bf16.mxu1 %v15834_v22  ;;  %11772 = vmatprep.subr.bf16.mxu0 %v15754_v21  ;;  %v11553_v21 = vpack.c.bf16 %v7085_v6, %v7083_v45 }
 0xeaa   : > { %7004 = vmatmul.mubr.f32.gmra.mrb[102].mxu1 %v15770_v19  ;;  %8028 = vmatmul.mubr.f32.gmra.mrb[90].mxu0 %v15748_v55 }
 0xeab   : > { %11542 = vmatpush1.bf16.msra.mxu1 %v15840_v40  ;;  %11774 = vmatpush1.bf16.msra.mxu0 %v15762_v0  ;;  %v11555_v0 = vpack.c.bf16 %v7090_v30, %v7088_v56 }
 0xeac   : > { %7009 = vmatprep.mubr.f32.mxu1 %v15748_v55  ;;  %8033 = vmatprep.mubr.f32.mxu0 %v15748_v55 }
 0xead   : > { %11544 = vmatprep.subr.bf16.mxu1 %v15846_v20  ;;  %11776 = vmatprep.subr.bf16.mxu0 %v15768_v37  ;;  %v12638_v37 = vld [vmem:[#allocation2 + $0x98] sm:$0xff] }
 0xeae   : > { %7010 = vmatmul.mubr.f32.gmra.mrb[104].mxu1 %v15784_v48  ;;  %8034 = vmatmul.mubr.f32.gmra.mrb[92].mxu0 %v15748_v55 }
 0xeaf   : > { %11546 = vmatpush1.bf16.msra.mxu1 %v15852_v5  ;;  %11778 = vmatpush1.bf16.msra.mxu0 %v15776_v32  ;;  %v8457_v32 = vld [vmem:[%s16236_s22 + $0x18] sm:$0xff] }
 0xeb0   : > { %7015 = vmatprep.mubr.f32.mxu1 %v15748_v55  ;;  %8039 = vmatprep.mubr.f32.mxu0 %v15748_v55 }
 0xeb1   : > { %11548 = vmatprep.subr.bf16.mxu1 %v15858_v12  ;;  %11780 = vmatprep.subr.bf16.mxu0 %v15782_v23  ;;  %v11823_v23 = vpack.c.bf16 %v8459_v31, %v8458_v34 }
 0xeb2   : > { %7016 = vmatmul.mubr.f32.gmra.mrb[106].mxu1 %v15798_v44  ;;  %8040 = vmatmul.mubr.f32.gmra.mrb[94].mxu0 %v15748_v55 }
 0xeb3   : > { %11550 = vmatpush1.bf16.msra.mxu1 %v11549_v9  ;;  %11782 = vmatpush1.bf16.msra.mxu0 %v15790_v54  ;;  %v8462_v54 = vld [vmem:[%s16236_s22 + $0x40] sm:$0xff] }
 0xeb4   : > { %7021 = vmatprep.mubr.f32.mxu1 %v15748_v55  ;;  %8134 = vmatprep.mubr.f32.mxu0 %v15748_v55  ;;  %v11831_v29 = vpack.c.bf16 %v8463_v52, %v8462_v54 }
 0xeb5   : > { %11552 = vmatprep.subr.bf16.mxu1 %v11551_v27  ;;  %11784 = vmatprep.subr.bf16.mxu0 %v15796_v41  ;;  %v8464_v41 = vld [vmem:[%s16236_s22 + $0x50] sm:$0xff] }
 0xeb6   : > { %7022 = vmatmul.mubr.f32.gmra.mrb[108].mxu1 %v12637_v26  ;;  %8135 = vmatmul.mubr.f32.vlgmr.msra.gmra.mrb[80].mxu0 %v15719_v47  ;;  %v12639_v47 = vld [vmem:[#allocation2 + $0xa0] sm:$0xff] }
 0xeb7   : > { %11554 = vmatpush1.bf16.msra.mxu1 %v11553_v21  ;;  %11786 = vmatpush1.bf16.msra.mxu0 %v15804_v8  ;;  %v8467_v8 = vld [vmem:[%s16236_s22 + $0x68] sm:$0xff] }
 0xeb8   : > { %7027 = vmatprep.mubr.f32.mxu1 %v15748_v55  ;;  %8140 = vmatprep.mubr.f32.mxu0 %v15748_v55  ;;  %v11839_v61 = vpack.c.bf16 %v8467_v8, %v8466_v39 }
 0xeb9   : > { %11556 = vmatprep.subr.bf16.mxu1 %v11555_v0  ;;  %11788 = vmatprep.subr.bf16.mxu0 %v15810_v18  ;;  %v8469_v18 = vld [vmem:[%s16236_s22 + $0x78] sm:$0xff] }
 0xeba   : > { %7028 = vmatmul.mubr.f32.gmra.mrb[110].mxu1 %v12638_v37  ;;  %8141 = vmatmul.mubr.f32.gmra.mrb[82].mxu0 %v15735_v63  ;;  %v12640_v63 = vld [vmem:[#allocation2 + $0xa8] sm:$0xff]  ;;  %v11843_v28 = vpack.c.bf16 %v8469_v18, %v8468_v43  ;;  %v16028_v43 = vld [vmem:[%s16310_s16] ss:$0 sm:$0xff] }
 0xebb   : > { %11558 = vmatpush1.bf16.msra.mxu1 %v11557_v2  ;;  %11790 = vmatpush1.bf16.msra.mxu0 %v15816_v33  ;;  %v8719_v33 = vld [vmem:[%s16238_s24 + $0x8] sm:$0xff] }
 0xebc   : > { %7155 = vmatprep.mubr.f32.mxu1 %v15748_v55  ;;  %8146 = vmatprep.mubr.f32.mxu0 %v15748_v55  ;;  %v15982_v15 = vpack.c.bf16 %v8719_v33, %v8718_v46 }
 0xebd   : > { %11792 = vmatprep.subr.bf16.mxu0 %v15822_v1  ;;  %v7223_v1 = vshrl.u32 %v7222_v49, 7 }
 0xebe   : > { %7156 = vmatmul.mubr.f32.vlgmr.msra.gmra.mrb[96].mxu1 %v15756_v35  ;;  %8147 = vmatmul.mubr.f32.gmra.mrb[84].mxu0 %v15748_v55  ;;  %v8454_v35 = vld [vmem:[%s16236_s22] sm:$0xff] }
 0xebf   : > { %11794 = vmatpush1.bf16.msra.mxu0 %v15828_v58  ;;  %7161 = vmatprep.mubr.f32.mxu1 %v15748_v55  ;;  %v7228_v51 = vsub.s32 1, %v7223_v1  ;;  %v7224_v30 = vsub.s32 0, %v7223_v1 }
 0xec0   : > { %8152 = vmatprep.mubr.f32.mxu0 %v15748_v55  ;;  %11796 = vmatprep.subr.bf16.mxu0 %v15834_v22 }
 0xec1   : > { %v15988_v58 = vrot.slane %v7220_v59, %v7228_v51 }
 0xec2   : > { %7162 = vmatmul.mubr.f32.gmra.mrb[98].mxu1 %v15770_v19  ;;  %8153 = vmatmul.mubr.f32.gmra.mrb[86].mxu0 %v15748_v55  ;;  %v8455_v19 = vld [vmem:[%s16236_s22 + $0x8] sm:$0xff] }
 0xec3   : > { %11798 = vmatpush1.bf16.msra.mxu0 %v15840_v40  ;;  %7167 = vmatprep.mubr.f32.mxu1 %v15748_v55  ;;  %v11815_v16 = vpack.c.bf16 %v8455_v19, %v8454_v35 }
 0xec4   : > { %8158 = vmatprep.mubr.f32.mxu0 %v15748_v55  ;;  %11800 = vmatprep.subr.bf16.mxu0 %v15846_v20 }
 0xec5   : > { %11816 = vmatprep.subr.bf16.mxu1 %v11815_v16 }
 0xec6   : > { %7168 = vmatmul.mubr.f32.gmra.mrb[100].mxu1 %v15784_v48  ;;  %8159 = vmatmul.mubr.f32.gmra.mrb[88].mxu0 %v15748_v55  ;;  %v8460_v48 = vld [vmem:[%s16236_s22 + $0x30] sm:$0xff] }
 0xec7   : > { %11802 = vmatpush1.bf16.msra.mxu0 %v15852_v5  ;;  %7173 = vmatprep.mubr.f32.mxu1 %v15748_v55  ;;  %v11827_v10 = vpack.c.bf16 %v8461_v17, %v8460_v48 }
 0xec8   : > { %8164 = vmatprep.mubr.f32.mxu0 %v15748_v55  ;;  %11804 = vmatprep.subr.bf16.mxu0 %v15858_v12 }
 0xec9   : > { %11818 = vmatpush3.bf16.msra.mxu1 %v11815_v16 }
 0xeca   : > { %7174 = vmatmul.mubr.f32.gmra.mrb[102].mxu1 %v15798_v44  ;;  %8165 = vmatmul.mubr.f32.gmra.mrb[90].mxu0 %v15748_v55  ;;  %v8465_v44 = vld [vmem:[%s16236_s22 + $0x58] sm:$0xff] }
 0xecb   : > { %11806 = vmatpush1.bf16.msra.mxu0 %v11549_v9  ;;  %7179 = vmatprep.mubr.f32.mxu1 %v15748_v55  ;;  %v11835_v38 = vpack.c.bf16 %v8465_v44, %v8464_v41  ;;  %v16020_v44 = vld [vmem:[%s16309_s3] ss:$0 sm:$0xff] }
 0xecc   : > { %8170 = vmatprep.mubr.f32.mxu0 %v15748_v55  ;;  %11808 = vmatprep.subr.bf16.mxu0 %v11551_v27 }
 0xece   : > { %7180 = vmatmul.mubr.f32.gmra.mrb[104].mxu1 %v12637_v26  ;;  %8171 = vmatmul.mubr.f32.gmra.mrb[92].mxu0 %v15748_v55 }
 0xecf   : > { %11810 = vmatpush1.bf16.msra.mxu0 %v11553_v21  ;;  %7185 = vmatprep.mubr.f32.mxu1 %v15748_v55 }
 0xed0   : > { %8176 = vmatprep.mubr.f32.mxu0 %v15748_v55  ;;  %11812 = vmatprep.subr.bf16.mxu0 %v11555_v0 }
 0xed2   : > { %7186 = vmatmul.mubr.f32.gmra.mrb[106].mxu1 %v12638_v37  ;;  %8177 = vmatmul.mubr.f32.gmra.mrb[94].mxu0 %v15748_v55  ;;  %v16004_v37 = vrot.slane %v7220_v59, %v7224_v30 }
 0xed3   : > { %11814 = vmatpush1.bf16.msra.mxu0 %v11557_v2  ;;  %7191 = vmatprep.mubr.f32.mxu1 %v15748_v55 }
 0xed4   : > { %8271 = vmatprep.mubr.f32.mxu0 %v15748_v55 }
 0xed6   : > { %7192 = vmatmul.mubr.f32.gmra.mrb[108].mxu1 %v12639_v47  ;;  %8272 = vmatmul.mubr.f32.vlgmr.msra.gmra.mrb[80].mxu0 %v15748_v55 }
 0xed7   : > { %7197 = vmatprep.mubr.f32.mxu1 %v15748_v55  ;;  %8277 = vmatprep.mubr.f32.mxu0 %v15748_v55 }
 0xeda   : > { %7198 = vmatmul.mubr.f32.gmra.mrb[110].mxu1 %v12640_v63  ;;  %8278 = vmatmul.mubr.f32.gmra.mrb[82].mxu0 %v15748_v55 }
 0xedb   : > { %8283 = vmatprep.mubr.f32.mxu0 %v15748_v55 }
 0xede   : > { %8284 = vmatmul.mubr.f32.gmra.mrb[84].mxu0 %v15748_v55 }
 0xedf   : > { %8289 = vmatprep.mubr.f32.mxu0 %v15748_v55 }
 0xee2   : > { %8290 = vmatmul.mubr.f32.gmra.mrb[86].mxu0 %v15748_v55 }
 0xee3   : > { %8295 = vmatprep.mubr.f32.mxu0 %v15748_v55 }
 0xee6   : > { %8296 = vmatmul.mubr.f32.gmra.mrb[88].mxu0 %v15748_v55 }
 0xee7   : > { %8301 = vmatprep.mubr.f32.mxu0 %v15748_v55 }
 0xeea   : > { %8302 = vmatmul.mubr.f32.gmra.mrb[90].mxu0 %v15748_v55 }
 0xeeb   : > { %8307 = vmatprep.mubr.f32.mxu0 %v15748_v55 }
 0xeee   : > { %8308 = vmatmul.mubr.f32.gmra.mrb[92].mxu0 %v15748_v55 }
 0xeef   : > { %8313 = vmatprep.mubr.f32.mxu0 %v15748_v55 }
 0xef2   : > { %8314 = vmatmul.mubr.f32.gmra.mrb[94].mxu0 %v15748_v55  ;;  %v11819_v55 = vpack.c.bf16 %v8457_v32, %v8456_v13 }
 0xef4   : > { %11820 = vmatprep.subr.bf16.mxu1 %v11819_v55 }
 0xef5   : > { %11822 = vmatpush3.bf16.msra.mxu1 %v11819_v55 }
 0xef6   : > { %11824 = vmatprep.subr.bf16.mxu1 %v11823_v23 }
 0xef9   : > { %11826 = vmatpush3.bf16.msra.mxu1 %v11823_v23 }
 0xefa   : > { %11828 = vmatprep.subr.bf16.mxu1 %v11827_v10 }
 0xefd   : > { %11830 = vmatpush3.bf16.msra.mxu1 %v11827_v10 }
 0xefe   : > { %11832 = vmatprep.subr.bf16.mxu1 %v11831_v29 }
 0xf01   : > { %11834 = vmatpush3.bf16.msra.mxu1 %v11831_v29 }
 0xf02   : > { %11836 = vmatprep.subr.bf16.mxu1 %v11835_v38 }
 0xf05   : > { %11838 = vmatpush3.bf16.msra.mxu1 %v11835_v38 }
 0xf06   : > { %11840 = vmatprep.subr.bf16.mxu1 %v11839_v61 }
 0xf09   : > { %11842 = vmatpush3.bf16.msra.mxu1 %v11839_v61 }
 0xf0a   : > { %11844 = vmatprep.subr.bf16.mxu1 %v11843_v28 }
 0xf0d   : > { %11846 = vmatpush3.bf16.msra.mxu1 %v11843_v28 }
 0xf0e   : > { %11848 = vmatprep.subr.bf16.mxu1 %v15982_v15 }
 0xf91   : > { %v7157_v60 = vpop.f32.mrb[96].mxu1 }
 0xf92   : > { %v7159_v57 = vpop.f32.mrb[97].mxu1  ;;  %v7232_v31 = vadd.f32 %v16004_v37, %v7157_v60 }
 0xf93   : > { %v7233_v22 = vadd.f32 %v15988_v58, %v7159_v57 }
 0xf95   : > { %v9467_v53 = vmul.f32 -1.442695, %v7233_v22  ;;  %v7163_v11 = vpop.f32.mrb[98].mxu1 }
 0xf96   : > { %v7165_v40 = vpop.f32.mrb[99].mxu1  ;;  %v7234_v61 = vadd.f32 %v16004_v37, %v7163_v11 }
 0xf97   : > { %12497 = vpow2.f32 %v9467_v53  ;;  %v7235_v4 = vadd.f32 %v15988_v58, %v7165_v40 }
 0xf99   : > { %v9468_v62 = vmul.f32 -1.442695, %v7235_v4  ;;  %v15992_v20 = vpop.f32.mrb[100].mxu1 }
 0xf9a   : > { %v7171_v25 = vpop.f32.mrb[101].mxu1  ;;  %v7236_v11 = vadd.f32 %v16004_v37, %v15992_v20 }
 0xf9b   : > { %12499 = vpow2.f32 %v9468_v62  ;;  %v7237_v50 = vadd.f32 %v15988_v58, %v7171_v25 }
 0xf9d   : > { %v9469_v5 = vmul.f32 -1.442695, %v7237_v50  ;;  %v15995_v42 = vpop.f32.mrb[102].mxu1 }
 0xf9e   : > { %v7177_v24 = vpop.f32.mrb[103].mxu1  ;;  %v7238_v20 = vadd.f32 %v16004_v37, %v15995_v42 }
 0xf9f   : > { %12501 = vpow2.f32 %v9469_v5  ;;  %v7239_v12 = vadd.f32 %v15988_v58, %v7177_v24 }
 0xfa1   : > { %v12498_v14 = vpop.eup %12497  ;;  %v9470_v36 = vmul.f32 -1.442695, %v7239_v12  ;;  %v15998_v9 = vpop.f32.mrb[104].mxu1 }
 0xfa2   : > { %v7272_v45 = vadd.f32 1.0, %v12498_v14  ;;  %v7183_v6 = vpop.f32.mrb[105].mxu1 }
 0xfa3   : > { %12503 = vpow2.f32 %v9470_v36  ;;  %v7241_v27 = vadd.f32 %v15988_v58, %v7183_v6 }
 0xfa4   : > { %12505 = vrcp.f32 %v7272_v45 }
 0xfa5   : > { %v12500_v56 = vpop.eup %12499  ;;  %v9471_v21 = vmul.f32 -1.442695, %v7241_v27  ;;  %v16001_v3 = vpop.f32.mrb[106].mxu1 }
 0xfa6   : > { %v7273_v7 = vadd.f32 1.0, %v12500_v56  ;;  %v7189_v0 = vpop.f32.mrb[107].mxu1 }
 0xfa7   : > { %12507 = vpow2.f32 %v9471_v21  ;;  %v7243_v26 = vadd.f32 %v15988_v58, %v7189_v0 }
 0xfa8   : > { %12509 = vrcp.f32 %v7273_v7 }
 0xfa9   : > { %v12502_v2 = vpop.eup %12501  ;;  %v9472_v47 = vmul.f32 -1.442695, %v7243_v26  ;;  %v16006_v63 = vpop.f32.mrb[108].mxu1 }
 0xfaa   : > { %v16008_v35 = vpop.f32.mrb[80].mxu0  ;;  %v7274_v19 = vadd.f32 1.0, %v12502_v2  ;;  %v7195_v16 = vpop.f32.mrb[109].mxu1 }
 0xfab   : > { %v8275_v13 = vpop.f32.mrb[81].mxu0  ;;  %12511 = vpow2.f32 %v9472_v47  ;;  %v7245_v32 = vadd.f32 %v15988_v58, %v7195_v16 }
 0xfac   : > { %v8337_v55 = vadd.f32 %v8275_v13, %v15988_v58  ;;  %12513 = vrcp.f32 %v7274_v19  ;;  %v7240_v19 = vadd.f32 %v16004_v37, %v15998_v9 }
 0xfad   : > { %v12504_v34 = vpop.eup %12503  ;;  %v9473_v23 = vmul.f32 -1.442695, %v7245_v32  ;;  %v16013_v17 = vpop.f32.mrb[110].mxu1 }
 0xfae   : > { %v9475_v48 = vmul.f32 -1.442695, %v8337_v55  ;;  %v16015_v10 = vpop.f32.mrb[82].mxu0  ;;  %v12506_v54 = vpop.eup %12505  ;;  %v7275_v52 = vadd.f32 1.0, %v12504_v34 }
 0xfaf   : > { %v7201_v29 = vpop.f32.mrb[111].mxu1  ;;  %v8281_v41 = vpop.f32.mrb[83].mxu0  ;;  %12515 = vpow2.f32 %v9473_v23  ;;  %v7296_v8 = vmul.f32 %v12506_v54, %v7232_v31 }
 0xfb0   : > { %v7247_v38 = vadd.f32 %v15988_v58, %v7201_v29  ;;  %v8339_v39 = vadd.f32 %v8281_v41, %v15988_v58  ;;  %12517 = vrcp.f32 %v7275_v52  ;;  %v7242_v29 = vadd.f32 %v16004_v37, %v16001_v3 }
 0xfb1   : > { %v12508_v18 = vpop.eup %12507  ;;  %12519 = vpow2.f32 %v9475_v48  ;;  %v16030_v33 = vpop.f32.mrb[84].mxu0  ;;  %v8415_v49 = vmul.f32 %v16020_v44, %v7296_v8  ;;  %v7244_v3 = vadd.f32 %v16004_v37, %v16006_v63 }
 0xfb2   : > { %v9474_v28 = vmul.f32 -1.442695, %v7247_v38  ;;  %v9476_v46 = vmul.f32 -1.442695, %v8339_v39  ;;  %v12510_v1 = vpop.eup %12509  ;;  %v7276_v51 = vadd.f32 1.0, %v12508_v18  ;;  %v8287_v59 = vpop.f32.mrb[85].mxu0 }
 0xfb3   : > { %v7297_v60 = vmul.f32 %v12510_v1, %v7234_v61  ;;  %v8341_v57 = vadd.f32 %v8287_v59, %v15988_v58  ;;  %v8438_v22 = vadd.f32 %v16028_v43, %v8415_v49 }
 0xfb4   : > { %12521 = vpow2.f32 %v9474_v28 }
 0xfb5   : > { %12523 = vrcp.f32 %v7276_v51  ;;  %v12512_v53 = vpop.eup %12511  ;;  %v9477_v40 = vmul.f32 -1.442695, %v8341_v57  ;;  %v16037_v4 = vpop.f32.mrb[86].mxu0  ;;  %10879 = vmatprep.mubr.f32.mxu1 %v8438_v22  ;;  %v8416_v62 = vmul.f32 %v16020_v44, %v7297_v60  ;;  %v8336_v22 = vadd.f32 %v16008_v35, %v16004_v37 }
 0xfb6   : > { %12525 = vpow2.f32 %v9476_v46  ;;  %v12514_v25 = vpop.eup %12513  ;;  %v7277_v50 = vadd.f32 1.0, %v12512_v53  ;;  %v8293_v5 = vpop.f32.mrb[87].mxu0 }
 0xfb7   : > { %12527 = vpow2.f32 %v9477_v40  ;;  %v8343_v24 = vadd.f32 %v8293_v5, %v15988_v58  ;;  %v8439_v12 = vadd.f32 %v16028_v43, %v8416_v62  ;;  %v7298_v14 = vmul.f32 %v12514_v25, %v7236_v11 }
 0xfb8   : > { %12529 = vrcp.f32 %v7277_v50  ;;  %v7246_v5 = vadd.f32 %v16004_v37, %v16013_v17  ;;  %v8340_v17 = vadd.f32 %v16030_v33, %v16004_v37 }
 0xfb9   : > { %v12516_v36 = vpop.eup %12515  ;;  %v9478_v45 = vmul.f32 -1.442695, %v8343_v24  ;;  %v16044_v6 = vpop.f32.mrb[88].mxu0  ;;  %10880 = vmatmul.mubr.f32.vlgmr.msra.gmra.mrb[112].mxu1 %v8439_v12  ;;  %v8417_v27 = vmul.f32 %v16020_v44, %v7298_v14 }
 0xfba   : > { %v12518_v56 = vpop.eup %12517  ;;  %v7278_v30 = vadd.f32 1.0, %v12516_v36  ;;  %v8299_v21 = vpop.f32.mrb[89].mxu0  ;;  %11850 = vmatpush3.bf16.msra.mxu1 %v15982_v15 }
 0xfbb   : > { %v12520_v7 = vpop.eup %12519  ;;  %12531 = vpow2.f32 %v9478_v45  ;;  %v8345_v0 = vadd.f32 %v8299_v21, %v15988_v58  ;;  %v8440_v26 = vadd.f32 %v16028_v43, %v8417_v27  ;;  %v7299_v2 = vmul.f32 %v12518_v56, %v7238_v20 }
 0xfbc   : > { %12533 = vrcp.f32 %v7278_v30  ;;  %v8376_v42 = vadd.f32 1.0, %v12520_v7  ;;  %v8338_v20 = vadd.f32 %v16015_v10, %v16004_v37 }
 0xfbd   : > { %v9479_v16 = vmul.f32 -1.442695, %v8345_v0  ;;  %v16052_v13 = vpop.f32.mrb[90].mxu0  ;;  %10882 = vmatprep.mubr.f32.mxu1 %v8440_v26  ;;  %v8418_v32 = vmul.f32 %v16020_v44, %v7299_v2 }
 0xfbe   : > { %v12522_v47 = vpop.eup %12521  ;;  %12535 = vrcp.f32 %v8376_v42  ;;  %v8305_v34 = vpop.f32.mrb[91].mxu0 }
 0xfbf   : > { %v12524_v15 = vpop.eup %12523  ;;  %v7279_v55 = vadd.f32 1.0, %v12522_v47  ;;  %12537 = vpow2.f32 %v9479_v16  ;;  %v8347_v23 = vadd.f32 %v8305_v34, %v15988_v58  ;;  %v8441_v48 = vadd.f32 %v16028_v43, %v8418_v32 }
 0xfc0   : > { %v12526_v31 = vpop.eup %12525  ;;  %v7300_v54 = vmul.f32 %v12524_v15, %v7240_v19  ;;  %v8342_v16 = vadd.f32 %v16037_v4, %v16004_v37 }
 0xfc1   : > { %12539 = vrcp.f32 %v7279_v55  ;;  %v8377_v52 = vadd.f32 1.0, %v12526_v31  ;;  %v12528_v9 = vpop.eup %12527  ;;  %v9480_v41 = vmul.f32 -1.442695, %v8347_v23  ;;  %v16059_v38 = vpop.f32.mrb[92].mxu0  ;;  %10883 = vmatmul.mubr.f32.gmra.mrb[114].mxu1 %v8441_v48  ;;  %v8344_v48 = vadd.f32 %v16044_v6, %v16004_v37 }
 0xfc2   : > { %v8419_v39 = vmul.f32 %v16020_v44, %v7300_v54  ;;  %v12530_v8 = vpop.eup %12529  ;;  %v8378_v61 = vadd.f32 1.0, %v12528_v9  ;;  %v8311_v18 = vpop.f32.mrb[93].mxu0 }
 0xfc3   : > { %12541 = vrcp.f32 %v8377_v52  ;;  %v8349_v28 = vadd.f32 %v8311_v18, %v15988_v58  ;;  %v7301_v49 = vmul.f32 %v12530_v8, %v7242_v29  ;;  %v8348_v18 = vadd.f32 %v16059_v38, %v16004_v37 }
 0xfc4   : > { %12543 = vpow2.f32 %v9480_v41  ;;  %v8442_v46 = vadd.f32 %v16028_v43, %v8419_v39  ;;  %v8346_v41 = vadd.f32 %v16052_v13, %v16004_v37 }
 0xfc5   : > { %12545 = vrcp.f32 %v8378_v61  ;;  %v12532_v1 = vpop.eup %12531  ;;  %v9481_v51 = vmul.f32 -1.442695, %v8349_v28  ;;  %v16066_v59 = vpop.f32.mrb[94].mxu0  ;;  %v8420_v60 = vmul.f32 %v16020_v44, %v7301_v49 }
 0xfc6   : > { %10885 = vmatprep.mubr.f32.mxu1 %v8442_v46  ;;  %v12534_v57 = vpop.eup %12533  ;;  %v8379_v53 = vadd.f32 1.0, %v12532_v1  ;;  %v8317_v11 = vpop.f32.mrb[95].mxu0  ;;  %v8350_v13 = vadd.f32 %v16066_v59, %v16004_v37  ;;  %v8721_v37 = vld [vmem:[%s16238_s24 + $0x18] sm:$0xff] }
 0xfc7   : > { %12547 = vpow2.f32 %v9481_v51  ;;  %v8351_v40 = vadd.f32 %v8317_v11, %v15988_v58  ;;  %v8443_v62 = vadd.f32 %v16028_v43, %v8420_v60  ;;  %v7302_v25 = vmul.f32 %v12534_v57, %v7244_v3  ;;  %v8722_v11 = vld [vmem:[%s16238_s24 + $0x20] sm:$0xff] }
 0xfc8   : > { %v12536_v50 = vpop.eup %12535  ;;  %12549 = vrcp.f32 %v8379_v53  ;;  %v8720_v53 = vld [vmem:[%s16238_s24 + $0x10] sm:$0xff] }
 0xfc9   : > { %v12538_v63 = vpop.eup %12537  ;;  %v9482_v24 = vmul.f32 -1.442695, %v8351_v40  ;;  %10886 = vmatmul.mubr.f32.gmra.mrb[116].mxu1 %v8443_v62  ;;  %v8421_v12 = vmul.f32 %v16020_v44, %v7302_v25  ;;  %v8400_v14 = vmul.f32 %v12536_v50, %v8336_v22  ;;  %v11851_v59 = vpack.c.bf16 %v8721_v37, %v8720_v53  ;;  %v8724_v40 = vld [vmem:[%s16238_s24 + $0x30] sm:$0xff]  ;;  %v8725_v62 = vld [vmem:[%s16238_s24 + $0x38] sm:$0xff]  ;;  %v8726_v50 = vld [vmem:[%s16238_s24 + $0x40] sm:$0xff] }
 0xfca   : > { %v8380_v36 = vadd.f32 1.0, %v12538_v63  ;;  %v11859_v25 = vpack.c.bf16 %v8725_v62, %v8724_v40  ;;  %v8727_v63 = vld [vmem:[%s16238_s24 + $0x48] sm:$0xff] }
 0xfcb   : > { %v12540_v35 = vpop.eup %12539  ;;  %12551 = vpow2.f32 %v9482_v24  ;;  %v8444_v58 = vadd.f32 %v16028_v43, %v8421_v12  ;;  %v8423_v56 = vmul.f32 %v16020_v44, %v8400_v14  ;;  %11852 = vmatprep.subr.bf16.mxu1 %v11851_v59  ;;  %v8728_v24 = vld [vmem:[%s16238_s24 + $0x50] sm:$0xff]  ;;  %v8729_v12 = vld [vmem:[%s16238_s24 + $0x58] sm:$0xff] }
 0xfcc   : > { %v7303_v45 = vmul.f32 %v12540_v35, %v7246_v5  ;;  %12553 = vrcp.f32 %v8380_v36  ;;  %11854 = vmatpush3.bf16.msra.mxu1 %v11851_v59  ;;  %v11863_v5 = vpack.c.bf16 %v8727_v63, %v8726_v50  ;;  %v11867_v14 = vpack.c.bf16 %v8729_v12, %v8728_v24  ;;  %v8730_v35 = vld [vmem:[%s16238_s24 + $0x60] sm:$0xff]  ;;  %v8731_v36 = vld [vmem:[%s16238_s24 + $0x68] sm:$0xff] }
 0xfcd   : > { %v12542_v27 = vpop.eup %12541  ;;  %10888 = vmatprep.mubr.f32.mxu1 %v8444_v58  ;;  %v8446_v47 = vadd.f32 %v16028_v43, %v8423_v56  ;;  %v8732_v58 = vld [vmem:[%s16238_s24 + $0x70] sm:$0xff]  ;;  %v16154_v56 = vld [vmem:[%s16311_s10] ss:$0 sm:$0xff] }
 0xfce   : > { %v12544_v30 = vpop.eup %12543  ;;  %v8422_v21 = vmul.f32 %v16020_v44, %v7303_v45  ;;  %v8401_v7 = vmul.f32 %v12542_v27, %v8338_v20  ;;  %v11871_v20 = vpack.c.bf16 %v8731_v36, %v8730_v35  ;;  %v8733_v45 = vld [vmem:[%s16238_s24 + $0x78] sm:$0xff] }
 0xfcf   : > { %v12546_v0 = vpop.eup %12545  ;;  %v8381_v26 = vadd.f32 1.0, %v12544_v30  ;;  %v11875_v27 = vpack.c.bf16 %v8733_v45, %v8732_v58 }
 0xfd0   : > { %v8445_v10 = vadd.f32 %v16028_v43, %v8422_v21  ;;  %v8424_v2 = vmul.f32 %v16020_v44, %v8401_v7  ;;  %v8402_v42 = vmul.f32 %v12546_v0, %v8340_v17 }
 0xfd1   : > { %12555 = vrcp.f32 %v8381_v26  ;;  %v12548_v19 = vpop.eup %12547 }
 0xfd2   : > { %10889 = vmatmul.mubr.f32.gmra.mrb[118].mxu1 %v8445_v10  ;;  %v8425_v33 = vmul.f32 %v16020_v44, %v8402_v42  ;;  %v12550_v32 = vpop.eup %12549  ;;  %v8382_v15 = vadd.f32 1.0, %v12548_v19  ;;  %v8447_v55 = vadd.f32 %v16028_v43, %v8424_v2 }
 0xfd3   : > { %10891 = vmatprep.mubr.f32.mxu1 %v8446_v47  ;;  %v8403_v31 = vmul.f32 %v12550_v32, %v8342_v16 }
 0xfd4   : > { %v8448_v34 = vadd.f32 %v16028_v43, %v8425_v33  ;;  %12557 = vrcp.f32 %v8382_v15 }
 0xfd5   : > { %v12552_v23 = vpop.eup %12551  ;;  %v8426_v54 = vmul.f32 %v16020_v44, %v8403_v31 }
 0xfd6   : > { %10892 = vmatmul.mubr.f32.gmra.mrb[120].mxu1 %v8447_v55  ;;  %v12554_v4 = vpop.eup %12553  ;;  %v8383_v52 = vadd.f32 1.0, %v12552_v23 }
 0xfd7   : > { %10894 = vmatprep.mubr.f32.mxu1 %v8448_v34  ;;  %v8449_v9 = vadd.f32 %v16028_v43, %v8426_v54  ;;  %v8404_v29 = vmul.f32 %v12554_v4, %v8344_v48 }
 0xfd8   : > { %12559 = vrcp.f32 %v8383_v52 }
 0xfd9   : > { %v8427_v39 = vmul.f32 %v16020_v44, %v8404_v29 }
 0xfda   : > { %10895 = vmatmul.mubr.f32.gmra.mrb[122].mxu1 %v8449_v9 }
 0xfdb   : > { %v12556_v8 = vpop.eup %12555  ;;  %v8450_v61 = vadd.f32 %v16028_v43, %v8427_v39 }
 0xfdc   : > { %v8405_v6 = vmul.f32 %v12556_v8, %v8346_v41 }
 0xfdd   : > { %10897 = vmatprep.mubr.f32.mxu1 %v8450_v61 }
 0xfde   : > { %v8428_v28 = vmul.f32 %v16020_v44, %v8405_v6  ;;  %v12558_v46 = vpop.eup %12557 }
 0xfdf   : > { %v8406_v1 = vmul.f32 %v12558_v46, %v8348_v18 }
 0xfe0   : > { %v8451_v49 = vadd.f32 %v16028_v43, %v8428_v28 }
 0xfe1   : > { %v8429_v3 = vmul.f32 %v16020_v44, %v8406_v1 }
 0xfe2   : > { %10898 = vmatmul.mubr.f32.gmra.mrb[124].mxu1 %v8451_v49  ;;  %v12560_v51 = vpop.eup %12559 }
 0xfe3   : > { %v8452_v60 = vadd.f32 %v16028_v43, %v8429_v3  ;;  %v8407_v57 = vmul.f32 %v12560_v51, %v8350_v13 }
 0xfe5   : > { %10900 = vmatprep.mubr.f32.mxu1 %v8452_v60  ;;  %v8430_v38 = vmul.f32 %v16020_v44, %v8407_v57  ;;  %v8723_v44 = vld [vmem:[%s16238_s24 + $0x28] sm:$0xff] }
 0xfe7   : > { %v8453_v22 = vadd.f32 %v16028_v43, %v8430_v38  ;;  %v11855_v43 = vpack.c.bf16 %v8723_v44, %v8722_v11 }
 0xfe9   : > { %10901 = vmatmul.mubr.f32.gmra.mrb[126].mxu1 %v8453_v22  ;;  %11856 = vmatprep.subr.bf16.mxu1 %v11855_v43 }
 0xfea   : > { %11858 = vmatpush3.bf16.msra.mxu1 %v11855_v43 }
 0xfeb   : > { %11860 = vmatprep.subr.bf16.mxu1 %v11859_v25 }
 0xfee   : > { %11862 = vmatpush3.bf16.msra.mxu1 %v11859_v25 }
 0xfef   : > { %11864 = vmatprep.subr.bf16.mxu1 %v11863_v5 }
 0xff2   : > { %11866 = vmatpush3.bf16.msra.mxu1 %v11863_v5 }
 0xff3   : > { %11868 = vmatprep.subr.bf16.mxu1 %v11867_v14 }
 0xff6   : > { %11870 = vmatpush3.bf16.msra.mxu1 %v11867_v14 }
 0xff7   : > { %11872 = vmatprep.subr.bf16.mxu1 %v11871_v20 }
 0xffa   : > { %11874 = vmatpush3.bf16.msra.mxu1 %v11871_v20 }
 0xffb   : > { %11876 = vmatprep.subr.bf16.mxu1 %v11875_v27 }
 0xffe   : > { %11878 = vmatpush3.bf16.msra.mxu1 %v11875_v27 }
0x108c   : > { %v10881_v30 = vpop.f32.mrb[112].mxu1 }
0x108d   : > { %v8549_v17 = vadd.f32 %v10881_v30, %v16154_v56  ;;  %v8543_v21 = vpop.f32.mrb[113].mxu1 }
0x108e   : > { %v8544_v7 = vadd.f32 %v16154_v56, %v8543_v21 }
0x108f   : > { %v9487_v0 = vmul.f32 -1.442695, %v8549_v17 }
0x1090   : > { %v9486_v26 = vmul.f32 -1.442695, %v8544_v7 }
0x1091   : > { %12561 = vpow2.f32 %v9487_v0 }
0x1092   : > { %12563 = vpow2.f32 %v9486_v26 }
0x1094   : > { %v10884_v10 = vpop.f32.mrb[114].mxu1 }
0x1095   : > { %v8559_v2 = vadd.f32 %v10884_v10, %v16154_v56  ;;  %v8553_v42 = vpop.f32.mrb[115].mxu1 }
0x1096   : > { %v8554_v47 = vadd.f32 %v16154_v56, %v8553_v42 }
0x1097   : > { %v9489_v19 = vmul.f32 -1.442695, %v8559_v2 }
0x1098   : > { %v9488_v16 = vmul.f32 -1.442695, %v8554_v47 }
0x1099   : > { %12565 = vpow2.f32 %v9489_v19 }
0x109a   : > { %12567 = vpow2.f32 %v9488_v16 }
0x109b   : > { %v12562_v33 = vpop.eup %12561 }
0x109c   : > { %v12564_v32 = vpop.eup %12563  ;;  %v8671_v15 = vadd.f32 1.0, %v12562_v33  ;;  %v10887_v55 = vpop.f32.mrb[116].mxu1 }
0x109d   : > { %v8670_v34 = vadd.f32 1.0, %v12564_v32  ;;  %v8569_v31 = vadd.f32 %v10887_v55, %v16154_v56  ;;  %v8563_v23 = vpop.f32.mrb[117].mxu1 }
0x109e   : > { %v8564_v48 = vadd.f32 %v16154_v56, %v8563_v23 }
0x109f   : > { %12569 = vrcp.f32 %v8670_v34  ;;  %v9491_v54 = vmul.f32 -1.442695, %v8569_v31 }
0x10a0   : > { %12571 = vrcp.f32 %v8671_v15  ;;  %v9490_v4 = vmul.f32 -1.442695, %v8564_v48 }
0x10a1   : > { %12573 = vpow2.f32 %v9491_v54 }
0x10a2   : > { %12575 = vpow2.f32 %v9490_v4 }
0x10a3   : > { %v12566_v52 = vpop.eup %12565 }
0x10a4   : > { %v12568_v9 = vpop.eup %12567  ;;  %v8673_v29 = vadd.f32 1.0, %v12566_v52 }
0x10a5   : > { %v10890_v41 = vpop.f32.mrb[118].mxu1  ;;  %v8672_v39 = vadd.f32 1.0, %v12568_v9 }
0x10a6   : > { %v8579_v8 = vadd.f32 %v10890_v41, %v16154_v56  ;;  %v8573_v61 = vpop.f32.mrb[119].mxu1 }
0x10a7   : > { %v8574_v6 = vadd.f32 %v16154_v56, %v8573_v61  ;;  %12577 = vrcp.f32 %v8672_v39 }
0x10a8   : > { %v9493_v18 = vmul.f32 -1.442695, %v8579_v8  ;;  %12579 = vrcp.f32 %v8673_v29 }
0x10a9   : > { %v9492_v28 = vmul.f32 -1.442695, %v8574_v6  ;;  %v10893_v46 = vpop.f32.mrb[120].mxu1  ;;  %v12570_v49 = vpop.eup %12569 }
0x10aa   : > { %12581 = vpow2.f32 %v9493_v18  ;;  %v8589_v1 = vadd.f32 %v10893_v46, %v16154_v56  ;;  %v8583_v13 = vpop.f32.mrb[121].mxu1  ;;  %v12572_v3 = vpop.eup %12571  ;;  %10935 = vmatprep.mubr.f32.mxu1 %v12570_v49  ;;  %v9502_v46 = vld [vmem:[#allocation3] ss:$0 sm:$0xff] }
0x10ab   : > { %12583 = vpow2.f32 %v9492_v28  ;;  %v8584_v51 = vadd.f32 %v16154_v56, %v8583_v13  ;;  %v12574_v60 = vpop.eup %12573  ;;  %10936 = vmatmul.mubr.f32.vlgmr.msra.gmra.mrb[128].mxu1 %v12572_v3 }
0x10ac   : > { %v9495_v57 = vmul.f32 -1.442695, %v8589_v1  ;;  %v12576_v38 = vpop.eup %12575  ;;  %v8675_v22 = vadd.f32 1.0, %v12574_v60 }
0x10ad   : > { %v9494_v53 = vmul.f32 -1.442695, %v8584_v51  ;;  %v10896_v37 = vpop.f32.mrb[122].mxu1  ;;  %v8674_v59 = vadd.f32 1.0, %v12576_v38 }
0x10ae   : > { %12585 = vpow2.f32 %v9495_v57  ;;  %v8599_v11 = vadd.f32 %v10896_v37, %v16154_v56  ;;  %v8593_v44 = vpop.f32.mrb[123].mxu1 }
0x10af   : > { %12587 = vrcp.f32 %v8675_v22  ;;  %v8594_v43 = vadd.f32 %v16154_v56, %v8593_v44 }
0x10b0   : > { %12589 = vrcp.f32 %v8674_v59  ;;  %v9497_v40 = vmul.f32 -1.442695, %v8599_v11 }
0x10b1   : > { %12591 = vpow2.f32 %v9494_v53  ;;  %v9496_v62 = vmul.f32 -1.442695, %v8594_v43  ;;  %v12578_v25 = vpop.eup %12577 }
0x10b2   : > { %12593 = vpow2.f32 %v9497_v40  ;;  %v12580_v50 = vpop.eup %12579  ;;  %10938 = vmatprep.mubr.f32.mxu1 %v12578_v25 }
0x10b3   : > { %12595 = vpow2.f32 %v9496_v62  ;;  %10939 = vmatmul.mubr.f32.gmra.mrb[130].mxu1 %v12580_v50 }
0x10b4   : > { %v12582_v63 = vpop.eup %12581 }
0x10b5   : > { %v12584_v5 = vpop.eup %12583  ;;  %v8677_v24 = vadd.f32 1.0, %v12582_v63  ;;  %v10899_v12 = vpop.f32.mrb[124].mxu1 }
0x10b6   : > { %v8676_v14 = vadd.f32 1.0, %v12584_v5  ;;  %v8609_v35 = vadd.f32 %v10899_v12, %v16154_v56  ;;  %v8603_v36 = vpop.f32.mrb[125].mxu1 }
0x10b7   : > { %v8604_v20 = vadd.f32 %v16154_v56, %v8603_v36 }
0x10b8   : > { %v12586_v58 = vpop.eup %12585  ;;  %12597 = vrcp.f32 %v8676_v14  ;;  %v9499_v45 = vmul.f32 -1.442695, %v8609_v35 }
0x10b9   : > { %v12588_v27 = vpop.eup %12587  ;;  %12599 = vrcp.f32 %v8677_v24  ;;  %v9498_v30 = vmul.f32 -1.442695, %v8604_v20  ;;  %v8679_v7 = vadd.f32 1.0, %v12586_v58 }
0x10ba   : > { %v12590_v17 = vpop.eup %12589  ;;  %12601 = vpow2.f32 %v9499_v45 }
0x10bb   : > { %v12592_v21 = vpop.eup %12591  ;;  %10941 = vmatprep.mubr.f32.mxu1 %v12590_v17  ;;  %12603 = vpow2.f32 %v9498_v30 }
0x10bc   : > { %v12594_v0 = vpop.eup %12593  ;;  %v8678_v26 = vadd.f32 1.0, %v12592_v21  ;;  %10942 = vmatmul.mubr.f32.gmra.mrb[132].mxu1 %v12588_v27  ;;  %v10902_v42 = vpop.f32.mrb[126].mxu1 }
0x10bd   : > { %v12596_v10 = vpop.eup %12595  ;;  %v8681_v2 = vadd.f32 1.0, %v12594_v0  ;;  %v8619_v19 = vadd.f32 %v10902_v42, %v16154_v56  ;;  %v8613_v16 = vpop.f32.mrb[127].mxu1 }
0x10be   : > { %12605 = vrcp.f32 %v8678_v26  ;;  %v8680_v47 = vadd.f32 1.0, %v12596_v10  ;;  %v8614_v33 = vadd.f32 %v16154_v56, %v8613_v16 }
0x10bf   : > { %12607 = vrcp.f32 %v8679_v7  ;;  %v9501_v32 = vmul.f32 -1.442695, %v8619_v19 }
0x10c0   : > { %12609 = vrcp.f32 %v8680_v47  ;;  %v9500_v15 = vmul.f32 -1.442695, %v8614_v33 }
0x10c1   : > { %12611 = vrcp.f32 %v8681_v2 }
0x10c2   : > { %v12598_v55 = vpop.eup %12597  ;;  %12613 = vpow2.f32 %v9501_v32 }
0x10c3   : > { %v12600_v34 = vpop.eup %12599  ;;  %12615 = vpow2.f32 %v9500_v15  ;;  %10944 = vmatprep.mubr.f32.mxu1 %v12598_v55 }
0x10c4   : > { %v12602_v31 = vpop.eup %12601  ;;  %10945 = vmatmul.mubr.f32.gmra.mrb[134].mxu1 %v12600_v34 }
0x10c5   : > { %v12604_v23 = vpop.eup %12603  ;;  %v8683_v48 = vadd.f32 1.0, %v12602_v31 }
0x10c6   : > { %v8682_v54 = vadd.f32 1.0, %v12604_v23 }
0x10c8   : > { %v12606_v4 = vpop.eup %12605  ;;  %12617 = vrcp.f32 %v8682_v54 }
0x10c9   : > { %v12608_v52 = vpop.eup %12607  ;;  %10947 = vmatprep.mubr.f32.mxu1 %v12606_v4  ;;  %12619 = vrcp.f32 %v8683_v48 }
0x10ca   : > { %v12610_v9 = vpop.eup %12609  ;;  %10948 = vmatmul.mubr.f32.gmra.mrb[136].mxu1 %v12608_v52 }
0x10cb   : > { %v12612_v56 = vpop.eup %12611  ;;  %10950 = vmatprep.mubr.f32.mxu1 %v12610_v9 }
0x10cc   : > { %v12614_v29 = vpop.eup %12613 }
0x10cd   : > { %v12616_v41 = vpop.eup %12615  ;;  %v8685_v39 = vadd.f32 1.0, %v12614_v29 }
0x10ce   : > { %v8684_v8 = vadd.f32 1.0, %v12616_v41  ;;  %10951 = vmatmul.mubr.f32.gmra.mrb[138].mxu1 %v12612_v56 }
0x10d0   : > { %12621 = vrcp.f32 %v8684_v8 }
0x10d1   : > { %12623 = vrcp.f32 %v8685_v39 }
0x10d2   : > { %v12618_v61 = vpop.eup %12617 }
0x10d3   : > { %v12620_v6 = vpop.eup %12619  ;;  %10953 = vmatprep.mubr.f32.mxu1 %v12618_v61 }
0x10d4   : > { %10954 = vmatmul.mubr.f32.gmra.mrb[140].mxu1 %v12620_v6 }
0x10da   : > { %v12622_v18 = vpop.eup %12621 }
0x10db   : > { %v12624_v28 = vpop.eup %12623  ;;  %10956 = vmatprep.mubr.f32.mxu1 %v12622_v18 }
0x10dc   : > { %10957 = vmatmul.mubr.f32.gmra.mrb[142].mxu1 %v12624_v28 }
0x117e   : > { %v10937_v49 = vpop.f32.mrb[128].mxu1 }
0x117f   : > { %v8813_v1 = vadd.f32 %v10937_v49, %v9502_v46  ;;  %v8807_v13 = vpop.f32.mrb[129].mxu1 }
0x1180   : > { %v8808_v3 = vadd.f32 %v9502_v46, %v8807_v13 }
0x1181   : > { %8887 = vst.msk [vmem:[%s16177_s27 + $0x8] sm:$0xff] %vm990_vm1, %v8813_v1 }
0x1182   : > { %8886 = vst.msk [vmem:[%s16177_s27] sm:$0xff] %vm990_vm1, %v8808_v3 }
0x1186   : > { %v10940_v51 = vpop.f32.mrb[130].mxu1 }
0x1187   : > { %v8823_v60 = vadd.f32 %v10940_v51, %v9502_v46  ;;  %v8817_v57 = vpop.f32.mrb[131].mxu1 }
0x1188   : > { %v8818_v38 = vadd.f32 %v9502_v46, %v8817_v57 }
0x1189   : > { %8889 = vst.msk [vmem:[%s16177_s27 + $0x18] sm:$0xff] %vm990_vm1, %v8823_v60 }
0x118a   : > { %8888 = vst.msk [vmem:[%s16177_s27 + $0x10] sm:$0xff] %vm990_vm1, %v8818_v38 }
0x118f   : > { %v10943_v22 = vpop.f32.mrb[132].mxu1 }
0x1190   : > { %v8833_v53 = vadd.f32 %v10943_v22, %v9502_v46  ;;  %v8827_v37 = vpop.f32.mrb[133].mxu1 }
0x1191   : > { %v8828_v59 = vadd.f32 %v9502_v46, %v8827_v37 }
0x1192   : > { %8891 = vst.msk [vmem:[%s16177_s27 + $0x28] sm:$0xff] %vm990_vm1, %v8833_v53 }
0x1193   : > { %8890 = vst.msk [vmem:[%s16177_s27 + $0x20] sm:$0xff] %vm990_vm1, %v8828_v59 }
0x1197   : > { %v10946_v11 = vpop.f32.mrb[134].mxu1 }
0x1198   : > { %v8843_v44 = vadd.f32 %v10946_v11, %v9502_v46  ;;  %v8837_v43 = vpop.f32.mrb[135].mxu1 }
0x1199   : > { %v8838_v40 = vadd.f32 %v9502_v46, %v8837_v43 }
0x119a   : > { %8893 = vst.msk [vmem:[%s16177_s27 + $0x38] sm:$0xff] %vm990_vm1, %v8843_v44 }
0x119b   : > { %8892 = vst.msk [vmem:[%s16177_s27 + $0x30] sm:$0xff] %vm990_vm1, %v8838_v40 }
0x119d   : > { %v10949_v62 = vpop.f32.mrb[136].mxu1 }
0x119e   : > { %v8853_v25 = vadd.f32 %v10949_v62, %v9502_v46  ;;  %v8847_v50 = vpop.f32.mrb[137].mxu1 }
0x119f   : > { %v8848_v63 = vadd.f32 %v9502_v46, %v8847_v50 }
0x11a0   : > { %8895 = vst.msk [vmem:[%s16177_s27 + $0x48] sm:$0xff] %vm990_vm1, %v8853_v25 }
0x11a1   : > { %8894 = vst.msk [vmem:[%s16177_s27 + $0x40] sm:$0xff] %vm990_vm1, %v8848_v63  ;;  %v10952_v5 = vpop.f32.mrb[138].mxu1 }
0x11a2   : > { %v8863_v24 = vadd.f32 %v10952_v5, %v9502_v46  ;;  %v8857_v12 = vpop.f32.mrb[139].mxu1 }
0x11a3   : > { %v8858_v14 = vadd.f32 %v9502_v46, %v8857_v12 }
0x11a4   : > { %8897 = vst.msk [vmem:[%s16177_s27 + $0x58] sm:$0xff] %vm990_vm1, %v8863_v24 }
0x11a5   : > { %8896 = vst.msk [vmem:[%s16177_s27 + $0x50] sm:$0xff] %vm990_vm1, %v8858_v14 }
0x11a7   : > { %v10955_v35 = vpop.f32.mrb[140].mxu1 }
0x11a8   : > { %v8873_v36 = vadd.f32 %v10955_v35, %v9502_v46  ;;  %v8867_v20 = vpop.f32.mrb[141].mxu1 }
0x11a9   : > { %v8868_v58 = vadd.f32 %v9502_v46, %v8867_v20 }
0x11aa   : > { %8899 = vst.msk [vmem:[%s16177_s27 + $0x68] sm:$0xff] %vm990_vm1, %v8873_v36 }
0x11ab   : > { %8898 = vst.msk [vmem:[%s16177_s27 + $0x60] sm:$0xff] %vm990_vm1, %v8868_v58 }
0x11af   : > { %v10958_v45 = vpop.f32.mrb[142].mxu1 }
0x11b0   : > { %v8883_v27 = vadd.f32 %v10958_v45, %v9502_v46  ;;  %v8877_v30 = vpop.f32.mrb[143].mxu1 }
0x11b1   : > { %v8878_v17 = vadd.f32 %v9502_v46, %v8877_v30 }
0x11b2   : > { %8901 = vst.msk [vmem:[%s16177_s27 + $0x78] sm:$0xff] %vm990_vm1, %v8883_v27 }
0x11b3   : > { %8900 = vst.msk [vmem:[%s16177_s27 + $0x70] sm:$0xff] %vm990_vm1, %v8878_v17 }
0x11b4 PF: > { %s16313_s8 = sld [smem:[#allocation30_spill]] }
0x11ba   : > { %s45_s7 = sadd.s32 1, %s16313_s8  }
0x11bb   : > { %p42_p7 = scmp.ge.s32.totalorder %s45_s7, 4  }
0x11bd   :  { %44 = sbr.rel (!%p42_p7) target bundleno = 26 (0x1a), region = 226 }
0x11c4   :  { %8923 = vsyncpa [#allocation5], 1 }
0x11c5   :  { %8925 = vsyncpa [#allocation5 + $0x1], 1 }
0x11c6   :  { %8926 = vsyncpa [#allocation7], 1 }
0x11c7   :  { %8927 = vsyncpa [#allocation10], 1 }
0x11c8   :  { %8928 = vsyncpa [#allocation13], 1 }
0x11c9   :  { %8929 = vsyncpa [#allocation16], 1 }
0x11ca   :  { %8930 = vsyncpa [#allocation19], 1 }
0x11cb   :  { %8931 = vsyncpa [#allocation22], 1 }

</bundles_post_ra>
